<compile_context>
chip_gen: v5e
topology: v5e:2x2
jax: 0.10.0
libtpu: 0.0.40
codegen_flags: <defaults>
</compile_context>

<pallas_src>
import math

import jax
import jax.numpy as jnp
from jax.experimental import pallas as pl
from jax.experimental.pallas import tpu as pltpu

LANE = 128
SUBLANE = 8


def _round_up(x, m):
    return (x + m - 1) // m * m


# ----------------------------------------------------------------------------
# Pallas kernel: one grid step == ALL WN layers of one batch element.
# ----------------------------------------------------------------------------
def make_kernel(Hp, OC, ON, k, dr, L, Tp, PAD):
    center = (k - 1) // 2

    def kernel(lens_ref,                       # SMEM (B,) int32 (scalar prefetch)
               x_ref, noise_ref,               # (1,Tp,Cinp) bf16 / (1,Tp,ON) f32
               w_pre_ref, b_pre_ref,           # pre 1x1 conv
               w_in_ref, b_in_ref,             # stacked dilated convs (L,...)
               w_rs_ref, b_rs_ref,             # stacked res/skip 1x1 convs
               w_proj_ref, b_proj_ref,         # proj 1x1 conv (tight-packed)
               out_ref,                        # (1, Tp, ON) fused z|m|logs
               h_pad):                         # VMEM (Tp+2*PAD, Hp) f32 scratch
        b = pl.program_id(0)
        length = lens_ref[b]

        # Lane-dense frame-validity masks built in-kernel (no 1-lane mask DMA).
        rows_h = jax.lax.broadcasted_iota(jnp.int32, (Tp, Hp), 0)
        mask_h = (rows_h < length).astype(jnp.float32)          # (Tp, Hp)
        rows_o = jax.lax.broadcasted_iota(jnp.int32, (Tp, ON), 0)
        mask_o = (rows_o < length).astype(jnp.float32)          # (Tp, ON)

        # Zero only the two PAD halo regions (interior is rewritten per layer).
        h_pad[pl.ds(0, PAD), :] = jnp.zeros((PAD, Hp), jnp.float32)
        h_pad[pl.ds(PAD + Tp, PAD), :] = jnp.zeros((PAD, Hp), jnp.float32)

        # pre 1x1 conv (bf16 MXU inputs, f32 accumulation)
        h = jnp.dot(x_ref[0], w_pre_ref[...],
                    preferred_element_type=jnp.float32)
        h = (h + b_pre_ref[...]) * mask_h                       # (Tp, Hp) f32

        skip = jnp.zeros((Tp, Hp), jnp.float32)

        # WN layers, statically unrolled: all tap offsets are Python ints.
        for i in range(L):
            d = dr ** i
            h_b = h.astype(jnp.bfloat16)
            h_pad[pl.ds(PAD, Tp), :] = h                        # refresh interior
            taps = []
            for tap in range(k):
                if tap == center:
                    taps.append(h_b)                            # reuse, no reload
                else:
                    off = PAD + (tap - center) * d              # static offset
                    taps.append(h_pad[pl.ds(off, Tp), :].astype(jnp.bfloat16))
            h_cat = jnp.concatenate(taps, axis=-1)              # (Tp, k*Hp) bf16

            # fused dilated conv: one (Tp, k*Hp) @ (k*Hp, 2*Hp) MXU pass
            x_in = jnp.dot(h_cat, w_in_ref[i],
                           preferred_element_type=jnp.float32) + b_in_ref[i]
            acts = jnp.tanh(x_in[:, :Hp]) * jax.nn.sigmoid(x_in[:, Hp:])

            # res/skip 1x1 conv (last layer's skip-only weights live in the
            # skip half; its res half is zero, so the h update is a no-op).
            rs = jnp.dot(acts.astype(jnp.bfloat16), w_rs_ref[i],
                         preferred_element_type=jnp.float32) + b_rs_ref[i]
            h = (h + rs[:, :Hp]) * mask_h
            skip = skip + rs[:, Hp:]

        # proj 1x1 conv + reparameterized sample.
        # w_proj columns: [Wm | Wm | Wlogs | 0 ...] for the first ON lanes and
        # [Wlogs | 0 ...] for the second ON lanes, so
        #   stats = [ m | m | logs | 0 ]      (lanes 0..ON)
        #   logs0 = [ logs | 0 ]              (lanes ON..2*ON)
        # and the tight [z | m | logs | 0] slab falls out of one masked FMA
        # with noise placed at lanes [0:OC] -- all slices are 128-aligned.
        out_b = (skip * mask_h).astype(jnp.bfloat16)
        r = jnp.dot(out_b, w_proj_ref[...],
                    preferred_element_type=jnp.float32) + b_proj_ref[...]
        stats = r[:, :ON]
        logs0 = r[:, ON:]
        out_ref[0] = (stats + noise_ref[0] * jnp.exp(logs0)) * mask_o

    return kernel


# ----------------------------------------------------------------------------
# Weight packing: pad channels to 128-lane multiples, stack per-layer weights.
# ----------------------------------------------------------------------------
def _pack_params(params, cfg, in_channels):
    H, OC, k, L = cfg["hidden"], cfg["out"], cfg["k"], cfg["n_layers"]
    Hp = _round_up(H, LANE)
    Cinp = _round_up(in_channels, LANE)
    ON = _round_up(3 * OC, LANE)

    w_pre = jnp.zeros((Cinp, Hp), jnp.float32)
    w_pre = w_pre.at[:in_channels, :H].set(params["w_pre"]).astype(jnp.bfloat16)
    b_pre = jnp.zeros((1, Hp), jnp.float32).at[:, :H].set(params["b_pre"])

    w_in = jnp.zeros((L, k, Hp, 2 * Hp), jnp.float32)
    b_in = jnp.zeros((L, 1, 2 * Hp), jnp.float32)
    w_rs = jnp.zeros((L, Hp, 2 * Hp), jnp.float32)
    b_rs = jnp.zeros((L, 1, 2 * Hp), jnp.float32)
    for i in range(L):
        wi, bi = params["w_in"][i], params["b_in"][i]          # (k,H,2H), (1,2H)
        w_in = w_in.at[i, :, :H, :H].set(wi[:, :, :H])          # tanh half
        w_in = w_in.at[i, :, :H, Hp:Hp + H].set(wi[:, :, H:])   # sigmoid half
        b_in = b_in.at[i, :, :H].set(bi[:, :H])
        b_in = b_in.at[i, :, Hp:Hp + H].set(bi[:, H:])
        wr, br = params["w_rs"][i], params["b_rs"][i]
        if i < L - 1:                                          # (H,2H): res|skip
            w_rs = w_rs.at[i, :H, :H].set(wr[:, :H])
            w_rs = w_rs.at[i, :H, Hp:Hp + H].set(wr[:, H:])
            b_rs = b_rs.at[i, :, :H].set(br[:, :H])
            b_rs = b_rs.at[i, :, Hp:Hp + H].set(br[:, H:])
        else:                                                  # (H,H): skip only
            w_rs = w_rs.at[i, :H, Hp:Hp + H].set(wr)
            b_rs = b_rs.at[i, :, Hp:Hp + H].set(br)

    # proj: tight z|m|logs packing (see kernel comment)
    Wm, Wl = params["w_proj"][:, :OC], params["w_proj"][:, OC:]
    bm, bl = params["b_proj"][:, :OC], params["b_proj"][:, OC:]
    w_proj = jnp.zeros((Hp, 2 * ON), jnp.float32)
    w_proj = w_proj.at[:H, 0:OC].set(Wm)
    w_proj = w_proj.at[:H, OC:2 * OC].set(Wm)
    w_proj = w_proj.at[:H, 2 * OC:3 * OC].set(Wl)
    w_proj = w_proj.at[:H, ON:ON + OC].set(Wl)
    b_proj = jnp.zeros((1, 2 * ON), jnp.float32)
    b_proj = b_proj.at[:, 0:OC].set(bm)
    b_proj = b_proj.at[:, OC:2 * OC].set(bm)
    b_proj = b_proj.at[:, 2 * OC:3 * OC].set(bl)
    b_proj = b_proj.at[:, ON:ON + OC].set(bl)

    return dict(
        w_pre=w_pre, b_pre=b_pre,
        w_in=w_in.reshape(L, k * Hp, 2 * Hp).astype(jnp.bfloat16),  # tap-major
        b_in=b_in,
        w_rs=w_rs.astype(jnp.bfloat16), b_rs=b_rs,
        w_proj=w_proj.astype(jnp.bfloat16), b_proj=b_proj,
    )


# ----------------------------------------------------------------------------
# Wrapper: layout transposes, channel/time padding, pallas_call setup.
# ----------------------------------------------------------------------------
def posterior_encoder_forward(x_nct, x_lengths, noise_nct, params, cfg):
    B, Cin, T = x_nct.shape
    H, OC, k = cfg["hidden"], cfg["out"], cfg["k"]
    dr, L = cfg["dilation_rate"], cfg["n_layers"]
    Hp = _round_up(H, LANE)
    Cinp = _round_up(Cin, LANE)
    ON = _round_up(3 * OC, LANE)
    Tp = _round_up(T, SUBLANE)
    center = (k - 1) // 2
    PAD = _round_up(max(center * dr ** (L - 1), SUBLANE), SUBLANE)

    # activations: NCL -> NLC (time on sublanes, channels on lanes), padded
    x_btc = jnp.zeros((B, Tp, Cinp), jnp.bfloat16)
    x_btc = x_btc.at[:, :T, :Cin].set(
        jnp.transpose(x_nct, (0, 2, 1)).astype(jnp.bfloat16))
    noise_btc = jnp.zeros((B, Tp, ON), jnp.float32)
    noise_btc = noise_btc.at[:, :T, :OC].set(jnp.transpose(noise_nct, (0, 2, 1)))

    p = _pack_params(params, cfg, Cin)
    lens_i32 = jnp.asarray(x_lengths, jnp.int32)

    grid_spec = pltpu.PrefetchScalarGridSpec(
        num_scalar_prefetch=1,                      # x_lengths -> SMEM
        grid=(B,),                                  # batch: parallel (megacore)
        in_specs=[
            pl.BlockSpec((1, Tp, Cinp), lambda b, lens: (b, 0, 0)),      # x
            pl.BlockSpec((1, Tp, ON), lambda b, lens: (b, 0, 0)),        # noise
            pl.BlockSpec((Cinp, Hp), lambda b, lens: (0, 0)),            # w_pre
            pl.BlockSpec((1, Hp), lambda b, lens: (0, 0)),               # b_pre
            pl.BlockSpec((L, k * Hp, 2 * Hp), lambda b, lens: (0, 0, 0)),  # w_in
            pl.BlockSpec((L, 1, 2 * Hp), lambda b, lens: (0, 0, 0)),     # b_in
            pl.BlockSpec((L, Hp, 2 * Hp), lambda b, lens: (0, 0, 0)),    # w_rs
            pl.BlockSpec((L, 1, 2 * Hp), lambda b, lens: (0, 0, 0)),     # b_rs
            pl.BlockSpec((Hp, 2 * ON), lambda b, lens: (0, 0)),          # w_proj
            pl.BlockSpec((1, 2 * ON), lambda b, lens: (0, 0)),           # b_proj
        ],
        out_specs=pl.BlockSpec((1, Tp, ON), lambda b, lens: (b, 0, 0)),
        scratch_shapes=[pltpu.VMEM((Tp + 2 * PAD, Hp), jnp.float32)],    # h halo
    )

    # Generation-aware scoped-VMEM budget: per-step blocks (x2 double-buffer)
    # + scratch + headroom, clamped below physical VMEM (v7x: 64 MiB).
    def nbytes(shape, dt):
        return math.prod(shape) * jnp.dtype(dt).itemsize

    block_bytes = (
        nbytes((Tp, Cinp), jnp.bfloat16) + nbytes((Tp, ON), jnp.float32)
        + nbytes((Cinp, Hp), jnp.bfloat16) + nbytes((1, Hp), jnp.float32)
        + nbytes((L, k * Hp, 2 * Hp), jnp.bfloat16)
        + nbytes((L, 1, 2 * Hp), jnp.float32)
        + nbytes((L, Hp, 2 * Hp), jnp.bfloat16)
        + nbytes((L, 1, 2 * Hp), jnp.float32)
        + nbytes((Hp, 2 * ON), jnp.bfloat16) + nbytes((1, 2 * ON), jnp.float32)
        + nbytes((Tp, ON), jnp.float32))
    scratch_bytes = nbytes((Tp + 2 * PAD, Hp), jnp.float32)
    needed = 2 * block_bytes + scratch_bytes
    try:
        vmem_cap = int(pltpu.get_tpu_info().vmem_capacity_bytes)
    except Exception:
        vmem_cap = 64 << 20        # conservative: v7x per-core physical VMEM
    vmem_bytes = int(min(max(needed + (16 << 20), 32 << 20),
                         vmem_cap - (8 << 20)))

    kernel = make_kernel(Hp, OC, ON, k, dr, L, Tp, PAD)

    slab = pl.pallas_call(
        kernel,
        out_shape=jax.ShapeDtypeStruct((B, Tp, ON), jnp.float32),
        grid_spec=grid_spec,
        compiler_params=pltpu.CompilerParams(
            dimension_semantics=("parallel",),
            vmem_limit_bytes=vmem_bytes),
    )(lens_i32, x_btc, noise_btc,
      p["w_pre"], p["b_pre"], p["w_in"], p["b_in"],
      p["w_rs"], p["b_rs"], p["w_proj"], p["b_proj"])

    # split the tight lane-dense slab, trim padding, back to PyTorch (B, C, T)
    z = jnp.transpose(slab[:, :T, 0:OC], (0, 2, 1))
    m = jnp.transpose(slab[:, :T, OC:2 * OC], (0, 2, 1))
    logs = jnp.transpose(slab[:, :T, 2 * OC:3 * OC], (0, 2, 1))
    # x_mask follows this module's masked_fill convention: True == padded frame
    # (the kernel itself zeroes exactly those frames).
    x_mask = jnp.arange(T)[None, None, :] >= x_lengths[:, None, None]
    return z, m, logs, x_mask


# ----------------------------------------------------------------------------
# Pure-JAX f32 reference (lax.conv_general_dilated) for verification
# ----------------------------------------------------------------------------
def reference_forward(x_nct, x_lengths, noise_nct, params, cfg):
    B, Cin, T = x_nct.shape
    H, OC, k = cfg["hidden"], cfg["out"], cfg["k"]
    t = jnp.arange(T)
    valid = (t[None, None, :] < x_lengths[:, None, None]).astype(jnp.float32)

    def conv1x1(x, w, b):  # w: (Cin, Cout) channels-last, b: (1, Cout)
        return jnp.einsum("bct,cd->bdt", x, w) + b.T[None]

    h = conv1x1(x_nct, params["w_pre"], params["b_pre"]) * valid
    out = jnp.zeros((B, H, T))
    for i in range(cfg["n_layers"]):
        d = cfg["dilation_rate"] ** i
        pad = (k * d - d) // 2
        w = jnp.transpose(params["w_in"][i], (2, 1, 0))  # -> (2H, H, k) OIH
        x_in = jax.lax.conv_general_dilated(
            h, w, window_strides=(1,), padding=[(pad, pad)], rhs_dilation=(d,),
            dimension_numbers=("NCH", "OIH", "NCH"))
        x_in = x_in + params["b_in"][i].T[None]
        acts = jnp.tanh(x_in[:, :H]) * jax.nn.sigmoid(x_in[:, H:])
        rs = conv1x1(acts, params["w_rs"][i], params["b_rs"][i])
        if i < cfg["n_layers"] - 1:
            h = (h + rs[:, :H]) * valid
            out = out + rs[:, H:]
        else:
            out = out + rs
    out = out * valid
    stats = conv1x1(out, params["w_proj"], params["b_proj"]) * valid
    m, logs = stats[:, :OC], stats[:, OC:]
    z = (m + noise_nct * jnp.exp(logs)) * valid
    return z, m, logs


# ----------------------------------------------------------------------------
# Deterministic parameter init + demo
# ----------------------------------------------------------------------------
def init_params(key, cfg, in_channels):
    H, OC, k, n_layers = cfg["hidden"], cfg["out"], cfg["k"], cfg["n_layers"]
    keys = iter(jax.random.split(key, 4 * n_layers + 8))
    s = 0.1

    def rnd(shape):
        return s * jax.random.normal(next(keys), shape, jnp.float32)

    params = {
        "w_pre": rnd((in_channels, H)),    # 1x1 conv, channels-last
        "b_pre": rnd((1, H)),
        "w_proj": rnd((H, 2 * OC)),
        "b_proj": rnd((1, 2 * OC)),
        "w_in": [], "b_in": [], "w_rs": [], "b_rs": [],
    }
    # TODO(synk): weight_norm is a reparametrization only; effective weights are
    # initialized directly (forward semantics identical to a plain Conv1d).
    for i in range(n_layers):
        params["w_in"].append(rnd((k, H, 2 * H)))   # per-tap (in, out)
        params["b_in"].append(rnd((1, 2 * H)))
        rs_out = 2 * H if i < n_layers - 1 else H
        params["w_rs"].append(rnd((H, rs_out)))
        params["b_rs"].append(rnd((1, rs_out)))
    return params


if __name__ == "__main__":
    cfg = dict(hidden=32, out=8, k=5, dilation_rate=2, n_layers=4)
    B, Cin, T = 2, 16, 64

    key = jax.random.PRNGKey(0)
    k_x, k_n, k_p = jax.random.split(key, 3)
    x = jax.random.normal(k_x, (B, Cin, T), jnp.float32)
    x_lengths = jnp.array([T, 48], dtype=jnp.int32)
    noise = jax.random.normal(k_n, (B, cfg["out"], T), jnp.float32)  # randn_like(m)
    params = init_params(k_p, cfg, Cin)

    z, m, logs, x_mask = posterior_encoder_forward(x, x_lengths, noise, params, cfg)
    jax.block_until_ready((z, m, logs))

    z_ref, m_ref, logs_ref = reference_forward(x, x_lengths, noise, params, cfg)
    import numpy as np
    # All matmuls use bf16 MXU inputs with f32 accumulation, so compare against
    # the pure-f32 reference with bf16-appropriate tolerances.
    np.testing.assert_allclose(np.asarray(m), np.asarray(m_ref), rtol=3e-2, atol=3e-2)
    np.testing.assert_allclose(np.asarray(logs), np.asarray(logs_ref), rtol=3e-2, atol=3e-2)
    np.testing.assert_allclose(np.asarray(z), np.asarray(z_ref), rtol=3e-2, atol=3e-2)

    print("KERNEL_OK")
</pallas_src>

<mosaic_0001>
module attributes {stable_mosaic.version = 11 : i64} {
  func.func @kernel(%arg0: i32, %arg1: memref<2xi32, #tpu.memory_space<smem>>, %arg2: memref<1x64x128xbf16, #tpu.memory_space<vmem>>, %arg3: memref<1x64x128xf32, #tpu.memory_space<vmem>>, %arg4: memref<128x128xbf16, #tpu.memory_space<vmem>>, %arg5: memref<1x128xf32, #tpu.memory_space<vmem>>, %arg6: memref<4x640x256xbf16, #tpu.memory_space<vmem>>, %arg7: memref<4x1x256xf32, #tpu.memory_space<vmem>>, %arg8: memref<4x128x256xbf16, #tpu.memory_space<vmem>>, %arg9: memref<4x1x256xf32, #tpu.memory_space<vmem>>, %arg10: memref<128x256xbf16, #tpu.memory_space<vmem>>, %arg11: memref<1x256xf32, #tpu.memory_space<vmem>>, %arg12: memref<1x64x128xf32, #tpu.memory_space<vmem>>, %arg13: memref<96x128xf32, #tpu.memory_space<vmem>>) attributes {dimension_semantics = [#tpu.dimension_semantics<parallel>], iteration_bounds = array<i64: 2>, scalar_prefetch = 1 : i64, scratch_operands = 1 : i64, tpu.core_type = #tpu.core_type<tc>, window_params = [{transform_indices = @transform_0, window_bounds = array<i64: 1, 64, 128>}, {transform_indices = @transform_1, window_bounds = array<i64: 1, 64, 128>}, {pipeline_mode = #tpu.pipeline_mode<synchronous>, transform_indices = @transform_2, window_bounds = array<i64: 128, 128>}, {pipeline_mode = #tpu.pipeline_mode<synchronous>, transform_indices = @transform_3, window_bounds = array<i64: 1, 128>}, {pipeline_mode = #tpu.pipeline_mode<synchronous>, transform_indices = @transform_4, window_bounds = array<i64: 4, 640, 256>}, {pipeline_mode = #tpu.pipeline_mode<synchronous>, transform_indices = @transform_5, window_bounds = array<i64: 4, 1, 256>}, {pipeline_mode = #tpu.pipeline_mode<synchronous>, transform_indices = @transform_6, window_bounds = array<i64: 4, 128, 256>}, {pipeline_mode = #tpu.pipeline_mode<synchronous>, transform_indices = @transform_7, window_bounds = array<i64: 4, 1, 256>}, {pipeline_mode = #tpu.pipeline_mode<synchronous>, transform_indices = @transform_8, window_bounds = array<i64: 128, 256>}, {pipeline_mode = #tpu.pipeline_mode<synchronous>, transform_indices = @transform_9, window_bounds = array<i64: 1, 256>}, {transform_indices = @transform_10, window_bounds = array<i64: 1, 64, 128>}]} {
    %0 = arith.index_cast %arg0 : i32 to index
    %1 = memref.load %arg1[%0] : memref<2xi32, #tpu.memory_space<smem>>
    %2 = tpu.iota {dimensions = array<i32: 0>} : vector<64x128xi32>
    %3 = vector.broadcast %1 : i32 to vector<64x128xi32>
    %4 = arith.cmpi slt, %2, %3 : vector<64x128xi32>
    %5 = arith.extui %4 : vector<64x128xi1> to vector<64x128xi32>
    %6 = arith.sitofp %5 : vector<64x128xi32> to vector<64x128xf32>
    %7 = tpu.iota {dimensions = array<i32: 0>} : vector<64x128xi32>
    %8 = vector.broadcast %1 : i32 to vector<64x128xi32>
    %9 = arith.cmpi slt, %7, %8 : vector<64x128xi32>
    %10 = arith.extui %9 : vector<64x128xi1> to vector<64x128xi32>
    %11 = arith.sitofp %10 : vector<64x128xi32> to vector<64x128xf32>
    %cst = arith.constant 0.000000e+00 : f32
    %12 = vector.broadcast %cst : f32 to vector<16x128xf32>
    %c0 = arith.constant 0 : index
    %c0_0 = arith.constant 0 : index
    %13 = vector.load %arg13[%c0, %c0_0] : memref<96x128xf32, #tpu.memory_space<vmem>>, vector<16x128xf32>
    tpu.vector_store %arg13[%c0, %c0_0], %12 {strides = array<i32>} : memref<96x128xf32, #tpu.memory_space<vmem>>, vector<16x128xf32>,
    %cst_1 = arith.constant 0.000000e+00 : f32
    %14 = vector.broadcast %cst_1 : f32 to vector<16x128xf32>
    %c80 = arith.constant 80 : index
    %c0_2 = arith.constant 0 : index
    %15 = vector.load %arg13[%c80, %c0_2] : memref<96x128xf32, #tpu.memory_space<vmem>>, vector<16x128xf32>
    tpu.vector_store %arg13[%c80, %c0_2], %14 {strides = array<i32>} : memref<96x128xf32, #tpu.memory_space<vmem>>, vector<16x128xf32>,
    %c0_3 = arith.constant 0 : index
    %c0_4 = arith.constant 0 : index
    %c0_5 = arith.constant 0 : index
    %16 = vector.load %arg2[%c0_3, %c0_4, %c0_5] : memref<1x64x128xbf16, #tpu.memory_space<vmem>>, vector<1x64x128xbf16>
    %17 = vector.shape_cast %16 : vector<1x64x128xbf16> to vector<64x128xbf16>
    %c0_6 = arith.constant 0 : index
    %c0_7 = arith.constant 0 : index
    %18 = vector.load %arg4[%c0_6, %c0_7] : memref<128x128xbf16, #tpu.memory_space<vmem>>, vector<128x128xbf16>
    %cst_8 = arith.constant dense<0.000000e+00> : vector<64x128xf32>
    %19 = tpu.matmul %17, %18, %cst_8 {dimension_numbers = #tpu.dot_dimension_numbers<[1], [0], [0], [1], [0, 0, 1, 1], [], []>} : vector<64x128xbf16>, vector<128x128xbf16>, vector<64x128xf32> -> vector<64x128xf32>
    %c0_9 = arith.constant 0 : index
    %c0_10 = arith.constant 0 : index
    %20 = vector.load %arg5[%c0_9, %c0_10] : memref<1x128xf32, #tpu.memory_space<vmem>>, vector<1x128xf32>
    %21 = vector.broadcast %20 : vector<1x128xf32> to vector<64x128xf32>
    %22 = arith.addf %19, %21 : vector<64x128xf32>
    %23 = arith.mulf %22, %6 : vector<64x128xf32>
    %cst_11 = arith.constant 0.000000e+00 : f32
    %24 = vector.broadcast %cst_11 : f32 to vector<64x128xf32>
    %25 = arith.truncf %23 : vector<64x128xf32> to vector<64x128xbf16>
    %c16 = arith.constant 16 : index
    %c0_12 = arith.constant 0 : index
    %26 = vector.load %arg13[%c16, %c0_12] : memref<96x128xf32, #tpu.memory_space<vmem>>, vector<64x128xf32>
    tpu.vector_store %arg13[%c16, %c0_12], %23 {strides = array<i32>} : memref<96x128xf32, #tpu.memory_space<vmem>>, vector<64x128xf32>,
    %c14 = arith.constant 14 : index
    %c0_13 = arith.constant 0 : index
    %27 = vector.load %arg13[%c14, %c0_13] : memref<96x128xf32, #tpu.memory_space<vmem>>, vector<64x128xf32>
    %28 = arith.truncf %27 : vector<64x128xf32> to vector<64x128xbf16>
    %c15 = arith.constant 15 : index
    %c0_14 = arith.constant 0 : index
    %29 = vector.load %arg13[%c15, %c0_14] : memref<96x128xf32, #tpu.memory_space<vmem>>, vector<64x128xf32>
    %30 = arith.truncf %29 : vector<64x128xf32> to vector<64x128xbf16>
    %c17 = arith.constant 17 : index
    %c0_15 = arith.constant 0 : index
    %31 = vector.load %arg13[%c17, %c0_15] : memref<96x128xf32, #tpu.memory_space<vmem>>, vector<64x128xf32>
    %32 = arith.truncf %31 : vector<64x128xf32> to vector<64x128xbf16>
    %c18 = arith.constant 18 : index
    %c0_16 = arith.constant 0 : index
    %33 = vector.load %arg13[%c18, %c0_16] : memref<96x128xf32, #tpu.memory_space<vmem>>, vector<64x128xf32>
    %34 = arith.truncf %33 : vector<64x128xf32> to vector<64x128xbf16>
    %35 = tpu.concatenate %28, %30, %25, %32, %34 in 1 : vector<64x128xbf16>, vector<64x128xbf16>, vector<64x128xbf16>, vector<64x128xbf16>, vector<64x128xbf16> -> vector<64x640xbf16>
    %c0_17 = arith.constant 0 : index
    %c0_18 = arith.constant 0 : index
    %c0_19 = arith.constant 0 : index
    %36 = vector.load %arg6[%c0_17, %c0_18, %c0_19] : memref<4x640x256xbf16, #tpu.memory_space<vmem>>, vector<1x640x256xbf16>
    %37 = vector.shape_cast %36 : vector<1x640x256xbf16> to vector<640x256xbf16>
    %cst_20 = arith.constant dense<0.000000e+00> : vector<64x256xf32>
    %38 = tpu.matmul %35, %37, %cst_20 {dimension_numbers = #tpu.dot_dimension_numbers<[1], [0], [0], [1], [0, 0, 1, 1], [], []>} : vector<64x640xbf16>, vector<640x256xbf16>, vector<64x256xf32> -> vector<64x256xf32>
    %c0_21 = arith.constant 0 : index
    %c0_22 = arith.constant 0 : index
    %c0_23 = arith.constant 0 : index
    %39 = vector.load %arg7[%c0_21, %c0_22, %c0_23] : memref<4x1x256xf32, #tpu.memory_space<vmem>>, vector<1x1x256xf32>
    %40 = vector.shape_cast %39 : vector<1x1x256xf32> to vector<1x256xf32>
    %41 = vector.broadcast %40 : vector<1x256xf32> to vector<64x256xf32>
    %42 = arith.addf %38, %41 : vector<64x256xf32>
    %43 = vector.extract_strided_slice %42 {offsets = [0, 0], sizes = [64, 128], strides = [1, 1]} : vector<64x256xf32> to vector<64x128xf32>
    %44 = math.tanh %43 : vector<64x128xf32>
    %45 = vector.extract_strided_slice %42 {offsets = [0, 128], sizes = [64, 128], strides = [1, 1]} : vector<64x256xf32> to vector<64x128xf32>
    %46 = arith.negf %45 : vector<64x128xf32>
    %47 = math.exp %46 : vector<64x128xf32>
    %cst_24 = arith.constant 1.000000e+00 : f32
    %48 = vector.broadcast %cst_24 : f32 to vector<64x128xf32>
    %49 = arith.addf %48, %47 : vector<64x128xf32>
    %50 = arith.divf %48, %49 : vector<64x128xf32>
    %51 = arith.mulf %44, %50 : vector<64x128xf32>
    %52 = arith.truncf %51 : vector<64x128xf32> to vector<64x128xbf16>
    %c0_25 = arith.constant 0 : index
    %c0_26 = arith.constant 0 : index
    %c0_27 = arith.constant 0 : index
    %53 = vector.load %arg8[%c0_25, %c0_26, %c0_27] : memref<4x128x256xbf16, #tpu.memory_space<vmem>>, vector<1x128x256xbf16>
    %54 = vector.shape_cast %53 : vector<1x128x256xbf16> to vector<128x256xbf16>
    %cst_28 = arith.constant dense<0.000000e+00> : vector<64x256xf32>
    %55 = tpu.matmul %52, %54, %cst_28 {dimension_numbers = #tpu.dot_dimension_numbers<[1], [0], [0], [1], [0, 0, 1, 1], [], []>} : vector<64x128xbf16>, vector<128x256xbf16>, vector<64x256xf32> -> vector<64x256xf32>
    %c0_29 = arith.constant 0 : index
    %c0_30 = arith.constant 0 : index
    %c0_31 = arith.constant 0 : index
    %56 = vector.load %arg9[%c0_29, %c0_30, %c0_31] : memref<4x1x256xf32, #tpu.memory_space<vmem>>, vector<1x1x256xf32>
    %57 = vector.shape_cast %56 : vector<1x1x256xf32> to vector<1x256xf32>
    %58 = vector.broadcast %57 : vector<1x256xf32> to vector<64x256xf32>
    %59 = arith.addf %55, %58 : vector<64x256xf32>
    %60 = vector.extract_strided_slice %59 {offsets = [0, 0], sizes = [64, 128], strides = [1, 1]} : vector<64x256xf32> to vector<64x128xf32>
    %61 = arith.addf %23, %60 : vector<64x128xf32>
    %62 = arith.mulf %61, %6 : vector<64x128xf32>
    %63 = vector.extract_strided_slice %59 {offsets = [0, 128], sizes = [64, 128], strides = [1, 1]} : vector<64x256xf32> to vector<64x128xf32>
    %64 = arith.addf %24, %63 : vector<64x128xf32>
    %65 = arith.truncf %62 : vector<64x128xf32> to vector<64x128xbf16>
    %c16_32 = arith.constant 16 : index
    %c0_33 = arith.constant 0 : index
    %66 = vector.load %arg13[%c16_32, %c0_33] : memref<96x128xf32, #tpu.memory_space<vmem>>, vector<64x128xf32>
    tpu.vector_store %arg13[%c16_32, %c0_33], %62 {strides = array<i32>} : memref<96x128xf32, #tpu.memory_space<vmem>>, vector<64x128xf32>,
    %c12 = arith.constant 12 : index
    %c0_34 = arith.constant 0 : index
    %67 = vector.load %arg13[%c12, %c0_34] : memref<96x128xf32, #tpu.memory_space<vmem>>, vector<64x128xf32>
    %68 = arith.truncf %67 : vector<64x128xf32> to vector<64x128xbf16>
    %c14_35 = arith.constant 14 : index
    %c0_36 = arith.constant 0 : index
    %69 = vector.load %arg13[%c14_35, %c0_36] : memref<96x128xf32, #tpu.memory_space<vmem>>, vector<64x128xf32>
    %70 = arith.truncf %69 : vector<64x128xf32> to vector<64x128xbf16>
    %c18_37 = arith.constant 18 : index
    %c0_38 = arith.constant 0 : index
    %71 = vector.load %arg13[%c18_37, %c0_38] : memref<96x128xf32, #tpu.memory_space<vmem>>, vector<64x128xf32>
    %72 = arith.truncf %71 : vector<64x128xf32> to vector<64x128xbf16>
    %c20 = arith.constant 20 : index
    %c0_39 = arith.constant 0 : index
    %73 = vector.load %arg13[%c20, %c0_39] : memref<96x128xf32, #tpu.memory_space<vmem>>, vector<64x128xf32>
    %74 = arith.truncf %73 : vector<64x128xf32> to vector<64x128xbf16>
    %75 = tpu.concatenate %68, %70, %65, %72, %74 in 1 : vector<64x128xbf16>, vector<64x128xbf16>, vector<64x128xbf16>, vector<64x128xbf16>, vector<64x128xbf16> -> vector<64x640xbf16>
    %c1 = arith.constant 1 : index
    %c0_40 = arith.constant 0 : index
    %c0_41 = arith.constant 0 : index
    %76 = vector.load %arg6[%c1, %c0_40, %c0_41] : memref<4x640x256xbf16, #tpu.memory_space<vmem>>, vector<1x640x256xbf16>
    %77 = vector.shape_cast %76 : vector<1x640x256xbf16> to vector<640x256xbf16>
    %cst_42 = arith.constant dense<0.000000e+00> : vector<64x256xf32>
    %78 = tpu.matmul %75, %77, %cst_42 {dimension_numbers = #tpu.dot_dimension_numbers<[1], [0], [0], [1], [0, 0, 1, 1], [], []>} : vector<64x640xbf16>, vector<640x256xbf16>, vector<64x256xf32> -> vector<64x256xf32>
    %c1_43 = arith.constant 1 : index
    %c0_44 = arith.constant 0 : index
    %c0_45 = arith.constant 0 : index
    %79 = vector.load %arg7[%c1_43, %c0_44, %c0_45] : memref<4x1x256xf32, #tpu.memory_space<vmem>>, vector<1x1x256xf32>
    %80 = vector.shape_cast %79 : vector<1x1x256xf32> to vector<1x256xf32>
    %81 = vector.broadcast %80 : vector<1x256xf32> to vector<64x256xf32>
    %82 = arith.addf %78, %81 : vector<64x256xf32>
    %83 = vector.extract_strided_slice %82 {offsets = [0, 0], sizes = [64, 128], strides = [1, 1]} : vector<64x256xf32> to vector<64x128xf32>
    %84 = math.tanh %83 : vector<64x128xf32>
    %85 = vector.extract_strided_slice %82 {offsets = [0, 128], sizes = [64, 128], strides = [1, 1]} : vector<64x256xf32> to vector<64x128xf32>
    %86 = arith.negf %85 : vector<64x128xf32>
    %87 = math.exp %86 : vector<64x128xf32>
    %cst_46 = arith.constant 1.000000e+00 : f32
    %88 = vector.broadcast %cst_46 : f32 to vector<64x128xf32>
    %89 = arith.addf %88, %87 : vector<64x128xf32>
    %90 = arith.divf %88, %89 : vector<64x128xf32>
    %91 = arith.mulf %84, %90 : vector<64x128xf32>
    %92 = arith.truncf %91 : vector<64x128xf32> to vector<64x128xbf16>
    %c1_47 = arith.constant 1 : index
    %c0_48 = arith.constant 0 : index
    %c0_49 = arith.constant 0 : index
    %93 = vector.load %arg8[%c1_47, %c0_48, %c0_49] : memref<4x128x256xbf16, #tpu.memory_space<vmem>>, vector<1x128x256xbf16>
    %94 = vector.shape_cast %93 : vector<1x128x256xbf16> to vector<128x256xbf16>
    %cst_50 = arith.constant dense<0.000000e+00> : vector<64x256xf32>
    %95 = tpu.matmul %92, %94, %cst_50 {dimension_numbers = #tpu.dot_dimension_numbers<[1], [0], [0], [1], [0, 0, 1, 1], [], []>} : vector<64x128xbf16>, vector<128x256xbf16>, vector<64x256xf32> -> vector<64x256xf32>
    %c1_51 = arith.constant 1 : index
    %c0_52 = arith.constant 0 : index
    %c0_53 = arith.constant 0 : index
    %96 = vector.load %arg9[%c1_51, %c0_52, %c0_53] : memref<4x1x256xf32, #tpu.memory_space<vmem>>, vector<1x1x256xf32>
    %97 = vector.shape_cast %96 : vector<1x1x256xf32> to vector<1x256xf32>
    %98 = vector.broadcast %97 : vector<1x256xf32> to vector<64x256xf32>
    %99 = arith.addf %95, %98 : vector<64x256xf32>
    %100 = vector.extract_strided_slice %99 {offsets = [0, 0], sizes = [64, 128], strides = [1, 1]} : vector<64x256xf32> to vector<64x128xf32>
    %101 = arith.addf %62, %100 : vector<64x128xf32>
    %102 = arith.mulf %101, %6 : vector<64x128xf32>
    %103 = vector.extract_strided_slice %99 {offsets = [0, 128], sizes = [64, 128], strides = [1, 1]} : vector<64x256xf32> to vector<64x128xf32>
    %104 = arith.addf %64, %103 : vector<64x128xf32>
    %105 = arith.truncf %102 : vector<64x128xf32> to vector<64x128xbf16>
    %c16_54 = arith.constant 16 : index
    %c0_55 = arith.constant 0 : index
    %106 = vector.load %arg13[%c16_54, %c0_55] : memref<96x128xf32, #tpu.memory_space<vmem>>, vector<64x128xf32>
    tpu.vector_store %arg13[%c16_54, %c0_55], %102 {strides = array<i32>} : memref<96x128xf32, #tpu.memory_space<vmem>>, vector<64x128xf32>,
    %c8 = arith.constant 8 : index
    %c0_56 = arith.constant 0 : index
    %107 = vector.load %arg13[%c8, %c0_56] : memref<96x128xf32, #tpu.memory_space<vmem>>, vector<64x128xf32>
    %108 = arith.truncf %107 : vector<64x128xf32> to vector<64x128xbf16>
    %c12_57 = arith.constant 12 : index
    %c0_58 = arith.constant 0 : index
    %109 = vector.load %arg13[%c12_57, %c0_58] : memref<96x128xf32, #tpu.memory_space<vmem>>, vector<64x128xf32>
    %110 = arith.truncf %109 : vector<64x128xf32> to vector<64x128xbf16>
    %c20_59 = arith.constant 20 : index
    %c0_60 = arith.constant 0 : index
    %111 = vector.load %arg13[%c20_59, %c0_60] : memref<96x128xf32, #tpu.memory_space<vmem>>, vector<64x128xf32>
    %112 = arith.truncf %111 : vector<64x128xf32> to vector<64x128xbf16>
    %c24 = arith.constant 24 : index
    %c0_61 = arith.constant 0 : index
    %113 = vector.load %arg13[%c24, %c0_61] : memref<96x128xf32, #tpu.memory_space<vmem>>, vector<64x128xf32>
    %114 = arith.truncf %113 : vector<64x128xf32> to vector<64x128xbf16>
    %115 = tpu.concatenate %108, %110, %105, %112, %114 in 1 : vector<64x128xbf16>, vector<64x128xbf16>, vector<64x128xbf16>, vector<64x128xbf16>, vector<64x128xbf16> -> vector<64x640xbf16>
    %c2 = arith.constant 2 : index
    %c0_62 = arith.constant 0 : index
    %c0_63 = arith.constant 0 : index
    %116 = vector.load %arg6[%c2, %c0_62, %c0_63] : memref<4x640x256xbf16, #tpu.memory_space<vmem>>, vector<1x640x256xbf16>
    %117 = vector.shape_cast %116 : vector<1x640x256xbf16> to vector<640x256xbf16>
    %cst_64 = arith.constant dense<0.000000e+00> : vector<64x256xf32>
    %118 = tpu.matmul %115, %117, %cst_64 {dimension_numbers = #tpu.dot_dimension_numbers<[1], [0], [0], [1], [0, 0, 1, 1], [], []>} : vector<64x640xbf16>, vector<640x256xbf16>, vector<64x256xf32> -> vector<64x256xf32>
    %c2_65 = arith.constant 2 : index
    %c0_66 = arith.constant 0 : index
    %c0_67 = arith.constant 0 : index
    %119 = vector.load %arg7[%c2_65, %c0_66, %c0_67] : memref<4x1x256xf32, #tpu.memory_space<vmem>>, vector<1x1x256xf32>
    %120 = vector.shape_cast %119 : vector<1x1x256xf32> to vector<1x256xf32>
    %121 = vector.broadcast %120 : vector<1x256xf32> to vector<64x256xf32>
    %122 = arith.addf %118, %121 : vector<64x256xf32>
    %123 = vector.extract_strided_slice %122 {offsets = [0, 0], sizes = [64, 128], strides = [1, 1]} : vector<64x256xf32> to vector<64x128xf32>
    %124 = math.tanh %123 : vector<64x128xf32>
    %125 = vector.extract_strided_slice %122 {offsets = [0, 128], sizes = [64, 128], strides = [1, 1]} : vector<64x256xf32> to vector<64x128xf32>
    %126 = arith.negf %125 : vector<64x128xf32>
    %127 = math.exp %126 : vector<64x128xf32>
    %cst_68 = arith.constant 1.000000e+00 : f32
    %128 = vector.broadcast %cst_68 : f32 to vector<64x128xf32>
    %129 = arith.addf %128, %127 : vector<64x128xf32>
    %130 = arith.divf %128, %129 : vector<64x128xf32>
    %131 = arith.mulf %124, %130 : vector<64x128xf32>
    %132 = arith.truncf %131 : vector<64x128xf32> to vector<64x128xbf16>
    %c2_69 = arith.constant 2 : index
    %c0_70 = arith.constant 0 : index
    %c0_71 = arith.constant 0 : index
    %133 = vector.load %arg8[%c2_69, %c0_70, %c0_71] : memref<4x128x256xbf16, #tpu.memory_space<vmem>>, vector<1x128x256xbf16>
    %134 = vector.shape_cast %133 : vector<1x128x256xbf16> to vector<128x256xbf16>
    %cst_72 = arith.constant dense<0.000000e+00> : vector<64x256xf32>
    %135 = tpu.matmul %132, %134, %cst_72 {dimension_numbers = #tpu.dot_dimension_numbers<[1], [0], [0], [1], [0, 0, 1, 1], [], []>} : vector<64x128xbf16>, vector<128x256xbf16>, vector<64x256xf32> -> vector<64x256xf32>
    %c2_73 = arith.constant 2 : index
    %c0_74 = arith.constant 0 : index
    %c0_75 = arith.constant 0 : index
    %136 = vector.load %arg9[%c2_73, %c0_74, %c0_75] : memref<4x1x256xf32, #tpu.memory_space<vmem>>, vector<1x1x256xf32>
    %137 = vector.shape_cast %136 : vector<1x1x256xf32> to vector<1x256xf32>
    %138 = vector.broadcast %137 : vector<1x256xf32> to vector<64x256xf32>
    %139 = arith.addf %135, %138 : vector<64x256xf32>
    %140 = vector.extract_strided_slice %139 {offsets = [0, 0], sizes = [64, 128], strides = [1, 1]} : vector<64x256xf32> to vector<64x128xf32>
    %141 = arith.addf %102, %140 : vector<64x128xf32>
    %142 = arith.mulf %141, %6 : vector<64x128xf32>
    %143 = vector.extract_strided_slice %139 {offsets = [0, 128], sizes = [64, 128], strides = [1, 1]} : vector<64x256xf32> to vector<64x128xf32>
    %144 = arith.addf %104, %143 : vector<64x128xf32>
    %145 = arith.truncf %142 : vector<64x128xf32> to vector<64x128xbf16>
    %c16_76 = arith.constant 16 : index
    %c0_77 = arith.constant 0 : index
    %146 = vector.load %arg13[%c16_76, %c0_77] : memref<96x128xf32, #tpu.memory_space<vmem>>, vector<64x128xf32>
    tpu.vector_store %arg13[%c16_76, %c0_77], %142 {strides = array<i32>} : memref<96x128xf32, #tpu.memory_space<vmem>>, vector<64x128xf32>,
    %c0_78 = arith.constant 0 : index
    %c0_79 = arith.constant 0 : index
    %147 = vector.load %arg13[%c0_78, %c0_79] : memref<96x128xf32, #tpu.memory_space<vmem>>, vector<64x128xf32>
    %148 = arith.truncf %147 : vector<64x128xf32> to vector<64x128xbf16>
    %c8_80 = arith.constant 8 : index
    %c0_81 = arith.constant 0 : index
    %149 = vector.load %arg13[%c8_80, %c0_81] : memref<96x128xf32, #tpu.memory_space<vmem>>, vector<64x128xf32>
    %150 = arith.truncf %149 : vector<64x128xf32> to vector<64x128xbf16>
    %c24_82 = arith.constant 24 : index
    %c0_83 = arith.constant 0 : index
    %151 = vector.load %arg13[%c24_82, %c0_83] : memref<96x128xf32, #tpu.memory_space<vmem>>, vector<64x128xf32>
    %152 = arith.truncf %151 : vector<64x128xf32> to vector<64x128xbf16>
    %c32 = arith.constant 32 : index
    %c0_84 = arith.constant 0 : index
    %153 = vector.load %arg13[%c32, %c0_84] : memref<96x128xf32, #tpu.memory_space<vmem>>, vector<64x128xf32>
    %154 = arith.truncf %153 : vector<64x128xf32> to vector<64x128xbf16>
    %155 = tpu.concatenate %148, %150, %145, %152, %154 in 1 : vector<64x128xbf16>, vector<64x128xbf16>, vector<64x128xbf16>, vector<64x128xbf16>, vector<64x128xbf16> -> vector<64x640xbf16>
    %c3 = arith.constant 3 : index
    %c0_85 = arith.constant 0 : index
    %c0_86 = arith.constant 0 : index
    %156 = vector.load %arg6[%c3, %c0_85, %c0_86] : memref<4x640x256xbf16, #tpu.memory_space<vmem>>, vector<1x640x256xbf16>
    %157 = vector.shape_cast %156 : vector<1x640x256xbf16> to vector<640x256xbf16>
    %cst_87 = arith.constant dense<0.000000e+00> : vector<64x256xf32>
    %158 = tpu.matmul %155, %157, %cst_87 {dimension_numbers = #tpu.dot_dimension_numbers<[1], [0], [0], [1], [0, 0, 1, 1], [], []>} : vector<64x640xbf16>, vector<640x256xbf16>, vector<64x256xf32> -> vector<64x256xf32>
    %c3_88 = arith.constant 3 : index
    %c0_89 = arith.constant 0 : index
    %c0_90 = arith.constant 0 : index
    %159 = vector.load %arg7[%c3_88, %c0_89, %c0_90] : memref<4x1x256xf32, #tpu.memory_space<vmem>>, vector<1x1x256xf32>
    %160 = vector.shape_cast %159 : vector<1x1x256xf32> to vector<1x256xf32>
    %161 = vector.broadcast %160 : vector<1x256xf32> to vector<64x256xf32>
    %162 = arith.addf %158, %161 : vector<64x256xf32>
    %163 = vector.extract_strided_slice %162 {offsets = [0, 0], sizes = [64, 128], strides = [1, 1]} : vector<64x256xf32> to vector<64x128xf32>
    %164 = math.tanh %163 : vector<64x128xf32>
    %165 = vector.extract_strided_slice %162 {offsets = [0, 128], sizes = [64, 128], strides = [1, 1]} : vector<64x256xf32> to vector<64x128xf32>
    %166 = arith.negf %165 : vector<64x128xf32>
    %167 = math.exp %166 : vector<64x128xf32>
    %cst_91 = arith.constant 1.000000e+00 : f32
    %168 = vector.broadcast %cst_91 : f32 to vector<64x128xf32>
    %169 = arith.addf %168, %167 : vector<64x128xf32>
    %170 = arith.divf %168, %169 : vector<64x128xf32>
    %171 = arith.mulf %164, %170 : vector<64x128xf32>
    %172 = arith.truncf %171 : vector<64x128xf32> to vector<64x128xbf16>
    %c3_92 = arith.constant 3 : index
    %c0_93 = arith.constant 0 : index
    %c0_94 = arith.constant 0 : index
    %173 = vector.load %arg8[%c3_92, %c0_93, %c0_94] : memref<4x128x256xbf16, #tpu.memory_space<vmem>>, vector<1x128x256xbf16>
    %174 = vector.shape_cast %173 : vector<1x128x256xbf16> to vector<128x256xbf16>
    %cst_95 = arith.constant dense<0.000000e+00> : vector<64x256xf32>
    %175 = tpu.matmul %172, %174, %cst_95 {dimension_numbers = #tpu.dot_dimension_numbers<[1], [0], [0], [1], [0, 0, 1, 1], [], []>} : vector<64x128xbf16>, vector<128x256xbf16>, vector<64x256xf32> -> vector<64x256xf32>
    %c3_96 = arith.constant 3 : index
    %c0_97 = arith.constant 0 : index
    %c0_98 = arith.constant 0 : index
    %176 = vector.load %arg9[%c3_96, %c0_97, %c0_98] : memref<4x1x256xf32, #tpu.memory_space<vmem>>, vector<1x1x256xf32>
    %177 = vector.shape_cast %176 : vector<1x1x256xf32> to vector<1x256xf32>
    %178 = vector.broadcast %177 : vector<1x256xf32> to vector<64x256xf32>
    %179 = arith.addf %175, %178 : vector<64x256xf32>
    %180 = vector.extract_strided_slice %179 {offsets = [0, 128], sizes = [64, 128], strides = [1, 1]} : vector<64x256xf32> to vector<64x128xf32>
    %181 = arith.addf %144, %180 : vector<64x128xf32>
    %182 = arith.mulf %181, %6 : vector<64x128xf32>
    %183 = arith.truncf %182 : vector<64x128xf32> to vector<64x128xbf16>
    %c0_99 = arith.constant 0 : index
    %c0_100 = arith.constant 0 : index
    %184 = vector.load %arg10[%c0_99, %c0_100] : memref<128x256xbf16, #tpu.memory_space<vmem>>, vector<128x256xbf16>
    %cst_101 = arith.constant dense<0.000000e+00> : vector<64x256xf32>
    %185 = tpu.matmul %183, %184, %cst_101 {dimension_numbers = #tpu.dot_dimension_numbers<[1], [0], [0], [1], [0, 0, 1, 1], [], []>} : vector<64x128xbf16>, vector<128x256xbf16>, vector<64x256xf32> -> vector<64x256xf32>
    %c0_102 = arith.constant 0 : index
    %c0_103 = arith.constant 0 : index
    %186 = vector.load %arg11[%c0_102, %c0_103] : memref<1x256xf32, #tpu.memory_space<vmem>>, vector<1x256xf32>
    %187 = vector.broadcast %186 : vector<1x256xf32> to vector<64x256xf32>
    %188 = arith.addf %185, %187 : vector<64x256xf32>
    %189 = vector.extract_strided_slice %188 {offsets = [0, 0], sizes = [64, 128], strides = [1, 1]} : vector<64x256xf32> to vector<64x128xf32>
    %190 = vector.extract_strided_slice %188 {offsets = [0, 128], sizes = [64, 128], strides = [1, 1]} : vector<64x256xf32> to vector<64x128xf32>
    %c0_104 = arith.constant 0 : index
    %c0_105 = arith.constant 0 : index
    %c0_106 = arith.constant 0 : index
    %191 = vector.load %arg3[%c0_104, %c0_105, %c0_106] : memref<1x64x128xf32, #tpu.memory_space<vmem>>, vector<1x64x128xf32>
    %192 = vector.shape_cast %191 : vector<1x64x128xf32> to vector<64x128xf32>
    %193 = math.exp %190 : vector<64x128xf32>
    %194 = arith.mulf %192, %193 : vector<64x128xf32>
    %195 = arith.addf %189, %194 : vector<64x128xf32>
    %196 = arith.mulf %195, %11 : vector<64x128xf32>
    %c0_107 = arith.constant 0 : index
    %c0_108 = arith.constant 0 : index
    %c0_109 = arith.constant 0 : index
    %197 = vector.load %arg12[%c0_107, %c0_108, %c0_109] : memref<1x64x128xf32, #tpu.memory_space<vmem>>, vector<1x64x128xf32>
    %198 = vector.shape_cast %197 : vector<1x64x128xf32> to vector<64x128xf32>
    %199 = vector.shape_cast %196 : vector<64x128xf32> to vector<1x64x128xf32>
    tpu.vector_store %arg12[%c0_107, %c0_108, %c0_109], %199 {strides = array<i32>} : memref<1x64x128xf32, #tpu.memory_space<vmem>>, vector<1x64x128xf32>,
    return
  }
  func.func @transform_0(%arg0: i32, %arg1: memref<2xi32, #tpu.memory_space<smem>>) -> (i32, i32, i32) {
    %c0_i32 = arith.constant 0 : i32
    %c0_i32_0 = arith.constant 0 : i32
    %c0_i32_1 = arith.constant 0 : i32
    return %arg0, %c0_i32, %c0_i32_0 : i32, i32, i32
  }
  func.func @transform_1(%arg0: i32, %arg1: memref<2xi32, #tpu.memory_space<smem>>) -> (i32, i32, i32) {
    %c0_i32 = arith.constant 0 : i32
    %c0_i32_0 = arith.constant 0 : i32
    %c0_i32_1 = arith.constant 0 : i32
    return %arg0, %c0_i32, %c0_i32_0 : i32, i32, i32
  }
  func.func @transform_2(%arg0: i32, %arg1: memref<2xi32, #tpu.memory_space<smem>>) -> (i32, i32) {
    %c0_i32 = arith.constant 0 : i32
    %c0_i32_0 = arith.constant 0 : i32
    %c0_i32_1 = arith.constant 0 : i32
    return %c0_i32, %c0_i32_0 : i32, i32
  }
  func.func @transform_3(%arg0: i32, %arg1: memref<2xi32, #tpu.memory_space<smem>>) -> (i32, i32) {
    %c0_i32 = arith.constant 0 : i32
    %c0_i32_0 = arith.constant 0 : i32
    %c0_i32_1 = arith.constant 0 : i32
    return %c0_i32, %c0_i32_0 : i32, i32
  }
  func.func @transform_4(%arg0: i32, %arg1: memref<2xi32, #tpu.memory_space<smem>>) -> (i32, i32, i32) {
    %c0_i32 = arith.constant 0 : i32
    %c0_i32_0 = arith.constant 0 : i32
    %c0_i32_1 = arith.constant 0 : i32
    %c0_i32_2 = arith.constant 0 : i32
    return %c0_i32, %c0_i32_0, %c0_i32_1 : i32, i32, i32
  }
  func.func @transform_5(%arg0: i32, %arg1: memref<2xi32, #tpu.memory_space<smem>>) -> (i32, i32, i32) {
    %c0_i32 = arith.constant 0 : i32
    %c0_i32_0 = arith.constant 0 : i32
    %c0_i32_1 = arith.constant 0 : i32
    %c0_i32_2 = arith.constant 0 : i32
    return %c0_i32, %c0_i32_0, %c0_i32_1 : i32, i32, i32
  }
  func.func @transform_6(%arg0: i32, %arg1: memref<2xi32, #tpu.memory_space<smem>>) -> (i32, i32, i32) {
    %c0_i32 = arith.constant 0 : i32
    %c0_i32_0 = arith.constant 0 : i32
    %c0_i32_1 = arith.constant 0 : i32
    %c0_i32_2 = arith.constant 0 : i32
    return %c0_i32, %c0_i32_0, %c0_i32_1 : i32, i32, i32
  }
  func.func @transform_7(%arg0: i32, %arg1: memref<2xi32, #tpu.memory_space<smem>>) -> (i32, i32, i32) {
    %c0_i32 = arith.constant 0 : i32
    %c0_i32_0 = arith.constant 0 : i32
    %c0_i32_1 = arith.constant 0 : i32
    %c0_i32_2 = arith.constant 0 : i32
    return %c0_i32, %c0_i32_0, %c0_i32_1 : i32, i32, i32
  }
  func.func @transform_8(%arg0: i32, %arg1: memref<2xi32, #tpu.memory_space<smem>>) -> (i32, i32) {
    %c0_i32 = arith.constant 0 : i32
    %c0_i32_0 = arith.constant 0 : i32
    %c0_i32_1 = arith.constant 0 : i32
    return %c0_i32, %c0_i32_0 : i32, i32
  }
  func.func @transform_9(%arg0: i32, %arg1: memref<2xi32, #tpu.memory_space<smem>>) -> (i32, i32) {
    %c0_i32 = arith.constant 0 : i32
    %c0_i32_0 = arith.constant 0 : i32
    %c0_i32_1 = arith.constant 0 : i32
    return %c0_i32, %c0_i32_0 : i32, i32
  }
  func.func @transform_10(%arg0: i32, %arg1: memref<2xi32, #tpu.memory_space<smem>>) -> (i32, i32, i32) {
    %c0_i32 = arith.constant 0 : i32
    %c0_i32_0 = arith.constant 0 : i32
    %c0_i32_1 = arith.constant 0 : i32
    return %arg0, %c0_i32, %c0_i32_0 : i32, i32, i32
  }
}

</mosaic_0001>

<bundles_post_ra>
// kernel: tpu_custom_call.1
= control target key start
LH: loop header
LB: loop body
LE: loop exit
PB: predicated region body
PF: predicated region fallthrough
CT: control target
= control target key end

     0   :  { %s9165_s20 = smov [#allocation4]   ;;  %s10715_s0 = inlined_call_operand.hbm [shape: s32[2], index: 0, kind: input, shape index: {}]   ;;  %s10716_s1 = inlined_call_operand.hbm [shape: bf16[2,64,128], index: 1, kind: input, shape index: {}]   ;;  %s10717_s2 = inlined_call_operand.hbm [shape: f32[2,64,128], index: 2, kind: input, shape index: {}]   ;;  %s10718_s3 = inlined_call_operand.hbm [shape: bf16[128,128], index: 3, kind: input, shape index: {}]   ;;  %s10719_s4 = inlined_call_operand.hbm [shape: f32[1,128], index: 4, kind: input, shape index: {}]   ;;  %s10720_s5 = inlined_call_operand.hbm [shape: bf16[4,640,256], index: 5, kind: input, shape index: {}]   ;;  %s10721_s6 = inlined_call_operand.hbm [shape: f32[4,1,256], index: 6, kind: input, shape index: {}]   ;;  %s10722_s7 = inlined_call_operand.hbm [shape: bf16[4,128,256], index: 7, kind: input, shape index: {}]   ;;  %s10723_s8 = inlined_call_operand.hbm [shape: f32[4,1,256], index: 8, kind: input, shape index: {}]   ;;  %s10724_s9 = inlined_call_operand.hbm [shape: bf16[128,256], index: 9, kind: input, shape index: {}]   ;;  %s10725_s10 = inlined_call_operand.hbm [shape: f32[1,256], index: 10, kind: input, shape index: {}]   ;;  %s10726_s11 = inlined_call_operand.hbm [shape: f32[2,64,128], index: 11, kind: output, shape index: {}]  }
   0x1   :  { %10745 = sst [smem:[#allocation50_spill]] %s10718_s3  ;;  %s17_s19 = sshll.u32 %s10715_s0, 4  ;;  %s18_s19 = int_to_ptr.hbm [resolvable:$true] %s17_s19 }
   0x2   :  { %10746 = sst [smem:[#allocation51_spill]] %s10719_s4 }
   0x3   :  { %10747 = sst [smem:[#allocation52_spill]] %s10720_s5 }
   0x4   :  { %10748 = sst [smem:[#allocation53_spill]] %s10721_s6 }
   0x5   :  { %10749 = sst [smem:[#allocation54_spill]] %s10722_s7 }
   0x6   :  { %10750 = sst [smem:[#allocation55_spill]] %s10723_s8 }
   0x7   :  { %10751 = sst [smem:[#allocation56_spill]] %s10724_s9 }
   0x8   :  { %10752 = sst [smem:[#allocation57_spill]] %s10725_s10 }
   0x9   :  { %20 = dma.hbm_to_smem %s18_s19, 16, %s9165_s20, [#allocation3] }
   0xa   :  { %9115 = dma.done.wait [#allocation3], 16 }
   0xb   :  { %9116 = vsyncadd [#allocation3], 4294967280 }
   0xc   :  { %23 = sfence }
   0xd   :  { %24 = vsyncpa [#allocation6], 0 }
   0xe   :  { %26 = vsyncpa [#allocation6 + $0x1], 0 }
   0xf   :  { %27 = vsyncpa [#allocation9], 0 }
  0x10   :  { %29 = vsyncpa [#allocation9 + $0x1], 0 }
  0x11   :  { %30 = vsyncpa [#allocation12], 0 }
  0x12   :  { %31 = vsyncpa [#allocation15], 0 }
  0x13   :  { %32 = vsyncpa [#allocation18], 0 }
  0x14   :  { %33 = vsyncpa [#allocation21], 0 }
  0x15   :  { %34 = vsyncpa [#allocation7], 0 }
  0x16   :  { %36 = vsyncpa [#allocation7 + $0x1], 0  ;;  %s9246_s21 = smov 0   ;;  %s9248_s22 = smov 0  }
  0x17   :  { %s9250_s0 = smov 0   ;;  %s9252_s23 = smov 0  }
  0x18 LB: > { %s10753_s3 = sld [smem:[#allocation50_spill]]  ;;  %s9270_s27 = sadd.s32 4294967295, %s9163_s23   ;;  %s9163_s23 = sphi %s9252_s23, %s10821_s23   ;;  %s9159_s0 = sphi %s9250_s0, %s10820_s0   ;;  %s9155_s22 = sphi %s9248_s22, %s10819_s22   ;;  %s9151_s21 = sphi %s9246_s21, %s10818_s21  }
  0x19   : > { %p6269_p0 = scmp.ge.s32.totalorder %s9163_s23, 1  ;;  %p63_p1 = scmp.eq.s32.totalorder %s9270_s27, 0 }
  0x1a   : > { %p293_p2 = scmp.lt.s32.totalorder %s9163_s23, 3  ;;  %s9166_s29 = smov [#allocation10]  }
  0x1b   : > { %s306_s30 = sshll.u32 %s9166_s29, 4  ;;  %s10755_s4 = sld [smem:[#allocation51_spill]]  ;;  %s307_s30 = int_to_ptr.vmem [resolvable:$true] %s306_s30 }
  0x1c   : > { %p9275_p3 = pnand %p6269_p0, %p293_p2  ;;  %s10757_s6 = sld [smem:[#allocation53_spill]] }
  0x1d   : > { %s9167_s19 = smov [#allocation11]   ;;  %s10727_s24 = smov 64  }
  0x1e   : > { %s304_s26 = sshll.u32 %s10753_s3, 4  ;;  %p8419_p4 = pneg %p9275_p3  ;;  %s305_s26 = int_to_ptr.hbm [resolvable:$true] %s304_s26 }
  0x1f   : > { %s321_s20 = sshll.u32 %s9167_s19, 4  ;;  %s10728_s25 = smov 4   ;;  %s322_s20 = int_to_ptr.vmem [resolvable:$true] %s321_s20 }
  0x20   : > { %p9287_p6 = pnand %p8419_p4, %p63_p1  ;;  %s9170_s29 = smov [#allocation14]  }
  0x21   : > { %s319_s14 = sshll.u32 %s10755_s4, 4  ;;  %s346_s12 = sshll.u32 %s9170_s29, 4  ;;  %s320_s14 = int_to_ptr.hbm [resolvable:$true] %s319_s14  ;;  %s347_s12 = int_to_ptr.vmem [resolvable:$true] %s346_s12 }
  0x22   : > { %s344_s18 = sshll.u32 %s10757_s6, 4  ;;  %s10758_s8 = sld [smem:[#allocation55_spill]]  ;;  %s345_s18 = int_to_ptr.hbm [resolvable:$true] %s344_s18 }
  0x23   : > { %8422 = dma.hbm_to_vmem [thread:$0]  (!%p9287_p6), %s305_s26, 1024, %s307_s30, [#allocation9], %s10727_s24, %s10727_s24, %s10728_s25  }
  0x24   : > { %8425 = dma.hbm_to_vmem [thread:$0]  (!%p9287_p6), %s320_s14, 16, %s322_s20, [#allocation12]  }
  0x25   : > { %s9171_s19 = smov 32   ;;  %s9172_s3 = smov 2  }
  0x26   : > { %8431 = dma.hbm_to_vmem [thread:$0]  (!%p9287_p6), %s345_s18, 128, %s347_s12, [#allocation15], %s9171_s19, %s9171_s19, %s9172_s3  }
  0x27   : > { %s9173_s4 = smov [#allocation17]   ;;  %s10759_s5 = sld [smem:[#allocation52_spill]] }
  0x28   : > { %s372_s17 = sshll.u32 %s10758_s8, 4  ;;  %s374_s26 = sshll.u32 %s9173_s4, 4  ;;  %s373_s17 = int_to_ptr.hbm [resolvable:$true] %s372_s17  ;;  %s375_s26 = int_to_ptr.vmem [resolvable:$true] %s374_s26 }
  0x29   : > { %8437 = dma.hbm_to_vmem [thread:$0]  (!%p9287_p6), %s373_s17, 128, %s375_s26, [#allocation18], %s9171_s19, %s9171_s19, %s9172_s3  }
  0x2a   : > { %s9174_s14 = smov [#allocation13]   ;;  %s10760_s7 = sld [smem:[#allocation54_spill]] }
  0x2b   : > { %s332_s20 = sshll.u32 %s9174_s14, 4  ;;  %s10729_s18 = smov 128   ;;  %s333_s20 = int_to_ptr.vmem [resolvable:$true] %s332_s20 }
  0x2c   : > { %s10730_s12 = smov 8   ;;  %s9177_s4 = smov [#allocation16]  }
  0x2d   : > { %s330_s25 = sshll.u32 %s10759_s5, 4  ;;  %s360_s3 = sshll.u32 %s9177_s4, 4  ;;  %s331_s25 = int_to_ptr.hbm [resolvable:$true] %s330_s25  ;;  %s361_s3 = int_to_ptr.vmem [resolvable:$true] %s360_s3 }
  0x2e   : > { %8428 = dma.hbm_to_vmem [thread:$0]  (!%p9287_p6), %s331_s25, 40960, %s333_s20, [#allocation12], %s10729_s18, %s10729_s18, %s10730_s12  }
  0x2f   : > { %s10761_s9 = sld [smem:[#allocation56_spill]]  ;;  %s9178_s14 = smov [#allocation19]  }
  0x30   : > { %s358_s16 = sshll.u32 %s10760_s7, 4  ;;  %s10762_s10 = sld [smem:[#allocation57_spill]]  ;;  %s359_s16 = int_to_ptr.hbm [resolvable:$true] %s358_s16 }
  0x31   : > { %8434 = dma.hbm_to_vmem [thread:$0]  (!%p9287_p6), %s359_s16, 8192, %s361_s3, [#allocation15], %s10729_s18, %s10729_s18, %s10730_s12  }
  0x32   : > { %s388_s20 = sshll.u32 %s9178_s14, 4  ;;  %s9179_s29 = smov [#allocation20]   ;;  %s389_s20 = int_to_ptr.vmem [resolvable:$true] %s388_s20 }
  0x33   : > { %s403_s13 = sshll.u32 %s9179_s29, 4  ;;  %s6268_s16 = sadd.s32 4294967294, %s9163_s23   ;;  %s404_s13 = int_to_ptr.vmem [resolvable:$true] %s403_s13 }
  0x34   : > { %s9339_s4 = sadd.s32 1, %s9163_s23   ;;  %s49_s24 = sadd.s32 1, %s9159_s0 }
  0x35   : > { %s386_s19 = sshll.u32 %s10761_s9, 4  ;;  %s46_s3 = ssub.s32 %s9163_s23, %s9339_s4  ;;  %s387_s19 = int_to_ptr.hbm [resolvable:$true] %s386_s19 }
  0x36   : > { %s401_s30 = sshll.u32 %s10762_s10, 4  ;;  %p47_p7 = scmp.eq.s32.totalorder %s46_s3, 0  ;;  %s402_s30 = int_to_ptr.hbm [resolvable:$true] %s401_s30 }
  0x37   : > { %8440 = dma.hbm_to_vmem [thread:$0]  (!%p9287_p6), %s387_s19, 2048, %s389_s20, [#allocation18], %s10729_s18, %s10729_s18, %s10730_s12  }
  0x38   : > { %8443 = dma.hbm_to_vmem [thread:$0]  (!%p9287_p6), %s402_s30, 32, %s404_s13, [#allocation21]  }
  0x39   : > { %p56_p8 = scmp.ne.s32.totalorder %s9159_s0, %s9155_s22  ;;  %p57_p9 = scmp.eq.s32.totalorder %s9163_s23, 0 }
  0x3a   : > { %p62_p10 = scmp.ne.s32.totalorder %s9155_s22, %s9151_s21  ;;  %p280_p13 = scmp.eq.s32.totalorder %s9270_s27, 1 }
  0x3b   : > { %s9350_s17 = scalar_select %p47_p7, %s9159_s0, %s49_s24  }
  0x3c   : > { %p9352_p11 = por %p57_p9, %p56_p8  ;;  %p9358_p12 = por %p63_p1, %p62_p10 }
  0x3d   : > { %10763 = sst [smem:[#allocation32_spill]] %s9350_s17  ;;  %p286_p0 = scmp.eq.s32.totalorder %s6268_s16, 1 }
  0x3e   : > { %p8463_p2 = scmp.lt.s32.totalorder %s9163_s23, 2  ;;  %s9365_s25 = sand.u32 1, %s9159_s0  }
  0x3f   : > { %p9367_p4 = por %p280_p13, %p56_p8  ;;  %p9371_p6 = por %p286_p0, %p62_p10 }
  0x40   : > { %s6279_s14 = sshll.u32 %s9365_s25, 5  ;;  %s7958_s20 = sshll.u32 %s9163_s23, 5 }
  0x41   : > { %s423_s16 = scalar_lea.hbm %s10716_s1, %s7958_s20  ;;  %s418_s3 = scalar_lea.vmem [#allocation5], %s6279_s14 }
  0x42   : > { %s426_s24 = sshll.u32 %s418_s3, 4  ;;  %s424_s18 = sshll.u32 %s423_s16, 4  ;;  %s427_s24 = int_to_ptr.vmem [resolvable:$true] %s426_s24  ;;  %s425_s18 = int_to_ptr.hbm [resolvable:$true] %s424_s18 }
  0x43   : > { %p9382_p7 = pnand %p8463_p2, %p9352_p11  ;;  %s436_s5 = sand.u32 1, %s9163_s23  }
  0x44   : > { %s6282_s6 = sshll.u32 %s9365_s25, 6  ;;  %s415_s7 = scalar_lea.sflag [#allocation6], %s9365_s25 }
  0x45   : > { %s9011_s8 = sshra.s32 %s425_s18, 4  ;;  %p9015_p9 = pneg %p9382_p7  ;;  %s9012_s8 = int_to_ptr.hbm [resolvable:$true] %s9011_s8 }
  0x46   : > { %s9013_s9 = scalar_lea.hbm %s9012_s8, 32  ;;  %s9018_s20 = scalar_lea.hbm %s10716_s1, 64 }
  0x47   : > { %p9014_p8 = scmp.ne.s32.totalorder %s9012_s8, %s9013_s9  ;;  %p9019_p11 = scmp.lt.s32.totalorder %s9012_s8, %s10716_s1 }
  0x48   : > { %p9020_p0 = scmp.lt.s32.totalorder %s9018_s20, %s9013_s9 }
  0x49   : > { %p9016_p10 = pnand %p9015_p9, %p9014_p8 }
  0x4a   : > { %p9021_p2 = por %p9020_p0, %p9019_p11 }
  0x4b   : > { %p9017_p13 = pneg %p9016_p10 }
  0x4d   : > { %p9022_p5 = pnand %p9021_p2, %p9017_p13 }
  0x4f   : > { %9025 = shalt.err (!%p9022_p5)
}
  0x50   : > { %s10769_s25 = smov 4   ;;  %s10770_s16 = smov 64  }
  0x51   : > { %8447 = dma.hbm_to_vmem [thread:$0]  (!%p9382_p7), %s425_s18, 512, %s427_s24, %s415_s7, %s10770_s16, %s10770_s16, %s10769_s25  }
  0x52   : > { %s7959_s3 = sshll.u32 %s9163_s23, 6  ;;  %s440_s17 = scalar_lea.vmem [#allocation8], %s6282_s6 }
  0x53   : > { %s445_s14 = scalar_lea.hbm %s10717_s2, %s7959_s3  ;;  %s448_s29 = sshll.u32 %s440_s17, 4  ;;  %s449_s29 = int_to_ptr.vmem [resolvable:$true] %s448_s29 }
  0x54   : > { %s446_s8 = sshll.u32 %s445_s14, 4  ;;  %s437_s9 = scalar_lea.sflag [#allocation9], %s436_s5  ;;  %s447_s8 = int_to_ptr.hbm [resolvable:$true] %s446_s8 }
  0x55   : > { %s9041_s20 = sshra.s32 %s447_s8, 4  ;;  %s9048_s24 = scalar_lea.hbm %s10717_s2, 128  ;;  %s9042_s20 = int_to_ptr.hbm [resolvable:$true] %s9041_s20 }
  0x56   : > { %s9043_s13 = scalar_lea.hbm %s9042_s20, 64  ;;  %p9049_p13 = scmp.lt.s32.totalorder %s9042_s20, %s10717_s2 }
  0x57   : > { %p9044_p5 = scmp.ne.s32.totalorder %s9042_s20, %s9043_s13  ;;  %p9050_p11 = scmp.lt.s32.totalorder %s9048_s24, %s9043_s13 }
  0x59   : > { %p9046_p8 = pnand %p9044_p5, %p9015_p9  ;;  %p9051_p0 = por %p9050_p11, %p9049_p13 }
  0x5b   : > { %p9047_p10 = pneg %p9046_p8 }
  0x5d   : > { %p9052_p2 = pnand %p9051_p0, %p9047_p10 }
  0x5f   : > { %9055 = shalt.err (!%p9052_p2)
}
  0x60   : > { %s10771_s5 = smov 8   ;;  %s10772_s6 = smov 128  }
  0x61   : > { %8450 = dma.hbm_to_vmem [thread:$0]  (!%p9382_p7), %s447_s8, 1024, %s449_s29, %s437_s9, %s10772_s6, %s10772_s6, %s10771_s5  }
  0x62   : > { %460 = sbr.rel (%p9275_p3) target bundleno = 2330 (0x91a), region = 60 }
  0x67   : > { %s9426_s17 = sand.u32 1, %s9155_s22  }
  0x68   : > { %s6286_s16 = sshll.u32 %s9426_s17, 5  ;;  %s463_s3 = scalar_lea.sflag [#allocation6], %s9426_s17 }
  0x69   : > { %s9430_s19 = scalar_lea.vmem [#allocation5], %s6286_s16 }
  0x6a   : > { %9118 = dma.done.wait (%p9358_p12), %s463_s3, 512  }
  0x6b   : > { %9120 = vsyncadd (%p9358_p12), %s463_s3, 4294966784  ;;  %s472_s28 = sand.u32 1, %s9270_s27   ;;  %s6287_s12 = sshll.u32 %s9426_s17, 6 }
  0x6c   : > { %s473_s14 = scalar_lea.sflag [#allocation9], %s472_s28  ;;  %s9440_s29 = scalar_lea.vmem [#allocation8], %s6287_s12 }
  0x6d   : > { %9122 = dma.done.wait (%p9358_p12), %s473_s14, 1024  }
  0x6e   : > { %9124 = vsyncadd (%p9358_p12), %s473_s14, 4294966272 }
  0x6f   : > { %9126 = dma.done.wait (%p63_p1), [#allocation9], 1024  }
  0x70   : > { %9128 = vsyncadd (%p63_p1), [#allocation9], 4294966272 }
  0x71   : > { %9130 = dma.done.wait (%p63_p1), [#allocation12], 40976  }
  0x72   : > { %9132 = vsyncadd (%p63_p1), [#allocation12], 4294926320 }
  0x73   : > { %9134 = dma.done.wait (%p63_p1), [#allocation15], 8320  }
  0x74   : > { %9136 = vsyncadd (%p63_p1), [#allocation15], 4294958976 }
  0x75   : > { %9138 = dma.done.wait (%p63_p1), [#allocation18], 2176  }
  0x76   : > { %9140 = vsyncadd (%p63_p1), [#allocation18], 4294965120 }
  0x77   : > { %9142 = dma.done.wait (%p63_p1), [#allocation21], 32  }
  0x78   : > { %9144 = vsyncadd (%p63_p1), [#allocation21], 4294967264  ;;  %v7971_v0 = vld [vmem:[#allocation10 + $0x38] sm:$0xff]  ;;  %v7970_v1 = vld [vmem:[#allocation10 + $0x30] sm:$0xff]  ;;  %v9180_v9 = vmov 0.0   ;;  %s559_s15 = sld [smem:[#allocation4 + %s9270_s27]] }
  0x79   : > { %698 = vmatpush.bf16.msra.mxu0 %v7971_v0  ;;  %8365 = vmatpush.bf16.msra.mxu2 %v7971_v0  ;;  %v7969_v2 = vld [vmem:[#allocation10 + $0x28] sm:$0xff]  ;;  %v7968_v3 = vld [vmem:[#allocation10 + $0x20] sm:$0xff]  ;;  %v7967_v4 = vld [vmem:[#allocation10 + $0x18] sm:$0xff]  ;;  %594 = vst [vmem:[#allocation2] sm:$0xff] %v9180_v9  ;;  %s10646_s8 = scalar_lea.vmem [#allocation22], %s6287_s12  ;;  %s8364_s9 = sshll.u32 %s9270_s27, 6 }
  0x7a   : > { %v6411_v5 = vld [vmem:[#allocation13 + $0x70] sm:$0xf]  ;;  %v7987_v7 = vld [vmem:[#allocation13 + $0x74] sm:$0xf0]  ;;  %595 = vst [vmem:[#allocation2 + $0x8] sm:$0xff] %v9180_v9  ;;  %v7965_v10 = vld [vmem:[#allocation10 + $0x8] sm:$0xff]  ;;  %s6092_s7 = scalar_lea.hbm %s10726_s11, %s8364_s9 }
  0x7b   : > { %v7966_v6 = vld [vmem:[#allocation10 + $0x10] sm:$0xff]  ;;  %v6412_v8 = vor.u32 %v7987_v7, %v6411_v5  ;;  %596 = vst [vmem:[#allocation2 + $0x50] sm:$0xff] %v9180_v9  ;;  %v8003_v12 = vld [vmem:[#allocation13 + $0xf4] sm:$0xf0]  ;;  %v7964_v13 = vld [vmem:[#allocation10] sm:$0xff]  ;;  %v560_v5 = vlaneseq  ;;  %s6093_s18 = sshll.u32 %s10646_s8, 4  ;;  %s6094_s18 = int_to_ptr.vmem [resolvable:$true] %s6093_s18 }
  0x7c   : > { %v6475_v11 = vld [vmem:[#allocation13 + $0xf0] sm:$0xf]  ;;  %v6467_v15 = vld [vmem:[#allocation13 + $0xe0] sm:$0xf]  ;;  %v8001_v16 = vld [vmem:[#allocation13 + $0xe4] sm:$0xf0] }
  0x7d   : > { %699 = vmatpush.bf16.msra.mxu0 %v7970_v1  ;;  %8366 = vmatpush.bf16.msra.mxu2 %v7970_v1  ;;  %v6476_v14 = vor.u32 %v8003_v12, %v6475_v11  ;;  %v7960_v17 = vld [vmem:[%s9430_s19] sm:$0xff]  ;;  %v7962_v18 = vld [vmem:[%s9430_s19 + $0x10] sm:$0xff]  ;;  %v6468_v19 = vor.u32 %v8001_v16, %v6467_v15  ;;  %v7961_v20 = vld [vmem:[%s9430_s19 + $0x8] sm:$0xff]  ;;  %v9474_v16 = vshrl.u32 %v560_v5, 7  ;;  %s6095_s24 = sshll.u32 %s6092_s7, 4  ;;  %s6081_s27 = scalar_lea.sflag [#allocation7], %s9426_s17  ;;  %s6096_s24 = int_to_ptr.hbm [resolvable:$true] %s6095_s24 }
  0x7e   : > { %1421 = vmatpush.bf16.msra.mxu1 %v6412_v8  ;;  %8373 = vmatpush.bf16.msra.mxu3 %v6412_v8  ;;  %v7963_v21 = vld [vmem:[%s9430_s19 + $0x18] sm:$0xff]  ;;  %v6403_v22 = vld [vmem:[#allocation13 + $0x60] sm:$0xf]  ;;  %v7985_v23 = vld [vmem:[#allocation13 + $0x64] sm:$0xf0]  ;;  %s9085_s10 = sshra.s32 %s6096_s24, 4  ;;  %s9086_s10 = int_to_ptr.hbm [resolvable:$true] %s9085_s10 }
  0x7f   : > { %v6404_v24 = vor.u32 %v7985_v23, %v6403_v22  ;;  %v6459_v25 = vld [vmem:[#allocation13 + $0xd0] sm:$0xf]  ;;  %v7999_v26 = vld [vmem:[#allocation13 + $0xd4] sm:$0xf0]  ;;  %v6451_v34 = vld [vmem:[#allocation13 + $0xc0] sm:$0xf]  ;;  %p9092_p7 = scmp.lt.s32.totalorder %s9086_s10, %s10726_s11 }
  0x80   : > { %v6395_v27 = vld [vmem:[#allocation13 + $0x50] sm:$0xf]  ;;  %v6460_v28 = vor.u32 %v7999_v26, %v6459_v25  ;;  %v7983_v29 = vld [vmem:[#allocation13 + $0x54] sm:$0xf0]  ;;  %v7997_v35 = vld [vmem:[#allocation13 + $0xc4] sm:$0xf0] }
  0x81   : > { %700 = vmatpush.bf16.msra.mxu0 %v7969_v2  ;;  %8367 = vmatpush.bf16.msra.mxu2 %v7969_v2  ;;  %v6603_v30 = vld [vmem:[#allocation13 + $0x1f0] sm:$0xf]  ;;  %v8035_v31 = vld [vmem:[#allocation13 + $0x1f4] sm:$0xf0]  ;;  %v6396_v32 = vor.u32 %v7983_v29, %v6395_v27  ;;  %v6452_v36 = vor.u32 %v7997_v35, %v6451_v34  ;;  %v6387_v37 = vld [vmem:[#allocation13 + $0x40] sm:$0xf] }
  0x82   : > { %1422 = vmatpush.bf16.msra.mxu1 %v6404_v24  ;;  %8374 = vmatpush.bf16.msra.mxu3 %v6404_v24  ;;  %v6604_v33 = vor.u32 %v8035_v31, %v6603_v30  ;;  %v7981_v38 = vld [vmem:[#allocation13 + $0x44] sm:$0xf0]  ;;  %v6595_v39 = vld [vmem:[#allocation13 + $0x1e0] sm:$0xf]  ;;  %v6443_v43 = vld [vmem:[#allocation13 + $0xb0] sm:$0xf] }
  0x83   : > { %v6388_v40 = vor.u32 %v7981_v38, %v6387_v37  ;;  %v8033_v41 = vld [vmem:[#allocation13 + $0x1e4] sm:$0xf0]  ;;  %v7995_v44 = vld [vmem:[#allocation13 + $0xb4] sm:$0xf0]  ;;  %v6379_v45 = vld [vmem:[#allocation13 + $0x30] sm:$0xf] }
  0x84   : > { %v6596_v42 = vor.u32 %v8033_v41, %v6595_v39  ;;  %v6444_v46 = vor.u32 %v7995_v44, %v6443_v43  ;;  %v7979_v47 = vld [vmem:[#allocation13 + $0x34] sm:$0xf0]  ;;  %v6587_v48 = vld [vmem:[#allocation13 + $0x1d0] sm:$0xf]  ;;  %v6435_v52 = vld [vmem:[#allocation13 + $0xa0] sm:$0xf] }
  0x85   : > { %701 = vmatpush.bf16.msra.mxu0 %v7968_v3  ;;  %8368 = vmatpush.bf16.msra.mxu2 %v7968_v3  ;;  %v6380_v49 = vor.u32 %v7979_v47, %v6379_v45  ;;  %v8031_v50 = vld [vmem:[#allocation13 + $0x1d4] sm:$0xf0]  ;;  %v7993_v53 = vld [vmem:[#allocation13 + $0xa4] sm:$0xf0]  ;;  %v6371_v55 = vld [vmem:[#allocation13 + $0x20] sm:$0xf] }
  0x86   : > { %1423 = vmatpush.bf16.msra.mxu1 %v6396_v32  ;;  %8375 = vmatpush.bf16.msra.mxu3 %v6396_v32  ;;  %v6588_v51 = vor.u32 %v8031_v50, %v6587_v48  ;;  %v6436_v54 = vor.u32 %v7993_v53, %v6435_v52  ;;  %v7977_v56 = vld [vmem:[#allocation13 + $0x24] sm:$0xf0]  ;;  %v6579_v57 = vld [vmem:[#allocation13 + $0x1c0] sm:$0xf]  ;;  %v6427_v61 = vld [vmem:[#allocation13 + $0x90] sm:$0xf] }
  0x87   : > { %v6372_v58 = vor.u32 %v7977_v56, %v6371_v55  ;;  %v8029_v59 = vld [vmem:[#allocation13 + $0x1c4] sm:$0xf0]  ;;  %v7991_v62 = vld [vmem:[#allocation13 + $0x94] sm:$0xf0]  ;;  %v6363_v63 = vld [vmem:[#allocation13 + $0x10] sm:$0xf] }
  0x88   : > { %v6580_v60 = vor.u32 %v8029_v59, %v6579_v57  ;;  %v6428_v0 = vor.u32 %v7991_v62, %v6427_v61  ;;  %v7975_v1 = vld [vmem:[#allocation13 + $0x14] sm:$0xf0]  ;;  %v6571_v2 = vld [vmem:[#allocation13 + $0x1b0] sm:$0xf]  ;;  %v6419_v7 = vld [vmem:[#allocation13 + $0x80] sm:$0xf] }
  0x89   : > { %702 = vmatpush.bf16.msra.mxu0 %v7967_v4  ;;  %8369 = vmatpush.bf16.msra.mxu2 %v7967_v4  ;;  %v6364_v3 = vor.u32 %v7975_v1, %v6363_v63  ;;  %v8027_v4 = vld [vmem:[#allocation13 + $0x1b4] sm:$0xf0]  ;;  %v7989_v8 = vld [vmem:[#allocation13 + $0x84] sm:$0xf0]  ;;  %v6355_v11 = vld [vmem:[#allocation13] sm:$0xf] }
  0x8a   : > { %1424 = vmatpush.bf16.msra.mxu1 %v6388_v40  ;;  %8376 = vmatpush.bf16.msra.mxu3 %v6388_v40  ;;  %v7973_v12 = vld [vmem:[#allocation13 + $0x4] sm:$0xf0]  ;;  %v8051_v23 = vld [vmem:[#allocation13 + $0x274] sm:$0xf0]  ;;  %v9480_v25 = vld [vmem:[#allocation11] ss:$0 sm:$0xff] }
  0x8b   : > { %v8025_v15 = vld [vmem:[#allocation13 + $0x1a4] sm:$0xf0]  ;;  %v7986_v26 = vld [vmem:[#allocation13 + $0x74] sm:$0xf]  ;;  %v6413_v27 = vld [vmem:[#allocation13 + $0x78] sm:$0xf0] }
  0x8c   : > { %v6547_v29 = vld [vmem:[#allocation13 + $0x180] sm:$0xf]  ;;  %v8021_v30 = vld [vmem:[#allocation13 + $0x184] sm:$0xf0]  ;;  %v565_v32 = vadd.s32 32, %v9474_v16  ;;  %v562_v39 = vadd.s32 8, %v9474_v16 }
  0x8d   : > { %703 = vmatpush.bf16.msra.mxu0 %v7966_v6  ;;  %8370 = vmatpush.bf16.msra.mxu2 %v7966_v6  ;;  %v6572_v6 = vor.u32 %v8027_v4, %v6571_v2  ;;  %v6659_v31 = vld [vmem:[#allocation13 + $0x260] sm:$0xf]  ;;  %v8049_v34 = vld [vmem:[#allocation13 + $0x264] sm:$0xf0]  ;;  %v6651_v40 = vld [vmem:[#allocation13 + $0x250] sm:$0xf] }
  0x8e   : > { %1425 = vmatpush.bf16.msra.mxu1 %v6380_v49  ;;  %8377 = vmatpush.bf16.msra.mxu3 %v6380_v49  ;;  %v6660_v37 = vor.u32 %v8049_v34, %v6659_v31  ;;  %v8047_v41 = vld [vmem:[#allocation13 + $0x254] sm:$0xf0]  ;;  %v7984_v44 = vld [vmem:[#allocation13 + $0x64] sm:$0xf]  ;;  %v6405_v45 = vld [vmem:[#allocation13 + $0x68] sm:$0xf0] }
  0x8f   : > { %v6408_v47 = vor.u32 %v7984_v44, %v6405_v45  ;;  %v8045_v48 = vld [vmem:[#allocation13 + $0x244] sm:$0xf0]  ;;  %v566_v49 = vadd.s32 40, %v9474_v16  ;;  %v6539_v59 = vld [vmem:[#allocation13 + $0x170] sm:$0xf]  ;;  %v567_v4 = vadd.s32 48, %v9474_v16 }
  0x90   : > { %v6635_v61 = vld [vmem:[#allocation13 + $0x230] sm:$0xf]  ;;  %v7982_v2 = vld [vmem:[#allocation13 + $0x54] sm:$0xf]  ;;  %v6397_v5 = vld [vmem:[#allocation13 + $0x58] sm:$0xf0] }
  0x91   : > { %704 = vmatpush.bf16.msra.mxu0 %v7965_v10  ;;  %8371 = vmatpush.bf16.msra.mxu2 %v7965_v10  ;;  %v6420_v10 = vor.u32 %v7989_v8, %v6419_v7  ;;  %v6400_v8 = vor.u32 %v7982_v2, %v6397_v5  ;;  %v8039_v44 = vld [vmem:[#allocation13 + $0x214] sm:$0xf0]  ;;  %v6515_v45 = vld [vmem:[#allocation13 + $0x140] sm:$0xf]  ;;  %v6507_v5 = vld [vmem:[#allocation13 + $0x130] sm:$0xf] }
  0x92   : > { %1426 = vmatpush.bf16.msra.mxu1 %v6372_v58  ;;  %8378 = vmatpush.bf16.msra.mxu3 %v6372_v58  ;;  %v563_v58 = vadd.s32 16, %v9474_v16  ;;  %s9087_s25 = scalar_lea.hbm %s9086_s10, 64  ;;  %s9091_s16 = scalar_lea.hbm %s10726_s11, 128 }
  0x93   : > { %p9088_p1 = scmp.ne.s32.totalorder %s9086_s10, %s9087_s25  ;;  %p9093_p9 = scmp.lt.s32.totalorder %s9091_s16, %s9087_s25 }
  0x95   : > { %705 = vmatpush.bf16.msra.mxu0 %v7964_v13  ;;  %8372 = vmatpush.bf16.msra.mxu2 %v7964_v13  ;;  %v6563_v13 = vld [vmem:[#allocation13 + $0x1a0] sm:$0xf]  ;;  %p9089_p3 = pnand %p9088_p1, %p9367_p4  ;;  %p9094_p5 = por %p9093_p9, %p9092_p7 }
  0x96   : > { %1427 = vmatpush.bf16.msra.mxu1 %v6364_v3  ;;  %8379 = vmatpush.bf16.msra.mxu3 %v6364_v3 }
  0x97   : > { %p9090_p12 = pneg %p9089_p3 }
  0x98   : > { %706 = vmatmul.bf16.vlgmr.msra.gmra.mxu0 %v7960_v17  ;;  %716 = vmatmul.bf16.vlgmr.msra.gmra.mxu2 %v7962_v18  ;;  %v6564_v17 = vor.u32 %v8025_v15, %v6563_v13  ;;  %v6555_v18 = vld [vmem:[#allocation13 + $0x190] sm:$0xf] }
  0x99   : > { %1450 = vmatpush.bf16.msrb.mxu2 %v6476_v14  ;;  %1508 = vmatpush.bf16.msrb.mxu0 %v6604_v33  ;;  %v6356_v14 = vor.u32 %v7973_v12, %v6355_v11  ;;  %v6548_v33 = vor.u32 %v8021_v30, %v6547_v29  ;;  %v6627_v11 = vld [vmem:[#allocation13 + $0x220] sm:$0xf]  ;;  %v8041_v12 = vld [vmem:[#allocation13 + $0x224] sm:$0xf0]  ;;  %v6619_v29 = vld [vmem:[#allocation13 + $0x210] sm:$0xf]  ;;  %p9095_p8 = pnand %p9094_p5, %p9090_p12 }
  0x9b   : > { %1428 = vmatpush.bf16.msra.mxu1 %v6356_v14  ;;  %8380 = vmatpush.bf16.msra.mxu3 %v6356_v14 }
  0x9d   : > { %1451 = vmatpush.bf16.msrb.mxu2 %v6468_v19  ;;  %1509 = vmatpush.bf16.msrb.mxu0 %v6596_v42  ;;  %v8023_v19 = vld [vmem:[#allocation13 + $0x194] sm:$0xf0]  ;;  %v6652_v42 = vor.u32 %v8047_v41, %v6651_v40 }
  0x9e   : > { %v6556_v22 = vor.u32 %v8023_v19, %v6555_v18 }
  0xa1   : > { %1452 = vmatpush.bf16.msrb.mxu2 %v6460_v28  ;;  %1510 = vmatpush.bf16.msrb.mxu0 %v6588_v51  ;;  %v6416_v28 = vor.u32 %v7986_v26, %v6413_v27  ;;  %v6523_v27 = vld [vmem:[#allocation13 + $0x150] sm:$0xf] }
  0xa5   : > { %1453 = vmatpush.bf16.msrb.mxu2 %v6452_v36  ;;  %1511 = vmatpush.bf16.msrb.mxu0 %v6580_v60  ;;  %v8019_v60 = vld [vmem:[#allocation13 + $0x174] sm:$0xf0] }
  0xa6   : > { %v6540_v63 = vor.u32 %v8019_v60, %v6539_v59 }
  0xa8   : > { %711 = vmatmul.bf16.gmra.mxu0 %v7961_v20  ;;  %721 = vmatmul.bf16.gmra.mxu2 %v7963_v21  ;;  %v6667_v20 = vld [vmem:[#allocation13 + $0x270] sm:$0xf]  ;;  %v9476_v21 = vstv %s559_s15 }
  0xa9   : > { %1454 = vmatpush.bf16.msrb.mxu2 %v6444_v46  ;;  %1512 = vmatpush.bf16.msrb.mxu0 %v6572_v6  ;;  %v6668_v24 = vor.u32 %v8051_v23, %v6667_v20  ;;  %vm570_vm0 = vcmp.lt.s32.totalorder %v9474_v16, %v9476_v21  ;;  %vm574_vm1 = vcmp.lt.s32.totalorder %v565_v32, %v9476_v21  ;;  %v6643_v46 = vld [vmem:[#allocation13 + $0x240] sm:$0xf]  ;;  %v7980_v32 = vld [vmem:[#allocation13 + $0x44] sm:$0xf] }
  0xaa   : > { %v9484_v35 = vsel %vm570_vm0, 1.0, %v9180_v9  ;;  %vm571_vm2 = vcmp.lt.s32.totalorder %v562_v39, %v9476_v21  ;;  %v9496_v50 = vsel %vm574_vm1, 1.0, %v9180_v9  ;;  %v6644_v52 = vor.u32 %v8045_v48, %v6643_v46  ;;  %1479 = vmatpush.bf16.msrb.mxu3 %v6540_v63  ;;  %v6531_v6 = vld [vmem:[#allocation13 + $0x160] sm:$0xf] }
  0xab   : > { %1537 = vmatpush.bf16.msrb.mxu1 %v6668_v24  ;;  %10773 = vst [vmem:[#allocation33_spill] sm:$0xff] %v9496_v50  ;;  %vm575_vm3 = vcmp.lt.s32.totalorder %v566_v49, %v9476_v21  ;;  %vm572_vm4 = vcmp.lt.s32.totalorder %v563_v58, %v9476_v21  ;;  %v6628_v20 = vor.u32 %v8041_v12, %v6627_v11  ;;  %v564_v24 = vadd.s32 24, %v9474_v16  ;;  %v8013_v49 = vld [vmem:[#allocation13 + $0x144] sm:$0xf0] }
  0xac   : > { %v9513_v1 = vsel %vm575_vm3, 1.0, %v9180_v9  ;;  %vm576_vm5 = vcmp.lt.s32.totalorder %v567_v4, %v9476_v21  ;;  %v6620_v48 = vor.u32 %v8039_v44, %v6619_v29 }
  0xad   : > { %1455 = vmatpush.bf16.msrb.mxu2 %v6436_v54  ;;  %1513 = vmatpush.bf16.msrb.mxu0 %v6564_v17  ;;  %v9500_v54 = vsel %vm571_vm2, 1.0, %v9180_v9  ;;  %10774 = vst [vmem:[#allocation34_spill] sm:$0xff] %v9513_v1  ;;  %v9520_v17 = vsel %vm572_vm4, 1.0, %v9180_v9  ;;  %vm573_vm6 = vcmp.lt.s32.totalorder %v564_v24, %v9476_v21  ;;  %v8009_v24 = vld [vmem:[#allocation13 + $0x124] sm:$0xf0] }
  0xae   : > { %v9542_v59 = vsel %vm573_vm6, 1.0, %v9180_v9 }
  0xaf   : > { %1538 = vmatpush.bf16.msrb.mxu1 %v6660_v37  ;;  %10776 = vst [vmem:[#allocation36_spill] sm:$0xff] %v9542_v59 }
  0xb1   : > { %1456 = vmatpush.bf16.msrb.mxu2 %v6428_v0  ;;  %1514 = vmatpush.bf16.msrb.mxu0 %v6556_v22  ;;  %v8043_v0 = vld [vmem:[#allocation13 + $0x234] sm:$0xf0] }
  0xb2   : > { %v6636_v3 = vor.u32 %v8043_v0, %v6635_v61  ;;  %v6516_v61 = vor.u32 %v8013_v49, %v6515_v45 }
  0xb3   : > { %1539 = vmatpush.bf16.msrb.mxu1 %v6652_v42  ;;  %v568_v42 = vadd.s32 56, %v9474_v16 }
  0xb5   : > { %1457 = vmatpush.bf16.msrb.mxu2 %v6420_v10  ;;  %1515 = vmatpush.bf16.msrb.mxu0 %v6548_v33  ;;  %v8017_v10 = vld [vmem:[#allocation13 + $0x164] sm:$0xf0]  ;;  %v6389_v33 = vld [vmem:[#allocation13 + $0x48] sm:$0xf0]  ;;  %vm577_vm7 = vcmp.lt.s32.totalorder %v568_v42, %v9476_v21 }
  0xb6   : > { %v6532_v15 = vor.u32 %v8017_v10, %v6531_v6  ;;  %v6392_v39 = vor.u32 %v7980_v32, %v6389_v33 }
  0xb7   : > { %1540 = vmatpush.bf16.msrb.mxu1 %v6644_v52  ;;  %v8037_v52 = vld [vmem:[#allocation13 + $0x204] sm:$0xf0] }
  0xb8   : > { %1480 = vmatpush.bf16.msrb.mxu3 %v6532_v15  ;;  %v9561_v15 = vsel %vm577_vm7, 1.0, %v9180_v9 }
  0xb9   : > { %1566 = vmatpush.bf16.msra.mxu2 %v6416_v28  ;;  %v8015_v28 = vld [vmem:[#allocation13 + $0x154] sm:$0xf0]  ;;  %10777 = vst [vmem:[#allocation37_spill] sm:$0xff] %v9561_v15 }
  0xba   : > { %v6524_v34 = vor.u32 %v8015_v28, %v6523_v27 }
  0xbb   : > { %1541 = vmatpush.bf16.msrb.mxu1 %v6636_v3 }
  0xbc   : > { %1481 = vmatpush.bf16.msrb.mxu3 %v6524_v34 }
  0xbd   : > { %1567 = vmatpush.bf16.msra.mxu2 %v6408_v47 }
  0xbf   : > { %1542 = vmatpush.bf16.msrb.mxu1 %v6628_v20 }
  0xc0   : > { %1482 = vmatpush.bf16.msrb.mxu3 %v6516_v61 }
  0xc1   : > { %1568 = vmatpush.bf16.msra.mxu2 %v6400_v8  ;;  %v8011_v8 = vld [vmem:[#allocation13 + $0x134] sm:$0xf0] }
  0xc2   : > { %v6508_v11 = vor.u32 %v8011_v8, %v6507_v5  ;;  %v8005_v5 = vld [vmem:[#allocation13 + $0x104] sm:$0xf0] }
  0xc3   : > { %1543 = vmatpush.bf16.msrb.mxu1 %v6620_v48 }
  0xc4   : > { %1483 = vmatpush.bf16.msrb.mxu3 %v6508_v11 }
  0xc5   : > { %1569 = vmatpush.bf16.msra.mxu2 %v6392_v39  ;;  %v6373_v39 = vld [vmem:[#allocation13 + $0x28] sm:$0xf0] }
 0x115   : > { %v707_v36 = vpop.f32.mrf.mxu0 }
 0x116   : > { %v708_v38 = vadd.f32 %v9480_v25, %v707_v36  ;;  %v9533_v36 = vsel %vm576_vm5, 1.0, %v9180_v9 }
 0x117   : > { %10775 = vst [vmem:[#allocation35_spill] sm:$0xff] %v9533_v36 }
 0x118   : > { %v9489_v43 = vmul.f32 %v9484_v35, %v708_v38 }
 0x11a   : > { %743 = vst [vmem:[#allocation2 + $0x10] sm:$0xff] %v9489_v43 }
 0x11b   : > { %v717_v51 = vpop.f32.mrf.mxu2 }
 0x11c   : > { %v718_v53 = vadd.f32 %v9480_v25, %v717_v51  ;;  %v6611_v51 = vld [vmem:[#allocation13 + $0x200] sm:$0xf] }
 0x11d   : > { %v709_v55 = vpop.f32.mrf.mxu0  ;;  %v6612_v63 = vor.u32 %v8037_v52, %v6611_v51 }
 0x11e   : > { %v9503_v56 = vmul.f32 %v9496_v50, %v718_v53  ;;  %v710_v57 = vadd.f32 %v9480_v25, %v709_v55 }
 0x11f   : > { %1544 = vmatpush.bf16.msrb.mxu1 %v6612_v63 }
 0x120   : > { %747 = vst [vmem:[#allocation2 + $0x30] sm:$0xff] %v9503_v56  ;;  %v9510_v62 = vmul.f32 %v9500_v54, %v710_v57 }
 0x121   : > { %v751_v14 = vld [vmem:[#allocation2 + $0xe] sm:$0xff] }
 0x122   : > { %744 = vst [vmem:[#allocation2 + $0x18] sm:$0xff] %v9510_v62  ;;  %v767_v19 = vld [vmem:[#allocation2 + $0xf] sm:$0xff]  ;;  %v759_v26 = vpack.c.bf16 %v751_v14, %v751_v14  ;;  %v6381_v14 = vld [vmem:[#allocation13 + $0x38] sm:$0xf0] }
 0x123   : > { %v719_v7 = vpop.f32.mrf.mxu2  ;;  %v775_v31 = vpack.c.bf16 %v767_v19, %v767_v19 }
 0x124   : > { %v720_v13 = vadd.f32 %v9480_v25, %v719_v7  ;;  %v823_v47 = vunpack.c.l.b16 %v759_v26 }
 0x125   : > { %v712_v18 = vpop.f32.mrf.mxu0  ;;  %v847_v57 = vunpack.c.l.b16 %v775_v31 }
 0x126   : > { %v9523_v22 = vmul.f32 %v9513_v1, %v720_v13  ;;  %v713_v23 = vadd.f32 %v9480_v25, %v712_v18  ;;  %v7978_v13 = vld [vmem:[#allocation13 + $0x34] sm:$0xf] }
 0x127   : > { %v6384_v20 = vor.u32 %v7978_v13, %v6381_v14  ;;  %v8016_v14 = vld [vmem:[#allocation13 + $0x164] sm:$0xf] }
 0x128   : > { %748 = vst [vmem:[#allocation2 + $0x38] sm:$0xff] %v9523_v22  ;;  %v9530_v30 = vmul.f32 %v9520_v17, %v713_v23  ;;  %v6499_v23 = vld [vmem:[#allocation13 + $0x120] sm:$0xf] }
 0x129   : > { %v752_v37 = vld [vmem:[#allocation2 + $0x16] sm:$0xff]  ;;  %1570 = vmatpush.bf16.msra.mxu2 %v6384_v20  ;;  %v6500_v31 = vor.u32 %v8009_v24, %v6499_v23  ;;  %v6365_v24 = vld [vmem:[#allocation13 + $0x18] sm:$0xf0] }
 0x12a   : > { %v768_v38 = vld [vmem:[#allocation2 + $0x17] sm:$0xff]  ;;  %745 = vst [vmem:[#allocation2 + $0x20] sm:$0xff] %v9530_v30  ;;  %v760_v40 = vpack.c.bf16 %v752_v37, %v752_v37 }
 0x12b   : > { %v776_v41 = vpack.c.bf16 %v768_v38, %v768_v38  ;;  %v722_v46 = vpop.f32.mrf.mxu2  ;;  %v783_v60 = vld [vmem:[#allocation2 + $0x11] sm:$0xff]  ;;  %1484 = vmatpush.bf16.msrb.mxu3 %v6500_v31 }
 0x12c   : > { %v723_v53 = vadd.f32 %v9480_v25, %v722_v46  ;;  %v824_v55 = vunpack.c.l.b16 %v760_v40  ;;  %v791_v7 = vpack.c.bf16 %v783_v60, %v783_v60  ;;  %v6491_v38 = vld [vmem:[#allocation13 + $0x110] sm:$0xf]  ;;  %v7974_v23 = vld [vmem:[#allocation13 + $0x14] sm:$0xf] }
 0x12d   : > { %v848_v58 = vunpack.c.l.b16 %v776_v41  ;;  %v714_v16 = vpop.f32.mrf.mxu0 }
 0x12e   : > { %v9545_v0 = vmul.f32 %v9533_v36, %v723_v53  ;;  %v715_v2 = vadd.f32 %v9480_v25, %v714_v16  ;;  %v9548_v3 = vpack.c.b16 %v824_v55, %v823_v47  ;;  %v895_v26 = vunpack.c.l.b16 %v791_v7  ;;  %v8007_v55 = vld [vmem:[#allocation13 + $0x114] sm:$0xf0] }
 0x12f   : > { %v9550_v4 = vpack.c.b16 %v848_v58, %v847_v57  ;;  %v756_v19 = vld [vmem:[#allocation2 + $0x36] sm:$0xff]  ;;  %v6541_v58 = vld [vmem:[#allocation13 + $0x178] sm:$0xf0]  ;;  %v6492_v63 = vor.u32 %v8007_v55, %v6491_v38 }
 0x130   : > { %749 = vst [vmem:[#allocation2 + $0x40] sm:$0xff] %v9545_v0  ;;  %v9554_v6 = vmul.f32 %v9542_v59, %v715_v2  ;;  %1429 = vmatmul.bf16.vlgmr.msra.gmra.mxu1 %v9548_v3  ;;  %v764_v9 = vpack.c.bf16 %v756_v19, %v756_v19  ;;  %v8018_v57 = vld [vmem:[#allocation13 + $0x174] sm:$0xf]  ;;  %v6483_v2 = vld [vmem:[#allocation13 + $0x100] sm:$0xf] }
 0x131   : > { %1458 = vmatmul.bf16.vlgmr.msrb.gmra.mxu2 %v9550_v4  ;;  %v784_v10 = vld [vmem:[#allocation2 + $0x19] sm:$0xff]  ;;  %1485 = vmatpush.bf16.msrb.mxu3 %v6492_v63  ;;  %v6544_v13 = vor.u32 %v8018_v57, %v6541_v58  ;;  %v6484_v19 = vor.u32 %v8005_v5, %v6483_v2 }
 0x132   : > { %746 = vst [vmem:[#allocation2 + $0x28] sm:$0xff] %v9554_v6  ;;  %v792_v12 = vpack.c.bf16 %v784_v10, %v784_v10  ;;  %v753_v28 = vld [vmem:[#allocation2 + $0x1e] sm:$0xff]  ;;  %v828_v47 = vunpack.c.l.b16 %v764_v9  ;;  %v8002_v57 = vld [vmem:[#allocation13 + $0xf4] sm:$0xf] }
 0x133   : > { %v724_v18 = vpop.f32.mrf.mxu2  ;;  %v769_v29 = vld [vmem:[#allocation2 + $0x1f] sm:$0xff]  ;;  %v761_v34 = vpack.c.bf16 %v753_v28, %v753_v28  ;;  %1624 = vmatpush.bf16.msra.mxu0 %v6544_v13  ;;  %v8014_v28 = vld [vmem:[#allocation13 + $0x154] sm:$0xf] }
 0x134   : > { %v725_v21 = vadd.f32 %v9480_v25, %v724_v18  ;;  %v896_v27 = vunpack.c.l.b16 %v792_v12  ;;  %v777_v37 = vpack.c.bf16 %v769_v29, %v769_v29  ;;  %v7976_v25 = vld [vmem:[#allocation13 + $0x24] sm:$0xf]  ;;  %v6533_v18 = vld [vmem:[#allocation13 + $0x168] sm:$0xf0]  ;;  %v6525_v29 = vld [vmem:[#allocation13 + $0x158] sm:$0xf0] }
 0x135   : > { %v6376_v44 = vor.u32 %v7976_v25, %v6373_v39  ;;  %v825_v52 = vunpack.c.l.b16 %v761_v34  ;;  %v6536_v20 = vor.u32 %v8016_v14, %v6533_v18  ;;  %1486 = vmatpush.bf16.msrb.mxu3 %v6484_v19  ;;  %v800_v9 = vld [vmem:[#allocation2 + $0x1a] sm:$0xff]  ;;  %v799_v25 = vld [vmem:[#allocation2 + $0x12] sm:$0xff]  ;;  %v6528_v39 = vor.u32 %v8014_v28, %v6525_v29 }
 0x136   : > { %v9565_v32 = vmul.f32 %v9561_v15, %v725_v21  ;;  %v9567_v33 = vpack.c.b16 %v896_v27, %v895_v26  ;;  %v849_v53 = vunpack.c.l.b16 %v777_v37  ;;  %v6368_v27 = vor.u32 %v7974_v23, %v6365_v24  ;;  %v772_v37 = vld [vmem:[#allocation2 + $0x37] sm:$0xff] }
 0x137   : > { %1571 = vmatpush.bf16.msra.mxu2 %v6376_v44  ;;  %v757_v38 = vld [vmem:[#allocation2 + $0x3e] sm:$0xff]  ;;  %1625 = vmatpush.bf16.msra.mxu0 %v6536_v20  ;;  %v8012_v44 = vld [vmem:[#allocation13 + $0x144] sm:$0xf] }
 0x138   : > { %750 = vst [vmem:[#allocation2 + $0x48] sm:$0xff] %v9565_v32  ;;  %1516 = vmatmul.bf16.vlgmr.msrb.gmra.mxu0 %v9567_v33  ;;  %v6477_v58 = vld [vmem:[#allocation13 + $0xf8] sm:$0xf0] }
 0x139   : > { %v754_v40 = vld [vmem:[#allocation2 + $0x26] sm:$0xff]  ;;  %v755_v41 = vld [vmem:[#allocation2 + $0x2e] sm:$0xff]  ;;  %v6509_v63 = vld [vmem:[#allocation13 + $0x138] sm:$0xf0]  ;;  %v6480_v2 = vor.u32 %v8002_v57, %v6477_v58 }
 0x13a   : > { %v770_v42 = vld [vmem:[#allocation2 + $0x27] sm:$0xff]  ;;  %v762_v45 = vpack.c.bf16 %v754_v40, %v754_v40  ;;  %v763_v46 = vpack.c.bf16 %v755_v41, %v755_v41  ;;  %v771_v34 = vld [vmem:[#allocation2 + $0x2f] sm:$0xff]  ;;  %v788_v13 = vld [vmem:[#allocation2 + $0x39] sm:$0xff] }
 0x13b   : > { %v778_v48 = vpack.c.bf16 %v770_v42, %v770_v42  ;;  %v785_v49 = vld [vmem:[#allocation2 + $0x21] sm:$0xff]  ;;  %v786_v51 = vld [vmem:[#allocation2 + $0x29] sm:$0xff]  ;;  %1572 = vmatpush.bf16.msra.mxu2 %v6368_v27  ;;  %v808_v42 = vpack.c.bf16 %v800_v9, %v800_v9  ;;  %1626 = vmatpush.bf16.msra.mxu0 %v6528_v39  ;;  %v8050_v9 = vld [vmem:[#allocation13 + $0x274] sm:$0xf] }
 0x13c   : > { %v826_v16 = vunpack.c.l.b16 %v762_v45  ;;  %v827_v60 = vunpack.c.l.b16 %v763_v46  ;;  %v793_v7 = vpack.c.bf16 %v785_v49, %v785_v49  ;;  %v794_v8 = vpack.c.bf16 %v786_v51, %v786_v51  ;;  %v6517_v45 = vld [vmem:[#allocation13 + $0x148] sm:$0xf0]  ;;  %v7972_v51 = vld [vmem:[#allocation13 + $0x4] sm:$0xf] }
 0x13d   : > { %v850_v61 = vunpack.c.l.b16 %v778_v48  ;;  %v779_v46 = vpack.c.bf16 %v771_v34, %v771_v34  ;;  %v765_v48 = vpack.c.bf16 %v757_v38, %v757_v38  ;;  %v807_v49 = vpack.c.bf16 %v799_v25, %v799_v25  ;;  %v6501_v27 = vld [vmem:[#allocation13 + $0x128] sm:$0xf0]  ;;  %v801_v29 = vld [vmem:[#allocation2 + $0x22] sm:$0xff]  ;;  %v6669_v34 = vld [vmem:[#allocation13 + $0x278] sm:$0xf0] }
 0x13e   : > { %v9571_v10 = vpack.c.b16 %v826_v16, %v825_v52  ;;  %v9573_v11 = vpack.c.b16 %v828_v47, %v827_v60  ;;  %v897_v21 = vunpack.c.l.b16 %v793_v7  ;;  %v898_v26 = vunpack.c.l.b16 %v794_v8  ;;  %v6357_v52 = vld [vmem:[#allocation13 + $0x8] sm:$0xf0] }
 0x13f   : > { %v9575_v12 = vpack.c.b16 %v850_v61, %v849_v53  ;;  %v758_v31 = vld [vmem:[#allocation2 + $0x46] sm:$0xff]  ;;  %v780_v47 = vpack.c.bf16 %v772_v37, %v772_v37  ;;  %v6520_v53 = vor.u32 %v8012_v44, %v6517_v45  ;;  %v6360_v55 = vor.u32 %v7972_v51, %v6357_v52  ;;  %v8010_v61 = vld [vmem:[#allocation13 + $0x134] sm:$0xf]  ;;  %v6605_v44 = vld [vmem:[#allocation13 + $0x1f8] sm:$0xf0] }
 0x140   : > { %1434 = vmatmul.bf16.gmra.mxu1 %v9571_v10  ;;  %1439 = vmatmul.bf16.vlgmr.msra.gmra.mxu3 %v9573_v11  ;;  %v9580_v40 = vpack.c.b16 %v898_v26, %v897_v21  ;;  %v766_v41 = vpack.c.bf16 %v758_v31, %v758_v31  ;;  %v920_v60 = vunpack.c.l.b16 %v808_v42  ;;  %v851_v5 = vunpack.c.l.b16 %v779_v46  ;;  %v787_v8 = vld [vmem:[#allocation2 + $0x31] sm:$0xff]  ;;  %v8008_v26 = vld [vmem:[#allocation13 + $0x124] sm:$0xf] }
 0x141   : > { %1463 = vmatmul.bf16.gmra.mxu2 %v9575_v12  ;;  %v852_v7 = vunpack.c.l.b16 %v780_v47  ;;  %v829_v14 = vunpack.c.l.b16 %v765_v48  ;;  %v919_v18 = vunpack.c.l.b16 %v807_v49  ;;  %1595 = vmatpush.bf16.msra.mxu3 %v6480_v2  ;;  %v6512_v19 = vor.u32 %v8010_v61, %v6509_v63  ;;  %v8006_v37 = vld [vmem:[#allocation13 + $0x114] sm:$0xf]  ;;  %v802_v45 = vld [vmem:[#allocation2 + $0x2a] sm:$0xff]  ;;  %v8000_v47 = vld [vmem:[#allocation13 + $0xe4] sm:$0xf] }
 0x142   : > { %v830_v16 = vunpack.c.l.b16 %v766_v41  ;;  %1573 = vmatpush.bf16.msra.mxu2 %v6360_v55  ;;  %1627 = vmatpush.bf16.msra.mxu0 %v6520_v53  ;;  %v795_v24 = vpack.c.bf16 %v787_v8, %v787_v8  ;;  %v796_v21 = vpack.c.bf16 %v788_v13, %v788_v13  ;;  %v6504_v31 = vor.u32 %v8008_v26, %v6501_v27  ;;  %v6493_v41 = vld [vmem:[#allocation13 + $0x118] sm:$0xf0]  ;;  %v8034_v42 = vld [vmem:[#allocation13 + $0x1f4] sm:$0xf]  ;;  %v6469_v48 = vld [vmem:[#allocation13 + $0xe8] sm:$0xf0] }
 0x143   : > { %v9585_v23 = vpack.c.b16 %v920_v60, %v919_v18  ;;  %v9587_v28 = vpack.c.b16 %v852_v7, %v851_v5  ;;  %v6672_v39 = vor.u32 %v8050_v9, %v6669_v34  ;;  %v6608_v46 = vor.u32 %v8034_v42, %v6605_v44  ;;  %v774_v49 = vld [vmem:[#allocation2 + $0x47] sm:$0xff]  ;;  %v773_v60 = vld [vmem:[#allocation2 + $0x3f] sm:$0xff]  ;;  %v7998_v27 = vld [vmem:[#allocation13 + $0xd4] sm:$0xf] }
 0x144   : > { %v9583_v20 = vpack.c.b16 %v830_v16, %v829_v14  ;;  %v899_v38 = vunpack.c.l.b16 %v795_v24  ;;  %v900_v25 = vunpack.c.l.b16 %v796_v21  ;;  %v6472_v51 = vor.u32 %v8000_v47, %v6469_v48  ;;  %v8032_v52 = vld [vmem:[#allocation13 + $0x1e4] sm:$0xf]  ;;  %v6597_v53 = vld [vmem:[#allocation13 + $0x1e8] sm:$0xf0]  ;;  %v8030_v14 = vld [vmem:[#allocation13 + $0x1d4] sm:$0xf] }
 0x145   : > { %v736_v55 = vpack.c.bf16 %v9510_v62, %v9510_v62  ;;  %v6496_v57 = vor.u32 %v8006_v37, %v6493_v41  ;;  %1653 = vmatpush.bf16.msra.mxu1 %v6608_v46  ;;  %v6600_v58 = vor.u32 %v8032_v52, %v6597_v53  ;;  %v809_v61 = vpack.c.bf16 %v801_v29, %v801_v29  ;;  %v8004_v2 = vld [vmem:[#allocation13 + $0x104] sm:$0xf]  ;;  %v6485_v5 = vld [vmem:[#allocation13 + $0x108] sm:$0xf0]  ;;  %v6589_v26 = vld [vmem:[#allocation13 + $0x1d8] sm:$0xf0] }
 0x146   : > { %1628 = vmatpush.bf16.msra.mxu0 %v6512_v19  ;;  %1682 = vmatpush.bf16.msrb.mxu2 %v6672_v39  ;;  %v9594_v16 = vpack.c.b16 %v900_v25, %v899_v38  ;;  %v810_v63 = vpack.c.bf16 %v802_v45, %v802_v45  ;;  %v782_v7 = vpack.c.bf16 %v774_v49, %v774_v49  ;;  %v8048_v13 = vld [vmem:[#allocation13 + $0x264] sm:$0xf]  ;;  %v6661_v62 = vld [vmem:[#allocation13 + $0x268] sm:$0xf0]  ;;  %v6461_v29 = vld [vmem:[#allocation13 + $0xd8] sm:$0xf0] }
 0x147   : > { %1596 = vmatpush.bf16.msra.mxu3 %v6472_v51  ;;  %v735_v8 = vpack.c.bf16 %v9489_v43, %v9489_v43  ;;  %v781_v18 = vpack.c.bf16 %v773_v60, %v773_v60  ;;  %v872_v19 = vunpack.c.l.b16 %v736_v55  ;;  %v6488_v24 = vor.u32 %v8004_v2, %v6485_v5  ;;  %v8028_v38 = vld [vmem:[#allocation13 + $0x1c4] sm:$0xf]  ;;  %v6581_v25 = vld [vmem:[#allocation13 + $0x1c8] sm:$0xf0]  ;;  %v803_v52 = vld [vmem:[#allocation2 + $0x32] sm:$0xff] }
 0x148   : > { %1521 = vmatmul.bf16.gmra.mxu0 %v9580_v40  ;;  %v6664_v21 = vor.u32 %v8048_v13, %v6661_v62  ;;  %v922_v9 = vunpack.c.l.b16 %v810_v63  ;;  %v6592_v34 = vor.u32 %v8030_v14, %v6589_v26  ;;  %v6464_v37 = vor.u32 %v7998_v27, %v6461_v29  ;;  %v789_v43 = vld [vmem:[#allocation2 + $0x41] sm:$0xff]  ;;  %v790_v41 = vld [vmem:[#allocation2 + $0x49] sm:$0xff]  ;;  %v8046_v53 = vld [vmem:[#allocation13 + $0x254] sm:$0xf] }
 0x149   : > { %1654 = vmatpush.bf16.msra.mxu1 %v6600_v58  ;;  %v854_v39 = vunpack.c.l.b16 %v782_v7  ;;  %v871_v42 = vunpack.c.l.b16 %v735_v8  ;;  %v853_v44 = vunpack.c.l.b16 %v781_v18  ;;  %v6584_v45 = vor.u32 %v8028_v38, %v6581_v25  ;;  %v6653_v55 = vld [vmem:[#allocation13 + $0x258] sm:$0xf0]  ;;  %v7996_v2 = vld [vmem:[#allocation13 + $0xc4] sm:$0xf]  ;;  %v6453_v5 = vld [vmem:[#allocation13 + $0xc8] sm:$0xf0] }
 0x14a   : > { %1629 = vmatpush.bf16.msra.mxu0 %v6504_v31  ;;  %v921_v31 = vunpack.c.l.b16 %v809_v61  ;;  %1683 = vmatpush.bf16.msrb.mxu2 %v6664_v21  ;;  %v797_v48 = vpack.c.bf16 %v789_v43, %v789_v43  ;;  %v798_v49 = vpack.c.bf16 %v790_v41, %v790_v41  ;;  %v6656_v61 = vor.u32 %v8046_v53, %v6653_v55  ;;  %v6573_v63 = vld [vmem:[#allocation13 + $0x1b8] sm:$0xf0]  ;;  %v8024_v62 = vld [vmem:[#allocation13 + $0x1a4] sm:$0xf]  ;;  %v6565_v14 = vld [vmem:[#allocation13 + $0x1a8] sm:$0xf0] }
 0x14b   : > { %1597 = vmatpush.bf16.msra.mxu3 %v6464_v37  ;;  %v9599_v46 = vpack.c.b16 %v872_v19, %v871_v42  ;;  %v9603_v51 = vpack.c.b16 %v854_v39, %v853_v44  ;;  %v804_v7 = vld [vmem:[#allocation2 + $0x3a] sm:$0xff]  ;;  %v6456_v13 = vor.u32 %v7996_v2, %v6453_v5  ;;  %v811_v18 = vpack.c.bf16 %v803_v52, %v803_v52  ;;  %v8044_v29 = vld [vmem:[#allocation13 + $0x244] sm:$0xf]  ;;  %v7994_v25 = vld [vmem:[#allocation13 + $0xb4] sm:$0xf] }
 0x14c   : > { %v9601_v47 = vpack.c.b16 %v922_v9, %v921_v31  ;;  %v901_v58 = vunpack.c.l.b16 %v797_v48  ;;  %v902_v60 = vunpack.c.l.b16 %v798_v49  ;;  %v6568_v19 = vor.u32 %v8024_v62, %v6565_v14  ;;  %v6645_v31 = vld [vmem:[#allocation13 + $0x248] sm:$0xf0]  ;;  %v8022_v9 = vld [vmem:[#allocation13 + $0x194] sm:$0xf]  ;;  %v6557_v38 = vld [vmem:[#allocation13 + $0x198] sm:$0xf0] }
 0x14d   : > { %1655 = vmatpush.bf16.msra.mxu1 %v6592_v34  ;;  %v738_v21 = vpack.c.bf16 %v9554_v6, %v9554_v6  ;;  %v812_v26 = vpack.c.bf16 %v804_v7, %v804_v7  ;;  %v737_v27 = vpack.c.bf16 %v9530_v30, %v9530_v30  ;;  %v923_v34 = vunpack.c.l.b16 %v811_v18  ;;  %v6445_v39 = vld [vmem:[#allocation13 + $0xb8] sm:$0xf0]  ;;  %v8020_v6 = vld [vmem:[#allocation13 + $0x184] sm:$0xf]  ;;  %v8042_v53 = vld [vmem:[#allocation13 + $0x234] sm:$0xf] }
 0x14e   : > { %1630 = vmatpush.bf16.msra.mxu0 %v6496_v57  ;;  %v8026_v57 = vld [vmem:[#allocation13 + $0x1b4] sm:$0xf]  ;;  %1684 = vmatpush.bf16.msrb.mxu2 %v6656_v61  ;;  %v6648_v37 = vor.u32 %v8044_v29, %v6645_v31  ;;  %v6560_v42 = vor.u32 %v8022_v9, %v6557_v38  ;;  %v6448_v44 = vor.u32 %v7994_v25, %v6445_v39  ;;  %v6637_v55 = vld [vmem:[#allocation13 + $0x238] sm:$0xf0]  ;;  %v805_v61 = vld [vmem:[#allocation2 + $0x42] sm:$0xff] }
 0x14f   : > { %v6576_v8 = vor.u32 %v8026_v57, %v6573_v63  ;;  %1598 = vmatpush.bf16.msra.mxu3 %v6456_v13  ;;  %v874_v43 = vunpack.c.l.b16 %v738_v21  ;;  %v924_v41 = vunpack.c.l.b16 %v812_v26  ;;  %v873_v48 = vunpack.c.l.b16 %v737_v27  ;;  %v7992_v57 = vld [vmem:[#allocation13 + $0xa4] sm:$0xf]  ;;  %v806_v63 = vld [vmem:[#allocation2 + $0x4a] sm:$0xff]  ;;  %v7990_v14 = vld [vmem:[#allocation13 + $0x94] sm:$0xf] }
 0x150   : > { %1444 = vmatmul.bf16.gmra.mxu3 %v9583_v20  ;;  %1545 = vmatmul.bf16.vlgmr.msrb.gmra.mxu1 %v9585_v23  ;;  %v739_v5 = vpack.c.bf16 %v9503_v56, %v9503_v56  ;;  %v740_v7 = vpack.c.bf16 %v9523_v22, %v9523_v22  ;;  %v814_v13 = vpack.c.bf16 %v806_v63, %v806_v63  ;;  %v6629_v62 = vld [vmem:[#allocation13 + $0x228] sm:$0xf0]  ;;  %v6429_v21 = vld [vmem:[#allocation13 + $0x98] sm:$0xf0]  ;;  %v7988_v9 = vld [vmem:[#allocation13 + $0x84] sm:$0xf] }
 0x151   : > { %1468 = vmatmul.bf16.gmra.mxu2 %v9587_v28  ;;  %1656 = vmatpush.bf16.msra.mxu1 %v6584_v45  ;;  %v6549_v45 = vld [vmem:[#allocation13 + $0x188] sm:$0xf0]  ;;  %v880_v49 = vpack.c.b16 %v874_v43, %v873_v48  ;;  %v9615_v52 = vpack.c.b16 %v924_v41, %v923_v34  ;;  %v6432_v31 = vor.u32 %v7990_v14, %v6429_v21  ;;  %v6621_v38 = vld [vmem:[#allocation13 + $0x218] sm:$0xf0]  ;;  %v8036_v41 = vld [vmem:[#allocation13 + $0x204] sm:$0xf] }
 0x152   : > { %1631 = vmatpush.bf16.msra.mxu0 %v6488_v24  ;;  %v9608_v24 = vpack.c.b16 %v902_v60, %v901_v58  ;;  %1685 = vmatpush.bf16.msrb.mxu2 %v6648_v37  ;;  %v6552_v30 = vor.u32 %v8020_v6, %v6549_v45  ;;  %v6640_v58 = vor.u32 %v8042_v53, %v6637_v55  ;;  %v6437_v60 = vld [vmem:[#allocation13 + $0xa8] sm:$0xf0]  ;;  %v875_v18 = vunpack.c.l.b16 %v739_v5 }
 0x153   : > { %1599 = vmatpush.bf16.msra.mxu3 %v6448_v44  ;;  %v6440_v2 = vor.u32 %v7992_v57, %v6437_v60  ;;  %v876_v26 = vunpack.c.l.b16 %v740_v7  ;;  %v926_v29 = vunpack.c.l.b16 %v814_v13  ;;  %v6421_v56 = vld [vmem:[#allocation13 + $0x88] sm:$0xf0]  ;;  %v741_v39 = vpack.c.bf16 %v9545_v0, %v9545_v0  ;;  %v9634_v0 = vld [vmem:[#allocation14] sm:$0x3] }
 0x154   : > { %v6424_v34 = vor.u32 %v7988_v9, %v6421_v56  ;;  %v742_v43 = vpack.c.bf16 %v9565_v32, %v9565_v32 }
 0x155   : > { %1657 = vmatpush.bf16.msra.mxu1 %v6576_v8  ;;  %v813_v8 = vpack.c.bf16 %v805_v61, %v805_v61  ;;  %v881_v22 = vpack.c.b16 %v876_v26, %v875_v18  ;;  %v877_v6 = vunpack.c.l.b16 %v741_v39 }
 0x156   : > { %1686 = vmatpush.bf16.msrb.mxu2 %v6640_v58  ;;  %v878_v45 = vunpack.c.l.b16 %v742_v43  ;;  %v6739_v43 = vld [vmem:[#allocation16 + $0x70] sm:$0xf] }
 0x157   : > { %1600 = vmatpush.bf16.msra.mxu3 %v6440_v2  ;;  %v925_v27 = vunpack.c.l.b16 %v813_v8 }
 0x158   : > { %1526 = vmatmul.bf16.gmra.mxu0 %v9594_v16  ;;  %v882_v48 = vpack.c.b16 %v878_v45, %v877_v6 }
 0x159   : > { %1658 = vmatpush.bf16.msra.mxu1 %v6568_v19  ;;  %v930_v37 = vpack.c.b16 %v926_v29, %v925_v27 }
 0x15b   : > { %1601 = vmatpush.bf16.msra.mxu3 %v6432_v31 }
 0x15d   : > { %1659 = vmatpush.bf16.msra.mxu1 %v6560_v42  ;;  %v6613_v42 = vld [vmem:[#allocation13 + $0x208] sm:$0xf0] }
 0x15e   : > { %v6616_v44 = vor.u32 %v8036_v41, %v6613_v42  ;;  %v8067_v41 = vld [vmem:[#allocation16 + $0x74] sm:$0xf0] }
 0x15f   : > { %1602 = vmatpush.bf16.msra.mxu3 %v6424_v34 }
 0x160   : > { %1487 = vmatmul.bf16.vlgmr.msrb.gmra.mxu3 %v9599_v46  ;;  %1550 = vmatmul.bf16.gmra.mxu1 %v9601_v47 }
 0x161   : > { %1473 = vmatmul.bf16.gmra.mxu2 %v9603_v51  ;;  %1660 = vmatpush.bf16.msra.mxu1 %v6552_v30 }
 0x168   : > { %1531 = vmatmul.bf16.gmra.mxu0 %v9608_v24 }
 0x170   : > { %1492 = vmatmul.bf16.gmra.mxu3 %v880_v49  ;;  %1555 = vmatmul.bf16.gmra.mxu1 %v9615_v52 }
 0x171   : > { %1574 = vmatmul.bf16.vlgmr.msra.gmra.mxu2 %v9548_v3  ;;  %v8040_v3 = vld [vmem:[#allocation13 + $0x224] sm:$0xf] }
 0x172   : > { %v6632_v19 = vor.u32 %v8040_v3, %v6629_v62 }
 0x174   : > { %1687 = vmatpush.bf16.msrb.mxu2 %v6632_v19 }
 0x178   : > { %1632 = vmatmul.bf16.vlgmr.msra.gmra.mxu0 %v9599_v46  ;;  %v8038_v46 = vld [vmem:[#allocation13 + $0x214] sm:$0xf] }
 0x179   : > { %v6624_v25 = vor.u32 %v8038_v46, %v6621_v38 }
 0x17b   : > { %1688 = vmatpush.bf16.msrb.mxu2 %v6624_v25 }
 0x17f   : > { %1689 = vmatpush.bf16.msrb.mxu2 %v6616_v44  ;;  %v6740_v44 = vor.u32 %v8067_v41, %v6739_v43  ;;  %v8064_v41 = vld [vmem:[#allocation16 + $0x64] sm:$0xf] }
 0x180   : > { %1497 = vmatmul.bf16.gmra.mxu3 %v881_v22  ;;  %1560 = vmatmul.bf16.gmra.mxu1 %v930_v37 }
 0x181   : > { %1579 = vmatmul.bf16.gmra.mxu2 %v9571_v10  ;;  %v9637_v10 = vperm.slane %v9634_v0, 0  ;;  %1985 = vmatpush.bf16.msrb.mxu3 %v6740_v44 }
 0x188   : > { %1637 = vmatmul.bf16.gmra.mxu0 %v880_v49 }
 0x190   : > { %1502 = vmatmul.bf16.gmra.mxu3 %v882_v48  ;;  %1661 = vmatmul.bf16.vlgmr.msra.gmra.mxu1 %v9567_v33 }
 0x191   : > { %1584 = vmatmul.bf16.gmra.mxu2 %v9573_v11 }
 0x198   : > { %1642 = vmatmul.bf16.gmra.mxu0 %v881_v22 }
 0x1a0   : > { %1603 = vmatmul.bf16.vlgmr.msra.gmra.mxu3 %v9550_v4  ;;  %1666 = vmatmul.bf16.gmra.mxu1 %v9580_v40 }
 0x1a1   : > { %1589 = vmatmul.bf16.gmra.mxu2 %v9583_v20 }
 0x1a8   : > { %1647 = vmatmul.bf16.gmra.mxu0 %v882_v48 }
 0x1ad   : > { %v1430_v32 = vpop.f32.mrf.mxu1 }
 0x1ae   : > { %v1431_v33 = vadd.f32 %v1430_v32, %v9637_v10 }
 0x1b0   : > { %1608 = vmatmul.bf16.gmra.mxu3 %v9575_v12  ;;  %1671 = vmatmul.bf16.gmra.mxu1 %v9594_v16 }
 0x1b1   : > { %1690 = vmatmul.bf16.vlgmr.msrb.gmra.mxu2 %v9585_v23 }
 0x1b4   : > { %v1459_v4 = vpop.f32.mrf.mxu2 }
 0x1b5   : > { %v1460_v11 = vadd.f32 %v1459_v4, %v1431_v33  ;;  %v9643_v40 = vpop.f32.mrf.mxu1  ;;  %v1517_v58 = vpop.f32.mrf.mxu0  ;;  %v6731_v33 = vld [vmem:[#allocation16 + $0x60] sm:$0xf]  ;;  %v8065_v4 = vld [vmem:[#allocation16 + $0x64] sm:$0xf0] }
 0x1bc   : > { %v9645_v20 = vpop.f32.mrf.mxu2 }
 0x1bd   : > { %v1435_v30 = vpop.f32.mrf.mxu1  ;;  %v9660_v63 = vpop.f32.mrf.mxu0 }
 0x1be   : > { %v1436_v12 = vadd.f32 %v1435_v30, %v9637_v10 }
 0x1c0   : > { %1613 = vmatmul.bf16.gmra.mxu3 %v9587_v28  ;;  %1676 = vmatmul.bf16.gmra.mxu1 %v9608_v24 }
 0x1c1   : > { %1695 = vmatmul.bf16.gmra.mxu2 %v9601_v47 }
 0x1c3   : > { %v1440_v16 = vpop.f32.mrf.mxu3 }
 0x1c4   : > { %v1464_v49 = vpop.f32.mrf.mxu2  ;;  %v1441_v28 = vadd.f32 %v1440_v16, %v9637_v10 }
 0x1c5   : > { %v1465_v23 = vadd.f32 %v1464_v49, %v1436_v12  ;;  %v9651_v53 = vpop.f32.mrf.mxu1  ;;  %v1522_v13 = vpop.f32.mrf.mxu0 }
 0x1cb   : > { %v9653_v55 = vpop.f32.mrf.mxu3 }
 0x1cc   : > { %v9655_v57 = vpop.f32.mrf.mxu2 }
 0x1cd   : > { %v1546_v24 = vpop.f32.mrf.mxu1  ;;  %v9675_v27 = vpop.f32.mrf.mxu0 }
 0x1d0   : > { %1618 = vmatmul.bf16.gmra.mxu3 %v9603_v51 }
 0x1d1   : > { %1700 = vmatmul.bf16.gmra.mxu2 %v9615_v52 }
 0x1d3   : > { %v1445_v47 = vpop.f32.mrf.mxu3 }
 0x1d4   : > { %v1469_v60 = vpop.f32.mrf.mxu2  ;;  %v1446_v8 = vadd.f32 %v1445_v47, %v9637_v10 }
 0x1d5   : > { %v1470_v61 = vadd.f32 %v1469_v60, %v1441_v28  ;;  %v9666_v7 = vpop.f32.mrf.mxu1  ;;  %v1527_v22 = vpop.f32.mrf.mxu0 }
 0x1db   : > { %v9662_v2 = vpop.f32.mrf.mxu3 }
 0x1dc   : > { %v9664_v5 = vpop.f32.mrf.mxu2 }
 0x1dd   : > { %v1551_v18 = vpop.f32.mrf.mxu1  ;;  %v9685_v39 = vpop.f32.mrf.mxu0 }
 0x1e1   : > { %1705 = vmatmul.bf16.gmra.mxu2 %v930_v37 }
 0x1e3   : > { %v1488_v51 = vpop.f32.mrf.mxu3 }
 0x1e4   : > { %v1474_v52 = vpop.f32.mrf.mxu2  ;;  %v1489_v3 = vadd.f32 %v1488_v51, %v1460_v11  ;;  %v6732_v11 = vor.u32 %v8065_v4, %v6731_v33 }
 0x1e5   : > { %v1475_v62 = vadd.f32 %v1474_v52, %v1446_v8  ;;  %v9677_v29 = vpop.f32.mrf.mxu1  ;;  %v1532_v16 = vpop.f32.mrf.mxu0 }
 0x1e6   : > { %v1518_v14 = vadd.f32 %v1517_v58, %v1489_v3  ;;  %1986 = vmatpush.bf16.msrb.mxu3 %v6732_v11  ;;  %v8063_v58 = vld [vmem:[#allocation16 + $0x54] sm:$0xf0] }
 0x1e8   : > { %v9669_v19 = vadd.f32 %v1546_v24, %v1518_v14 }
 0x1eb   : > { %v9671_v21 = vpop.f32.mrf.mxu3 }
 0x1ec   : > { %v9673_v26 = vpop.f32.mrf.mxu2 }
 0x1ed   : > { %v1556_v46 = vpop.f32.mrf.mxu1  ;;  %v9699_v8 = vpop.f32.mrf.mxu0 }
 0x1f3   : > { %v1493_v31 = vpop.f32.mrf.mxu3 }
 0x1f4   : > { %v1494_v9 = vadd.f32 %v1493_v31, %v1465_v23  ;;  %v1575_v56 = vpop.f32.mrf.mxu2  ;;  %v6723_v23 = vld [vmem:[#allocation16 + $0x50] sm:$0xf] }
 0x1f5   : > { %v9689_v48 = vpop.f32.mrf.mxu1  ;;  %v6724_v24 = vor.u32 %v8063_v58, %v6723_v23  ;;  %v6725_v23 = vld [vmem:[#allocation16 + $0x58] sm:$0xf0] }
 0x1f6   : > { %v1523_v34 = vadd.f32 %v1522_v13, %v1494_v9 }
 0x1f7   : > { %1987 = vmatpush.bf16.msrb.mxu3 %v6724_v24  ;;  %v8061_v24 = vld [vmem:[#allocation16 + $0x44] sm:$0xf0] }
 0x1f8   : > { %v9679_v37 = vadd.f32 %v1551_v18, %v1523_v34  ;;  %v1633_v18 = vpop.f32.mrf.mxu0 }
 0x1fb   : > { %v9681_v38 = vpop.f32.mrf.mxu3 }
 0x1fc   : > { %v9683_v25 = vpop.f32.mrf.mxu2 }
 0x1fd   : > { %v1561_v28 = vpop.f32.mrf.mxu1 }
 0x203   : > { %v1498_v42 = vpop.f32.mrf.mxu3 }
 0x204   : > { %v1499_v6 = vadd.f32 %v1498_v42, %v1470_v61  ;;  %v9687_v45 = vpop.f32.mrf.mxu2  ;;  %v6733_v42 = vld [vmem:[#allocation16 + $0x68] sm:$0xf0] }
 0x205   : > { %v9703_v52 = vpop.f32.mrf.mxu1 }
 0x206   : > { %v1528_v32 = vadd.f32 %v1527_v22, %v1499_v6  ;;  %v8066_v22 = vld [vmem:[#allocation16 + $0x74] sm:$0xf]  ;;  %v6736_v6 = vor.u32 %v8064_v41, %v6733_v42  ;;  %v6707_v42 = vld [vmem:[#allocation16 + $0x30] sm:$0xf] }
 0x208   : > { %v9691_v30 = vadd.f32 %v1556_v46, %v1528_v32  ;;  %v9712_v46 = vperm.slane %v9634_v0, 1  ;;  %v1635_v32 = vpop.f32.mrf.mxu0 }
 0x20a   : > { %v1576_v44 = vadd.f32 %v1575_v56, %v9712_v46  ;;  %v1578_v56 = vadd.f32 %v9683_v25, %v9712_v46 }
 0x20b   : > { %v9693_v12 = vpop.f32.mrf.mxu3 }
 0x20c   : > { %v9695_v49 = vpop.f32.mrf.mxu2 }
 0x20d   : > { %v1662_v31 = vpop.f32.mrf.mxu1 }
 0x210   : > { %v1638_v15 = vpop.f32.mrf.mxu0 }
 0x213   : > { %v1503_v47 = vpop.f32.mrf.mxu3 }
 0x214   : > { %v1504_v60 = vadd.f32 %v1503_v47, %v1475_v62  ;;  %v9697_v61 = vpop.f32.mrf.mxu2  ;;  %v6741_v62 = vld [vmem:[#allocation16 + $0x78] sm:$0xf0] }
 0x215   : > { %v6744_v43 = vor.u32 %v8066_v22, %v6741_v62  ;;  %v1664_v58 = vpop.f32.mrf.mxu1  ;;  %v6717_v22 = vld [vmem:[#allocation16 + $0x48] sm:$0xf0] }
 0x216   : > { %v1533_v51 = vadd.f32 %v1532_v16, %v1504_v60  ;;  %v8062_v16 = vld [vmem:[#allocation16 + $0x54] sm:$0xf] }
 0x217   : > { %2014 = vmatpush.bf16.msrb.mxu0 %v6744_v43  ;;  %v6728_v0 = vor.u32 %v8062_v16, %v6725_v23  ;;  %v8057_v23 = vld [vmem:[#allocation16 + $0x24] sm:$0xf0] }
 0x218   : > { %v9701_v13 = vadd.f32 %v1561_v28, %v1533_v51  ;;  %v6715_v28 = vld [vmem:[#allocation16 + $0x40] sm:$0xf]  ;;  %v8060_v51 = vld [vmem:[#allocation16 + $0x44] sm:$0xf] }
 0x219   : > { %v6716_v47 = vor.u32 %v8061_v24, %v6715_v28 }
 0x21b   : > { %v9705_v3 = vpop.f32.mrf.mxu3  ;;  %2015 = vmatpush.bf16.msrb.mxu0 %v6736_v6  ;;  %1988 = vmatpush.bf16.msrb.mxu3 %v6716_v47  ;;  %v6699_v6 = vld [vmem:[#allocation16 + $0x20] sm:$0xf] }
 0x21c   : > { %v9707_v14 = vpop.f32.mrf.mxu2 }
 0x21d   : > { %v1667_v47 = vpop.f32.mrf.mxu1 }
 0x21f   : > { %2016 = vmatpush.bf16.msrb.mxu0 %v6728_v0  ;;  %v6700_v0 = vor.u32 %v8057_v23, %v6699_v6 }
 0x223   : > { %v1604_v9 = vpop.f32.mrf.mxu3 }
 0x224   : > { %v9709_v34 = vpop.f32.mrf.mxu2  ;;  %v1605_v33 = vadd.f32 %v1604_v9, %v1576_v44  ;;  %v6720_v9 = vor.u32 %v8060_v51, %v6717_v22  ;;  %v8059_v44 = vld [vmem:[#allocation16 + $0x34] sm:$0xf0] }
 0x225   : > { %v6708_v16 = vor.u32 %v8059_v44, %v6707_v42 }
 0x226   : > { %v1634_v60 = vadd.f32 %v1633_v18, %v1605_v33  ;;  %2017 = vmatpush.bf16.msrb.mxu0 %v6720_v9  ;;  %v8058_v18 = vld [vmem:[#allocation16 + $0x34] sm:$0xf]  ;;  %v6709_v33 = vld [vmem:[#allocation16 + $0x38] sm:$0xf0]  ;;  %v8055_v9 = vld [vmem:[#allocation16 + $0x14] sm:$0xf0] }
 0x227   : > { %v6712_v24 = vor.u32 %v8058_v18, %v6709_v33  ;;  %1989 = vmatpush.bf16.msrb.mxu3 %v6708_v16  ;;  %v8054_v16 = vld [vmem:[#allocation16 + $0x14] sm:$0xf]  ;;  %v1640_v18 = vpop.f32.mrf.mxu0 }
 0x228   : > { %v1663_v41 = vadd.f32 %v1662_v31, %v1634_v60  ;;  %v6701_v31 = vld [vmem:[#allocation16 + $0x28] sm:$0xf0]  ;;  %v1581_v60 = vadd.f32 %v9687_v45, %v9712_v46 }
 0x22a   : > { %2018 = vmatpush.bf16.msrb.mxu0 %v6712_v24 }
 0x22b   : > { %v1606_v4 = vpop.f32.mrf.mxu3  ;;  %1990 = vmatpush.bf16.msrb.mxu3 %v6700_v0  ;;  %v6683_v0 = vld [vmem:[#allocation16] sm:$0xf] }
 0x22c   : > { %v9715_v11 = vpop.f32.mrf.mxu2  ;;  %v1607_v62 = vadd.f32 %v1606_v4, %v1578_v56  ;;  %v8056_v4 = vld [vmem:[#allocation16 + $0x24] sm:$0xf]  ;;  %v6691_v56 = vld [vmem:[#allocation16 + $0x10] sm:$0xf] }
 0x22d   : > { %v6704_v22 = vor.u32 %v8056_v4, %v6701_v31  ;;  %v8052_v4 = vld [vmem:[#allocation16 + $0x4] sm:$0xf]  ;;  %v6685_v31 = vld [vmem:[#allocation16 + $0x8] sm:$0xf0] }
 0x22e   : > { %v1636_v25 = vadd.f32 %v1635_v32, %v1607_v62  ;;  %v6693_v32 = vld [vmem:[#allocation16 + $0x18] sm:$0xf0] }
 0x22f   : > { %2019 = vmatpush.bf16.msrb.mxu0 %v6704_v22  ;;  %v6696_v23 = vor.u32 %v8054_v16, %v6693_v32 }
 0x233   : > { %v1609_v43 = vpop.f32.mrf.mxu3  ;;  %2020 = vmatpush.bf16.msrb.mxu0 %v6696_v23  ;;  %v1643_v23 = vpop.f32.mrf.mxu0 }
 0x234   : > { %v1691_v36 = vpop.f32.mrf.mxu2  ;;  %v1610_v42 = vadd.f32 %v1609_v43, %v1581_v60  ;;  %v1583_v43 = vadd.f32 %v9695_v49, %v9712_v46  ;;  %v6688_v60 = vor.u32 %v8052_v4, %v6685_v31 }
 0x235   : > { %v1692_v28 = vadd.f32 %v1691_v36, %v1663_v41  ;;  %v1665_v36 = vadd.f32 %v1664_v58, %v1636_v25  ;;  %v6692_v41 = vor.u32 %v8055_v9, %v6691_v56  ;;  %v1669_v58 = vpop.f32.mrf.mxu1 }
 0x237   : > { %v6673_v51 = vmul.f32 -1.442695, %v1692_v28  ;;  %1991 = vmatpush.bf16.msrb.mxu3 %v6692_v41  ;;  %v1639_v28 = vadd.f32 %v1638_v15, %v1610_v42  ;;  %v1433_v15 = vadd.f32 %v9643_v40, %v9637_v10  ;;  %2021 = vmatpush.bf16.msrb.mxu0 %v6688_v60 }
 0x239   : > { %8524 = vpow2.f32 %v6673_v51  ;;  %v8053_v51 = vld [vmem:[#allocation16 + $0x4] sm:$0xf0]  ;;  %v1668_v9 = vadd.f32 %v1667_v47, %v1639_v28  ;;  %v1462_v41 = vadd.f32 %v9645_v20, %v1433_v15  ;;  %v1586_v47 = vadd.f32 %v9697_v61, %v9712_v46 }
 0x23a   : > { %v6684_v25 = vor.u32 %v8053_v51, %v6683_v0 }
 0x23b   : > { %v1611_v44 = vpop.f32.mrf.mxu3 }
 0x23c   : > { %v1693_v6 = vpop.f32.mrf.mxu2  ;;  %v1612_v22 = vadd.f32 %v1611_v44, %v1583_v43  ;;  %1992 = vmatpush.bf16.msrb.mxu3 %v6684_v25 }
 0x23d   : > { %v1694_v62 = vadd.f32 %v1693_v6, %v1665_v36  ;;  %v1672_v40 = vpop.f32.mrf.mxu1 }
 0x23e   : > { %v1641_v6 = vadd.f32 %v1640_v18, %v1612_v22 }
 0x23f   : > { %v8525_v33 = vpop.eup %8524  ;;  %v6674_v45 = vmul.f32 -1.442695, %v1694_v62  ;;  %v1491_v62 = vadd.f32 %v9671_v21, %v1462_v41 }
 0x240   : > { %v1743_v24 = vadd.f32 1.0, %v8525_v33  ;;  %v1670_v20 = vadd.f32 %v1669_v58, %v1641_v6 }
 0x241   : > { %8526 = vpow2.f32 %v6674_v45  ;;  %v1520_v18 = vadd.f32 %v9660_v63, %v1491_v62 }
 0x242   : > { %8528 = vrcp.f32 %v1743_v24  ;;  %v1762_v51 = vand.u32 2147483648, %v1743_v24  ;;  %v1760_v4 = vand.u32 2147483647, %v1743_v24  ;;  %vm1756_vm9 = vweird.f32 %v1743_v24 }
 0x243   : > { %v1614_v56 = vpop.f32.mrf.mxu3 }
 0x244   : > { %v1696_v42 = vpop.f32.mrf.mxu2  ;;  %v1615_v45 = vadd.f32 %v1614_v56, %v1586_v47  ;;  %v1549_v56 = vadd.f32 %v9666_v7, %v1520_v18  ;;  %v1763_v63 = vor.u32 1.1754944e-38, %v1762_v51  ;;  %vm1761_vm11 = vcmp.eq.f32.partialorder %v1760_v4, 8.507059e+37 }
 0x245   : > { %v1697_v36 = vadd.f32 %v1696_v42, %v1668_v9 }
 0x246   : > { %v1644_v31 = vadd.f32 %v1643_v23, %v1615_v45  ;;  %v1674_v45 = vpop.f32.mrf.mxu1 }
 0x247   : > { %v8527_v49 = vpop.eup %8526  ;;  %v6675_v16 = vmul.f32 -1.442695, %v1697_v36 }
 0x248   : > { %v8529_v32 = vpop.eup %8528  ;;  %v9727_v33 = vadd.f32 1.0, %v8527_v49  ;;  %v1673_v7 = vadd.f32 %v1672_v40, %v1644_v31 }
 0x249   : > { %v1752_v44 = vmul.f32 %v8529_v32, %v1743_v24  ;;  %8530 = vpow2.f32 %v6675_v16  ;;  %vm1757_vm8 = vweird.f32 %v8529_v32  ;;  %v1645_v24 = vpop.f32.mrf.mxu0 }
 0x24a   : > { %8532 = vrcp.f32 %v9727_v33  ;;  %vm1758_vm10 = vmor %vm1756_vm9, %vm1757_vm8  ;;  %v1777_v23 = vand.u32 2147483648, %v9727_v33  ;;  %vm1771_vm13 = vweird.f32 %v9727_v33 }
 0x24b   : > { %v1753_v28 = vsub.f32 1.0, %v1752_v44  ;;  %8534 = vtanh.f32 %v9669_v19  ;;  %v1616_v0 = vpop.f32.mrf.mxu3  ;;  %v1588_v19 = vadd.f32 %v9707_v14, %v9712_v46  ;;  %v1438_v14 = vadd.f32 %v9651_v53, %v9637_v10 }
 0x24c   : > { %v1698_v21 = vpop.f32.mrf.mxu2  ;;  %v1778_v4 = vor.u32 1.1754944e-38, %v1777_v23 }
 0x24d   : > { %v1754_v43 = vmul.f32 %v8529_v32, %v1753_v28  ;;  %v1699_v25 = vadd.f32 %v1698_v21, %v1670_v20  ;;  %v1617_v6 = vadd.f32 %v1616_v0, %v1588_v19  ;;  %v1467_v28 = vadd.f32 %v9655_v57, %v1438_v14 }
 0x24e   : > { %v1593_v14 = vadd.f32 %v9715_v11, %v9712_v46 }
 0x24f   : > { %v8531_v61 = vpop.eup %8530  ;;  %v6676_v60 = vmul.f32 -1.442695, %v1699_v25  ;;  %v1755_v22 = vadd.f32 %v8529_v32, %v1754_v43  ;;  %v1646_v0 = vadd.f32 %v1645_v24, %v1617_v6  ;;  %v1496_v51 = vadd.f32 %v9681_v38, %v1467_v28 }
 0x250   : > { %v8533_v9 = vpop.eup %8532  ;;  %v9737_v58 = vadd.f32 1.0, %v8531_v61  ;;  %v1591_v43 = vadd.f32 %v9709_v34, %v9712_v46  ;;  %v1443_v46 = vadd.f32 %v9653_v55, %v9637_v10 }
 0x251   : > { %v1767_v15 = vmul.f32 %v8533_v9, %v9727_v33  ;;  %8536 = vpow2.f32 %v6676_v60  ;;  %v1759_v42 = vsel %vm1758_vm10, %v8529_v32, %v1755_v22  ;;  %v8535_v36 = vpop.eup %8534  ;;  %vm1772_vm12 = vweird.f32 %v8533_v9  ;;  %v1648_v19 = vpop.f32.mrf.mxu0 }
 0x252   : > { %8538 = vrcp.f32 %v9737_v58  ;;  %v1764_v41 = vsel %vm1761_vm11, %v1763_v63, %v1759_v42  ;;  %v1775_v32 = vand.u32 2147483647, %v9727_v33  ;;  %vm1773_vm14 = vmor %vm1771_vm13, %vm1772_vm12  ;;  %v1675_v22 = vadd.f32 %v1674_v45, %v1646_v0 }
 0x253   : > { %v1768_v49 = vsub.f32 1.0, %v1767_v15  ;;  %v1871_v16 = vmul.f32 %v8535_v36, %v1764_v41  ;;  %8540 = vtanh.f32 %v1549_v56  ;;  %v1619_v20 = vpop.f32.mrf.mxu3  ;;  %v1525_v34 = vadd.f32 %v9675_v27, %v1496_v51 }
 0x254   : > { %v1701_v62 = vpop.f32.mrf.mxu2  ;;  %vm1776_vm15 = vcmp.eq.f32.partialorder %v1775_v32, 8.507059e+37  ;;  %v1620_v33 = vadd.f32 %v1619_v20, %v1591_v43  ;;  %v1790_v15 = vand.u32 2147483647, %v9737_v58  ;;  %vm1786_vm1 = vweird.f32 %v9737_v58 }
 0x255   : > { %v1702_v47 = vadd.f32 %v1701_v62, %v1673_v7  ;;  %v1769_v44 = vmul.f32 %v8533_v9, %v1768_v49  ;;  %v1554_v27 = vadd.f32 %v9677_v29, %v1525_v34  ;;  %v1677_v62 = vpop.f32.mrf.mxu1  ;;  %v1472_v51 = vadd.f32 %v9664_v5, %v1443_v46 }
 0x256   : > { %v1649_v49 = vadd.f32 %v1648_v19, %v1620_v33  ;;  %vm1791_vm3 = vcmp.eq.f32.partialorder %v1790_v15, 8.507059e+37 }
 0x257   : > { %v8537_v18 = vpop.eup %8536  ;;  %v6677_v40 = vmul.f32 -1.442695, %v1702_v47  ;;  %v1770_v21 = vadd.f32 %v8533_v9, %v1769_v44  ;;  %v1501_v55 = vadd.f32 %v9693_v12, %v1472_v51 }
 0x258   : > { %v8539_v53 = vpop.eup %8538  ;;  %v9750_v25 = vadd.f32 1.0, %v8537_v18  ;;  %v1678_v29 = vadd.f32 %v1677_v62, %v1649_v49 }
 0x259   : > { %8542 = vpow2.f32 %v6677_v40  ;;  %v1774_v57 = vsel %vm1773_vm14, %v8533_v9, %v1770_v21  ;;  %v1782_v61 = vmul.f32 %v8539_v53, %v9737_v58  ;;  %v8541_v31 = vpop.eup %8540  ;;  %v1792_v9 = vand.u32 2147483648, %v9737_v58  ;;  %v1650_v43 = vpop.f32.mrf.mxu0 }
 0x25a   : > { %8544 = vrcp.f32 %v9750_v25  ;;  %v1779_v60 = vsel %vm1776_vm15, %v1778_v4, %v1774_v57  ;;  %vm1787_vm0 = vweird.f32 %v8539_v53  ;;  %v1807_v0 = vand.u32 2147483648, %v9750_v25 }
 0x25b   : > { %v1872_v56 = vmul.f32 %v8541_v31, %v1779_v60  ;;  %v1783_v38 = vsub.f32 1.0, %v1782_v61  ;;  %8546 = vtanh.f32 %v9679_v37  ;;  %vm1788_vm2 = vmor %vm1786_vm1, %vm1787_vm0  ;;  %v1793_v47 = vor.u32 1.1754944e-38, %v1792_v9 }
 0x25c   : > { %v1703_v63 = vpop.f32.mrf.mxu2  ;;  %vm1801_vm5 = vweird.f32 %v9750_v25  ;;  %v1530_v12 = vadd.f32 %v9685_v39, %v1501_v55 }
 0x25d   : > { %v1704_v42 = vadd.f32 %v1703_v63, %v1675_v22  ;;  %v1879_v36 = vpack.c.bf16 %v1872_v56, %v1871_v16  ;;  %v1784_v24 = vmul.f32 %v8539_v53, %v1783_v38  ;;  %v1621_v16 = vpop.f32.mrf.mxu3  ;;  %v1808_v22 = vor.u32 1.1754944e-38, %v1807_v0  ;;  %v1679_v34 = vpop.f32.mrf.mxu1 }
 0x25e   : > { %v1622_v45 = vadd.f32 %v1621_v16, %v1593_v14  ;;  %v1559_v39 = vadd.f32 %v9689_v48, %v1530_v12  ;;  %v6795_v48 = vld [vmem:[#allocation13 + $0x2e0] sm:$0xf] }
 0x25f   : > { %v8543_v41 = vpop.eup %8542  ;;  %v6678_v6 = vmul.f32 -1.442695, %v1704_v42  ;;  %1993 = vmatmul.bf16.vlgmr.msrb.gmra.mxu3 %v1879_v36  ;;  %2022 = vmatmul.bf16.vlgmr.msrb.gmra.mxu0 %v1879_v36  ;;  %v1785_v7 = vadd.f32 %v8539_v53, %v1784_v24 }
 0x260   : > { %v8545_v37 = vpop.eup %8544  ;;  %v9762_v23 = vadd.f32 1.0, %v8543_v41  ;;  %v1651_v57 = vadd.f32 %v1650_v43, %v1622_v45  ;;  %v6859_v45 = vld [vmem:[#allocation13 + $0x360] sm:$0xf] }
 0x261   : > { %8548 = vpow2.f32 %v6678_v6  ;;  %v1789_v44 = vsel %vm1788_vm2, %v8539_v53, %v1785_v7  ;;  %v1797_v32 = vmul.f32 %v8545_v37, %v9750_v25  ;;  %v8547_v28 = vpop.eup %8546  ;;  %vm1802_vm4 = vweird.f32 %v8545_v37 }
 0x262   : > { %8550 = vrcp.f32 %v9762_v23  ;;  %v1794_v58 = vsel %vm1791_vm3, %v1793_v47, %v1789_v44  ;;  %v1805_v53 = vand.u32 2147483647, %v9750_v25  ;;  %vm1803_vm6 = vmor %vm1801_vm5, %vm1802_vm4  ;;  %v1680_v15 = vadd.f32 %v1679_v34, %v1651_v57  ;;  %v6803_v44 = vld [vmem:[#allocation13 + $0x2f0] sm:$0xf]  ;;  %v8093_v34 = vld [vmem:[#allocation13 + $0x344] sm:$0xf0] }
 0x263   : > { %v1798_v20 = vsub.f32 1.0, %v1797_v32  ;;  %v1873_v18 = vmul.f32 %v8547_v28, %v1794_v58  ;;  %8552 = vtanh.f32 %v1554_v27  ;;  %v1820_v42 = vand.u32 2147483647, %v9762_v23  ;;  %v6867_v27 = vld [vmem:[#allocation13 + $0x370] sm:$0xf] }
 0x264   : > { %v1706_v11 = vpop.f32.mrf.mxu2  ;;  %vm1806_vm7 = vcmp.eq.f32.partialorder %v1805_v53, 8.507059e+37  ;;  %v1822_v36 = vand.u32 2147483648, %v9762_v23  ;;  %vm1816_vm9 = vweird.f32 %v9762_v23  ;;  %v8083_v32 = vld [vmem:[#allocation13 + $0x2f4] sm:$0xf0]  ;;  %v1448_v53 = vadd.f32 %v9662_v2, %v9637_v10  ;;  %v6843_v2 = vld [vmem:[#allocation13 + $0x340] sm:$0xf] }
 0x265   : > { %v1707_v40 = vadd.f32 %v1706_v11, %v1678_v29  ;;  %v1799_v21 = vmul.f32 %v8545_v37, %v1798_v20  ;;  %vm1821_vm11 = vcmp.eq.f32.partialorder %v1820_v42, 8.507059e+37  ;;  %v8097_v29 = vld [vmem:[#allocation13 + $0x364] sm:$0xf0]  ;;  %v6804_v0 = vor.u32 %v8083_v32, %v6803_v44 }
 0x266   : > { %v1823_v16 = vor.u32 1.1754944e-38, %v1822_v36  ;;  %v6860_v43 = vor.u32 %v8097_v29, %v6859_v45 }
 0x267   : > { %v8549_v4 = vpop.eup %8548  ;;  %v6679_v61 = vmul.f32 -1.442695, %v1707_v40  ;;  %v1800_v31 = vadd.f32 %v8545_v37, %v1799_v21  ;;  %v6851_v40 = vld [vmem:[#allocation13 + $0x350] sm:$0xf]  ;;  %v8095_v21 = vld [vmem:[#allocation13 + $0x354] sm:$0xf0]  ;;  %2727 = vmatpush.bf16.msrb.mxu1 %v6804_v0 }
 0x268   : > { %v8551_v60 = vpop.eup %8550  ;;  %v9773_v33 = vadd.f32 1.0, %v8549_v4  ;;  %v6852_v55 = vor.u32 %v8095_v21, %v6851_v40  ;;  %v6923_v21 = vld [vmem:[#allocation13 + $0x3e0] sm:$0xf] }
 0x269   : > { %v1812_v56 = vmul.f32 %v8551_v60, %v9762_v23  ;;  %8554 = vpow2.f32 %v6679_v61  ;;  %v1804_v38 = vsel %vm1803_vm6, %v8545_v37, %v1800_v31  ;;  %v8553_v5 = vpop.eup %8552  ;;  %vm1817_vm8 = vweird.f32 %v8551_v60  ;;  %v6931_v31 = vld [vmem:[#allocation13 + $0x3f0] sm:$0xf] }
 0x26a   : > { %8556 = vrcp.f32 %v9773_v33  ;;  %v1809_v19 = vsel %vm1806_vm7, %v1808_v22, %v1804_v38  ;;  %vm1818_vm10 = vmor %vm1816_vm9, %vm1817_vm8  ;;  %v1837_v51 = vand.u32 2147483648, %v9773_v33  ;;  %v1835_v57 = vand.u32 2147483647, %v9773_v33  ;;  %v6787_v22 = vld [vmem:[#allocation13 + $0x2d0] sm:$0xf] }
 0x26b   : > { %v1813_v63 = vsub.f32 1.0, %v1812_v56  ;;  %v1874_v25 = vmul.f32 %v8553_v5, %v1809_v19  ;;  %8558 = vtanh.f32 %v9691_v30  ;;  %v8099_v30 = vld [vmem:[#allocation13 + $0x374] sm:$0xf0]  ;;  %vm1831_vm13 = vweird.f32 %v9773_v33 }
 0x26c   : > { %v1708_v9 = vpop.f32.mrf.mxu2  ;;  %v6868_v47 = vor.u32 %v8099_v30, %v6867_v27  ;;  %v8079_v56 = vld [vmem:[#allocation13 + $0x2d4] sm:$0xf0]  ;;  %v1838_v12 = vor.u32 1.1754944e-38, %v1837_v51  ;;  %vm1836_vm15 = vcmp.eq.f32.partialorder %v1835_v57, 8.507059e+37  ;;  %v6835_v51 = vld [vmem:[#allocation13 + $0x330] sm:$0xf] }
 0x26d   : > { %v1709_v24 = vadd.f32 %v1708_v9, %v1680_v15  ;;  %v1880_v41 = vpack.c.bf16 %v1874_v25, %v1873_v18  ;;  %v1814_v49 = vmul.f32 %v8551_v60, %v1813_v63  ;;  %v8081_v18 = vld [vmem:[#allocation13 + $0x2e4] sm:$0xf0]  ;;  %v8115_v38 = vld [vmem:[#allocation13 + $0x3f4] sm:$0xf0]  ;;  %v6788_v42 = vor.u32 %v8079_v56, %v6787_v22  ;;  %v6915_v57 = vld [vmem:[#allocation13 + $0x3d0] sm:$0xf] }
 0x26e   : > { %2756 = vmatpush.bf16.msra.mxu2 %v6868_v47  ;;  %v6796_v61 = vor.u32 %v8081_v18, %v6795_v48  ;;  %v6932_v19 = vor.u32 %v8115_v38, %v6931_v31  ;;  %v8109_v22 = vld [vmem:[#allocation13 + $0x3c4] sm:$0xf0]  ;;  %v6771_v38 = vld [vmem:[#allocation13 + $0x2b0] sm:$0xf] }
 0x26f   : > { %v8555_v6 = vpop.eup %8554  ;;  %v6680_v7 = vmul.f32 -1.442695, %v1709_v24  ;;  %1998 = vmatmul.bf16.gmra.mxu3 %v1880_v41  ;;  %2027 = vmatmul.bf16.gmra.mxu0 %v1880_v41  ;;  %v1815_v37 = vadd.f32 %v8551_v60, %v1814_v49  ;;  %v6844_v24 = vor.u32 %v8093_v34, %v6843_v2  ;;  %v6779_v41 = vld [vmem:[#allocation13 + $0x2c0] sm:$0xf]  ;;  %v8077_v49 = vld [vmem:[#allocation13 + $0x2c4] sm:$0xf0] }
 0x270   : > { %v8557_v14 = vpop.eup %8556  ;;  %v9783_v62 = vadd.f32 1.0, %v8555_v6  ;;  %2728 = vmatpush.bf16.msrb.mxu1 %v6796_v61  ;;  %2785 = vmatpush.bf16.msra.mxu3 %v6932_v19  ;;  %v8111_v61 = vld [vmem:[#allocation13 + $0x3d4] sm:$0xf0]  ;;  %v8089_v34 = vld [vmem:[#allocation13 + $0x324] sm:$0xf0] }
 0x271   : > { %v1827_v28 = vmul.f32 %v8557_v14, %v9773_v33  ;;  %8560 = vpow2.f32 %v6680_v7  ;;  %v1819_v58 = vsel %vm1818_vm10, %v8551_v60, %v1815_v37  ;;  %v8559_v23 = vpop.eup %8558  ;;  %vm1832_vm12 = vweird.f32 %v8557_v14  ;;  %v6899_v19 = vld [vmem:[#allocation13 + $0x3b0] sm:$0xf] }
 0x272   : > { %8562 = vrcp.f32 %v9783_v62  ;;  %v1824_v20 = vsel %vm1821_vm11, %v1823_v16, %v1819_v58  ;;  %v1477_v60 = vadd.f32 %v9673_v26, %v1448_v53  ;;  %2757 = vmatpush.bf16.msra.mxu2 %v6860_v43  ;;  %vm1833_vm14 = vmor %vm1831_vm13, %vm1832_vm12  ;;  %v1850_v37 = vand.u32 2147483647, %v9783_v62  ;;  %v8113_v53 = vld [vmem:[#allocation13 + $0x3e4] sm:$0xf0] }
 0x273   : > { %v1828_v46 = vsub.f32 1.0, %v1827_v28  ;;  %v1875_v11 = vmul.f32 %v8559_v23, %v1824_v20  ;;  %8564 = vtanh.f32 %v1559_v39  ;;  %v1852_v27 = vand.u32 2147483648, %v9783_v62 }
 0x274   : > { %v1506_v15 = vadd.f32 %v9705_v3, %v1477_v60  ;;  %2729 = vmatpush.bf16.msrb.mxu1 %v6788_v42  ;;  %v6780_v39 = vor.u32 %v8077_v49, %v6779_v41  ;;  %vm1846_vm1 = vweird.f32 %v9783_v62  ;;  %vm1851_vm3 = vcmp.eq.f32.partialorder %v1850_v37, 8.507059e+37  ;;  %v6891_v42 = vld [vmem:[#allocation13 + $0x3a0] sm:$0xf]  ;;  %v8129_v41 = vld [vmem:[#allocation13 + $0x464] sm:$0xf0] }
 0x275   : > { %v1829_v4 = vmul.f32 %v8557_v14, %v1828_v46  ;;  %v6924_v43 = vor.u32 %v8113_v53, %v6923_v21  ;;  %v6916_v60 = vor.u32 %v8111_v61, %v6915_v57  ;;  %v6747_v53 = vld [vmem:[#allocation13 + $0x280] sm:$0xf]  ;;  %v8121_v57 = vld [vmem:[#allocation13 + $0x424] sm:$0xf0]  ;;  %v8082_v61 = vld [vmem:[#allocation13 + $0x2f4] sm:$0xf] }
 0x276   : > { %2758 = vmatpush.bf16.msra.mxu2 %v6852_v55  ;;  %v1535_v7 = vadd.f32 %v9699_v8, %v1506_v15  ;;  %v1853_v8 = vor.u32 1.1754944e-38, %v1852_v27  ;;  %v6907_v55 = vld [vmem:[#allocation13 + $0x3c0] sm:$0xf]  ;;  %v8087_v27 = vld [vmem:[#allocation13 + $0x314] sm:$0xf0] }
 0x277   : > { %v8561_v5 = vpop.eup %8560  ;;  %v1830_v10 = vadd.f32 %v8557_v14, %v1829_v4  ;;  %v8091_v4 = vld [vmem:[#allocation13 + $0x334] sm:$0xf0]  ;;  %2786 = vmatpush.bf16.msra.mxu3 %v6924_v43  ;;  %v6908_v56 = vor.u32 %v8109_v22, %v6907_v55  ;;  %v6955_v43 = vld [vmem:[#allocation13 + $0x420] sm:$0xf] }
 0x278   : > { %v8563_v63 = vpop.eup %8562  ;;  %v1750_v25 = vadd.f32 1.0, %v8561_v5  ;;  %2730 = vmatpush.bf16.msrb.mxu1 %v6780_v39  ;;  %v6836_v31 = vor.u32 %v8091_v4, %v6835_v51  ;;  %v8075_v5 = vld [vmem:[#allocation13 + $0x2b4] sm:$0xf0]  ;;  %v8069_v51 = vld [vmem:[#allocation13 + $0x284] sm:$0xf0]  ;;  %v6956_v55 = vor.u32 %v8121_v57, %v6955_v43 }
 0x279   : > { %v1842_v26 = vmul.f32 %v8563_v63, %v9783_v62  ;;  %v1834_v9 = vsel %vm1833_vm14, %v8557_v14, %v1830_v10  ;;  %v8565_v36 = vpop.eup %8564  ;;  %vm1847_vm0 = vweird.f32 %v8563_v63  ;;  %v6827_v10 = vld [vmem:[#allocation13 + $0x320] sm:$0xf]  ;;  %v6772_v2 = vor.u32 %v8075_v5, %v6771_v38  ;;  %v8119_v38 = vld [vmem:[#allocation13 + $0x414] sm:$0xf0]  ;;  %v6781_v57 = vld [vmem:[#allocation13 + $0x2c8] sm:$0xf0] }
 0x27a   : > { %8566 = vrcp.f32 %v1750_v25  ;;  %v1839_v33 = vsel %vm1836_vm15, %v1838_v12, %v1834_v9  ;;  %2759 = vmatpush.bf16.msra.mxu2 %v6844_v24  ;;  %vm1848_vm2 = vmor %vm1846_vm1, %vm1847_vm0  ;;  %v1867_v23 = vand.u32 2147483648, %v1750_v25  ;;  %v1865_v48 = vand.u32 2147483647, %v1750_v25  ;;  %v6995_v12 = vld [vmem:[#allocation13 + $0x470] sm:$0xf] }
 0x27b   : > { %v1843_v6 = vsub.f32 1.0, %v1842_v26  ;;  %v1876_v3 = vmul.f32 %v8565_v36, %v1839_v33  ;;  %8568 = vtanh.f32 %v9701_v13  ;;  %v1564_v13 = vadd.f32 %v9703_v52, %v1535_v7  ;;  %2787 = vmatpush.bf16.msra.mxu3 %v6916_v60  ;;  %v8131_v26 = vld [vmem:[#allocation13 + $0x474] sm:$0xf0]  ;;  %v8105_v36 = vld [vmem:[#allocation13 + $0x3a4] sm:$0xf0] }
 0x27c   : > { %vm1861_vm5 = vweird.f32 %v1750_v25  ;;  %v1868_v62 = vor.u32 1.1754944e-38, %v1867_v23  ;;  %vm1866_vm7 = vcmp.eq.f32.partialorder %v1865_v48, 8.507059e+37  ;;  %v6828_v15 = vor.u32 %v8089_v34, %v6827_v10  ;;  %2731 = vmatpush.bf16.msrb.mxu1 %v6772_v2  ;;  %v6987_v33 = vld [vmem:[#allocation13 + $0x460] sm:$0xf]  ;;  %v6819_v7 = vld [vmem:[#allocation13 + $0x310] sm:$0xf] }
 0x27d   : > { %v1881_v30 = vpack.c.bf16 %v1876_v3, %v1875_v11  ;;  %v1844_v14 = vmul.f32 %v8563_v63, %v1843_v6  ;;  %8570 = vtanh.f32 %v1564_v13  ;;  %v6996_v9 = vor.u32 %v8131_v26, %v6995_v12  ;;  %v6763_v6 = vld [vmem:[#allocation13 + $0x2a0] sm:$0xf]  ;;  %v8073_v3 = vld [vmem:[#allocation13 + $0x2a4] sm:$0xf0]  ;;  %v8127_v13 = vld [vmem:[#allocation13 + $0x454] sm:$0xf0] }
 0x27e   : > { %2760 = vmatpush.bf16.msra.mxu2 %v6836_v31  ;;  %v6892_v24 = vor.u32 %v8105_v36, %v6891_v42  ;;  %v6988_v49 = vor.u32 %v8129_v41, %v6987_v33  ;;  %v6764_v37 = vor.u32 %v8073_v3, %v6763_v6  ;;  %v6820_v39 = vor.u32 %v8087_v27, %v6819_v7  ;;  %v8125_v23 = vld [vmem:[#allocation13 + $0x444] sm:$0xf0]  ;;  %v6805_v31 = vld [vmem:[#allocation13 + $0x2f8] sm:$0xf0]  ;;  %v8732_v2 = vld [vmem:[#allocation2 + $0x10] sm:$0xff] }
 0x27f   : > { %2003 = vmatmul.bf16.gmra.mxu3 %v1881_v30  ;;  %2032 = vmatmul.bf16.gmra.mxu0 %v1881_v30  ;;  %v1845_v16 = vadd.f32 %v8563_v63, %v1844_v14  ;;  %v6883_v30 = vld [vmem:[#allocation13 + $0x390] sm:$0xf]  ;;  %v8103_v14 = vld [vmem:[#allocation13 + $0x394] sm:$0xf0]  ;;  %v6748_v4 = vor.u32 %v8069_v51, %v6747_v53  ;;  %v6808_v22 = vor.u32 %v8082_v61, %v6805_v31  ;;  %v8080_v36 = vld [vmem:[#allocation13 + $0x2e4] sm:$0xf] }
 0x280   : > { %v8567_v47 = vpop.eup %8566  ;;  %2788 = vmatpush.bf16.msra.mxu3 %v6908_v56  ;;  %2814 = vmatpush.bf16.msra.mxu0 %v6996_v9  ;;  %v6947_v56 = vld [vmem:[#allocation13 + $0x410] sm:$0xf]  ;;  %v8147_v12 = vld [vmem:[#allocation13 + $0x4f4] sm:$0xf0]  ;;  %v6797_v33 = vld [vmem:[#allocation13 + $0x2e8] sm:$0xf0] }
 0x281   : > { %v1857_v44 = vmul.f32 %v8567_v47, %v1750_v25  ;;  %v1849_v32 = vsel %vm1848_vm2, %v8563_v63, %v1845_v16  ;;  %v8569_v28 = vpop.eup %8568  ;;  %vm1862_vm4 = vweird.f32 %v8567_v47  ;;  %v8107_v63 = vld [vmem:[#allocation13 + $0x3b4] sm:$0xf0]  ;;  %v6884_v16 = vor.u32 %v8103_v14, %v6883_v30  ;;  %2732 = vmatpush.bf16.msrb.mxu1 %v6764_v37  ;;  %v7051_v27 = vld [vmem:[#allocation13 + $0x4e0] sm:$0xf]  ;;  %v8145_v30 = vld [vmem:[#allocation13 + $0x4e4] sm:$0xf0] }
 0x282   : > { %v1854_v58 = vsel %vm1851_vm3, %v1853_v8, %v1849_v32  ;;  %vm1863_vm6 = vmor %vm1861_vm5, %vm1862_vm4  ;;  %v6900_v25 = vor.u32 %v8107_v63, %v6899_v19  ;;  %2761 = vmatpush.bf16.msra.mxu2 %v6828_v15  ;;  %v8101_v32 = vld [vmem:[#allocation13 + $0x384] sm:$0xf0]  ;;  %v6948_v10 = vor.u32 %v8119_v38, %v6947_v56  ;;  %v6939_v63 = vld [vmem:[#allocation13 + $0x400] sm:$0xf]  ;;  %v6800_v41 = vor.u32 %v8080_v36, %v6797_v33 }
 0x283   : > { %v1858_v45 = vsub.f32 1.0, %v1857_v44  ;;  %v1877_v29 = vmul.f32 %v8569_v28, %v1854_v58  ;;  %v8571_v46 = vpop.eup %8570  ;;  %v6875_v44 = vld [vmem:[#allocation13 + $0x380] sm:$0xf]  ;;  %v6755_v58 = vld [vmem:[#allocation13 + $0x290] sm:$0xf] }
 0x284   : > { %2789 = vmatpush.bf16.msra.mxu3 %v6900_v25  ;;  %2815 = vmatpush.bf16.msra.mxu0 %v6988_v49  ;;  %v6971_v28 = vld [vmem:[#allocation13 + $0x440] sm:$0xf]  ;;  %v8117_v15 = vld [vmem:[#allocation13 + $0x404] sm:$0xf0]  ;;  %v7059_v25 = vld [vmem:[#allocation13 + $0x4f0] sm:$0xf] }
 0x285   : > { %v1859_v20 = vmul.f32 %v8567_v47, %v1858_v45  ;;  %v8071_v45 = vld [vmem:[#allocation13 + $0x294] sm:$0xf0]  ;;  %v6972_v48 = vor.u32 %v8125_v23, %v6971_v28  ;;  %v6940_v26 = vor.u32 %v8117_v15, %v6939_v63  ;;  %v7060_v42 = vor.u32 %v8147_v12, %v7059_v25  ;;  %v8098_v61 = vld [vmem:[#allocation13 + $0x374] sm:$0xf]  ;;  %v6869_v56 = vld [vmem:[#allocation13 + $0x378] sm:$0xf0] }
 0x286   : > { %2762 = vmatpush.bf16.msra.mxu2 %v6820_v39  ;;  %v8733_v49 = vld [vmem:[#allocation2 + $0x18] sm:$0xff]  ;;  %v7052_v39 = vor.u32 %v8145_v30, %v7051_v27  ;;  %v7035_v33 = vld [vmem:[#allocation13 + $0x4c0] sm:$0xf] }
 0x287   : > { %v1860_v18 = vadd.f32 %v8567_v47, %v1859_v20  ;;  %v6756_v20 = vor.u32 %v8071_v45, %v6755_v58  ;;  %v8734_v45 = vld [vmem:[#allocation2 + $0x20] sm:$0xff] }
 0x288   : > { %2790 = vmatpush.bf16.msra.mxu3 %v6892_v24 }
 0x289   : > { %v1864_v52 = vsel %vm1863_vm6, %v8567_v47, %v1860_v18  ;;  %v6979_v47 = vld [vmem:[#allocation13 + $0x450] sm:$0xf]  ;;  %v6811_v18 = vld [vmem:[#allocation13 + $0x300] sm:$0xf]  ;;  %2733 = vmatpush.bf16.msrb.mxu1 %v6756_v20 }
 0x28a   : > { %v1869_v11 = vsel %vm1866_vm7, %v1868_v62, %v1864_v52  ;;  %v6980_v8 = vor.u32 %v8127_v13, %v6979_v47  ;;  %v8085_v62 = vld [vmem:[#allocation13 + $0x304] sm:$0xf0]  ;;  %v6963_v52 = vld [vmem:[#allocation13 + $0x430] sm:$0xf]  ;;  %v6789_v47 = vld [vmem:[#allocation13 + $0x2d8] sm:$0xf0] }
 0x28b   : > { %v1878_v0 = vmul.f32 %v8571_v46, %v1869_v11  ;;  %v6812_v46 = vor.u32 %v8085_v62, %v6811_v18  ;;  %v8123_v11 = vld [vmem:[#allocation13 + $0x434] sm:$0xf0] }
 0x28c   : > { %2791 = vmatpush.bf16.msra.mxu3 %v6884_v16  ;;  %2816 = vmatpush.bf16.msra.mxu0 %v6980_v8  ;;  %v8078_v16 = vld [vmem:[#allocation13 + $0x2d4] sm:$0xf] }
 0x28d   : > { %v1882_v40 = vpack.c.bf16 %v1878_v0, %v1877_v29  ;;  %v6876_v29 = vor.u32 %v8101_v32, %v6875_v44  ;;  %v6964_v0 = vor.u32 %v8123_v11, %v6963_v52  ;;  %2763 = vmatpush.bf16.msra.mxu2 %v6812_v46  ;;  %2734 = vmatpush.bf16.msrb.mxu1 %v6748_v4  ;;  %v8076_v4 = vld [vmem:[#allocation13 + $0x2c4] sm:$0xf] }
 0x28e   : > { %v6792_v58 = vor.u32 %v8078_v16, %v6789_v47  ;;  %v6773_v16 = vld [vmem:[#allocation13 + $0x2b8] sm:$0xf0]  ;;  %v8094_v47 = vld [vmem:[#allocation13 + $0x354] sm:$0xf] }
 0x28f   : > { %2008 = vmatmul.bf16.gmra.mxu3 %v1882_v40  ;;  %2037 = vmatmul.bf16.gmra.mxu0 %v1882_v40  ;;  %v1899_v40 = vld [vmem:[#allocation17] sm:$0x3] }
 0x290   : > { %2792 = vmatpush.bf16.msra.mxu3 %v6876_v29  ;;  %2817 = vmatpush.bf16.msra.mxu0 %v6972_v48  ;;  %v9802_v21 = vperm.slane %v1899_v40, 0  ;;  %v8143_v40 = vld [vmem:[#allocation13 + $0x4d4] sm:$0xf0] }
 0x291   : > { %2872 = vmatpush.bf16.msrb.mxu2 %v6808_v22  ;;  %2843 = vmatpush.bf16.msra.mxu1 %v7060_v42 }
 0x294   : > { %2818 = vmatpush.bf16.msra.mxu0 %v6964_v0  ;;  %v7043_v0 = vld [vmem:[#allocation13 + $0x4d0] sm:$0xf] }
 0x295   : > { %2873 = vmatpush.bf16.msrb.mxu2 %v6800_v41  ;;  %2844 = vmatpush.bf16.msra.mxu1 %v7052_v39  ;;  %v7044_v43 = vor.u32 %v8143_v40, %v7043_v0  ;;  %v6845_v40 = vld [vmem:[#allocation13 + $0x348] sm:$0xf0] }
 0x298   : > { %2819 = vmatpush.bf16.msra.mxu0 %v6956_v55 }
 0x299   : > { %2874 = vmatpush.bf16.msrb.mxu2 %v6792_v58  ;;  %2845 = vmatpush.bf16.msra.mxu1 %v7044_v43  ;;  %v8139_v58 = vld [vmem:[#allocation13 + $0x4b4] sm:$0xf0] }
 0x29c   : > { %2820 = vmatpush.bf16.msra.mxu0 %v6948_v10  ;;  %v6872_v10 = vor.u32 %v8098_v61, %v6869_v56 }
 0x29e   : > { %2901 = vmatpush.bf16.msrb.mxu3 %v6872_v10  ;;  %v7019_v10 = vld [vmem:[#allocation13 + $0x4a0] sm:$0xf] }
 0x2a0   : > { %2821 = vmatpush.bf16.msra.mxu0 %v6940_v26 }
 0x2e2   : > { %v1994_v60 = vpop.f32.mrf.mxu3 }
 0x2e3   : > { %v1995_v5 = vadd.f32 %v1994_v60, %v9802_v21 }
 0x2e5   : > { %v2043_v34 = vadd.f32 %v8732_v2, %v1995_v5  ;;  %v6784_v5 = vor.u32 %v8076_v4, %v6781_v57  ;;  %v8735_v2 = vld [vmem:[#allocation2 + $0x28] sm:$0xff] }
 0x2e7   : > { %v2051_v19 = vmul.f32 %v9484_v35, %v2043_v34  ;;  %2875 = vmatpush.bf16.msrb.mxu2 %v6784_v5  ;;  %v6933_v5 = vld [vmem:[#allocation13 + $0x3f8] sm:$0xf0] }
 0x2e9   : > { %2075 = vst [vmem:[#allocation2 + $0x10] sm:$0xff] %v2051_v19  ;;  %v2067_v3 = vpack.c.bf16 %v2051_v19, %v2051_v19 }
 0x2ea   : > { %v1996_v9 = vpop.f32.mrf.mxu3 }
 0x2eb   : > { %v1997_v24 = vadd.f32 %v1996_v9, %v9802_v21  ;;  %v2189_v13 = vunpack.c.l.b16 %v2067_v3  ;;  %v8096_v3 = vld [vmem:[#allocation13 + $0x364] sm:$0xf] }
 0x2ed   : > { %v2044_v6 = vadd.f32 %v8733_v49, %v1997_v24  ;;  %v8141_v24 = vld [vmem:[#allocation13 + $0x4c4] sm:$0xf0] }
 0x2ef   : > { %v2052_v7 = vmul.f32 %v9500_v54, %v2044_v6  ;;  %v7036_v6 = vor.u32 %v8141_v24, %v7035_v33 }
 0x2f0   : > { %v2083_v32 = vld [vmem:[#allocation2 + $0xc] sm:$0xff] }
 0x2f1   : > { %v2068_v37 = vpack.c.bf16 %v2052_v7, %v2052_v7  ;;  %2076 = vst [vmem:[#allocation2 + $0x18] sm:$0xff] %v2052_v7  ;;  %v2099_v28 = vld [vmem:[#allocation2 + $0xe] sm:$0xff]  ;;  %v2091_v20 = vpack.c.bf16 %v2083_v32, %v2083_v32  ;;  %2846 = vmatpush.bf16.msra.mxu1 %v7036_v6 }
 0x2f2   : > { %v1999_v14 = vpop.f32.mrf.mxu3  ;;  %v2107_v18 = vpack.c.bf16 %v2099_v28, %v2099_v28  ;;  %v6861_v7 = vld [vmem:[#allocation13 + $0x368] sm:$0xf0]  ;;  %v7027_v28 = vld [vmem:[#allocation13 + $0x4b0] sm:$0xf] }
 0x2f3   : > { %v2190_v8 = vunpack.c.l.b16 %v2068_v37  ;;  %v2000_v44 = vadd.f32 %v1999_v14, %v9802_v21  ;;  %v2141_v51 = vunpack.c.l.b16 %v2091_v20  ;;  %v8074_v37 = vld [vmem:[#allocation13 + $0x2b4] sm:$0xf] }
 0x2f4   : > { %v2165_v55 = vunpack.c.l.b16 %v2107_v18  ;;  %v6776_v32 = vor.u32 %v8074_v37, %v6773_v16 }
 0x2f5   : > { %v2045_v29 = vadd.f32 %v8734_v45, %v2000_v44  ;;  %v9809_v23 = vpack.c.b16 %v2190_v8, %v2189_v13  ;;  %v6853_v13 = vld [vmem:[#allocation13 + $0x358] sm:$0xf0]  ;;  %v6864_v44 = vor.u32 %v8096_v3, %v6861_v7  ;;  %v8736_v45 = vld [vmem:[#allocation2 + $0x30] sm:$0xff] }
 0x2f6   : > { %2876 = vmatpush.bf16.msrb.mxu2 %v6776_v32 }
 0x2f7   : > { %v2053_v48 = vmul.f32 %v9520_v17, %v2045_v29  ;;  %2793 = vmatmul.bf16.vlgmr.msra.gmra.mxu3 %v9809_v23 }
 0x2f8   : > { %v2084_v62 = vld [vmem:[#allocation2 + $0x14] sm:$0xff]  ;;  %2902 = vmatpush.bf16.msrb.mxu3 %v6864_v44 }
 0x2f9   : > { %v2100_v52 = vld [vmem:[#allocation2 + $0x16] sm:$0xff]  ;;  %2077 = vst [vmem:[#allocation2 + $0x20] sm:$0xff] %v2053_v48  ;;  %v2092_v46 = vpack.c.bf16 %v2084_v62, %v2084_v62  ;;  %v2069_v15 = vpack.c.bf16 %v2053_v48, %v2053_v48  ;;  %v6856_v62 = vor.u32 %v8094_v47, %v6853_v13  ;;  %v6829_v47 = vld [vmem:[#allocation13 + $0x328] sm:$0xf0] }
 0x2fa   : > { %v2108_v11 = vpack.c.bf16 %v2100_v52, %v2100_v52  ;;  %v2001_v53 = vpop.f32.mrf.mxu3  ;;  %v2115_v38 = vld [vmem:[#allocation2 + $0x12] sm:$0xff]  ;;  %v7028_v52 = vor.u32 %v8139_v58, %v7027_v28 }
 0x2fb   : > { %v2002_v31 = vadd.f32 %v2001_v53, %v9802_v21  ;;  %v9814_v60 = vunpack.c.l.b16 %v2092_v46  ;;  %v2123_v12 = vpack.c.bf16 %v2115_v38, %v2115_v38  ;;  %v2191_v49 = vunpack.c.l.b16 %v2069_v15  ;;  %v8092_v46 = vld [vmem:[#allocation13 + $0x344] sm:$0xf]  ;;  %v8070_v13 = vld [vmem:[#allocation13 + $0x294] sm:$0xf] }
 0x2fc   : > { %v2166_v22 = vunpack.c.l.b16 %v2108_v11  ;;  %v8072_v53 = vld [vmem:[#allocation13 + $0x2a4] sm:$0xf]  ;;  %2847 = vmatpush.bf16.msra.mxu1 %v7028_v52  ;;  %2903 = vmatpush.bf16.msrb.mxu3 %v6856_v62  ;;  %v6848_v38 = vor.u32 %v8092_v46, %v6845_v40  ;;  %v6917_v46 = vld [vmem:[#allocation13 + $0x3d8] sm:$0xf0] }
 0x2fd   : > { %v2046_v34 = vadd.f32 %v8735_v2, %v2002_v31  ;;  %v9817_v19 = vpack.c.b16 %v9814_v60, %v2141_v51  ;;  %v2213_v14 = vunpack.c.l.b16 %v2123_v12  ;;  %v6765_v51 = vld [vmem:[#allocation13 + $0x2a8] sm:$0xf0]  ;;  %v8137_v2 = vld [vmem:[#allocation13 + $0x4a4] sm:$0xf0] }
 0x2fe   : > { %v9819_v63 = vpack.c.b16 %v2166_v22, %v2165_v55  ;;  %v6768_v57 = vor.u32 %v8072_v53, %v6765_v51  ;;  %v8114_v55 = vld [vmem:[#allocation13 + $0x3f4] sm:$0xf]  ;;  %v7020_v24 = vor.u32 %v8137_v2, %v7019_v10 }
 0x2ff   : > { %v2054_v25 = vmul.f32 %v9542_v59, %v2046_v34  ;;  %2735 = vmatmul.bf16.vlgmr.msrb.gmra.mxu1 %v9817_v19  ;;  %v6936_v33 = vor.u32 %v8114_v55, %v6933_v5  ;;  %v8738_v5 = vld [vmem:[#allocation2 + $0x40] sm:$0xff] }
 0x300   : > { %2764 = vmatmul.bf16.vlgmr.msra.gmra.mxu2 %v9819_v63  ;;  %v2116_v26 = vld [vmem:[#allocation2 + $0x1a] sm:$0xff]  ;;  %2904 = vmatpush.bf16.msrb.mxu3 %v6848_v38  ;;  %v6909_v38 = vld [vmem:[#allocation13 + $0x3c8] sm:$0xf0] }
 0x301   : > { %2078 = vst [vmem:[#allocation2 + $0x28] sm:$0xff] %v2054_v25  ;;  %v2070_v9 = vpack.c.bf16 %v2054_v25, %v2054_v25  ;;  %v2124_v42 = vpack.c.bf16 %v2116_v26, %v2116_v26  ;;  %v2085_v36 = vld [vmem:[#allocation2 + $0x1c] sm:$0xff]  ;;  %2877 = vmatpush.bf16.msrb.mxu2 %v6768_v57  ;;  %v8090_v26 = vld [vmem:[#allocation13 + $0x334] sm:$0xf]  ;;  %2930 = vmatpush.bf16.msrb.mxu0 %v6936_v33 }
 0x302   : > { %v2004_v41 = vpop.f32.mrf.mxu3  ;;  %v2101_v8 = vld [vmem:[#allocation2 + $0x1e] sm:$0xff]  ;;  %v2093_v18 = vpack.c.bf16 %v2085_v36, %v2085_v36  ;;  %2848 = vmatpush.bf16.msra.mxu1 %v7020_v24 }
 0x303   : > { %v2005_v27 = vadd.f32 %v2004_v41, %v9802_v21  ;;  %v2192_v30 = vunpack.c.l.b16 %v2070_v9  ;;  %v2214_v39 = vunpack.c.l.b16 %v2124_v42  ;;  %v2109_v0 = vpack.c.bf16 %v2101_v8, %v2101_v8  ;;  %v6837_v9 = vld [vmem:[#allocation13 + $0x338] sm:$0xf0]  ;;  %v8112_v42 = vld [vmem:[#allocation13 + $0x3e4] sm:$0xf]  ;;  %v6925_v41 = vld [vmem:[#allocation13 + $0x3e8] sm:$0xf0] }
 0x304   : > { %v9832_v56 = vunpack.c.l.b16 %v2093_v18  ;;  %v6757_v8 = vld [vmem:[#allocation13 + $0x298] sm:$0xf0] }
 0x305   : > { %v2047_v29 = vadd.f32 %v8736_v45, %v2005_v27  ;;  %v9825_v20 = vpack.c.b16 %v2192_v30, %v2191_v49  ;;  %v9827_v48 = vpack.c.b16 %v2214_v39, %v2213_v14  ;;  %v2167_v25 = vunpack.c.l.b16 %v2109_v0  ;;  %v8737_v49 = vld [vmem:[#allocation2 + $0x38] sm:$0xff]  ;;  %v8088_v30 = vld [vmem:[#allocation13 + $0x324] sm:$0xf] }
 0x306   : > { %v6840_v27 = vor.u32 %v8090_v26, %v6837_v9  ;;  %v6928_v14 = vor.u32 %v8112_v42, %v6925_v41  ;;  %v6760_v32 = vor.u32 %v8070_v13, %v6757_v8  ;;  %v8086_v45 = vld [vmem:[#allocation13 + $0x314] sm:$0xf]  ;;  %v6832_v52 = vor.u32 %v8088_v30, %v6829_v47  ;;  %v8135_v0 = vld [vmem:[#allocation13 + $0x494] sm:$0xf0]  ;;  %v6821_v57 = vld [vmem:[#allocation13 + $0x318] sm:$0xf0] }
 0x307   : > { %v2055_v11 = vmul.f32 %v9496_v50, %v2047_v29  ;;  %2798 = vmatmul.bf16.gmra.mxu3 %v9825_v20  ;;  %2822 = vmatmul.bf16.vlgmr.msra.gmra.mxu0 %v9827_v48  ;;  %v8110_v29 = vld [vmem:[#allocation13 + $0x3d4] sm:$0xf]  ;;  %v8084_v26 = vld [vmem:[#allocation13 + $0x304] sm:$0xf]  ;;  %v6813_v9 = vld [vmem:[#allocation13 + $0x308] sm:$0xf0] }
 0x308   : > { %v2086_v43 = vld [vmem:[#allocation2 + $0x24] sm:$0xff]  ;;  %2905 = vmatpush.bf16.msrb.mxu3 %v6840_v27  ;;  %2931 = vmatpush.bf16.msrb.mxu0 %v6928_v14  ;;  %v6920_v55 = vor.u32 %v8110_v29, %v6917_v46 }
 0x309   : > { %v2102_v4 = vld [vmem:[#allocation2 + $0x26] sm:$0xff]  ;;  %2079 = vst [vmem:[#allocation2 + $0x30] sm:$0xff] %v2055_v11  ;;  %v2094_v61 = vpack.c.bf16 %v2086_v43, %v2086_v43  ;;  %v2071_v37 = vpack.c.bf16 %v2055_v11, %v2055_v11  ;;  %v7011_v11 = vld [vmem:[#allocation13 + $0x490] sm:$0xf]  ;;  %2878 = vmatpush.bf16.msrb.mxu2 %v6760_v32  ;;  %v7003_v47 = vld [vmem:[#allocation13 + $0x480] sm:$0xf] }
 0x30a   : > { %v2110_v31 = vpack.c.bf16 %v2102_v4, %v2102_v4  ;;  %v2006_v22 = vpop.f32.mrf.mxu3  ;;  %v2117_v36 = vld [vmem:[#allocation2 + $0x22] sm:$0xff] }
 0x30b   : > { %v2007_v34 = vadd.f32 %v2006_v22, %v9802_v21  ;;  %v9835_v15 = vunpack.c.l.b16 %v2094_v61  ;;  %v2125_v16 = vpack.c.bf16 %v2117_v36, %v2117_v36  ;;  %v2193_v62 = vunpack.c.l.b16 %v2071_v37  ;;  %v8108_v61 = vld [vmem:[#allocation13 + $0x3c4] sm:$0xf] }
 0x30c   : > { %v2168_v12 = vunpack.c.l.b16 %v2110_v31  ;;  %v7012_v22 = vor.u32 %v8135_v0, %v7011_v11  ;;  %2906 = vmatpush.bf16.msrb.mxu3 %v6832_v52  ;;  %2932 = vmatpush.bf16.msrb.mxu0 %v6920_v55  ;;  %v6912_v42 = vor.u32 %v8108_v61, %v6909_v38  ;;  %v10778_v36 = vld [vmem:[#allocation35_spill] sm:$0xff]  ;;  %v6893_v52 = vld [vmem:[#allocation13 + $0x3a8] sm:$0xf0]  ;;  %v7061_v55 = vld [vmem:[#allocation13 + $0x4f8] sm:$0xf0] }
 0x30d   : > { %v2048_v6 = vadd.f32 %v8737_v49, %v2007_v34  ;;  %v9839_v3 = vpack.c.b16 %v9835_v15, %v9832_v56  ;;  %v2215_v51 = vunpack.c.l.b16 %v2125_v16  ;;  %v8068_v41 = vld [vmem:[#allocation13 + $0x284] sm:$0xf]  ;;  %v6749_v49 = vld [vmem:[#allocation13 + $0x288] sm:$0xf0]  ;;  %v6901_v16 = vld [vmem:[#allocation13 + $0x3b8] sm:$0xf0] }
 0x30e   : > { %v9841_v7 = vpack.c.b16 %v2168_v12, %v2167_v25  ;;  %v6824_v12 = vor.u32 %v8086_v45, %v6821_v57  ;;  %2849 = vmatpush.bf16.msra.mxu1 %v7012_v22  ;;  %v6752_v30 = vor.u32 %v8068_v41, %v6749_v49  ;;  %v8739_v0 = vld [vmem:[#allocation2 + $0x48] sm:$0xff]  ;;  %v8102_v22 = vld [vmem:[#allocation13 + $0x394] sm:$0xf] }
 0x30f   : > { %v2056_v39 = vmul.f32 %v9513_v1, %v2048_v6  ;;  %2740 = vmatmul.bf16.gmra.mxu1 %v9839_v3  ;;  %v8106_v6 = vld [vmem:[#allocation13 + $0x3b4] sm:$0xf]  ;;  %v7099_v1 = vld [vmem:[#allocation16 + $0xb0] sm:$0xf] }
 0x310   : > { %2769 = vmatmul.bf16.gmra.mxu2 %v9841_v7  ;;  %v2118_v44 = vld [vmem:[#allocation2 + $0x2a] sm:$0xff]  ;;  %2907 = vmatpush.bf16.msrb.mxu3 %v6824_v12  ;;  %v6904_v32 = vor.u32 %v8106_v6, %v6901_v16  ;;  %v6885_v12 = vld [vmem:[#allocation13 + $0x398] sm:$0xf0]  ;;  %v8100_v6 = vld [vmem:[#allocation13 + $0x384] sm:$0xf] }
 0x311   : > { %2080 = vst [vmem:[#allocation2 + $0x38] sm:$0xff] %v2056_v39  ;;  %v2072_v28 = vpack.c.bf16 %v2056_v39, %v2056_v39  ;;  %v2126_v58 = vpack.c.bf16 %v2118_v44, %v2118_v44  ;;  %v2087_v4 = vld [vmem:[#allocation2 + $0x2c] sm:$0xff]  ;;  %v6816_v44 = vor.u32 %v8084_v26, %v6813_v9  ;;  %2933 = vmatpush.bf16.msrb.mxu0 %v6912_v42  ;;  %v8130_v26 = vld [vmem:[#allocation13 + $0x474] sm:$0xf]  ;;  %v6997_v42 = vld [vmem:[#allocation13 + $0x478] sm:$0xf0] }
 0x312   : > { %v2009_v18 = vpop.f32.mrf.mxu3  ;;  %v2103_v31 = vld [vmem:[#allocation2 + $0x2e] sm:$0xff]  ;;  %v2095_v25 = vpack.c.bf16 %v2087_v4, %v2087_v4  ;;  %2879 = vmatpush.bf16.msrb.mxu2 %v6752_v30  ;;  %v6888_v9 = vor.u32 %v8102_v22, %v6885_v12  ;;  %v8126_v12 = vld [vmem:[#allocation13 + $0x454] sm:$0xf] }
 0x313   : > { %v2010_v40 = vadd.f32 %v2009_v18, %v9802_v21  ;;  %v2194_v53 = vunpack.c.l.b16 %v2072_v28  ;;  %v2216_v43 = vunpack.c.l.b16 %v2126_v58  ;;  %v2111_v24 = vpack.c.bf16 %v2103_v31, %v2103_v31  ;;  %v8133_v28 = vld [vmem:[#allocation13 + $0x484] sm:$0xf0]  ;;  %v8146_v31 = vld [vmem:[#allocation13 + $0x4f4] sm:$0xf] }
 0x314   : > { %v9854_v8 = vunpack.c.l.b16 %v2095_v25  ;;  %v7004_v11 = vor.u32 %v8133_v28, %v7003_v47  ;;  %2908 = vmatpush.bf16.msrb.mxu3 %v6816_v44  ;;  %v7053_v28 = vld [vmem:[#allocation13 + $0x4e8] sm:$0xf0] }
 0x315   : > { %v2049_v10 = vadd.f32 %v8738_v5, %v2010_v40  ;;  %v9847_v2 = vpack.c.b16 %v2194_v53, %v2193_v62  ;;  %v9849_v34 = vpack.c.b16 %v2216_v43, %v2215_v51  ;;  %v2169_v29 = vunpack.c.l.b16 %v2111_v24  ;;  %v8104_v62 = vld [vmem:[#allocation13 + $0x3a4] sm:$0xf]  ;;  %2934 = vmatpush.bf16.msrb.mxu0 %v6904_v32  ;;  %v10779_v43 = vld [vmem:[#allocation37_spill] sm:$0xff] }
 0x316   : > { %2850 = vmatpush.bf16.msra.mxu1 %v7004_v11  ;;  %v7064_v5 = vor.u32 %v8146_v31, %v7061_v55  ;;  %v8144_v32 = vld [vmem:[#allocation13 + $0x4e4] sm:$0xf]  ;;  %v6989_v11 = vld [vmem:[#allocation13 + $0x468] sm:$0xf0] }
 0x317   : > { %v2057_v33 = vmul.f32 %v10778_v36, %v2049_v10  ;;  %2803 = vmatmul.bf16.gmra.mxu3 %v9847_v2  ;;  %2827 = vmatmul.bf16.gmra.mxu0 %v9849_v34 }
 0x318   : > { %v2088_v37 = vld [vmem:[#allocation2 + $0x34] sm:$0xff]  ;;  %2988 = vmatpush.bf16.msra.mxu2 %v7064_v5 }
 0x319   : > { %v2104_v27 = vld [vmem:[#allocation2 + $0x36] sm:$0xff]  ;;  %2081 = vst [vmem:[#allocation2 + $0x40] sm:$0xff] %v2057_v33  ;;  %v2096_v14 = vpack.c.bf16 %v2088_v37, %v2088_v37  ;;  %v2073_v57 = vpack.c.bf16 %v2057_v33, %v2057_v33  ;;  %v6877_v37 = vld [vmem:[#allocation13 + $0x388] sm:$0xf0] }
 0x31a   : > { %v2112_v39 = vpack.c.bf16 %v2104_v27, %v2104_v27  ;;  %v2011_v13 = vpop.f32.mrf.mxu3  ;;  %v2119_v46 = vld [vmem:[#allocation2 + $0x32] sm:$0xff]  ;;  %v6880_v47 = vor.u32 %v8100_v6, %v6877_v37  ;;  %v8140_v6 = vld [vmem:[#allocation13 + $0x4c4] sm:$0xf]  ;;  %v7037_v37 = vld [vmem:[#allocation13 + $0x4c8] sm:$0xf0] }
 0x31b   : > { %v2012_v58 = vadd.f32 %v2011_v13, %v9802_v21  ;;  %v9857_v45 = vunpack.c.l.b16 %v2096_v14  ;;  %v6896_v21 = vor.u32 %v8104_v62, %v6893_v52  ;;  %v2127_v61 = vpack.c.bf16 %v2119_v46, %v2119_v46 }
 0x31c   : > { %v2170_v18 = vunpack.c.l.b16 %v2112_v39  ;;  %v2195_v24 = vunpack.c.l.b16 %v2073_v57  ;;  %v7000_v14 = vor.u32 %v8130_v26, %v6997_v42  ;;  %v7056_v62 = vor.u32 %v8144_v32, %v7053_v28  ;;  %v7029_v32 = vld [vmem:[#allocation13 + $0x4b8] sm:$0xf0]  ;;  %v8122_v28 = vld [vmem:[#allocation13 + $0x434] sm:$0xf] }
 0x31d   : > { %v2050_v40 = vadd.f32 %v8739_v0, %v2012_v58  ;;  %v9861_v53 = vpack.c.b16 %v9857_v45, %v9854_v8  ;;  %2935 = vmatpush.bf16.msrb.mxu0 %v6896_v21  ;;  %v2217_v49 = vunpack.c.l.b16 %v2127_v61  ;;  %v8128_v58 = vld [vmem:[#allocation13 + $0x464] sm:$0xf] }
 0x31e   : > { %v9863_v51 = vpack.c.b16 %v2170_v18, %v2169_v29  ;;  %2959 = vmatpush.bf16.msrb.mxu1 %v7000_v14  ;;  %2989 = vmatpush.bf16.msra.mxu2 %v7056_v62  ;;  %v6992_v21 = vor.u32 %v8128_v58, %v6989_v11  ;;  %v6973_v14 = vld [vmem:[#allocation13 + $0x448] sm:$0xf0]  ;;  %v8120_v62 = vld [vmem:[#allocation13 + $0x424] sm:$0xf] }
 0x31f   : > { %v2058_v4 = vmul.f32 %v10779_v43, %v2050_v40  ;;  %2745 = vmatmul.bf16.gmra.mxu1 %v9861_v53 }
 0x320   : > { %2774 = vmatmul.bf16.gmra.mxu2 %v9863_v51  ;;  %v2120_v38 = vld [vmem:[#allocation2 + $0x3a] sm:$0xff] }
 0x321   : > { %2082 = vst [vmem:[#allocation2 + $0x48] sm:$0xff] %v2058_v4  ;;  %v2074_v10 = vpack.c.bf16 %v2058_v4, %v2058_v4  ;;  %v2128_v25 = vpack.c.bf16 %v2120_v38, %v2120_v38  ;;  %v2089_v27 = vld [vmem:[#allocation2 + $0x3c] sm:$0xff]  ;;  %2936 = vmatpush.bf16.msrb.mxu0 %v6888_v9 }
 0x322   : > { %v2105_v30 = vld [vmem:[#allocation2 + $0x3e] sm:$0xff]  ;;  %v2097_v13 = vpack.c.bf16 %v2089_v27, %v2089_v27  ;;  %2960 = vmatpush.bf16.msrb.mxu1 %v6992_v21  ;;  %v8124_v27 = vld [vmem:[#allocation13 + $0x444] sm:$0xf]  ;;  %v8118_v21 = vld [vmem:[#allocation13 + $0x414] sm:$0xf] }
 0x323   : > { %v2196_v41 = vunpack.c.l.b16 %v2074_v10  ;;  %v2218_v33 = vunpack.c.l.b16 %v2128_v25  ;;  %v2113_v44 = vpack.c.bf16 %v2105_v30, %v2105_v30  ;;  %v8142_v10 = vld [vmem:[#allocation13 + $0x4d4] sm:$0xf]  ;;  %v7045_v25 = vld [vmem:[#allocation13 + $0x4d8] sm:$0xf0]  ;;  %v7040_v30 = vor.u32 %v8140_v6, %v7037_v37 }
 0x324   : > { %v9874_v4 = vunpack.c.l.b16 %v2097_v13  ;;  %v7048_v26 = vor.u32 %v8142_v10, %v7045_v25  ;;  %v6981_v9 = vld [vmem:[#allocation13 + $0x458] sm:$0xf0]  ;;  %v9894_v13 = vpack.c.b16 %v9832_v56, %v9814_v60  ;;  %v8136_v60 = vld [vmem:[#allocation13 + $0x4a4] sm:$0xf]  ;;  %v7021_v56 = vld [vmem:[#allocation13 + $0x4a8] sm:$0xf0] }
 0x325   : > { %v9868_v39 = vpack.c.b16 %v2196_v41, %v2195_v24  ;;  %v9870_v16 = vpack.c.b16 %v2218_v33, %v2217_v49  ;;  %2937 = vmatpush.bf16.msrb.mxu0 %v6880_v47  ;;  %v2171_v61 = vunpack.c.l.b16 %v2113_v44  ;;  %v6984_v41 = vor.u32 %v8126_v12, %v6981_v9  ;;  %v9888_v33 = vpop.f32.mrf.mxu0  ;;  %v8138_v44 = vld [vmem:[#allocation13 + $0x4b4] sm:$0xf]  ;;  %v7005_v10 = vld [vmem:[#allocation13 + $0x488] sm:$0xf0] }
 0x326   : > { %2990 = vmatpush.bf16.msra.mxu2 %v7048_v26  ;;  %v6976_v47 = vor.u32 %v8124_v27, %v6973_v14  ;;  %v7032_v58 = vor.u32 %v8138_v44, %v7029_v32  ;;  %v2233_v12 = vpack.c.b16 %v9874_v4, %v9857_v45 }
 0x327   : > { %2808 = vmatmul.bf16.gmra.mxu3 %v9868_v39  ;;  %2832 = vmatmul.bf16.gmra.mxu0 %v9870_v16 }
 0x328   : > { %v2090_v29 = vld [vmem:[#allocation2 + $0x44] sm:$0xff]  ;;  %2961 = vmatpush.bf16.msrb.mxu1 %v6984_v41  ;;  %v2131_v9 = vld [vmem:[#allocation2 + $0x4c] sm:$0xff] }
 0x329   : > { %v2106_v18 = vld [vmem:[#allocation2 + $0x46] sm:$0xff]  ;;  %v2098_v52 = vpack.c.bf16 %v2090_v29, %v2090_v29  ;;  %v6965_v29 = vld [vmem:[#allocation13 + $0x438] sm:$0xf0] }
 0x32a   : > { %v2114_v46 = vpack.c.bf16 %v2106_v18, %v2106_v18  ;;  %v2121_v0 = vld [vmem:[#allocation2 + $0x42] sm:$0xff]  ;;  %v2122_v40 = vld [vmem:[#allocation2 + $0x4a] sm:$0xff]  ;;  %2991 = vmatpush.bf16.msra.mxu2 %v7040_v30  ;;  %v6968_v18 = vor.u32 %v8122_v28, %v6965_v29 }
 0x32b   : > { %v9876_v57 = vunpack.c.l.b16 %v2098_v52  ;;  %v2129_v38 = vpack.c.bf16 %v2121_v0, %v2121_v0  ;;  %v2130_v5 = vpack.c.bf16 %v2122_v40, %v2122_v40  ;;  %v7024_v52 = vor.u32 %v8136_v60, %v7021_v56  ;;  %v8134_v40 = vld [vmem:[#allocation13 + $0x494] sm:$0xf] }
 0x32c   : > { %v2172_v31 = vunpack.c.l.b16 %v2114_v46  ;;  %2962 = vmatpush.bf16.msrb.mxu1 %v6976_v47  ;;  %v6957_v46 = vld [vmem:[#allocation13 + $0x428] sm:$0xf0]  ;;  %v2232_v0 = vpack.c.b16 %v9854_v8, %v9835_v15  ;;  %v8116_v8 = vld [vmem:[#allocation13 + $0x404] sm:$0xf] }
 0x32d   : > { %v9880_v55 = vpack.c.b16 %v9876_v57, %v9874_v4  ;;  %v2219_v42 = vunpack.c.l.b16 %v2129_v38  ;;  %v2220_v24 = vunpack.c.l.b16 %v2130_v5  ;;  %v8132_v5 = vld [vmem:[#allocation13 + $0x484] sm:$0xf] }
 0x32e   : > { %v9882_v22 = vpack.c.b16 %v2172_v31, %v2171_v61  ;;  %2992 = vmatpush.bf16.msra.mxu2 %v7032_v58  ;;  %v6949_v61 = vld [vmem:[#allocation13 + $0x418] sm:$0xf0]  ;;  %v7008_v15 = vor.u32 %v8132_v5, %v7005_v10 }
 0x32f   : > { %2750 = vmatmul.bf16.gmra.mxu1 %v9880_v55  ;;  %v9886_v49 = vpack.c.b16 %v2220_v24, %v2219_v42  ;;  %v6952_v31 = vor.u32 %v8118_v21, %v6949_v61 }
 0x330   : > { %2779 = vmatmul.bf16.gmra.mxu2 %v9882_v22  ;;  %2963 = vmatpush.bf16.msrb.mxu1 %v6968_v18 }
 0x332   : > { %2993 = vmatpush.bf16.msra.mxu2 %v7024_v52 }
 0x337   : > { %2837 = vmatmul.bf16.gmra.mxu0 %v9886_v49  ;;  %2909 = vmatmul.bf16.vlgmr.msrb.gmra.mxu3 %v9819_v63  ;;  %v9898_v63 = vpop.f32.mrf.mxu0 }
 0x338   : > { %10780 = vst [vmem:[#allocation38_spill] sm:$0xff] %v9898_v63  ;;  %v8156_v63 = vld [vmem:[#allocation16 + $0xc4] sm:$0xf] }
 0x33f   : > { %2851 = vmatmul.bf16.vlgmr.msra.gmra.mxu1 %v9894_v13  ;;  %v9902_v11 = vpop.f32.mrf.mxu0 }
 0x340   : > { %2880 = vmatmul.bf16.vlgmr.msrb.gmra.mxu2 %v9817_v19  ;;  %v6960_v19 = vor.u32 %v8120_v62, %v6957_v46 }
 0x342   : > { %2964 = vmatpush.bf16.msrb.mxu1 %v6960_v19 }
 0x346   : > { %2965 = vmatpush.bf16.msrb.mxu1 %v6952_v31 }
 0x347   : > { %2914 = vmatmul.bf16.gmra.mxu3 %v9841_v7  ;;  %2938 = vmatmul.bf16.vlgmr.msrb.gmra.mxu0 %v9809_v23  ;;  %v7013_v7 = vld [vmem:[#allocation13 + $0x498] sm:$0xf0]  ;;  %v9907_v38 = vpop.f32.mrf.mxu0 }
 0x348   : > { %v7016_v23 = vor.u32 %v8134_v40, %v7013_v7  ;;  %10781 = vst [vmem:[#allocation39_spill] sm:$0xff] %v9907_v38  ;;  %v7107_v38 = vld [vmem:[#allocation16 + $0xc0] sm:$0xf] }
 0x34a   : > { %2994 = vmatpush.bf16.msra.mxu2 %v7016_v23 }
 0x34e   : > { %2995 = vmatpush.bf16.msra.mxu2 %v7008_v15 }
 0x34f   : > { %2856 = vmatmul.bf16.gmra.mxu1 %v2232_v0  ;;  %v9913_v26 = vpop.f32.mrf.mxu0 }
 0x350   : > { %2885 = vmatmul.bf16.gmra.mxu2 %v9839_v3  ;;  %v6941_v3 = vld [vmem:[#allocation13 + $0x408] sm:$0xf0] }
 0x351   : > { %v6944_v25 = vor.u32 %v8116_v8, %v6941_v3 }
 0x353   : > { %2966 = vmatpush.bf16.msrb.mxu1 %v6944_v25 }
 0x357   : > { %2919 = vmatmul.bf16.gmra.mxu3 %v9863_v51  ;;  %2943 = vmatmul.bf16.gmra.mxu0 %v9825_v20  ;;  %v2132_v51 = vpack.c.bf16 %v2131_v9, %v2131_v9  ;;  %v9918_v20 = vpop.f32.mrf.mxu0 }
 0x358   : > { %10782 = vst [vmem:[#allocation40_spill] sm:$0xff] %v9918_v20 }
 0x359   : > { %v2230_v42 = vunpack.c.l.b16 %v2132_v51 }
 0x35b   : > { %v2234_v24 = vpack.c.b16 %v2230_v42, %v9876_v57 }
 0x35f   : > { %2861 = vmatmul.bf16.gmra.mxu1 %v2233_v12  ;;  %v9922_v45 = vpop.f32.mrf.mxu0 }
 0x360   : > { %2890 = vmatmul.bf16.gmra.mxu2 %v9861_v53  ;;  %10783 = vst [vmem:[#allocation41_spill] sm:$0xff] %v9922_v45  ;;  %v9925_v53 = vld [vmem:[#allocation14 + $0x2] sm:$0x3] }
 0x361   : > { %v8155_v45 = vld [vmem:[#allocation16 + $0xb4] sm:$0xf0] }
 0x362   : > { %v7100_v50 = vor.u32 %v8155_v45, %v7099_v1  ;;  %v7083_v45 = vld [vmem:[#allocation16 + $0x90] sm:$0xf] }
 0x367   : > { %2924 = vmatmul.bf16.gmra.mxu3 %v9882_v22  ;;  %2948 = vmatmul.bf16.gmra.mxu0 %v9847_v2  ;;  %v9927_v41 = vpop.f32.mrf.mxu0  ;;  %v9930_v2 = vperm.slane %v9925_v53, 0 }
 0x368   : > { %10784 = vst [vmem:[#allocation42_spill] sm:$0xff] %v9927_v41 }
 0x36f   : > { %2866 = vmatmul.bf16.gmra.mxu1 %v2234_v24 }
 0x370   : > { %2895 = vmatmul.bf16.gmra.mxu2 %v9880_v55 }
 0x377   : > { %2953 = vmatmul.bf16.gmra.mxu0 %v9868_v39 }
 0x37a   : > { %v2794_v4 = vpop.f32.mrf.mxu3 }
 0x37c   : > { %v2736_v22 = vpop.f32.mrf.mxu1 }
 0x37d   : > { %v2737_v57 = vadd.f32 %v2736_v22, %v9930_v2 }
 0x37f   : > { %2967 = vmatmul.bf16.vlgmr.msrb.gmra.mxu1 %v9827_v48 }
 0x380   : > { %2996 = vmatmul.bf16.vlgmr.msra.gmra.mxu2 %v9894_v13 }
 0x382   : > { %v9935_v6 = vpop.f32.mrf.mxu3 }
 0x383   : > { %v2765_v55 = vpop.f32.mrf.mxu2 }
 0x384   : > { %v2766_v37 = vadd.f32 %v2765_v55, %v2737_v57  ;;  %v9937_v39 = vpop.f32.mrf.mxu1  ;;  %v2823_v27 = vpop.f32.mrf.mxu0 }
 0x386   : > { %v2795_v30 = vadd.f32 %v2794_v4, %v2766_v37 }
 0x388   : > { %v2824_v14 = vadd.f32 %v2823_v27, %v2795_v30 }
 0x38a   : > { %v2799_v44 = vpop.f32.mrf.mxu3 }
 0x38b   : > { %v9939_v47 = vpop.f32.mrf.mxu2 }
 0x38c   : > { %v2741_v32 = vpop.f32.mrf.mxu1  ;;  %v9941_v28 = vpop.f32.mrf.mxu0 }
 0x38d   : > { %v2742_v48 = vadd.f32 %v2741_v32, %v9930_v2  ;;  %v8163_v32 = vld [vmem:[#allocation16 + $0xf4] sm:$0xf0] }
 0x38f   : > { %2972 = vmatmul.bf16.gmra.mxu1 %v9849_v34 }
 0x390   : > { %3001 = vmatmul.bf16.gmra.mxu2 %v2232_v0 }
 0x392   : > { %v9947_v56 = vpop.f32.mrf.mxu3 }
 0x393   : > { %v2770_v13 = vpop.f32.mrf.mxu2 }
 0x394   : > { %v2771_v58 = vadd.f32 %v2770_v13, %v2742_v48  ;;  %v9945_v29 = vpop.f32.mrf.mxu1  ;;  %v2828_v18 = vpop.f32.mrf.mxu0 }
 0x396   : > { %v2800_v60 = vadd.f32 %v2799_v44, %v2771_v58  ;;  %v7131_v44 = vld [vmem:[#allocation16 + $0xf0] sm:$0xf] }
 0x397   : > { %v7132_v48 = vor.u32 %v8163_v32, %v7131_v44  ;;  %v9998_v44 = vperm.slane %v9925_v53, 1 }
 0x398   : > { %v2829_v62 = vadd.f32 %v2828_v18, %v2800_v60  ;;  %v7123_v18 = vld [vmem:[#allocation16 + $0xe0] sm:$0xf]  ;;  %v8161_v60 = vld [vmem:[#allocation16 + $0xe4] sm:$0xf0] }
 0x399   : > { %3293 = vmatpush.bf16.msra.mxu3 %v7132_v48 }
 0x39a   : > { %v2804_v34 = vpop.f32.mrf.mxu3 }
 0x39b   : > { %v9949_v52 = vpop.f32.mrf.mxu2 }
 0x39c   : > { %v2746_v46 = vpop.f32.mrf.mxu1  ;;  %v9951_v19 = vpop.f32.mrf.mxu0 }
 0x39d   : > { %v2747_v0 = vadd.f32 %v2746_v46, %v9930_v2  ;;  %v7124_v46 = vor.u32 %v8161_v60, %v7123_v18  ;;  %v8160_v60 = vld [vmem:[#allocation16 + $0xe4] sm:$0xf] }
 0x39f   : > { %2977 = vmatmul.bf16.gmra.mxu1 %v9870_v16  ;;  %3294 = vmatpush.bf16.msra.mxu3 %v7124_v46  ;;  %v7125_v46 = vld [vmem:[#allocation16 + $0xe8] sm:$0xf0] }
 0x3a0   : > { %3006 = vmatmul.bf16.gmra.mxu2 %v2233_v12 }
 0x3a2   : > { %v9957_v5 = vpop.f32.mrf.mxu3 }
 0x3a3   : > { %v2775_v40 = vpop.f32.mrf.mxu2 }
 0x3a4   : > { %v2776_v7 = vadd.f32 %v2775_v40, %v2747_v0  ;;  %v9955_v21 = vpop.f32.mrf.mxu1  ;;  %v2833_v23 = vpop.f32.mrf.mxu0  ;;  %v7115_v40 = vld [vmem:[#allocation16 + $0xd0] sm:$0xf] }
 0x3a6   : > { %v2805_v61 = vadd.f32 %v2804_v34, %v2776_v7 }
 0x3a8   : > { %v2834_v31 = vadd.f32 %v2833_v23, %v2805_v61 }
 0x3aa   : > { %v2809_v12 = vpop.f32.mrf.mxu3 }
 0x3ab   : > { %v9959_v10 = vpop.f32.mrf.mxu2 }
 0x3ac   : > { %v2751_v15 = vpop.f32.mrf.mxu1  ;;  %v9961_v8 = vpop.f32.mrf.mxu0 }
 0x3ad   : > { %v2752_v16 = vadd.f32 %v2751_v15, %v9930_v2 }
 0x3af   : > { %2982 = vmatmul.bf16.gmra.mxu1 %v9886_v49 }
 0x3b0   : > { %3011 = vmatmul.bf16.gmra.mxu2 %v2234_v24 }
 0x3b2   : > { %v9983_v23 = vpop.f32.mrf.mxu3 }
 0x3b3   : > { %v2780_v3 = vpop.f32.mrf.mxu2 }
 0x3b4   : > { %v2781_v25 = vadd.f32 %v2780_v3, %v2752_v16  ;;  %v9965_v9 = vpop.f32.mrf.mxu1  ;;  %v2838_v42 = vpop.f32.mrf.mxu0 }
 0x3b6   : > { %v2810_v51 = vadd.f32 %v2809_v12, %v2781_v25 }
 0x3b8   : > { %v2839_v4 = vadd.f32 %v2838_v42, %v2810_v51 }
 0x3ba   : > { %v2910_v25 = vpop.f32.mrf.mxu3 }
 0x3bb   : > { %v9967_v22 = vpop.f32.mrf.mxu2 }
 0x3bc   : > { %v2852_v57 = vpop.f32.mrf.mxu1  ;;  %v9989_v16 = vpop.f32.mrf.mxu0 }
 0x3bd   : > { %v9969_v55 = vadd.f32 %v2852_v57, %v2824_v14  ;;  %v8162_v57 = vld [vmem:[#allocation16 + $0xf4] sm:$0xf] }
 0x3c2   : > { %v2912_v18 = vpop.f32.mrf.mxu3 }
 0x3c3   : > { %v2881_v37 = vpop.f32.mrf.mxu2 }
 0x3c4   : > { %v9971_v27 = vpop.f32.mrf.mxu1 }
 0x3cb   : > { %v2883_v49 = vpop.f32.mrf.mxu2 }
 0x3cc   : > { %v2857_v24 = vpop.f32.mrf.mxu1  ;;  %v2884_v36 = vadd.f32 %v2883_v49, %v9998_v44  ;;  %v8153_v49 = vld [vmem:[#allocation16 + $0xa4] sm:$0xf0] }
 0x3cd   : > { %v9973_v30 = vadd.f32 %v2857_v24, %v2829_v62  ;;  %v8159_v62 = vld [vmem:[#allocation16 + $0xd4] sm:$0xf0]  ;;  %v7133_v24 = vld [vmem:[#allocation16 + $0xf8] sm:$0xf0] }
 0x3ce   : > { %v7116_v7 = vor.u32 %v8159_v62, %v7115_v40  ;;  %v7136_v32 = vor.u32 %v8162_v57, %v7133_v24  ;;  %v7128_v40 = vor.u32 %v8160_v60, %v7125_v46  ;;  %v8157_v57 = vld [vmem:[#allocation16 + $0xc4] sm:$0xf0] }
 0x3cf   : > { %v7108_v24 = vor.u32 %v8157_v57, %v7107_v38 }
 0x3d0   : > { %3295 = vmatpush.bf16.msra.mxu3 %v7116_v7  ;;  %3322 = vmatpush.bf16.msra.mxu0 %v7136_v32  ;;  %v8158_v7 = vld [vmem:[#allocation16 + $0xd4] sm:$0xf]  ;;  %v7109_v32 = vld [vmem:[#allocation16 + $0xc8] sm:$0xf0] }
 0x3d1   : > { %v7112_v60 = vor.u32 %v8156_v63, %v7109_v32  ;;  %v8152_v63 = vld [vmem:[#allocation16 + $0xa4] sm:$0xf] }
 0x3d3   : > { %v9975_v13 = vpop.f32.mrf.mxu2 }
 0x3d4   : > { %v9977_v58 = vpop.f32.mrf.mxu1  ;;  %3323 = vmatpush.bf16.msra.mxu0 %v7128_v40  ;;  %3296 = vmatpush.bf16.msra.mxu3 %v7108_v24  ;;  %v7093_v24 = vld [vmem:[#allocation16 + $0xa8] sm:$0xf0] }
 0x3d8   : > { %3297 = vmatpush.bf16.msra.mxu3 %v7100_v50  ;;  %v8150_v50 = vld [vmem:[#allocation16 + $0x94] sm:$0xf] }
 0x3db   : > { %v9979_v14 = vpop.f32.mrf.mxu2 }
 0x3dc   : > { %v2862_v34 = vpop.f32.mrf.mxu1 }
 0x3dd   : > { %v9981_v0 = vadd.f32 %v2862_v34, %v2834_v31  ;;  %v2939_v31 = vpop.f32.mrf.mxu0  ;;  %v2882_v34 = vadd.f32 %v2881_v37, %v9998_v44  ;;  %v2915_v37 = vpop.f32.mrf.mxu3 }
 0x3df   : > { %v2911_v41 = vadd.f32 %v2910_v25, %v2882_v34  ;;  %v8154_v25 = vld [vmem:[#allocation16 + $0xb4] sm:$0xf]  ;;  %v2913_v34 = vadd.f32 %v2912_v18, %v2884_v36  ;;  %v7096_v36 = vor.u32 %v8152_v63, %v7093_v24  ;;  %v2889_v63 = vadd.f32 %v9979_v14, %v9998_v44 }
 0x3e1   : > { %v2940_v43 = vadd.f32 %v2939_v31, %v2911_v41  ;;  %v7091_v41 = vld [vmem:[#allocation16 + $0xa0] sm:$0xf] }
 0x3e3   : > { %v9985_v61 = vpop.f32.mrf.mxu2 }
 0x3e4   : > { %v9987_v15 = vpop.f32.mrf.mxu1 }
 0x3e5   : > { %v2917_v18 = vpop.f32.mrf.mxu3 }
 0x3eb   : > { %v9991_v3 = vpop.f32.mrf.mxu2 }
 0x3ec   : > { %v2867_v12 = vpop.f32.mrf.mxu1 }
 0x3ed   : > { %v9993_v51 = vadd.f32 %v2867_v12, %v2839_v4  ;;  %v2941_v4 = vpop.f32.mrf.mxu0  ;;  %v7117_v12 = vld [vmem:[#allocation16 + $0xd8] sm:$0xf0] }
 0x3ee   : > { %v7120_v20 = vor.u32 %v8158_v7, %v7117_v12  ;;  %v2942_v31 = vadd.f32 %v2941_v4, %v2913_v34 }
 0x3f0   : > { %3324 = vmatpush.bf16.msra.mxu0 %v7120_v20  ;;  %v7101_v20 = vld [vmem:[#allocation16 + $0xb8] sm:$0xf0] }
 0x3f1   : > { %v7104_v57 = vor.u32 %v8154_v25, %v7101_v20 }
 0x3f3   : > { %v9995_v42 = vpop.f32.mrf.mxu2 }
 0x3f4   : > { %v10000_v48 = vpop.f32.mrf.mxu1  ;;  %3325 = vmatpush.bf16.msra.mxu0 %v7112_v60  ;;  %v8151_v60 = vld [vmem:[#allocation16 + $0x94] sm:$0xf0] }
 0x3f5   : > { %v2944_v7 = vpop.f32.mrf.mxu0  ;;  %v7084_v25 = vor.u32 %v8151_v60, %v7083_v45  ;;  %v2920_v45 = vpop.f32.mrf.mxu3  ;;  %v2918_v60 = vadd.f32 %v2917_v18, %v2889_v63 }
 0x3f8   : > { %3326 = vmatpush.bf16.msra.mxu0 %v7104_v57 }
 0x3fb   : > { %v10003_v62 = vpop.f32.mrf.mxu2 }
 0x3fc   : > { %v2968_v53 = vpop.f32.mrf.mxu1  ;;  %3327 = vmatpush.bf16.msra.mxu0 %v7096_v36 }
 0x3fd   : > { %v2969_v46 = vadd.f32 %v2968_v53, %v2940_v43  ;;  %v2887_v43 = vadd.f32 %v9975_v13, %v9998_v44  ;;  %v7092_v53 = vor.u32 %v8153_v49, %v7091_v41  ;;  %v2946_v13 = vpop.f32.mrf.mxu0  ;;  %v7075_v41 = vld [vmem:[#allocation16 + $0x80] sm:$0xf]  ;;  %v8149_v49 = vld [vmem:[#allocation16 + $0x84] sm:$0xf0] }
 0x3ff   : > { %3298 = vmatpush.bf16.msra.mxu3 %v7092_v53  ;;  %v2739_v53 = vadd.f32 %v9937_v39, %v9930_v2  ;;  %v2892_v39 = vadd.f32 %v9985_v61, %v9998_v44 }
 0x403   : > { %v2997_v40 = vpop.f32.mrf.mxu2  ;;  %3299 = vmatpush.bf16.msra.mxu3 %v7084_v25 }
 0x404   : > { %v2998_v12 = vadd.f32 %v2997_v40, %v2969_v46  ;;  %v2970_v38 = vpop.f32.mrf.mxu1  ;;  %v2916_v46 = vadd.f32 %v2915_v37, %v2887_v43  ;;  %v8148_v37 = vld [vmem:[#allocation16 + $0x84] sm:$0xf]  ;;  %v7077_v43 = vld [vmem:[#allocation16 + $0x88] sm:$0xf0] }
 0x405   : > { %v2971_v32 = vadd.f32 %v2970_v38, %v2942_v31  ;;  %v7076_v31 = vor.u32 %v8149_v49, %v7075_v41  ;;  %v7080_v36 = vor.u32 %v8148_v37, %v7077_v43  ;;  %v2921_v41 = vadd.f32 %v2920_v45, %v2892_v39 }
 0x406   : > { %v7065_v59 = vmul.f32 -1.442695, %v2998_v12  ;;  %v7085_v12 = vld [vmem:[#allocation16 + $0x98] sm:$0xf0]  ;;  %v2945_v38 = vadd.f32 %v2944_v7, %v2916_v46 }
 0x407   : > { %v7088_v34 = vor.u32 %v8150_v50, %v7085_v12  ;;  %3300 = vmatpush.bf16.msra.mxu3 %v7076_v31 }
 0x408   : > { %8572 = vpow2.f32 %v7065_v59 }
 0x409   : > { %3328 = vmatpush.bf16.msra.mxu0 %v7088_v34  ;;  %v2949_v34 = vpop.f32.mrf.mxu0 }
 0x40b   : > { %v2999_v1 = vpop.f32.mrf.mxu2 }
 0x40c   : > { %v3000_v40 = vadd.f32 %v2999_v1, %v2971_v32  ;;  %v2973_v4 = vpop.f32.mrf.mxu1  ;;  %v2768_v32 = vadd.f32 %v9939_v47, %v2739_v53  ;;  %v2922_v53 = vpop.f32.mrf.mxu3 }
 0x40d   : > { %v2974_v24 = vadd.f32 %v2973_v4, %v2945_v38  ;;  %3329 = vmatpush.bf16.msra.mxu0 %v7080_v36  ;;  %v2947_v4 = vadd.f32 %v2946_v13, %v2918_v60  ;;  %v2744_v13 = vadd.f32 %v9945_v29, %v9930_v2 }
 0x40e   : > { %v8573_v20 = vpop.eup %8572  ;;  %v7066_v59 = vmul.f32 -1.442695, %v3000_v40  ;;  %v2797_v25 = vadd.f32 %v9935_v6, %v2768_v32  ;;  %v2894_v32 = vadd.f32 %v9991_v3, %v9998_v44 }
 0x40f   : > { %v3049_v57 = vadd.f32 1.0, %v8573_v20 }
 0x410   : > { %8574 = vpow2.f32 %v7066_v59  ;;  %v2826_v59 = vadd.f32 %v9941_v28, %v2797_v25  ;;  %v2923_v3 = vadd.f32 %v2922_v53, %v2894_v32 }
 0x411   : > { %8576 = vrcp.f32 %v3049_v57  ;;  %v3068_v49 = vand.u32 2147483648, %v3049_v57  ;;  %v3066_v61 = vand.u32 2147483647, %v3049_v57  ;;  %vm3062_vm9 = vweird.f32 %v3049_v57 }
 0x412   : > { %v2855_v43 = vadd.f32 %v9971_v27, %v2826_v59 }
 0x413   : > { %v3002_v1 = vpop.f32.mrf.mxu2  ;;  %vm3067_vm11 = vcmp.eq.f32.partialorder %v3066_v61, 8.507059e+37 }
 0x414   : > { %v3003_v7 = vadd.f32 %v3002_v1, %v2974_v24  ;;  %v2975_v50 = vpop.f32.mrf.mxu1  ;;  %v3069_v1 = vor.u32 1.1754944e-38, %v3068_v49 }
 0x415   : > { %v2976_v18 = vadd.f32 %v2975_v50, %v2947_v4  ;;  %v2951_v50 = vpop.f32.mrf.mxu0 }
 0x416   : > { %v8575_v14 = vpop.eup %8574  ;;  %v7067_v46 = vmul.f32 -1.442695, %v3003_v7 }
 0x417   : > { %v8577_v40 = vpop.eup %8576  ;;  %v10016_v12 = vadd.f32 1.0, %v8575_v14 }
 0x418   : > { %v3058_v20 = vmul.f32 %v8577_v40, %v3049_v57  ;;  %8578 = vpow2.f32 %v7067_v46  ;;  %vm3063_vm8 = vweird.f32 %v8577_v40  ;;  %v2773_v57 = vadd.f32 %v9949_v52, %v2744_v13  ;;  %v2925_v13 = vpop.f32.mrf.mxu3 }
 0x419   : > { %8580 = vrcp.f32 %v10016_v12  ;;  %vm3064_vm10 = vmor %vm3062_vm9, %vm3063_vm8  ;;  %v3083_v39 = vand.u32 2147483648, %v10016_v12  ;;  %vm3077_vm13 = vweird.f32 %v10016_v12 }
 0x41a   : > { %v3059_v47 = vsub.f32 1.0, %v3058_v20  ;;  %8582 = vtanh.f32 %v9969_v55  ;;  %v2950_v55 = vadd.f32 %v2949_v34, %v2921_v41  ;;  %v3081_v20 = vand.u32 2147483647, %v10016_v12 }
 0x41b   : > { %v3004_v6 = vpop.f32.mrf.mxu2  ;;  %v2802_v59 = vadd.f32 %v9947_v56, %v2773_v57  ;;  %v3084_v61 = vor.u32 1.1754944e-38, %v3083_v39 }
 0x41c   : > { %v3060_v38 = vmul.f32 %v8577_v40, %v3059_v47  ;;  %v3005_v63 = vadd.f32 %v3004_v6, %v2976_v18  ;;  %v2978_v31 = vpop.f32.mrf.mxu1  ;;  %v2952_v6 = vadd.f32 %v2951_v50, %v2923_v3  ;;  %vm3082_vm15 = vcmp.eq.f32.partialorder %v3081_v20, 8.507059e+37 }
 0x41d   : > { %v2979_v46 = vadd.f32 %v2978_v31, %v2950_v55  ;;  %v2899_v3 = vadd.f32 %v10003_v62, %v9998_v44 }
 0x41e   : > { %v8579_v37 = vpop.eup %8578  ;;  %v3061_v24 = vadd.f32 %v8577_v40, %v3060_v38  ;;  %v7068_v28 = vmul.f32 -1.442695, %v3005_v63  ;;  %v2897_v38 = vadd.f32 %v9995_v42, %v9998_v44  ;;  %v2749_v44 = vadd.f32 %v9955_v21, %v9930_v2 }
 0x41f   : > { %v8581_v36 = vpop.eup %8580  ;;  %v10026_v45 = vadd.f32 1.0, %v8579_v37 }
 0x420   : > { %v3073_v29 = vmul.f32 %v8581_v36, %v10016_v12  ;;  %8584 = vpow2.f32 %v7068_v28  ;;  %v3065_v60 = vsel %vm3064_vm10, %v8577_v40, %v3061_v24  ;;  %v8583_v7 = vpop.eup %8582  ;;  %vm3078_vm12 = vweird.f32 %v8581_v36 }
 0x421   : > { %8586 = vrcp.f32 %v10026_v45  ;;  %v3070_v27 = vsel %vm3067_vm11, %v3069_v1, %v3065_v60  ;;  %vm3079_vm14 = vmor %vm3077_vm13, %vm3078_vm12  ;;  %v2926_v42 = vadd.f32 %v2925_v13, %v2897_v38  ;;  %v3096_v32 = vand.u32 2147483647, %v10026_v45 }
 0x422   : > { %v3074_v14 = vsub.f32 1.0, %v3073_v29  ;;  %v3177_v25 = vmul.f32 %v8583_v7, %v3070_v27  ;;  %8588 = vtanh.f32 %v2855_v43  ;;  %v2831_v43 = vadd.f32 %v9951_v19, %v2802_v59  ;;  %v2954_v29 = vpop.f32.mrf.mxu0 }
 0x423   : > { %v3007_v4 = vpop.f32.mrf.mxu2  ;;  %v3098_v1 = vand.u32 2147483648, %v10026_v45  ;;  %vm3092_vm1 = vweird.f32 %v10026_v45  ;;  %vm3097_vm3 = vcmp.eq.f32.partialorder %v3096_v32, 8.507059e+37  ;;  %v2778_v38 = vadd.f32 %v9959_v10, %v2749_v44  ;;  %v8177_v44 = vld [vmem:[#allocation13 + $0x564] sm:$0xf0] }
 0x424   : > { %v3075_v34 = vmul.f32 %v8581_v36, %v3074_v14  ;;  %v3008_v40 = vadd.f32 %v3007_v4, %v2979_v46  ;;  %v2980_v47 = vpop.f32.mrf.mxu1  ;;  %v2860_v19 = vadd.f32 %v9977_v58, %v2831_v43  ;;  %v2955_v46 = vadd.f32 %v2954_v29, %v2926_v42 }
 0x425   : > { %v2981_v24 = vadd.f32 %v2980_v47, %v2952_v6  ;;  %v2807_v10 = vadd.f32 %v9957_v5, %v2778_v38 }
 0x426   : > { %v8585_v18 = vpop.eup %8584  ;;  %v3076_v41 = vadd.f32 %v8581_v36, %v3075_v34  ;;  %v7069_v52 = vmul.f32 -1.442695, %v3008_v40  ;;  %v2927_v40 = vpop.f32.mrf.mxu3 }
 0x427   : > { %v8587_v49 = vpop.eup %8586  ;;  %v10037_v63 = vadd.f32 1.0, %v8585_v18  ;;  %v2928_v62 = vadd.f32 %v2927_v40, %v2899_v3 }
 0x428   : > { %v3088_v31 = vmul.f32 %v8587_v49, %v10026_v45  ;;  %8590 = vpow2.f32 %v7069_v52  ;;  %v3080_v37 = vsel %vm3079_vm14, %v8581_v36, %v3076_v41  ;;  %v8589_v56 = vpop.eup %8588  ;;  %vm3093_vm0 = vweird.f32 %v8587_v49 }
 0x429   : > { %8592 = vrcp.f32 %v10037_v63  ;;  %v3085_v12 = vsel %vm3082_vm15, %v3084_v61, %v3080_v37  ;;  %vm3094_vm2 = vmor %vm3092_vm1, %vm3093_vm0  ;;  %v3113_v41 = vand.u32 2147483648, %v10037_v63  ;;  %vm3107_vm5 = vweird.f32 %v10037_v63 }
 0x42a   : > { %v3089_v53 = vsub.f32 1.0, %v3088_v31  ;;  %v3178_v28 = vmul.f32 %v8589_v56, %v3085_v12  ;;  %8594 = vtanh.f32 %v9973_v30  ;;  %v2956_v13 = vpop.f32.mrf.mxu0 }
 0x42b   : > { %v3009_v55 = vpop.f32.mrf.mxu2  ;;  %v2957_v21 = vadd.f32 %v2956_v13, %v2928_v62 }
 0x42c   : > { %v3010_v36 = vadd.f32 %v3009_v55, %v2981_v24  ;;  %v3185_v60 = vpack.c.bf16 %v3178_v28, %v3177_v25  ;;  %v3090_v7 = vmul.f32 %v8587_v49, %v3089_v53  ;;  %v2983_v27 = vpop.f32.mrf.mxu1  ;;  %v3099_v25 = vor.u32 1.1754944e-38, %v3098_v1 }
 0x42d   : > { %v2984_v47 = vadd.f32 %v2983_v27, %v2955_v46  ;;  %v3114_v53 = vor.u32 1.1754944e-38, %v3113_v41 }
 0x42e   : > { %v8591_v57 = vpop.eup %8590  ;;  %v7070_v50 = vmul.f32 -1.442695, %v3010_v36  ;;  %3301 = vmatmul.bf16.vlgmr.msra.gmra.mxu3 %v3185_v60  ;;  %3330 = vmatmul.bf16.vlgmr.msra.gmra.mxu0 %v3185_v60  ;;  %v3091_v14 = vadd.f32 %v8587_v49, %v3090_v7 }
 0x42f   : > { %v8593_v30 = vpop.eup %8592  ;;  %v10049_v39 = vadd.f32 1.0, %v8591_v57 }
 0x430   : > { %v3103_v4 = vmul.f32 %v8593_v30, %v10037_v63  ;;  %8596 = vpow2.f32 %v7070_v50  ;;  %v3095_v34 = vsel %vm3094_vm2, %v8587_v49, %v3091_v14  ;;  %v8595_v58 = vpop.eup %8594  ;;  %vm3108_vm4 = vweird.f32 %v8593_v30 }
 0x431   : > { %8598 = vrcp.f32 %v10049_v39  ;;  %v3100_v20 = vsel %vm3097_vm3, %v3099_v25, %v3095_v34  ;;  %v3111_v49 = vand.u32 2147483647, %v10037_v63  ;;  %vm3109_vm6 = vmor %vm3107_vm5, %vm3108_vm4  ;;  %v3126_v36 = vand.u32 2147483647, %v10049_v39 }
 0x432   : > { %v3104_v45 = vsub.f32 1.0, %v3103_v4  ;;  %v3179_v18 = vmul.f32 %v8595_v58, %v3100_v20  ;;  %8600 = vtanh.f32 %v2860_v19  ;;  %v3128_v60 = vand.u32 2147483648, %v10049_v39  ;;  %v7195_v58 = vld [vmem:[#allocation13 + $0x570] sm:$0xf]  ;;  %v8179_v20 = vld [vmem:[#allocation13 + $0x574] sm:$0xf0] }
 0x433   : > { %v3012_v59 = vpop.f32.mrf.mxu2  ;;  %vm3112_vm7 = vcmp.eq.f32.partialorder %v3111_v49, 8.507059e+37  ;;  %v2836_v19 = vadd.f32 %v9961_v8, %v2807_v10  ;;  %vm3122_vm9 = vweird.f32 %v10049_v39  ;;  %vm3127_vm11 = vcmp.eq.f32.partialorder %v3126_v36, 8.507059e+37  ;;  %v8189_v10 = vld [vmem:[#allocation13 + $0x5c4] sm:$0xf0] }
 0x434   : > { %v3013_v52 = vadd.f32 %v3012_v59, %v2984_v47  ;;  %v3105_v6 = vmul.f32 %v8593_v30, %v3104_v45  ;;  %v2985_v43 = vpop.f32.mrf.mxu1  ;;  %v3129_v4 = vor.u32 1.1754944e-38, %v3128_v60  ;;  %v7251_v45 = vld [vmem:[#allocation13 + $0x5e0] sm:$0xf]  ;;  %v8193_v47 = vld [vmem:[#allocation13 + $0x5e4] sm:$0xf0]  ;;  %v7196_v41 = vor.u32 %v8179_v20, %v7195_v58 }
 0x435   : > { %v2986_v63 = vadd.f32 %v2985_v43, %v2957_v21  ;;  %v2865_v3 = vadd.f32 %v9987_v15, %v2836_v19  ;;  %v7187_v15 = vld [vmem:[#allocation13 + $0x560] sm:$0xf]  ;;  %v2754_v49 = vadd.f32 %v9965_v9, %v9930_v2  ;;  %v8173_v19 = vld [vmem:[#allocation13 + $0x544] sm:$0xf0] }
 0x436   : > { %v8597_v61 = vpop.eup %8596  ;;  %v7071_v31 = vmul.f32 -1.442695, %v3013_v52  ;;  %v3106_v37 = vadd.f32 %v8593_v30, %v3105_v6  ;;  %v7243_v52 = vld [vmem:[#allocation13 + $0x5d0] sm:$0xf]  ;;  %v8191_v6 = vld [vmem:[#allocation13 + $0x5d4] sm:$0xf0]  ;;  %4005 = vmatpush.bf16.msra.mxu1 %v7196_v41 }
 0x437   : > { %v8599_v56 = vpop.eup %8598  ;;  %v10059_v12 = vadd.f32 1.0, %v8597_v61  ;;  %v7252_v61 = vor.u32 %v8193_v47, %v7251_v45  ;;  %v2783_v21 = vadd.f32 %v9967_v22, %v2754_v49  ;;  %v7244_v43 = vor.u32 %v8191_v6, %v7243_v52  ;;  %v7235_v9 = vld [vmem:[#allocation13 + $0x5c0] sm:$0xf]  ;;  %v8209_v49 = vld [vmem:[#allocation13 + $0x664] sm:$0xf0] }
 0x438   : > { %v3118_v24 = vmul.f32 %v8599_v56, %v10049_v39  ;;  %8602 = vpow2.f32 %v7071_v31  ;;  %v3110_v28 = vsel %vm3109_vm6, %v8593_v30, %v3106_v37  ;;  %v8601_v42 = vpop.eup %8600  ;;  %vm3123_vm8 = vweird.f32 %v8599_v56  ;;  %v7259_v30 = vld [vmem:[#allocation13 + $0x5f0] sm:$0xf]  ;;  %v7315_v6 = vld [vmem:[#allocation13 + $0x660] sm:$0xf] }
 0x439   : > { %8604 = vrcp.f32 %v10059_v12  ;;  %v3115_v55 = vsel %vm3112_vm7, %v3114_v53, %v3110_v28  ;;  %vm3124_vm10 = vmor %vm3122_vm9, %vm3123_vm8  ;;  %v3143_v38 = vand.u32 2147483648, %v10059_v12  ;;  %v3141_v31 = vand.u32 2147483647, %v10059_v12  ;;  %v7179_v53 = vld [vmem:[#allocation13 + $0x550] sm:$0xf] }
 0x43a   : > { %v3119_v32 = vsub.f32 1.0, %v3118_v24  ;;  %v3180_v1 = vmul.f32 %v8601_v42, %v3115_v55  ;;  %8606 = vtanh.f32 %v9981_v0  ;;  %v8195_v0 = vld [vmem:[#allocation13 + $0x5f4] sm:$0xf0]  ;;  %v7188_v37 = vor.u32 %v8177_v44, %v7187_v15 }
 0x43b   : > { %v3014_v29 = vpop.f32.mrf.mxu2  ;;  %v7260_v34 = vor.u32 %v8195_v0, %v7259_v30  ;;  %v8175_v24 = vld [vmem:[#allocation13 + $0x554] sm:$0xf0]  ;;  %vm3137_vm13 = vweird.f32 %v10059_v12  ;;  %vm3142_vm15 = vcmp.eq.f32.partialorder %v3141_v31, 8.507059e+37  ;;  %v7307_v31 = vld [vmem:[#allocation13 + $0x650] sm:$0xf] }
 0x43c   : > { %v3015_v7 = vadd.f32 %v3014_v29, %v2986_v63  ;;  %v3186_v27 = vpack.c.bf16 %v3180_v1, %v3179_v18  ;;  %v3120_v57 = vmul.f32 %v8599_v56, %v3119_v32  ;;  %v8211_v28 = vld [vmem:[#allocation13 + $0x674] sm:$0xf0]  ;;  %v3144_v1 = vor.u32 1.1754944e-38, %v3143_v38  ;;  %4006 = vmatpush.bf16.msra.mxu1 %v7188_v37  ;;  %v7227_v38 = vld [vmem:[#allocation13 + $0x5b0] sm:$0xf] }
 0x43d   : > { %4034 = vmatpush.bf16.msrb.mxu2 %v7260_v34  ;;  %v7180_v36 = vor.u32 %v8175_v24, %v7179_v53  ;;  %v8207_v37 = vld [vmem:[#allocation13 + $0x654] sm:$0xf0] }
 0x43e   : > { %v8603_v5 = vpop.eup %8602  ;;  %v7072_v50 = vmul.f32 -1.442695, %v3015_v7  ;;  %3306 = vmatmul.bf16.gmra.mxu3 %v3186_v27  ;;  %3335 = vmatmul.bf16.gmra.mxu0 %v3186_v27  ;;  %v3121_v14 = vadd.f32 %v8599_v56, %v3120_v57  ;;  %v2812_v7 = vadd.f32 %v9983_v23, %v2783_v21  ;;  %v7236_v27 = vor.u32 %v8189_v10, %v7235_v9  ;;  %v7171_v57 = vld [vmem:[#allocation13 + $0x540] sm:$0xf]  ;;  %v8171_v53 = vld [vmem:[#allocation13 + $0x534] sm:$0xf0] }
 0x43f   : > { %v8605_v46 = vpop.eup %8604  ;;  %v10070_v25 = vadd.f32 1.0, %v8603_v5  ;;  %v7308_v21 = vor.u32 %v8207_v37, %v7307_v31  ;;  %v8169_v10 = vld [vmem:[#allocation13 + $0x524] sm:$0xf0] }
 0x440   : > { %v3133_v8 = vmul.f32 %v8605_v46, %v10059_v12  ;;  %8608 = vpow2.f32 %v7072_v50  ;;  %v3125_v40 = vsel %vm3124_vm10, %v8599_v56, %v3121_v14  ;;  %v8607_v39 = vpop.eup %8606  ;;  %vm3138_vm12 = vweird.f32 %v8605_v46  ;;  %v7323_v56 = vld [vmem:[#allocation13 + $0x670] sm:$0xf]  ;;  %4007 = vmatpush.bf16.msra.mxu1 %v7180_v36 }
 0x441   : > { %8610 = vrcp.f32 %v10070_v25  ;;  %v3130_v18 = vsel %vm3127_vm11, %v3129_v4, %v3125_v40  ;;  %4035 = vmatpush.bf16.msrb.mxu2 %v7252_v61  ;;  %v7324_v55 = vor.u32 %v8211_v28, %v7323_v56  ;;  %vm3139_vm14 = vmor %vm3137_vm13, %vm3138_vm12  ;;  %v3156_v14 = vand.u32 2147483647, %v10070_v25  ;;  %v7299_v28 = vld [vmem:[#allocation13 + $0x640] sm:$0xf]  ;;  %v7387_v36 = vld [vmem:[#allocation13 + $0x6f0] sm:$0xf] }
 0x442   : > { %v3134_v62 = vsub.f32 1.0, %v3133_v8  ;;  %v3181_v59 = vmul.f32 %v8607_v39, %v3130_v18  ;;  %8612 = vtanh.f32 %v2865_v3  ;;  %v3158_v30 = vand.u32 2147483648, %v10070_v25 }
 0x443   : > { %4063 = vmatpush.bf16.msrb.mxu3 %v7324_v55  ;;  %v7172_v3 = vor.u32 %v8173_v19, %v7171_v57  ;;  %v2841_v23 = vadd.f32 %v9989_v16, %v2812_v7  ;;  %vm3152_vm1 = vweird.f32 %v10070_v25  ;;  %vm3157_vm3 = vcmp.eq.f32.partialorder %v3156_v14, 8.507059e+37  ;;  %v8167_v57 = vld [vmem:[#allocation13 + $0x514] sm:$0xf0]  ;;  %v7379_v14 = vld [vmem:[#allocation13 + $0x6e0] sm:$0xf] }
 0x444   : > { %v3135_v13 = vmul.f32 %v8605_v46, %v3134_v62  ;;  %v3159_v58 = vor.u32 1.1754944e-38, %v3158_v30  ;;  %v7316_v61 = vor.u32 %v8209_v49, %v7315_v6  ;;  %v8181_v6 = vld [vmem:[#allocation13 + $0x584] sm:$0xf0] }
 0x445   : > { %4036 = vmatpush.bf16.msrb.mxu2 %v7244_v43  ;;  %4008 = vmatpush.bf16.msra.mxu1 %v7172_v3  ;;  %v7163_v43 = vld [vmem:[#allocation13 + $0x530] sm:$0xf]  ;;  %v8165_v3 = vld [vmem:[#allocation13 + $0x504] sm:$0xf0] }
 0x446   : > { %v8609_v42 = vpop.eup %8608  ;;  %v3136_v2 = vadd.f32 %v8605_v46, %v3135_v13  ;;  %v8187_v13 = vld [vmem:[#allocation13 + $0x5b4] sm:$0xf0]  ;;  %v7164_v24 = vor.u32 %v8171_v53, %v7163_v43 }
 0x447   : > { %v8611_v32 = vpop.eup %8610  ;;  %v3056_v63 = vadd.f32 1.0, %v8609_v42  ;;  %v7228_v56 = vor.u32 %v8187_v13, %v7227_v38  ;;  %4064 = vmatpush.bf16.msrb.mxu3 %v7316_v61  ;;  %v8205_v42 = vld [vmem:[#allocation13 + $0x644] sm:$0xf0]  ;;  %v7355_v61 = vld [vmem:[#allocation13 + $0x6b0] sm:$0xf] }
 0x448   : > { %v3148_v29 = vmul.f32 %v8611_v32, %v10070_v25  ;;  %v3140_v22 = vsel %vm3139_vm14, %v8605_v46, %v3136_v2  ;;  %v8613_v60 = vpop.eup %8612  ;;  %vm3153_vm0 = vweird.f32 %v8611_v32  ;;  %v7155_v2 = vld [vmem:[#allocation13 + $0x520] sm:$0xf]  ;;  %v7300_v9 = vor.u32 %v8205_v42, %v7299_v28  ;;  %v8219_v13 = vld [vmem:[#allocation13 + $0x6b4] sm:$0xf0]  ;;  %v8217_v28 = vld [vmem:[#allocation13 + $0x6a4] sm:$0xf0] }
 0x449   : > { %8614 = vrcp.f32 %v3056_v63  ;;  %v3145_v12 = vsel %vm3142_vm15, %v3144_v1, %v3140_v22  ;;  %4037 = vmatpush.bf16.msrb.mxu2 %v7236_v27  ;;  %vm3154_vm2 = vmor %vm3152_vm1, %vm3153_vm0  ;;  %v3173_v16 = vand.u32 2147483648, %v3056_v63  ;;  %v3171_v15 = vand.u32 2147483647, %v3056_v63  ;;  %4009 = vmatpush.bf16.msra.mxu1 %v7164_v24  ;;  %v7291_v1 = vld [vmem:[#allocation13 + $0x630] sm:$0xf] }
 0x44a   : > { %v3149_v5 = vsub.f32 1.0, %v3148_v29  ;;  %v3182_v50 = vmul.f32 %v8613_v60, %v3145_v12  ;;  %8616 = vtanh.f32 %v9993_v51  ;;  %v2870_v51 = vadd.f32 %v10000_v48, %v2841_v23  ;;  %v8203_v22 = vld [vmem:[#allocation13 + $0x634] sm:$0xf0]  ;;  %v7147_v27 = vld [vmem:[#allocation13 + $0x510] sm:$0xf] }
 0x44b   : > { %vm3167_vm5 = vweird.f32 %v3056_v63  ;;  %v3174_v25 = vor.u32 1.1754944e-38, %v3173_v16  ;;  %vm3172_vm7 = vcmp.eq.f32.partialorder %v3171_v15, 8.507059e+37  ;;  %4065 = vmatpush.bf16.msrb.mxu3 %v7308_v21  ;;  %v7156_v55 = vor.u32 %v8169_v10, %v7155_v2  ;;  %v8227_v60 = vld [vmem:[#allocation13 + $0x6f4] sm:$0xf0]  ;;  %v3207_v23 = vld [vmem:[#allocation17 + $0x2] sm:$0x3] }
 0x44c   : > { %v3187_v0 = vpack.c.bf16 %v3182_v50, %v3181_v59  ;;  %v3150_v46 = vmul.f32 %v8611_v32, %v3149_v5  ;;  %8618 = vtanh.f32 %v2870_v51  ;;  %v7292_v7 = vor.u32 %v8203_v22, %v7291_v1  ;;  %v7283_v5 = vld [vmem:[#allocation13 + $0x620] sm:$0xf]  ;;  %v8201_v50 = vld [vmem:[#allocation13 + $0x624] sm:$0xf0]  ;;  %v7211_v51 = vld [vmem:[#allocation13 + $0x590] sm:$0xf] }
 0x44d   : > { %4038 = vmatpush.bf16.msrb.mxu2 %v7228_v56  ;;  %4010 = vmatpush.bf16.msra.mxu1 %v7156_v55  ;;  %v7388_v12 = vor.u32 %v8227_v60, %v7387_v36  ;;  %v7148_v19 = vor.u32 %v8167_v57, %v7147_v27  ;;  %v7284_v30 = vor.u32 %v8201_v50, %v7283_v5  ;;  %v10098_v53 = vperm.slane %v3207_v23, 0  ;;  %v7347_v24 = vld [vmem:[#allocation13 + $0x6a0] sm:$0xf]  ;;  %v8178_v2 = vld [vmem:[#allocation13 + $0x574] sm:$0xf] }
 0x44e   : > { %3311 = vmatmul.bf16.gmra.mxu3 %v3187_v0  ;;  %3340 = vmatmul.bf16.gmra.mxu0 %v3187_v0  ;;  %v3151_v4 = vadd.f32 %v8611_v32, %v3150_v46  ;;  %v8225_v0 = vld [vmem:[#allocation13 + $0x6e4] sm:$0xf0]  ;;  %v7139_v46 = vld [vmem:[#allocation13 + $0x500] sm:$0xf]  ;;  %v7356_v37 = vor.u32 %v8219_v13, %v7355_v61  ;;  %v7348_v42 = vor.u32 %v8217_v28, %v7347_v24  ;;  %v7339_v10 = vld [vmem:[#allocation13 + $0x690] sm:$0xf] }
 0x44f   : > { %v8615_v34 = vpop.eup %8614  ;;  %4066 = vmatpush.bf16.msrb.mxu3 %v7300_v9  ;;  %4092 = vmatpush.bf16.msrb.mxu0 %v7388_v12  ;;  %v7197_v9 = vld [vmem:[#allocation13 + $0x578] sm:$0xf0]  ;;  %v8741_v22 = vld [vmem:[#allocation2 + $0x10] sm:$0xff]  ;;  %v7331_v27 = vld [vmem:[#allocation13 + $0x680] sm:$0xf] }
 0x450   : > { %v3163_v20 = vmul.f32 %v8615_v34, %v3056_v63  ;;  %v3155_v8 = vsel %vm3154_vm2, %v8611_v32, %v3151_v4  ;;  %v8617_v40 = vpop.eup %8616  ;;  %vm3168_vm4 = vweird.f32 %v8615_v34  ;;  %v7219_v32 = vld [vmem:[#allocation13 + $0x5a0] sm:$0xf]  ;;  %v8185_v63 = vld [vmem:[#allocation13 + $0x5a4] sm:$0xf0]  ;;  %v7380_v4 = vor.u32 %v8225_v0, %v7379_v14  ;;  %v7451_v50 = vld [vmem:[#allocation13 + $0x770] sm:$0xf] }
 0x451   : > { %v3160_v45 = vsel %vm3157_vm3, %v3159_v58, %v3155_v8  ;;  %vm3169_vm6 = vmor %vm3167_vm5, %vm3168_vm4  ;;  %v7220_v29 = vor.u32 %v8185_v63, %v7219_v32  ;;  %4011 = vmatpush.bf16.msra.mxu1 %v7148_v19  ;;  %v8183_v58 = vld [vmem:[#allocation13 + $0x594] sm:$0xf0]  ;;  %v7200_v32 = vor.u32 %v8178_v2, %v7197_v9  ;;  %v8742_v60 = vld [vmem:[#allocation2] sm:$0xff] }
 0x452   : > { %v3164_v47 = vsub.f32 1.0, %v3163_v20  ;;  %v3183_v39 = vmul.f32 %v8617_v40, %v3160_v45  ;;  %v8619_v62 = vpop.eup %8618  ;;  %v7275_v20 = vld [vmem:[#allocation13 + $0x610] sm:$0xf]  ;;  %v7212_v8 = vor.u32 %v8183_v58, %v7211_v51  ;;  %v8199_v40 = vld [vmem:[#allocation13 + $0x614] sm:$0xf0]  ;;  %v8744_v13 = vld [vmem:[#allocation2 + $0x20] sm:$0xff] }
 0x453   : > { %4039 = vmatpush.bf16.msrb.mxu2 %v7220_v29  ;;  %4067 = vmatpush.bf16.msrb.mxu3 %v7292_v7  ;;  %v7371_v45 = vld [vmem:[#allocation13 + $0x6d0] sm:$0xf]  ;;  %v8215_v63 = vld [vmem:[#allocation13 + $0x694] sm:$0xf0]  ;;  %v3399_v7 = vpack.c.bf16 %v8742_v60, %v8742_v60  ;;  %v8213_v57 = vld [vmem:[#allocation13 + $0x684] sm:$0xf0] }
 0x454   : > { %v3165_v18 = vmul.f32 %v8615_v34, %v3164_v47  ;;  %4093 = vmatpush.bf16.msrb.mxu0 %v7380_v4  ;;  %v8223_v47 = vld [vmem:[#allocation13 + $0x6d4] sm:$0xf0]  ;;  %v7435_v2 = vld [vmem:[#allocation13 + $0x750] sm:$0xf] }
 0x455   : > { %v7372_v16 = vor.u32 %v8223_v47, %v7371_v45  ;;  %v10104_v5 = vunpack.c.l.b16 %v3399_v7  ;;  %v8243_v14 = vld [vmem:[#allocation13 + $0x774] sm:$0xf0] }
 0x456   : > { %v3166_v44 = vadd.f32 %v8615_v34, %v3165_v18  ;;  %v8740_v18 = vld [vmem:[#allocation17] sm:$0x3]  ;;  %v8239_v9 = vld [vmem:[#allocation13 + $0x754] sm:$0xf0] }
 0x457   : > { %4068 = vmatpush.bf16.msrb.mxu3 %v7284_v30  ;;  %4040 = vmatpush.bf16.msrb.mxu2 %v7212_v8  ;;  %v10089_v15 = vperm.slane %v8740_v18, 1  ;;  %v7332_v30 = vor.u32 %v8213_v57, %v7331_v27  ;;  %v8743_v8 = vld [vmem:[#allocation2 + $0x18] sm:$0xff] }
 0x458   : > { %v3170_v48 = vsel %vm3169_vm6, %v8615_v34, %v3166_v44  ;;  %v7140_v34 = vor.u32 %v8165_v3, %v7139_v46  ;;  %v10091_v44 = vperm.slane %v3207_v23, 1  ;;  %4094 = vmatpush.bf16.msrb.mxu0 %v7372_v16  ;;  %v7452_v46 = vor.u32 %v8243_v14, %v7451_v50  ;;  %v8176_v3 = vld [vmem:[#allocation13 + $0x564] sm:$0xf]  ;;  %v7189_v23 = vld [vmem:[#allocation13 + $0x568] sm:$0xf0] }
 0x459   : > { %v3175_v59 = vsel %vm3172_vm7, %v3174_v25, %v3170_v48  ;;  %10785 = vst [vmem:[#allocation43_spill] sm:$0xff] %v10089_v15  ;;  %v7267_v25 = vld [vmem:[#allocation13 + $0x600] sm:$0xf]  ;;  %v8197_v48 = vld [vmem:[#allocation13 + $0x604] sm:$0xf0]  ;;  %v2024_v56 = vadd.f32 %v9888_v33, %v10089_v15  ;;  %v7340_v33 = vor.u32 %v8215_v63, %v7339_v10  ;;  %v7192_v51 = vor.u32 %v8176_v3, %v7189_v23 }
 0x45a   : > { %v3184_v41 = vmul.f32 %v8619_v62, %v3175_v59  ;;  %4012 = vmatpush.bf16.msra.mxu1 %v7140_v34  ;;  %10786 = vst [vmem:[#allocation44_spill] sm:$0xff] %v10091_v44  ;;  %v7363_v62 = vld [vmem:[#allocation13 + $0x6c0] sm:$0xf]  ;;  %v7268_v59 = vor.u32 %v8197_v48, %v7267_v25  ;;  %v8241_v48 = vld [vmem:[#allocation13 + $0x764] sm:$0xf0]  ;;  %v2034_v27 = vadd.f32 %v9913_v26, %v10089_v15 }
 0x45b   : > { %v7443_v25 = vld [vmem:[#allocation13 + $0x760] sm:$0xf]  ;;  %v8172_v63 = vld [vmem:[#allocation13 + $0x544] sm:$0xf]  ;;  %v10789_v3 = vld [vmem:[#allocation36_spill] sm:$0xff] }
 0x45c   : > { %v3188_v52 = vpack.c.bf16 %v3184_v41, %v3183_v39  ;;  %v7276_v39 = vor.u32 %v8199_v40, %v7275_v20  ;;  %v8221_v41 = vld [vmem:[#allocation13 + $0x6c4] sm:$0xf0]  ;;  %v2029_v20 = vadd.f32 %v9902_v11, %v10089_v15  ;;  %v7444_v11 = vor.u32 %v8241_v48, %v7443_v25  ;;  %v8170_v25 = vld [vmem:[#allocation13 + $0x534] sm:$0xf]  ;;  %v7165_v48 = vld [vmem:[#allocation13 + $0x538] sm:$0xf0] }
 0x45d   : > { %v7364_v49 = vor.u32 %v8221_v41, %v7363_v62  ;;  %v7181_v41 = vld [vmem:[#allocation13 + $0x558] sm:$0xf0]  ;;  %v8745_v50 = vld [vmem:[#allocation2 + $0x28] sm:$0xff] }
 0x45e   : > { %3316 = vmatmul.bf16.gmra.mxu3 %v3188_v52  ;;  %3345 = vmatmul.bf16.gmra.mxu0 %v3188_v52  ;;  %v7203_v52 = vld [vmem:[#allocation13 + $0x580] sm:$0xf] }
 0x45f   : > { %4069 = vmatpush.bf16.msrb.mxu3 %v7276_v39  ;;  %v7204_v38 = vor.u32 %v8181_v6, %v7203_v52  ;;  %4095 = vmatpush.bf16.msrb.mxu0 %v7364_v49 }
 0x460   : > { %4121 = vmatpush.bf16.msrb.mxu1 %v7452_v46 }
 0x461   : > { %4041 = vmatpush.bf16.msrb.mxu2 %v7204_v38 }
 0x463   : > { %4070 = vmatpush.bf16.msrb.mxu3 %v7268_v59  ;;  %4096 = vmatpush.bf16.msrb.mxu0 %v7356_v37  ;;  %v8174_v59 = vld [vmem:[#allocation13 + $0x554] sm:$0xf] }
 0x464   : > { %v7184_v38 = vor.u32 %v8174_v59, %v7181_v41  ;;  %4122 = vmatpush.bf16.msrb.mxu1 %v7444_v11 }
 0x465   : > { %4150 = vmatpush.bf16.msra.mxu2 %v7200_v32  ;;  %v7436_v32 = vor.u32 %v8239_v9, %v7435_v2  ;;  %v8188_v2 = vld [vmem:[#allocation13 + $0x5c4] sm:$0xf]  ;;  %v7237_v9 = vld [vmem:[#allocation13 + $0x5c8] sm:$0xf0] }
 0x467   : > { %4097 = vmatpush.bf16.msrb.mxu0 %v7348_v42 }
 0x468   : > { %4123 = vmatpush.bf16.msrb.mxu1 %v7436_v32  ;;  %v8168_v32 = vld [vmem:[#allocation13 + $0x524] sm:$0xf] }
 0x469   : > { %4151 = vmatpush.bf16.msra.mxu2 %v7192_v51  ;;  %v8237_v51 = vld [vmem:[#allocation13 + $0x744] sm:$0xf0] }
 0x46b   : > { %4098 = vmatpush.bf16.msrb.mxu0 %v7340_v33  ;;  %v8194_v33 = vld [vmem:[#allocation13 + $0x5f4] sm:$0xf] }
 0x46d   : > { %4152 = vmatpush.bf16.msra.mxu2 %v7184_v38  ;;  %v8235_v38 = vld [vmem:[#allocation13 + $0x734] sm:$0xf0] }
 0x46f   : > { %4099 = vmatpush.bf16.msrb.mxu0 %v7332_v30 }
 0x4ab   : > { %v3331_v31 = vpop.f32.mrf.mxu0 }
 0x4ac   : > { %v3332_v21 = vadd.f32 %v3331_v31, %v10091_v44 }
 0x4ae   : > { %v10096_v43 = vadd.f32 %v3332_v21, %v2024_v56 }
 0x4b1   : > { %v3302_v55 = vpop.f32.mrf.mxu3 }
 0x4b2   : > { %v3303_v1 = vadd.f32 %v3302_v55, %v10098_v53 }
 0x4b3   : > { %v10101_v29 = vpop.f32.mrf.mxu0 }
 0x4b4   : > { %10787 = vst [vmem:[#allocation45_spill] sm:$0xff] %v10101_v29  ;;  %v3351_v36 = vadd.f32 %v8741_v22, %v3303_v1  ;;  %v7173_v1 = vld [vmem:[#allocation13 + $0x548] sm:$0xf0] }
 0x4b5   : > { %v7176_v7 = vor.u32 %v8172_v63, %v7173_v1  ;;  %v7157_v63 = vld [vmem:[#allocation13 + $0x528] sm:$0xf0]  ;;  %v8186_v1 = vld [vmem:[#allocation13 + $0x5b4] sm:$0xf] }
 0x4b6   : > { %v3359_v12 = vmul.f32 %v9484_v35, %v3351_v36 }
 0x4b7   : > { %4153 = vmatpush.bf16.msra.mxu2 %v7176_v7  ;;  %v7229_v7 = vld [vmem:[#allocation13 + $0x5b8] sm:$0xf0] }
 0x4b8   : > { %v3375_v19 = vpack.c.bf16 %v3359_v12, %v3359_v12  ;;  %3383 = vst [vmem:[#allocation2 + $0x10] sm:$0xff] %v3359_v12  ;;  %v7261_v12 = vld [vmem:[#allocation13 + $0x5f8] sm:$0xf0] }
 0x4b9   : > { %v3304_v0 = vpop.f32.mrf.mxu3 }
 0x4ba   : > { %v3485_v4 = vunpack.c.l.b16 %v3375_v19  ;;  %v3305_v34 = vadd.f32 %v3304_v0, %v10098_v53  ;;  %v7264_v19 = vor.u32 %v8194_v33, %v7261_v12 }
 0x4bb   : > { %v3336_v58 = vpop.f32.mrf.mxu0 }
 0x4bc   : > { %v3352_v40 = vadd.f32 %v8743_v8, %v3305_v34  ;;  %v3337_v45 = vadd.f32 %v3336_v58, %v10091_v44  ;;  %v10111_v47 = vpack.c.b16 %v3485_v4, %v10104_v5  ;;  %4179 = vmatpush.bf16.msra.mxu3 %v7264_v19  ;;  %v7427_v34 = vld [vmem:[#allocation13 + $0x740] sm:$0xf] }
 0x4bd   : > { %v7428_v8 = vor.u32 %v8237_v51, %v7427_v34  ;;  %v7411_v19 = vld [vmem:[#allocation13 + $0x720] sm:$0xf] }
 0x4be   : > { %v3360_v39 = vmul.f32 %v9500_v54, %v3352_v40  ;;  %v10114_v16 = vadd.f32 %v3337_v45, %v2029_v20  ;;  %4013 = vmatmul.bf16.vlgmr.msra.gmra.mxu1 %v10111_v47  ;;  %v8192_v40 = vld [vmem:[#allocation13 + $0x5e4] sm:$0xf]  ;;  %v7253_v45 = vld [vmem:[#allocation13 + $0x5e8] sm:$0xf0] }
 0x4bf   : > { %v3407_v49 = vld [vmem:[#allocation2 + $0xc] sm:$0xff]  ;;  %4124 = vmatpush.bf16.msrb.mxu1 %v7428_v8  ;;  %v10793_v8 = vld [vmem:[#allocation41_spill] sm:$0xff] }
 0x4c0   : > { %v3376_v18 = vpack.c.bf16 %v3360_v39, %v3360_v39  ;;  %3384 = vst [vmem:[#allocation2 + $0x18] sm:$0xff] %v3360_v39  ;;  %v3415_v56 = vpack.c.bf16 %v3407_v49, %v3407_v49  ;;  %v7419_v49 = vld [vmem:[#allocation13 + $0x730] sm:$0xf] }
 0x4c1   : > { %v3307_v62 = vpop.f32.mrf.mxu3 }
 0x4c2   : > { %v3486_v52 = vunpack.c.l.b16 %v3376_v18  ;;  %v3308_v6 = vadd.f32 %v3307_v62, %v10098_v53  ;;  %v3461_v55 = vunpack.c.l.b16 %v3415_v56  ;;  %v7256_v18 = vor.u32 %v8192_v40, %v7253_v45  ;;  %v8190_v62 = vld [vmem:[#allocation13 + $0x5d4] sm:$0xf] }
 0x4c3   : > { %v10118_v61 = vpop.f32.mrf.mxu0  ;;  %v7420_v56 = vor.u32 %v8235_v38, %v7419_v49  ;;  %v2039_v40 = vadd.f32 %v10793_v8, %v10089_v15  ;;  %v8184_v38 = vld [vmem:[#allocation13 + $0x5a4] sm:$0xf] }
 0x4c4   : > { %10788 = vst [vmem:[#allocation46_spill] sm:$0xff] %v10118_v61  ;;  %v3353_v31 = vadd.f32 %v8744_v13, %v3308_v6  ;;  %v10120_v37 = vpack.c.b16 %v3486_v52, %v3485_v4  ;;  %v7245_v6 = vld [vmem:[#allocation13 + $0x5d8] sm:$0xf0]  ;;  %4180 = vmatpush.bf16.msra.mxu3 %v7256_v18  ;;  %v7509_v15 = vld [vmem:[#allocation16 + $0x158] sm:$0xf0] }
 0x4c5   : > { %4125 = vmatpush.bf16.msrb.mxu1 %v7420_v56  ;;  %v8748_v8 = vld [vmem:[#allocation2 + $0x40] sm:$0xff] }
 0x4c6   : > { %v3361_v21 = vmul.f32 %v9520_v17, %v3353_v31  ;;  %4071 = vmatmul.bf16.vlgmr.msrb.gmra.mxu3 %v10120_v37  ;;  %v7248_v31 = vor.u32 %v8190_v62, %v7245_v6  ;;  %v8747_v62 = vld [vmem:[#allocation2 + $0x38] sm:$0xff] }
 0x4c7   : > { %v3408_v24 = vld [vmem:[#allocation2 + $0x14] sm:$0xff]  ;;  %v8254_v61 = vld [vmem:[#allocation16 + $0x154] sm:$0xf] }
 0x4c8   : > { %3385 = vst [vmem:[#allocation2 + $0x20] sm:$0xff] %v3361_v21  ;;  %v3416_v28 = vpack.c.bf16 %v3408_v24, %v3408_v24  ;;  %v3402_v42 = vpack.c.bf16 %v3361_v21, %v3361_v21  ;;  %v8746_v21 = vld [vmem:[#allocation2 + $0x30] sm:$0xff]  ;;  %4181 = vmatpush.bf16.msra.mxu3 %v7248_v31 }
 0x4c9   : > { %v3309_v10 = vpop.f32.mrf.mxu3  ;;  %v7221_v31 = vld [vmem:[#allocation13 + $0x5a8] sm:$0xf0] }
 0x4ca   : > { %v3310_v22 = vadd.f32 %v3309_v10, %v10098_v53  ;;  %v3462_v36 = vunpack.c.l.b16 %v3416_v28  ;;  %v3440_v60 = vunpack.c.l.b16 %v3402_v42  ;;  %v10792_v10 = vld [vmem:[#allocation33_spill] sm:$0xff] }
 0x4cb   : > { %v3341_v57 = vpop.f32.mrf.mxu0 }
 0x4cc   : > { %v3354_v14 = vadd.f32 %v8745_v50, %v3310_v22  ;;  %v3342_v30 = vadd.f32 %v3341_v57, %v10091_v44  ;;  %v10128_v0 = vpack.c.b16 %v3462_v36, %v3461_v55  ;;  %v10130_v46 = vpack.c.b16 %v3440_v60, %v3486_v52  ;;  %v7325_v57 = vld [vmem:[#allocation13 + $0x678] sm:$0xf0] }
 0x4cd   : > { %v7168_v52 = vor.u32 %v8170_v25, %v7165_v48  ;;  %v7240_v22 = vor.u32 %v8188_v2, %v7237_v9  ;;  %v7403_v25 = vld [vmem:[#allocation13 + $0x710] sm:$0xf]  ;;  %v8231_v48 = vld [vmem:[#allocation13 + $0x714] sm:$0xf0]  ;;  %v8166_v9 = vld [vmem:[#allocation13 + $0x514] sm:$0xf] }
 0x4ce   : > { %v3362_v23 = vmul.f32 %v10789_v3, %v3354_v14  ;;  %v10133_v4 = vadd.f32 %v3342_v30, %v2034_v27  ;;  %4042 = vmatmul.bf16.vlgmr.msrb.gmra.mxu2 %v10128_v0  ;;  %4018 = vmatmul.bf16.gmra.mxu1 %v10130_v46  ;;  %v8233_v30 = vld [vmem:[#allocation13 + $0x724] sm:$0xf0]  ;;  %v7404_v56 = vor.u32 %v8231_v48, %v7403_v25  ;;  %v7205_v25 = vld [vmem:[#allocation13 + $0x588] sm:$0xf0] }
 0x4cf   : > { %v3409_v26 = vld [vmem:[#allocation2 + $0x1c] sm:$0xff]  ;;  %4154 = vmatpush.bf16.msra.mxu2 %v7168_v52  ;;  %v7412_v51 = vor.u32 %v8233_v30, %v7411_v19  ;;  %4182 = vmatpush.bf16.msra.mxu3 %v7240_v22  ;;  %v10796_v48 = vld [vmem:[#allocation35_spill] sm:$0xff] }
 0x4d0   : > { %10790 = vst [vmem:[#allocation47_spill] sm:$0xff] %v10133_v4  ;;  %v3378_v58 = vpack.c.bf16 %v3362_v23, %v3362_v23  ;;  %v3417_v20 = vpack.c.bf16 %v3409_v26, %v3409_v26  ;;  %v8250_v4 = vld [vmem:[#allocation16 + $0x134] sm:$0xf] }
 0x4d1   : > { %3386 = vst [vmem:[#allocation2 + $0x28] sm:$0xff] %v3362_v23  ;;  %v3312_v39 = vpop.f32.mrf.mxu3  ;;  %4126 = vmatpush.bf16.msrb.mxu1 %v7412_v51  ;;  %v7301_v51 = vld [vmem:[#allocation13 + $0x648] sm:$0xf0] }
 0x4d2   : > { %v3313_v11 = vadd.f32 %v3312_v39, %v10098_v53  ;;  %v3488_v59 = vunpack.c.l.b16 %v3378_v58  ;;  %v3463_v41 = vunpack.c.l.b16 %v3417_v20  ;;  %v8208_v58 = vld [vmem:[#allocation13 + $0x664] sm:$0xf]  ;;  %v7317_v20 = vld [vmem:[#allocation13 + $0x668] sm:$0xf0]  ;;  %v7232_v39 = vor.u32 %v8186_v1, %v7229_v7  ;;  %v7213_v1 = vld [vmem:[#allocation13 + $0x598] sm:$0xf0] }
 0x4d3   : > { %v10138_v13 = vpop.f32.mrf.mxu0  ;;  %v7320_v18 = vor.u32 %v8208_v58, %v7317_v20  ;;  %v7309_v7 = vld [vmem:[#allocation13 + $0x658] sm:$0xf0] }
 0x4d4   : > { %10791 = vst [vmem:[#allocation48_spill] sm:$0xff] %v10138_v13  ;;  %v3355_v24 = vadd.f32 %v8746_v21, %v3313_v11  ;;  %v10140_v28 = vpack.c.b16 %v3488_v59, %v3440_v60  ;;  %v10142_v42 = vpack.c.b16 %v3463_v41, %v3462_v36  ;;  %v7160_v60 = vor.u32 %v8168_v32, %v7157_v63  ;;  %v8210_v36 = vld [vmem:[#allocation13 + $0x674] sm:$0xf]  ;;  %v10794_v21 = vld [vmem:[#allocation34_spill] sm:$0xff] }
 0x4d5   : > { %v7328_v14 = vor.u32 %v8210_v36, %v7325_v57  ;;  %v8182_v32 = vld [vmem:[#allocation13 + $0x594] sm:$0xf]  ;;  %4183 = vmatpush.bf16.msra.mxu3 %v7232_v39  ;;  %4127 = vmatpush.bf16.msrb.mxu1 %v7404_v56  ;;  %v7395_v36 = vld [vmem:[#allocation13 + $0x700] sm:$0xf]  ;;  %v8229_v57 = vld [vmem:[#allocation13 + $0x704] sm:$0xf0] }
 0x4d6   : > { %v3363_v55 = vmul.f32 %v10792_v10, %v3355_v24  ;;  %4076 = vmatmul.bf16.gmra.mxu3 %v10140_v28  ;;  %4100 = vmatmul.bf16.vlgmr.msrb.gmra.mxu0 %v10142_v42  ;;  %v7396_v30 = vor.u32 %v8229_v57, %v7395_v36  ;;  %v7216_v58 = vor.u32 %v8182_v32, %v7213_v1  ;;  %v8200_v32 = vld [vmem:[#allocation13 + $0x624] sm:$0xf]  ;;  %v8251_v10 = vld [vmem:[#allocation16 + $0x134] sm:$0xf0] }
 0x4d7   : > { %4155 = vmatpush.bf16.msra.mxu2 %v7160_v60  ;;  %4208 = vmatpush.bf16.msra.mxu0 %v7328_v14 }
 0x4d8   : > { %v3410_v33 = vld [vmem:[#allocation2 + $0x24] sm:$0xff]  ;;  %3387 = vst [vmem:[#allocation2 + $0x30] sm:$0xff] %v3363_v55  ;;  %v3404_v27 = vpack.c.bf16 %v3363_v55, %v3363_v55  ;;  %v7149_v55 = vld [vmem:[#allocation13 + $0x518] sm:$0xf0] }
 0x4d9   : > { %v3418_v12 = vpack.c.bf16 %v3410_v33, %v3410_v33  ;;  %v3314_v50 = vpop.f32.mrf.mxu3  ;;  %v8206_v33 = vld [vmem:[#allocation13 + $0x654] sm:$0xf]  ;;  %4128 = vmatpush.bf16.msrb.mxu1 %v7396_v30  ;;  %v7453_v30 = vld [vmem:[#allocation13 + $0x778] sm:$0xf0] }
 0x4da   : > { %v3315_v23 = vadd.f32 %v3314_v50, %v10098_v53  ;;  %v3442_v34 = vunpack.c.l.b16 %v3404_v27  ;;  %v7312_v27 = vor.u32 %v8206_v33, %v7309_v7 }
 0x4db   : > { %v3464_v26 = vunpack.c.l.b16 %v3418_v12  ;;  %v3346_v45 = vpop.f32.mrf.mxu0  ;;  %4209 = vmatpush.bf16.msra.mxu0 %v7320_v18  ;;  %v8180_v18 = vld [vmem:[#allocation13 + $0x584] sm:$0xf] }
 0x4dc   : > { %v3356_v11 = vadd.f32 %v8747_v62, %v3315_v23  ;;  %v3347_v52 = vadd.f32 %v3346_v45, %v10091_v44  ;;  %v10153_v49 = vpack.c.b16 %v3442_v34, %v3488_v59  ;;  %v7152_v59 = vor.u32 %v8166_v9, %v7149_v55  ;;  %v8204_v23 = vld [vmem:[#allocation13 + $0x644] sm:$0xf] }
 0x4dd   : > { %v10151_v6 = vpack.c.b16 %v3464_v26, %v3463_v41  ;;  %v7224_v41 = vor.u32 %v8184_v38, %v7221_v31  ;;  %v7304_v20 = vor.u32 %v8204_v23, %v7301_v51  ;;  %v8202_v38 = vld [vmem:[#allocation13 + $0x634] sm:$0xf]  ;;  %v7208_v56 = vor.u32 %v8180_v18, %v7205_v25  ;;  %v8196_v18 = vld [vmem:[#allocation13 + $0x604] sm:$0xf] }
 0x4de   : > { %v3364_v24 = vmul.f32 %v10794_v21, %v3356_v11  ;;  %v10156_v2 = vadd.f32 %v3347_v52, %v2039_v40  ;;  %4023 = vmatmul.bf16.gmra.mxu1 %v10153_v49  ;;  %4156 = vmatpush.bf16.msra.mxu2 %v7152_v59  ;;  %v8164_v11 = vld [vmem:[#allocation13 + $0x504] sm:$0xf]  ;;  %v7141_v52 = vld [vmem:[#allocation13 + $0x508] sm:$0xf0]  ;;  %v7512_v44 = vor.u32 %v8254_v61, %v7509_v15  ;;  %v7491_v21 = vld [vmem:[#allocation16 + $0x130] sm:$0xf] }
 0x4df   : > { %4047 = vmatmul.bf16.gmra.mxu2 %v10151_v6  ;;  %v3411_v63 = vld [vmem:[#allocation2 + $0x2c] sm:$0xff]  ;;  %4184 = vmatpush.bf16.msra.mxu3 %v7224_v41 }
 0x4e0   : > { %10795 = vst [vmem:[#allocation41_spill] sm:$0xff] %v10156_v2  ;;  %v3380_v22 = vpack.c.bf16 %v3364_v24, %v3364_v24  ;;  %v3419_v60 = vpack.c.bf16 %v3411_v63, %v3411_v63  ;;  %4210 = vmatpush.bf16.msra.mxu0 %v7312_v27  ;;  %v7285_v63 = vld [vmem:[#allocation13 + $0x628] sm:$0xf0]  ;;  %v10797_v27 = vld [vmem:[#allocation37_spill] sm:$0xff] }
 0x4e1   : > { %3388 = vst [vmem:[#allocation2 + $0x38] sm:$0xff] %v3364_v24  ;;  %v3317_v12 = vpop.f32.mrf.mxu3  ;;  %v7293_v24 = vld [vmem:[#allocation13 + $0x638] sm:$0xf0] }
 0x4e2   : > { %v3318_v19 = vadd.f32 %v3317_v12, %v10098_v53  ;;  %v3490_v50 = vunpack.c.l.b16 %v3380_v22  ;;  %v3465_v14 = vunpack.c.l.b16 %v3419_v60  ;;  %v7296_v55 = vor.u32 %v8202_v38, %v7293_v24  ;;  %v8749_v60 = vld [vmem:[#allocation2 + $0x48] sm:$0xff] }
 0x4e3   : > { %4185 = vmatpush.bf16.msra.mxu3 %v7216_v58  ;;  %v7288_v22 = vor.u32 %v8200_v32, %v7285_v63  ;;  %v7277_v58 = vld [vmem:[#allocation13 + $0x618] sm:$0xf0]  ;;  %v7445_v24 = vld [vmem:[#allocation13 + $0x768] sm:$0xf0] }
 0x4e4   : > { %v3357_v40 = vadd.f32 %v8748_v8, %v3318_v19  ;;  %v10161_v45 = vpack.c.b16 %v3490_v50, %v3442_v34  ;;  %v10163_v39 = vpack.c.b16 %v3465_v14, %v3464_v26  ;;  %4211 = vmatpush.bf16.msra.mxu0 %v7304_v20  ;;  %v7144_v34 = vor.u32 %v8164_v11, %v7141_v52  ;;  %v8242_v19 = vld [vmem:[#allocation13 + $0x774] sm:$0xf]  ;;  %v7381_v32 = vld [vmem:[#allocation13 + $0x6e8] sm:$0xf0] }
 0x4e5   : > { %v7456_v51 = vor.u32 %v8242_v19, %v7453_v30  ;;  %v8226_v20 = vld [vmem:[#allocation13 + $0x6f4] sm:$0xf]  ;;  %v7373_v30 = vld [vmem:[#allocation13 + $0x6d8] sm:$0xf0] }
 0x4e6   : > { %v3365_v62 = vmul.f32 %v10796_v48, %v3357_v40  ;;  %4081 = vmatmul.bf16.gmra.mxu3 %v10161_v45  ;;  %4105 = vmatmul.bf16.gmra.mxu0 %v10163_v39 }
 0x4e7   : > { %4157 = vmatpush.bf16.msra.mxu2 %v7144_v34  ;;  %4186 = vmatpush.bf16.msra.mxu3 %v7208_v56  ;;  %v8240_v34 = vld [vmem:[#allocation13 + $0x764] sm:$0xf] }
 0x4e8   : > { %v3412_v31 = vld [vmem:[#allocation2 + $0x34] sm:$0xff]  ;;  %3389 = vst [vmem:[#allocation2 + $0x40] sm:$0xff] %v3365_v62  ;;  %v3406_v9 = vpack.c.bf16 %v3365_v62, %v3365_v62  ;;  %4212 = vmatpush.bf16.msra.mxu0 %v7296_v55  ;;  %v7269_v62 = vld [vmem:[#allocation13 + $0x608] sm:$0xf0]  ;;  %v7448_v55 = vor.u32 %v8240_v34, %v7445_v24 }
 0x4e9   : > { %v3420_v26 = vpack.c.bf16 %v3412_v31, %v3412_v31  ;;  %v3319_v41 = vpop.f32.mrf.mxu3  ;;  %v7272_v38 = vor.u32 %v8196_v18, %v7269_v62  ;;  %v8234_v18 = vld [vmem:[#allocation13 + $0x734] sm:$0xf]  ;;  %v7413_v24 = vld [vmem:[#allocation13 + $0x728] sm:$0xf0] }
 0x4ea   : > { %v3320_v59 = vadd.f32 %v3319_v41, %v10098_v53  ;;  %v3444_v33 = vunpack.c.l.b16 %v3406_v9  ;;  %v8198_v53 = vld [vmem:[#allocation13 + $0x614] sm:$0xf] }
 0x4eb   : > { %v3466_v1 = vunpack.c.l.b16 %v3420_v26  ;;  %v7280_v40 = vor.u32 %v8198_v53, %v7277_v58  ;;  %4266 = vmatpush.bf16.msrb.mxu2 %v7456_v51  ;;  %v8224_v26 = vld [vmem:[#allocation13 + $0x6e4] sm:$0xf]  ;;  %v8218_v62 = vld [vmem:[#allocation13 + $0x6b4] sm:$0xf] }
 0x4ec   : > { %v3358_v7 = vadd.f32 %v8749_v60, %v3320_v59  ;;  %v10171_v12 = vpack.c.b16 %v3444_v33, %v3490_v50  ;;  %4213 = vmatpush.bf16.msra.mxu0 %v7288_v22  ;;  %v7389_v50 = vld [vmem:[#allocation13 + $0x6f8] sm:$0xf0]  ;;  %v7384_v41 = vor.u32 %v8224_v26, %v7381_v32  ;;  %v8238_v60 = vld [vmem:[#allocation13 + $0x754] sm:$0xf]  ;;  %v8236_v58 = vld [vmem:[#allocation13 + $0x744] sm:$0xf] }
 0x4ed   : > { %v10169_v36 = vpack.c.b16 %v3466_v1, %v3465_v14  ;;  %v7392_v25 = vor.u32 %v8226_v20, %v7389_v50  ;;  %v7429_v20 = vld [vmem:[#allocation13 + $0x748] sm:$0xf0]  ;;  %v8216_v26 = vld [vmem:[#allocation13 + $0x6a4] sm:$0xf]  ;;  %v8214_v32 = vld [vmem:[#allocation13 + $0x694] sm:$0xf] }
 0x4ee   : > { %v3366_v57 = vmul.f32 %v10797_v27, %v3358_v7  ;;  %4028 = vmatmul.bf16.gmra.mxu1 %v10171_v12  ;;  %v7437_v7 = vld [vmem:[#allocation13 + $0x758] sm:$0xf0]  ;;  %v7499_v27 = vld [vmem:[#allocation16 + $0x140] sm:$0xf] }
 0x4ef   : > { %4052 = vmatmul.bf16.gmra.mxu2 %v10169_v36  ;;  %v3413_v23 = vld [vmem:[#allocation2 + $0x3c] sm:$0xff]  ;;  %4237 = vmatpush.bf16.msra.mxu1 %v7392_v25  ;;  %v7440_v19 = vor.u32 %v8238_v60, %v7437_v7  ;;  %v8228_v7 = vld [vmem:[#allocation13 + $0x704] sm:$0xf] }
 0x4f0   : > { %3390 = vst [vmem:[#allocation2 + $0x48] sm:$0xff] %v3366_v57  ;;  %v3382_v8 = vpack.c.bf16 %v3366_v57, %v3366_v57  ;;  %v3421_v14 = vpack.c.bf16 %v3413_v23, %v3413_v23  ;;  %4214 = vmatpush.bf16.msra.mxu0 %v7280_v40  ;;  %4267 = vmatpush.bf16.msrb.mxu2 %v7448_v55  ;;  %v8222_v57 = vld [vmem:[#allocation13 + $0x6d4] sm:$0xf]  ;;  %v7365_v40 = vld [vmem:[#allocation13 + $0x6c8] sm:$0xf0] }
 0x4f1   : > { %v7376_v23 = vor.u32 %v8222_v57, %v7373_v30  ;;  %v7421_v25 = vld [vmem:[#allocation13 + $0x738] sm:$0xf0]  ;;  %v7349_v55 = vld [vmem:[#allocation13 + $0x6a8] sm:$0xf0] }
 0x4f2   : > { %v10176_v11 = vunpack.c.l.b16 %v3382_v8  ;;  %v3467_v52 = vunpack.c.l.b16 %v3421_v14  ;;  %v8220_v8 = vld [vmem:[#allocation13 + $0x6c4] sm:$0xf]  ;;  %v7432_v14 = vor.u32 %v8236_v58, %v7429_v20  ;;  %v7397_v57 = vld [vmem:[#allocation13 + $0x708] sm:$0xf0] }
 0x4f3   : > { %4238 = vmatpush.bf16.msra.mxu1 %v7384_v41  ;;  %v7368_v50 = vor.u32 %v8220_v8, %v7365_v40 }
 0x4f4   : > { %v10179_v31 = vpack.c.b16 %v10176_v11, %v3444_v33  ;;  %v10181_v56 = vpack.c.b16 %v3467_v52, %v3466_v1  ;;  %4215 = vmatpush.bf16.msra.mxu0 %v7272_v38  ;;  %4268 = vmatpush.bf16.msrb.mxu2 %v7440_v19  ;;  %v7357_v38 = vld [vmem:[#allocation13 + $0x6b8] sm:$0xf0]  ;;  %v7400_v19 = vor.u32 %v8228_v7, %v7397_v57 }
 0x4f5   : > { %v7360_v34 = vor.u32 %v8218_v62, %v7357_v38  ;;  %v3515_v30 = vpack.c.b16 %v10104_v5, %v10176_v11  ;;  %v10213_v5 = vpop.f32.mrf.mxu0 }
 0x4f6   : > { %4086 = vmatmul.bf16.gmra.mxu3 %v10179_v31  ;;  %4110 = vmatmul.bf16.gmra.mxu0 %v10181_v56  ;;  %10798 = vst [vmem:[#allocation49_spill] sm:$0xff] %v10213_v5 }
 0x4f7   : > { %v3414_v9 = vld [vmem:[#allocation2 + $0x44] sm:$0xff]  ;;  %v3423_v59 = vld [vmem:[#allocation2 + $0x4c] sm:$0xff]  ;;  %4239 = vmatpush.bf16.msra.mxu1 %v7376_v23 }
 0x4f8   : > { %v3422_v63 = vpack.c.bf16 %v3414_v9, %v3414_v9  ;;  %v3424_v1 = vpack.c.bf16 %v3423_v59, %v3423_v59  ;;  %4269 = vmatpush.bf16.msrb.mxu2 %v7432_v14  ;;  %v8230_v59 = vld [vmem:[#allocation13 + $0x714] sm:$0xf] }
 0x4fa   : > { %v3468_v22 = vunpack.c.l.b16 %v3422_v63  ;;  %v3502_v53 = vunpack.c.l.b16 %v3424_v1  ;;  %v7341_v63 = vld [vmem:[#allocation13 + $0x698] sm:$0xf0]  ;;  %v7333_v1 = vld [vmem:[#allocation13 + $0x688] sm:$0xf0] }
 0x4fb   : > { %4240 = vmatpush.bf16.msra.mxu1 %v7368_v50  ;;  %v7344_v41 = vor.u32 %v8214_v32, %v7341_v63 }
 0x4fc   : > { %v10185_v33 = vpack.c.b16 %v3468_v22, %v3467_v52  ;;  %v10189_v51 = vpack.c.b16 %v3502_v53, %v3468_v22  ;;  %v7424_v52 = vor.u32 %v8234_v18, %v7421_v25  ;;  %v7405_v22 = vld [vmem:[#allocation13 + $0x718] sm:$0xf0] }
 0x4fe   : > { %4129 = vmatmul.bf16.vlgmr.msrb.gmra.mxu1 %v10130_v46  ;;  %4270 = vmatpush.bf16.msrb.mxu2 %v7424_v52 }
 0x4ff   : > { %4057 = vmatmul.bf16.gmra.mxu2 %v10185_v33  ;;  %4241 = vmatpush.bf16.msra.mxu1 %v7360_v34 }
 0x506   : > { %4115 = vmatmul.bf16.gmra.mxu0 %v10189_v51  ;;  %4187 = vmatmul.bf16.vlgmr.msra.gmra.mxu3 %v10128_v0  ;;  %v8232_v0 = vld [vmem:[#allocation13 + $0x724] sm:$0xf] }
 0x507   : > { %v7416_v9 = vor.u32 %v8232_v0, %v7413_v24 }
 0x509   : > { %4271 = vmatpush.bf16.msrb.mxu2 %v7416_v9 }
 0x50e   : > { %4134 = vmatmul.bf16.gmra.mxu1 %v10153_v49 }
 0x50f   : > { %4158 = vmatmul.bf16.vlgmr.msra.gmra.mxu2 %v10111_v47  ;;  %v7352_v47 = vor.u32 %v8216_v26, %v7349_v55 }
 0x511   : > { %4242 = vmatpush.bf16.msra.mxu1 %v7352_v47 }
 0x515   : > { %4243 = vmatpush.bf16.msra.mxu1 %v7344_v41 }
 0x516   : > { %4192 = vmatmul.bf16.gmra.mxu3 %v10151_v6  ;;  %4216 = vmatmul.bf16.vlgmr.msra.gmra.mxu0 %v10120_v37  ;;  %v7408_v6 = vor.u32 %v8230_v59, %v7405_v22  ;;  %v8212_v37 = vld [vmem:[#allocation13 + $0x684] sm:$0xf] }
 0x517   : > { %v7336_v60 = vor.u32 %v8212_v37, %v7333_v1 }
 0x518   : > { %4272 = vmatpush.bf16.msrb.mxu2 %v7408_v6 }
 0x519   : > { %4244 = vmatpush.bf16.msra.mxu1 %v7336_v60 }
 0x51c   : > { %4273 = vmatpush.bf16.msrb.mxu2 %v7400_v19 }
 0x51e   : > { %4139 = vmatmul.bf16.gmra.mxu1 %v10171_v12 }
 0x51f   : > { %4163 = vmatmul.bf16.gmra.mxu2 %v10130_v46 }
 0x526   : > { %4197 = vmatmul.bf16.gmra.mxu3 %v10169_v36  ;;  %4221 = vmatmul.bf16.gmra.mxu0 %v10140_v28  ;;  %v10211_v36 = vld [vmem:[#allocation14 + $0x4] sm:$0x3] }
 0x527   : > { %v10216_v58 = vperm.slane %v10211_v36, 0 }
 0x52e   : > { %4144 = vmatmul.bf16.gmra.mxu1 %v3515_v30 }
 0x52f   : > { %4168 = vmatmul.bf16.gmra.mxu2 %v10153_v49 }
 0x536   : > { %4202 = vmatmul.bf16.gmra.mxu3 %v10185_v33  ;;  %4226 = vmatmul.bf16.gmra.mxu0 %v10161_v45 }
 0x53b   : > { %v4014_v53 = vpop.f32.mrf.mxu1 }
 0x53c   : > { %v4015_v45 = vadd.f32 %v4014_v53, %v10216_v58 }
 0x53e   : > { %4245 = vmatmul.bf16.vlgmr.msra.gmra.mxu1 %v10142_v42 }
 0x53f   : > { %4173 = vmatmul.bf16.gmra.mxu2 %v10171_v12 }
 0x543   : > { %v10208_v28 = vpop.f32.mrf.mxu1 }
 0x546   : > { %4231 = vmatmul.bf16.gmra.mxu0 %v10179_v31 }
 0x549   : > { %v4072_v23 = vpop.f32.mrf.mxu3 }
 0x54b   : > { %v4019_v11 = vpop.f32.mrf.mxu1 }
 0x54e   : > { %4250 = vmatmul.bf16.gmra.mxu1 %v10163_v39 }
 0x54f   : > { %4274 = vmatmul.bf16.vlgmr.msrb.gmra.mxu2 %v10130_v46  ;;  %v4020_v46 = vadd.f32 %v4019_v11, %v10216_v58 }
 0x551   : > { %v4043_v42 = vpop.f32.mrf.mxu2  ;;  %v10221_v33 = vpop.f32.mrf.mxu3 }
 0x552   : > { %v4044_v20 = vadd.f32 %v4043_v42, %v4015_v45 }
 0x553   : > { %v4101_v31 = vpop.f32.mrf.mxu0  ;;  %v10223_v8 = vpop.f32.mrf.mxu1 }
 0x554   : > { %v4073_v14 = vadd.f32 %v4072_v23, %v4044_v20 }
 0x556   : > { %v4102_v40 = vadd.f32 %v4101_v31, %v4073_v14 }
 0x559   : > { %v10225_v50 = vpop.f32.mrf.mxu2  ;;  %v4077_v18 = vpop.f32.mrf.mxu3 }
 0x55b   : > { %v10227_v25 = vpop.f32.mrf.mxu0  ;;  %v4024_v62 = vpop.f32.mrf.mxu1 }
 0x55e   : > { %4255 = vmatmul.bf16.gmra.mxu1 %v10181_v56  ;;  %v4025_v56 = vadd.f32 %v4024_v62, %v10216_v58 }
 0x55f   : > { %4279 = vmatmul.bf16.gmra.mxu2 %v10153_v49 }
 0x561   : > { %v10234_v24 = vpop.f32.mrf.mxu3 }
 0x562   : > { %v4048_v39 = vpop.f32.mrf.mxu2 }
 0x563   : > { %v4049_v52 = vadd.f32 %v4048_v39, %v4020_v46  ;;  %v4106_v38 = vpop.f32.mrf.mxu0  ;;  %v10232_v34 = vpop.f32.mrf.mxu1  ;;  %v7523_v39 = vld [vmem:[#allocation16 + $0x170] sm:$0xf] }
 0x565   : > { %v4078_v0 = vadd.f32 %v4077_v18, %v4049_v52  ;;  %v8259_v52 = vld [vmem:[#allocation16 + $0x174] sm:$0xf0] }
 0x567   : > { %v4107_v26 = vadd.f32 %v4106_v38, %v4078_v0  ;;  %v7524_v38 = vor.u32 %v8259_v52, %v7523_v39  ;;  %v7525_v52 = vld [vmem:[#allocation16 + $0x178] sm:$0xf0] }
 0x569   : > { %v4082_v49 = vpop.f32.mrf.mxu3  ;;  %4571 = vmatpush.bf16.msrb.mxu3 %v7524_v38  ;;  %v10285_v38 = vperm.slane %v10211_v36, 1  ;;  %v8253_v36 = vld [vmem:[#allocation16 + $0x144] sm:$0xf0] }
 0x56a   : > { %v10236_v9 = vpop.f32.mrf.mxu2 }
 0x56b   : > { %v10238_v55 = vpop.f32.mrf.mxu0  ;;  %v4029_v47 = vpop.f32.mrf.mxu1 }
 0x56e   : > { %4260 = vmatmul.bf16.gmra.mxu1 %v10189_v51  ;;  %v4030_v51 = vadd.f32 %v4029_v47, %v10216_v58 }
 0x56f   : > { %4284 = vmatmul.bf16.gmra.mxu2 %v10171_v12 }
 0x571   : > { %v10245_v37 = vpop.f32.mrf.mxu3 }
 0x572   : > { %v4053_v32 = vpop.f32.mrf.mxu2 }
 0x573   : > { %v4054_v63 = vadd.f32 %v4053_v32, %v4025_v56  ;;  %v4111_v41 = vpop.f32.mrf.mxu0  ;;  %v10243_v59 = vpop.f32.mrf.mxu1  ;;  %v8257_v56 = vld [vmem:[#allocation16 + $0x164] sm:$0xf0] }
 0x575   : > { %v4083_v22 = vadd.f32 %v4082_v49, %v4054_v63  ;;  %v7515_v49 = vld [vmem:[#allocation16 + $0x160] sm:$0xf] }
 0x576   : > { %v7516_v32 = vor.u32 %v8257_v56, %v7515_v49 }
 0x577   : > { %v4112_v6 = vadd.f32 %v4111_v41, %v4083_v22  ;;  %v7507_v22 = vld [vmem:[#allocation16 + $0x150] sm:$0xf] }
 0x578   : > { %4572 = vmatpush.bf16.msrb.mxu3 %v7516_v32  ;;  %v8256_v32 = vld [vmem:[#allocation16 + $0x164] sm:$0xf] }
 0x579   : > { %v4087_v53 = vpop.f32.mrf.mxu3 }
 0x57a   : > { %v10247_v1 = vpop.f32.mrf.mxu2 }
 0x57b   : > { %v10249_v60 = vpop.f32.mrf.mxu0  ;;  %v4130_v7 = vpop.f32.mrf.mxu1 }
 0x57c   : > { %v10251_v12 = vadd.f32 %v4130_v7, %v4102_v40 }
 0x57f   : > { %4289 = vmatmul.bf16.gmra.mxu2 %v3515_v30 }
 0x582   : > { %v4058_v57 = vpop.f32.mrf.mxu2 }
 0x583   : > { %v4059_v19 = vadd.f32 %v4058_v57, %v4030_v51  ;;  %v10254_v23 = vpop.f32.mrf.mxu1  ;;  %v4116_v45 = vpop.f32.mrf.mxu0 }
 0x584   : > { %v10272_v51 = vpop.f32.mrf.mxu3 }
 0x585   : > { %v4088_v11 = vadd.f32 %v4087_v53, %v4059_v19 }
 0x587   : > { %v4117_v42 = vadd.f32 %v4116_v45, %v4088_v11 }
 0x58a   : > { %v10256_v20 = vpop.f32.mrf.mxu2 }
 0x58b   : > { %v4135_v31 = vpop.f32.mrf.mxu1  ;;  %v10276_v19 = vpop.f32.mrf.mxu0 }
 0x58c   : > { %v10258_v14 = vadd.f32 %v4135_v31, %v4107_v26  ;;  %v4188_v45 = vpop.f32.mrf.mxu3 }
 0x592   : > { %v4159_v18 = vpop.f32.mrf.mxu2 }
 0x593   : > { %v10260_v62 = vpop.f32.mrf.mxu1  ;;  %v4217_v31 = vpop.f32.mrf.mxu0 }
 0x594   : > { %v4190_v56 = vpop.f32.mrf.mxu3 }
 0x59a   : > { %v4161_v40 = vpop.f32.mrf.mxu2 }
 0x59b   : > { %v4140_v30 = vpop.f32.mrf.mxu1  ;;  %v4162_v2 = vadd.f32 %v4161_v40, %v10285_v38  ;;  %v8249_v40 = vld [vmem:[#allocation16 + $0x124] sm:$0xf0] }
 0x59c   : > { %v10262_v46 = vadd.f32 %v4140_v30, %v4112_v6  ;;  %v8255_v6 = vld [vmem:[#allocation16 + $0x154] sm:$0xf0] }
 0x59d   : > { %v7508_v7 = vor.u32 %v8255_v6, %v7507_v22  ;;  %v4160_v22 = vadd.f32 %v4159_v18, %v10285_v38  ;;  %v4193_v18 = vpop.f32.mrf.mxu3 }
 0x59f   : > { %4573 = vmatpush.bf16.msrb.mxu3 %v7508_v7  ;;  %v4219_v7 = vpop.f32.mrf.mxu0  ;;  %v4189_v29 = vadd.f32 %v4188_v45, %v4160_v22  ;;  %v4191_v45 = vadd.f32 %v4190_v56, %v4162_v2  ;;  %v7492_v22 = vor.u32 %v8251_v10, %v7491_v21  ;;  %v7475_v21 = vld [vmem:[#allocation16 + $0x110] sm:$0xf] }
 0x5a1   : > { %v4218_v48 = vadd.f32 %v4217_v31, %v4189_v29  ;;  %v7483_v29 = vld [vmem:[#allocation16 + $0x120] sm:$0xf]  ;;  %v8248_v31 = vld [vmem:[#allocation16 + $0x124] sm:$0xf] }
 0x5a2   : > { %v10264_v0 = vpop.f32.mrf.mxu2 }
 0x5a3   : > { %v10266_v47 = vpop.f32.mrf.mxu1 }
 0x5a5   : > { %v4195_v56 = vpop.f32.mrf.mxu3 }
 0x5a7   : > { %v4222_v15 = vpop.f32.mrf.mxu0 }
 0x5aa   : > { %v10268_v26 = vpop.f32.mrf.mxu2 }
 0x5ab   : > { %v4145_v63 = vpop.f32.mrf.mxu1 }
 0x5ac   : > { %v10270_v41 = vadd.f32 %v4145_v63, %v4117_v42  ;;  %v8258_v42 = vld [vmem:[#allocation16 + $0x174] sm:$0xf]  ;;  %v7517_v63 = vld [vmem:[#allocation16 + $0x168] sm:$0xf0] }
 0x5ad   : > { %v7528_v49 = vor.u32 %v8258_v42, %v7525_v52  ;;  %v7520_v6 = vor.u32 %v8256_v32, %v7517_v63  ;;  %v7500_v42 = vor.u32 %v8253_v36, %v7499_v27  ;;  %v8252_v52 = vld [vmem:[#allocation16 + $0x144] sm:$0xf] }
 0x5af   : > { %4600 = vmatpush.bf16.msrb.mxu0 %v7528_v49  ;;  %v7501_v49 = vld [vmem:[#allocation16 + $0x148] sm:$0xf0]  ;;  %4574 = vmatpush.bf16.msrb.mxu3 %v7500_v42  ;;  %v4220_v42 = vadd.f32 %v4219_v7, %v4191_v45 }
 0x5b0   : > { %v7504_v32 = vor.u32 %v8252_v52, %v7501_v49  ;;  %v7485_v52 = vld [vmem:[#allocation16 + $0x128] sm:$0xf0] }
 0x5b1   : > { %v7488_v2 = vor.u32 %v8248_v31, %v7485_v52  ;;  %v4167_v31 = vadd.f32 %v10268_v26, %v10285_v38 }
 0x5b2   : > { %v10274_v57 = vpop.f32.mrf.mxu2 }
 0x5b3   : > { %v10278_v53 = vpop.f32.mrf.mxu1  ;;  %4601 = vmatpush.bf16.msrb.mxu0 %v7520_v6  ;;  %4575 = vmatpush.bf16.msrb.mxu3 %v7492_v22  ;;  %v7477_v22 = vld [vmem:[#allocation16 + $0x118] sm:$0xf0] }
 0x5b7   : > { %4602 = vmatpush.bf16.msrb.mxu0 %v7512_v44  ;;  %v7493_v44 = vld [vmem:[#allocation16 + $0x138] sm:$0xf0] }
 0x5b8   : > { %v7496_v36 = vor.u32 %v8250_v4, %v7493_v44  ;;  %v8247_v4 = vld [vmem:[#allocation16 + $0x114] sm:$0xf0]  ;;  %v4224_v44 = vpop.f32.mrf.mxu0 }
 0x5ba   : > { %v10280_v11 = vpop.f32.mrf.mxu2 }
 0x5bb   : > { %v4246_v30 = vpop.f32.mrf.mxu1  ;;  %4603 = vmatpush.bf16.msrb.mxu0 %v7504_v32  ;;  %v8246_v32 = vld [vmem:[#allocation16 + $0x114] sm:$0xf] }
 0x5bc   : > { %v4247_v63 = vadd.f32 %v4246_v30, %v4218_v48  ;;  %v4165_v48 = vadd.f32 %v10264_v0, %v10285_v38  ;;  %v7484_v30 = vor.u32 %v8249_v40, %v7483_v29  ;;  %v7480_v7 = vor.u32 %v8246_v32, %v7477_v22  ;;  %v7467_v29 = vld [vmem:[#allocation16 + $0x100] sm:$0xf]  ;;  %v8245_v40 = vld [vmem:[#allocation16 + $0x104] sm:$0xf0] }
 0x5be   : > { %4576 = vmatpush.bf16.msrb.mxu3 %v7484_v30  ;;  %v4017_v30 = vadd.f32 %v10208_v28, %v10216_v58 }
 0x5bf   : > { %4604 = vmatpush.bf16.msrb.mxu0 %v7496_v36 }
 0x5c0   : > { %v4227_v22 = vpop.f32.mrf.mxu0 }
 0x5c2   : > { %v10282_v39 = vpop.f32.mrf.mxu2 }
 0x5c3   : > { %v4248_v13 = vpop.f32.mrf.mxu1  ;;  %4605 = vmatpush.bf16.msrb.mxu0 %v7488_v2 }
 0x5c4   : > { %v4249_v49 = vadd.f32 %v4248_v13, %v4220_v42  ;;  %v7468_v42 = vor.u32 %v8245_v40, %v7467_v29 }
 0x5c7   : > { %4606 = vmatpush.bf16.msrb.mxu0 %v7480_v7 }
 0x5ca   : > { %v10288_v5 = vpop.f32.mrf.mxu2 }
 0x5cb   : > { %v4251_v27 = vpop.f32.mrf.mxu1 }
 0x5d2   : > { %v4275_v6 = vpop.f32.mrf.mxu2 }
 0x5d3   : > { %v4276_v61 = vadd.f32 %v4275_v6, %v4247_v63  ;;  %v4194_v63 = vadd.f32 %v4193_v18, %v4165_v48  ;;  %v4253_v36 = vpop.f32.mrf.mxu1  ;;  %v8244_v18 = vld [vmem:[#allocation16 + $0x104] sm:$0xf]  ;;  %v7469_v48 = vld [vmem:[#allocation16 + $0x108] sm:$0xf0] }
 0x5d4   : > { %v7472_v2 = vor.u32 %v8244_v18, %v7469_v48 }
 0x5d5   : > { %v7457_v3 = vmul.f32 -1.442695, %v4276_v61  ;;  %v7476_v61 = vor.u32 %v8247_v4, %v7475_v21  ;;  %v4223_v13 = vadd.f32 %v4222_v15, %v4194_v63  ;;  %v4198_v21 = vpop.f32.mrf.mxu3  ;;  %v4196_v4 = vadd.f32 %v4195_v56, %v4167_v31 }
 0x5d6   : > { %4607 = vmatpush.bf16.msrb.mxu0 %v7472_v2 }
 0x5d7   : > { %8620 = vpow2.f32 %v7457_v3  ;;  %4577 = vmatpush.bf16.msrb.mxu3 %v7476_v61  ;;  %v4252_v52 = vadd.f32 %v4251_v27, %v4223_v13  ;;  %v4170_v61 = vadd.f32 %v10274_v57, %v10285_v38  ;;  %v4225_v27 = vadd.f32 %v4224_v44, %v4196_v4  ;;  %v4229_v4 = vpop.f32.mrf.mxu0 }
 0x5d8   : > { %v4022_v44 = vadd.f32 %v10223_v8, %v10216_v58 }
 0x5d9   : > { %v4199_v29 = vadd.f32 %v4198_v21, %v4170_v61 }
 0x5da   : > { %v4277_v10 = vpop.f32.mrf.mxu2 }
 0x5db   : > { %v4278_v6 = vadd.f32 %v4277_v10, %v4249_v49  ;;  %4578 = vmatpush.bf16.msrb.mxu3 %v7468_v42  ;;  %v4046_v49 = vadd.f32 %v10225_v50, %v4017_v30  ;;  %v4256_v50 = vpop.f32.mrf.mxu1 }
 0x5dd   : > { %v8621_v45 = vpop.eup %8620  ;;  %v7458_v0 = vmul.f32 -1.442695, %v4278_v6  ;;  %v4075_v6 = vadd.f32 %v10221_v33, %v4046_v49  ;;  %v4200_v48 = vpop.f32.mrf.mxu3 }
 0x5de   : > { %v4327_v3 = vadd.f32 1.0, %v8621_v45  ;;  %v4254_v45 = vadd.f32 %v4253_v36, %v4225_v27 }
 0x5df   : > { %8622 = vpow2.f32 %v7458_v0  ;;  %v4104_v0 = vadd.f32 %v10227_v25, %v4075_v6 }
 0x5e0   : > { %8624 = vrcp.f32 %v4327_v3  ;;  %v4346_v33 = vand.u32 2147483648, %v4327_v3  ;;  %v4344_v57 = vand.u32 2147483647, %v4327_v3  ;;  %vm4340_vm9 = vweird.f32 %v4327_v3 }
 0x5e1   : > { %v4133_v18 = vadd.f32 %v10254_v23, %v4104_v0 }
 0x5e2   : > { %v4280_v10 = vpop.f32.mrf.mxu2  ;;  %v4347_v2 = vor.u32 1.1754944e-38, %v4346_v33  ;;  %vm4345_vm11 = vcmp.eq.f32.partialorder %v4344_v57, 8.507059e+37  ;;  %v4175_v33 = vadd.f32 %v10282_v39, %v10285_v38 }
 0x5e3   : > { %v4281_v15 = vadd.f32 %v4280_v10, %v4252_v52  ;;  %v4228_v52 = vadd.f32 %v4227_v22, %v4199_v29  ;;  %v4258_v61 = vpop.f32.mrf.mxu1 }
 0x5e5   : > { %v8623_v32 = vpop.eup %8622  ;;  %v7459_v26 = vmul.f32 -1.442695, %v4281_v15  ;;  %v4203_v57 = vpop.f32.mrf.mxu3 }
 0x5e6   : > { %v8625_v63 = vpop.eup %8624  ;;  %v10301_v28 = vadd.f32 1.0, %v8623_v32  ;;  %v4257_v32 = vadd.f32 %v4256_v50, %v4228_v52  ;;  %v4204_v39 = vadd.f32 %v4203_v57, %v4175_v33 }
 0x5e7   : > { %v4336_v7 = vmul.f32 %v8625_v63, %v4327_v3  ;;  %8626 = vpow2.f32 %v7459_v26  ;;  %vm4341_vm8 = vweird.f32 %v8625_v63  ;;  %v4051_v3 = vadd.f32 %v10236_v9, %v4022_v44 }
 0x5e8   : > { %8628 = vrcp.f32 %v10301_v28  ;;  %vm4342_vm10 = vmor %vm4340_vm9, %vm4341_vm8  ;;  %v4361_v6 = vand.u32 2147483648, %v10301_v28  ;;  %vm4355_vm13 = vweird.f32 %v10301_v28 }
 0x5e9   : > { %v4337_v56 = vsub.f32 1.0, %v4336_v7  ;;  %8630 = vtanh.f32 %v10251_v12  ;;  %v4172_v12 = vadd.f32 %v10280_v11, %v10285_v38 }
 0x5ea   : > { %v4282_v40 = vpop.f32.mrf.mxu2 }
 0x5eb   : > { %v4338_v13 = vmul.f32 %v8625_v63, %v4337_v56  ;;  %v4283_v31 = vadd.f32 %v4282_v40, %v4254_v45  ;;  %v4201_v11 = vadd.f32 %v4200_v48, %v4172_v12  ;;  %v4080_v45 = vadd.f32 %v10234_v24, %v4051_v3 }
 0x5ec   : > { %v4362_v40 = vor.u32 1.1754944e-38, %v4361_v6 }
 0x5ed   : > { %v8627_v42 = vpop.eup %8626  ;;  %v4339_v30 = vadd.f32 %v8625_v63, %v4338_v13  ;;  %v7460_v36 = vmul.f32 -1.442695, %v4283_v31  ;;  %v4230_v29 = vadd.f32 %v4229_v4, %v4201_v11 }
 0x5ee   : > { %v8629_v25 = vpop.eup %8628  ;;  %v10311_v49 = vadd.f32 1.0, %v8627_v42  ;;  %v4109_v42 = vadd.f32 %v10238_v55, %v4080_v45 }
 0x5ef   : > { %v4351_v10 = vmul.f32 %v8629_v25, %v10301_v28  ;;  %8632 = vpow2.f32 %v7460_v36  ;;  %v4343_v8 = vsel %vm4342_vm10, %v8625_v63, %v4339_v30  ;;  %v8631_v21 = vpop.eup %8630  ;;  %vm4356_vm12 = vweird.f32 %v8629_v25 }
 0x5f0   : > { %8634 = vrcp.f32 %v10311_v49  ;;  %v4348_v23 = vsel %vm4345_vm11, %v4347_v2, %v4343_v8  ;;  %v4359_v63 = vand.u32 2147483647, %v10301_v28  ;;  %vm4357_vm14 = vmor %vm4355_vm13, %vm4356_vm12  ;;  %v4259_v48 = vadd.f32 %v4258_v61, %v4230_v29  ;;  %v4232_v2 = vpop.f32.mrf.mxu0 }
 0x5f1   : > { %v4352_v15 = vsub.f32 1.0, %v4351_v10  ;;  %v4455_v26 = vmul.f32 %v8631_v21, %v4348_v23  ;;  %8636 = vtanh.f32 %v4133_v18  ;;  %v4374_v52 = vand.u32 2147483647, %v10311_v49  ;;  %v4261_v21 = vpop.f32.mrf.mxu1 }
 0x5f2   : > { %v4285_v27 = vpop.f32.mrf.mxu2  ;;  %vm4360_vm15 = vcmp.eq.f32.partialorder %v4359_v63, 8.507059e+37  ;;  %v4376_v12 = vand.u32 2147483648, %v10311_v49  ;;  %v4138_v55 = vadd.f32 %v10260_v62, %v4109_v42  ;;  %vm4370_vm1 = vweird.f32 %v10311_v49 }
 0x5f3   : > { %v4353_v22 = vmul.f32 %v8629_v25, %v4352_v15  ;;  %v4286_v7 = vadd.f32 %v4285_v27, %v4257_v32  ;;  %v4233_v15 = vadd.f32 %v4232_v2, %v4204_v39  ;;  %v4177_v32 = vadd.f32 %v10288_v5, %v10285_v38 }
 0x5f4   : > { %vm4375_vm3 = vcmp.eq.f32.partialorder %v4374_v52, 8.507059e+37  ;;  %v4027_v5 = vadd.f32 %v10232_v34, %v10216_v58 }
 0x5f5   : > { %v8633_v56 = vpop.eup %8632  ;;  %v4354_v0 = vadd.f32 %v8629_v25, %v4353_v22  ;;  %v7461_v9 = vmul.f32 -1.442695, %v4286_v7  ;;  %v4205_v22 = vpop.f32.mrf.mxu3  ;;  %v4262_v63 = vadd.f32 %v4261_v21, %v4233_v15 }
 0x5f6   : > { %v8635_v50 = vpop.eup %8634  ;;  %v10322_v13 = vadd.f32 1.0, %v8633_v56  ;;  %v4206_v38 = vadd.f32 %v4205_v22, %v4177_v32  ;;  %v4056_v29 = vadd.f32 %v10247_v1, %v4027_v5  ;;  %v7643_v22 = vld [vmem:[#allocation13 + $0x860] sm:$0xf] }
 0x5f7   : > { %v4366_v31 = vmul.f32 %v8635_v50, %v10311_v49  ;;  %8638 = vpow2.f32 %v7461_v9  ;;  %v4358_v44 = vsel %vm4357_vm14, %v8629_v25, %v4354_v0  ;;  %v8637_v24 = vpop.eup %8636  ;;  %vm4371_vm0 = vweird.f32 %v8635_v50 }
 0x5f8   : > { %8640 = vrcp.f32 %v10322_v13  ;;  %v4363_v28 = vsel %vm4360_vm15, %v4362_v40, %v4358_v44  ;;  %vm4372_vm2 = vmor %vm4370_vm1, %vm4371_vm0  ;;  %v4391_v45 = vand.u32 2147483648, %v10322_v13  ;;  %v4234_v40 = vpop.f32.mrf.mxu0  ;;  %vm4385_vm5 = vweird.f32 %v10322_v13 }
 0x5f9   : > { %v4367_v18 = vsub.f32 1.0, %v4366_v31  ;;  %v4456_v30 = vmul.f32 %v8637_v24, %v4363_v28  ;;  %8642 = vtanh.f32 %v10258_v14  ;;  %v4235_v34 = vadd.f32 %v4234_v40, %v4206_v38  ;;  %v4263_v28 = vpop.f32.mrf.mxu1 }
 0x5fa   : > { %v4287_v36 = vpop.f32.mrf.mxu2  ;;  %v4392_v42 = vor.u32 1.1754944e-38, %v4391_v45  ;;  %v4085_v1 = vadd.f32 %v10245_v37, %v4056_v29  ;;  %v7635_v45 = vld [vmem:[#allocation13 + $0x850] sm:$0xf] }
 0x5fb   : > { %v4288_v25 = vadd.f32 %v4287_v36, %v4259_v48  ;;  %v4463_v10 = vpack.c.bf16 %v4456_v30, %v4455_v26  ;;  %v4368_v8 = vmul.f32 %v8635_v50, %v4367_v18  ;;  %v4377_v26 = vor.u32 1.1754944e-38, %v4376_v12 }
 0x5fd   : > { %v8639_v23 = vpop.eup %8638  ;;  %v7462_v3 = vmul.f32 -1.442695, %v4288_v25  ;;  %4579 = vmatmul.bf16.vlgmr.msrb.gmra.mxu3 %v4463_v10  ;;  %4608 = vmatmul.bf16.vlgmr.msrb.gmra.mxu0 %v4463_v10  ;;  %v4369_v4 = vadd.f32 %v8635_v50, %v4368_v8 }
 0x5fe   : > { %v8641_v14 = vpop.eup %8640  ;;  %v10334_v11 = vadd.f32 1.0, %v8639_v23  ;;  %v4114_v23 = vadd.f32 %v10249_v60, %v4085_v1 }
 0x5ff   : > { %v4381_v6 = vmul.f32 %v8641_v14, %v10322_v13  ;;  %8644 = vpow2.f32 %v7462_v3  ;;  %v4373_v61 = vsel %vm4372_vm2, %v8635_v50, %v4369_v4  ;;  %v8643_v62 = vpop.eup %8642  ;;  %vm4386_vm4 = vweird.f32 %v8641_v14  ;;  %v7651_v4 = vld [vmem:[#allocation13 + $0x870] sm:$0xf] }
 0x600   : > { %8646 = vrcp.f32 %v10334_v11  ;;  %v4378_v27 = vsel %vm4375_vm3, %v4377_v26, %v4373_v61  ;;  %v4389_v50 = vand.u32 2147483647, %v10322_v13  ;;  %vm4387_vm6 = vmor %vm4385_vm5, %vm4386_vm4  ;;  %v4264_v13 = vadd.f32 %v4263_v28, %v4235_v34  ;;  %v7587_v61 = vld [vmem:[#allocation13 + $0x7f0] sm:$0xf]  ;;  %v8271_v28 = vld [vmem:[#allocation13 + $0x7d4] sm:$0xf0] }
 0x601   : > { %v4382_v49 = vsub.f32 1.0, %v4381_v6  ;;  %v4457_v7 = vmul.f32 %v8643_v62, %v4378_v27  ;;  %8648 = vtanh.f32 %v4138_v55  ;;  %v4404_v2 = vand.u32 2147483647, %v10334_v11  ;;  %v8275_v62 = vld [vmem:[#allocation13 + $0x7f4] sm:$0xf0] }
 0x602   : > { %v4290_v56 = vpop.f32.mrf.mxu2  ;;  %vm4390_vm7 = vcmp.eq.f32.partialorder %v4389_v50, 8.507059e+37  ;;  %v4406_v25 = vand.u32 2147483648, %v10334_v11  ;;  %vm4400_vm9 = vweird.f32 %v10334_v11  ;;  %v4143_v15 = vadd.f32 %v10266_v47, %v4114_v23  ;;  %v7579_v47 = vld [vmem:[#allocation13 + $0x7e0] sm:$0xf]  ;;  %v7571_v34 = vld [vmem:[#allocation13 + $0x7d0] sm:$0xf] }
 0x603   : > { %v4291_v0 = vadd.f32 %v4290_v56, %v4262_v63  ;;  %v4383_v9 = vmul.f32 %v8641_v14, %v4382_v49  ;;  %vm4405_vm11 = vcmp.eq.f32.partialorder %v4404_v2, 8.507059e+37  ;;  %v8289_v49 = vld [vmem:[#allocation13 + $0x864] sm:$0xf0]  ;;  %v7588_v56 = vor.u32 %v8275_v62, %v7587_v61  ;;  %v7555_v61 = vld [vmem:[#allocation13 + $0x7b0] sm:$0xf] }
 0x604   : > { %v4407_v26 = vor.u32 1.1754944e-38, %v4406_v25  ;;  %v7644_v29 = vor.u32 %v8289_v49, %v7643_v22  ;;  %v8267_v62 = vld [vmem:[#allocation13 + $0x7b4] sm:$0xf0] }
 0x605   : > { %v8645_v33 = vpop.eup %8644  ;;  %v7463_v57 = vmul.f32 -1.442695, %v4291_v0  ;;  %v4384_v31 = vadd.f32 %v8641_v14, %v4383_v9  ;;  %v8287_v0 = vld [vmem:[#allocation13 + $0x854] sm:$0xf0]  ;;  %v4032_v9 = vadd.f32 %v10243_v59, %v10216_v58  ;;  %5283 = vmatpush.bf16.msrb.mxu1 %v7588_v56  ;;  %v8285_v58 = vld [vmem:[#allocation13 + $0x844] sm:$0xf0] }
 0x606   : > { %v8647_v44 = vpop.eup %8646  ;;  %v10344_v24 = vadd.f32 1.0, %v8645_v33  ;;  %v7715_v59 = vld [vmem:[#allocation13 + $0x8f0] sm:$0xf] }
 0x607   : > { %v4396_v18 = vmul.f32 %v8647_v44, %v10334_v11  ;;  %8650 = vpow2.f32 %v7463_v57  ;;  %v4388_v48 = vsel %vm4387_vm6, %v8641_v14, %v4384_v31  ;;  %v8649_v30 = vpop.eup %8648  ;;  %vm4401_vm8 = vweird.f32 %v8647_v44 }
 0x608   : > { %8652 = vrcp.f32 %v10344_v24  ;;  %v4393_v39 = vsel %vm4390_vm7, %v4392_v42, %v4388_v48  ;;  %vm4402_vm10 = vmor %vm4400_vm9, %vm4401_vm8  ;;  %v4421_v50 = vand.u32 2147483648, %v10344_v24  ;;  %v4419_v40 = vand.u32 2147483647, %v10344_v24  ;;  %v7627_v42 = vld [vmem:[#allocation13 + $0x840] sm:$0xf] }
 0x609   : > { %v4397_v36 = vsub.f32 1.0, %v4396_v18  ;;  %v4458_v52 = vmul.f32 %v8649_v30, %v4393_v39  ;;  %8654 = vtanh.f32 %v10262_v46  ;;  %v8291_v46 = vld [vmem:[#allocation13 + $0x874] sm:$0xf0]  ;;  %v4061_v31 = vadd.f32 %v10256_v20, %v4032_v9 }
 0x60a   : > { %v4292_v12 = vpop.f32.mrf.mxu2  ;;  %v7652_v6 = vor.u32 %v8291_v46, %v7651_v4  ;;  %vm4415_vm13 = vweird.f32 %v10344_v24  ;;  %v8307_v30 = vld [vmem:[#allocation13 + $0x8f4] sm:$0xf0]  ;;  %vm4420_vm15 = vcmp.eq.f32.partialorder %v4419_v40, 8.507059e+37  ;;  %v7707_v40 = vld [vmem:[#allocation13 + $0x8e0] sm:$0xf] }
 0x60b   : > { %v4293_v10 = vadd.f32 %v4292_v12, %v4264_v13  ;;  %v4464_v8 = vpack.c.bf16 %v4458_v52, %v4457_v7  ;;  %v4398_v21 = vmul.f32 %v8647_v44, %v4397_v36  ;;  %v8273_v7 = vld [vmem:[#allocation13 + $0x7e4] sm:$0xf0]  ;;  %v4422_v36 = vor.u32 1.1754944e-38, %v4421_v50 }
 0x60c   : > { %5312 = vmatpush.bf16.msra.mxu2 %v7652_v6  ;;  %v7580_v57 = vor.u32 %v8273_v7, %v7579_v47  ;;  %v7716_v13 = vor.u32 %v8307_v30, %v7715_v59  ;;  %v7572_v12 = vor.u32 %v8271_v28, %v7571_v34  ;;  %v4090_v25 = vadd.f32 %v10272_v51, %v4061_v31  ;;  %v7611_v31 = vld [vmem:[#allocation13 + $0x820] sm:$0xf]  ;;  %v8281_v34 = vld [vmem:[#allocation13 + $0x824] sm:$0xf0]  ;;  %v7699_v28 = vld [vmem:[#allocation13 + $0x8d0] sm:$0xf] }
 0x60d   : > { %v8651_v37 = vpop.eup %8650  ;;  %v7464_v55 = vmul.f32 -1.442695, %v4293_v10  ;;  %4584 = vmatmul.bf16.gmra.mxu3 %v4464_v8  ;;  %4613 = vmatmul.bf16.gmra.mxu0 %v4464_v8  ;;  %v4399_v3 = vadd.f32 %v8647_v44, %v4398_v21  ;;  %v7628_v10 = vor.u32 %v8285_v58, %v7627_v42  ;;  %v7563_v8 = vld [vmem:[#allocation13 + $0x7c0] sm:$0xf]  ;;  %v8269_v21 = vld [vmem:[#allocation13 + $0x7c4] sm:$0xf0] }
 0x60e   : > { %v8653_v14 = vpop.eup %8652  ;;  %v10355_v32 = vadd.f32 1.0, %v8651_v37  ;;  %5284 = vmatpush.bf16.msrb.mxu1 %v7580_v57  ;;  %5341 = vmatpush.bf16.msra.mxu3 %v7716_v13  ;;  %v8305_v57 = vld [vmem:[#allocation13 + $0x8e4] sm:$0xf0]  ;;  %v8303_v42 = vld [vmem:[#allocation13 + $0x8d4] sm:$0xf0] }
 0x60f   : > { %v4411_v60 = vmul.f32 %v8653_v14, %v10344_v24  ;;  %8656 = vpow2.f32 %v7464_v55  ;;  %v4403_v27 = vsel %vm4402_vm10, %v8647_v44, %v4399_v3  ;;  %v8655_v11 = vpop.eup %8654  ;;  %vm4416_vm12 = vweird.f32 %v8653_v14  ;;  %v7619_v55 = vld [vmem:[#allocation13 + $0x830] sm:$0xf]  ;;  %v8283_v3 = vld [vmem:[#allocation13 + $0x834] sm:$0xf0]  ;;  %v8265_v58 = vld [vmem:[#allocation13 + $0x7a4] sm:$0xf0] }
 0x610   : > { %8658 = vrcp.f32 %v10355_v32  ;;  %v4408_v63 = vsel %vm4405_vm11, %v4407_v26, %v4403_v27  ;;  %5313 = vmatpush.bf16.msra.mxu2 %v7644_v29  ;;  %v7636_v44 = vor.u32 %v8287_v0, %v7635_v45  ;;  %vm4417_vm14 = vmor %vm4415_vm13, %vm4416_vm12  ;;  %v4434_v4 = vand.u32 2147483647, %v10355_v32 }
 0x611   : > { %v4412_v5 = vsub.f32 1.0, %v4411_v60  ;;  %v4459_v38 = vmul.f32 %v8655_v11, %v4408_v63  ;;  %8660 = vtanh.f32 %v4143_v15  ;;  %v4436_v46 = vand.u32 2147483648, %v10355_v32 }
 0x612   : > { %5285 = vmatpush.bf16.msrb.mxu1 %v7572_v12  ;;  %v7564_v15 = vor.u32 %v8269_v21, %v7563_v8  ;;  %v4119_v26 = vadd.f32 %v10276_v19, %v4090_v25  ;;  %v7620_v6 = vor.u32 %v8283_v3, %v7619_v55  ;;  %vm4430_vm1 = vweird.f32 %v10355_v32  ;;  %v7691_v12 = vld [vmem:[#allocation13 + $0x8c0] sm:$0xf]  ;;  %v8261_v21 = vld [vmem:[#allocation13 + $0x784] sm:$0xf0] }
 0x613   : > { %v4413_v33 = vmul.f32 %v8653_v14, %v4412_v5  ;;  %v4437_v22 = vor.u32 1.1754944e-38, %v4436_v46  ;;  %vm4435_vm3 = vcmp.eq.f32.partialorder %v4434_v4, 8.507059e+37  ;;  %v7556_v19 = vor.u32 %v8267_v62, %v7555_v61  ;;  %v7531_v25 = vld [vmem:[#allocation13 + $0x780] sm:$0xf]  ;;  %v7603_v46 = vld [vmem:[#allocation13 + $0x810] sm:$0xf] }
 0x614   : > { %5314 = vmatpush.bf16.msra.mxu2 %v7636_v44  ;;  %v4148_v27 = vadd.f32 %v10278_v53, %v4119_v26  ;;  %v7708_v44 = vor.u32 %v8305_v57, %v7707_v40  ;;  %v7700_v59 = vor.u32 %v8303_v42, %v7699_v28  ;;  %v7532_v55 = vor.u32 %v8261_v21, %v7531_v25  ;;  %v8299_v26 = vld [vmem:[#allocation13 + $0x8b4] sm:$0xf0]  ;;  %v7763_v61 = vld [vmem:[#allocation13 + $0x950] sm:$0xf]  ;;  %v7739_v40 = vld [vmem:[#allocation13 + $0x920] sm:$0xf] }
 0x615   : > { %v8657_v18 = vpop.eup %8656  ;;  %v4414_v48 = vadd.f32 %v8653_v14, %v4413_v33  ;;  %v8319_v62 = vld [vmem:[#allocation13 + $0x954] sm:$0xf0] }
 0x616   : > { %v8659_v1 = vpop.eup %8658  ;;  %v10365_v39 = vadd.f32 1.0, %v8657_v18  ;;  %5286 = vmatpush.bf16.msrb.mxu1 %v7564_v15  ;;  %v7612_v18 = vor.u32 %v8281_v34, %v7611_v31  ;;  %5342 = vmatpush.bf16.msra.mxu3 %v7708_v44  ;;  %v8274_v31 = vld [vmem:[#allocation13 + $0x7f4] sm:$0xf]  ;;  %v7589_v44 = vld [vmem:[#allocation13 + $0x7f8] sm:$0xf0] }
 0x617   : > { %v4426_v20 = vmul.f32 %v8659_v1, %v10355_v32  ;;  %v4418_v52 = vsel %vm4417_vm14, %v8653_v14, %v4414_v48  ;;  %v8661_v2 = vpop.eup %8660  ;;  %vm4431_vm0 = vweird.f32 %v8659_v1  ;;  %v7547_v48 = vld [vmem:[#allocation13 + $0x7a0] sm:$0xf]  ;;  %v8313_v34 = vld [vmem:[#allocation13 + $0x924] sm:$0xf0]  ;;  %v7592_v28 = vor.u32 %v8274_v31, %v7589_v44 }
 0x618   : > { %8662 = vrcp.f32 %v10365_v39  ;;  %v4423_v24 = vsel %vm4420_vm15, %v4422_v36, %v4418_v52  ;;  %5315 = vmatpush.bf16.msra.mxu2 %v7628_v10  ;;  %vm4432_vm2 = vmor %vm4430_vm1, %vm4431_vm0  ;;  %v4449_v53 = vand.u32 2147483647, %v10365_v39  ;;  %vm4445_vm5 = vweird.f32 %v10365_v39  ;;  %v7779_v36 = vld [vmem:[#allocation13 + $0x970] sm:$0xf]  ;;  %v7819_v44 = vld [vmem:[#allocation13 + $0x9c0] sm:$0xf] }
 0x619   : > { %v4427_v23 = vsub.f32 1.0, %v4426_v20  ;;  %v4460_v37 = vmul.f32 %v8661_v2, %v4423_v24  ;;  %8664 = vtanh.f32 %v10270_v41  ;;  %v7548_v30 = vor.u32 %v8265_v58, %v7547_v48  ;;  %v8323_v20 = vld [vmem:[#allocation13 + $0x974] sm:$0xf0]  ;;  %v8301_v2 = vld [vmem:[#allocation13 + $0x8c4] sm:$0xf0]  ;;  %v8750_v24 = vld [vmem:[#allocation2] sm:$0xff] }
 0x61a   : > { %8666 = vtanh.f32 %v4148_v27  ;;  %5287 = vmatpush.bf16.msrb.mxu1 %v7556_v19  ;;  %vm4450_vm7 = vcmp.eq.f32.partialorder %v4449_v53, 8.507059e+37  ;;  %5343 = vmatpush.bf16.msra.mxu3 %v7700_v59  ;;  %v7780_v52 = vor.u32 %v8323_v20, %v7779_v36  ;;  %v4677_v10 = vpack.c.bf16 %v8750_v24, %v8750_v24  ;;  %v7675_v27 = vld [vmem:[#allocation13 + $0x8a0] sm:$0xf]  ;;  %v8277_v19 = vld [vmem:[#allocation13 + $0x804] sm:$0xf0] }
 0x61b   : > { %v4465_v14 = vpack.c.bf16 %v4460_v37, %v4459_v38  ;;  %v4428_v51 = vmul.f32 %v8659_v1, %v4427_v23  ;;  %v4451_v38 = vand.u32 2147483648, %v10365_v39  ;;  %v7692_v8 = vor.u32 %v8301_v2, %v7691_v12  ;;  %v7771_v23 = vld [vmem:[#allocation13 + $0x960] sm:$0xf]  ;;  %v8321_v37 = vld [vmem:[#allocation13 + $0x964] sm:$0xf0] }
 0x61c   : > { %5316 = vmatpush.bf16.msra.mxu2 %v7620_v6  ;;  %5370 = vmatpush.bf16.msra.mxu0 %v7780_v52  ;;  %v7772_v3 = vor.u32 %v8321_v37, %v7771_v23  ;;  %v10381_v4 = vunpack.c.l.b16 %v4677_v10  ;;  %v8295_v53 = vld [vmem:[#allocation13 + $0x894] sm:$0xf0]  ;;  %v7740_v42 = vor.u32 %v8313_v34, %v7739_v40  ;;  %v7731_v48 = vld [vmem:[#allocation13 + $0x910] sm:$0xf]  ;;  %v7723_v36 = vld [vmem:[#allocation13 + $0x900] sm:$0xf] }
 0x61d   : > { %4589 = vmatmul.bf16.gmra.mxu3 %v4465_v14  ;;  %4618 = vmatmul.bf16.gmra.mxu0 %v4465_v14  ;;  %v4429_v60 = vadd.f32 %v8659_v1, %v4428_v51  ;;  %v4452_v45 = vor.u32 1.1754944e-38, %v4451_v38  ;;  %v8279_v14 = vld [vmem:[#allocation13 + $0x814] sm:$0xf0]  ;;  %v7683_v51 = vld [vmem:[#allocation13 + $0x8b0] sm:$0xf] }
 0x61e   : > { %v8663_v41 = vpop.eup %8662  ;;  %5288 = vmatpush.bf16.msrb.mxu1 %v7548_v30  ;;  %5344 = vmatpush.bf16.msra.mxu3 %v7692_v8  ;;  %v7604_v15 = vor.u32 %v8279_v14, %v7603_v46  ;;  %v10385_v6 = vpack.c.b16 %v10381_v4, %v10381_v4  ;;  %v4485_v38 = vld [vmem:[#allocation17 + $0x4] sm:$0x3]  ;;  %v8311_v58 = vld [vmem:[#allocation13 + $0x914] sm:$0xf0]  ;;  %v7843_v20 = vld [vmem:[#allocation13 + $0x9f0] sm:$0xf] }
 0x61f   : > { %v4441_v49 = vmul.f32 %v8663_v41, %v10365_v39  ;;  %v4433_v11 = vsel %vm4432_vm2, %v8659_v1, %v4429_v60  ;;  %v8665_v63 = vpop.eup %8664  ;;  %vm4446_vm4 = vweird.f32 %v8663_v41  ;;  %v7539_v1 = vld [vmem:[#allocation13 + $0x790] sm:$0xf]  ;;  %v8263_v39 = vld [vmem:[#allocation13 + $0x794] sm:$0xf0]  ;;  %v7684_v60 = vor.u32 %v8299_v26, %v7683_v51  ;;  %v8272_v12 = vld [vmem:[#allocation13 + $0x7e4] sm:$0xf] }
 0x620   : > { %v4438_v47 = vsel %vm4435_vm3, %v4437_v22, %v4433_v11  ;;  %vm4447_vm6 = vmor %vm4445_vm5, %vm4446_vm4  ;;  %v8667_v9 = vpop.eup %8666  ;;  %5317 = vmatpush.bf16.msra.mxu2 %v7612_v18  ;;  %v7540_v13 = vor.u32 %v8263_v39, %v7539_v1  ;;  %5371 = vmatpush.bf16.msra.mxu0 %v7772_v3  ;;  %v8297_v22 = vld [vmem:[#allocation13 + $0x8a4] sm:$0xf0]  ;;  %v7732_v30 = vor.u32 %v8311_v58, %v7731_v48  ;;  %v10394_v39 = vperm.slane %v4485_v38, 0  ;;  %v8339_v52 = vld [vmem:[#allocation13 + $0x9f4] sm:$0xf0] }
 0x621   : > { %v4442_v7 = vsub.f32 1.0, %v4441_v49  ;;  %v4461_v5 = vmul.f32 %v8665_v63, %v4438_v47  ;;  %v7595_v49 = vld [vmem:[#allocation13 + $0x800] sm:$0xf]  ;;  %v7676_v11 = vor.u32 %v8297_v22, %v7675_v27  ;;  %v8317_v47 = vld [vmem:[#allocation13 + $0x944] sm:$0xf0]  ;;  %v7844_v24 = vor.u32 %v8339_v52, %v7843_v20  ;;  %v8752_v22 = vld [vmem:[#allocation2 + $0x18] sm:$0xff] }
 0x622   : > { %5289 = vmatpush.bf16.msrb.mxu1 %v7540_v13  ;;  %5345 = vmatpush.bf16.msra.mxu3 %v7684_v60  ;;  %v7755_v63 = vld [vmem:[#allocation13 + $0x940] sm:$0xf]  ;;  %v8309_v13 = vld [vmem:[#allocation13 + $0x904] sm:$0xf0]  ;;  %v7581_v10 = vld [vmem:[#allocation13 + $0x7e8] sm:$0xf0] }
 0x623   : > { %v4443_v32 = vmul.f32 %v8663_v41, %v4442_v7  ;;  %v7596_v7 = vor.u32 %v8277_v19, %v7595_v49  ;;  %v7724_v2 = vor.u32 %v8309_v13, %v7723_v36  ;;  %v7584_v21 = vor.u32 %v8272_v12, %v7581_v10  ;;  %v7835_v46 = vld [vmem:[#allocation13 + $0x9e0] sm:$0xf]  ;;  %v8337_v14 = vld [vmem:[#allocation13 + $0x9e4] sm:$0xf0]  ;;  %v8270_v26 = vld [vmem:[#allocation13 + $0x7d4] sm:$0xf] }
 0x624   : > { %5318 = vmatpush.bf16.msra.mxu2 %v7604_v15  ;;  %v7836_v15 = vor.u32 %v8337_v14, %v7835_v46  ;;  %v8333_v34 = vld [vmem:[#allocation13 + $0x9c4] sm:$0xf0]  ;;  %v7557_v48 = vld [vmem:[#allocation13 + $0x7b8] sm:$0xf0]  ;;  %v8288_v14 = vld [vmem:[#allocation13 + $0x864] sm:$0xf] }
 0x625   : > { %v4444_v56 = vadd.f32 %v8663_v41, %v4443_v32  ;;  %v7667_v32 = vld [vmem:[#allocation13 + $0x890] sm:$0xf]  ;;  %v7653_v36 = vld [vmem:[#allocation13 + $0x878] sm:$0xf0] }
 0x626   : > { %5290 = vmatpush.bf16.msrb.mxu1 %v7532_v55  ;;  %5346 = vmatpush.bf16.msra.mxu3 %v7676_v11 }
 0x627   : > { %v4448_v0 = vsel %vm4447_vm6, %v8663_v41, %v4444_v56  ;;  %v7764_v41 = vor.u32 %v8319_v62, %v7763_v61  ;;  %v7747_v56 = vld [vmem:[#allocation13 + $0x930] sm:$0xf]  ;;  %v7573_v61 = vld [vmem:[#allocation13 + $0x7d8] sm:$0xf0] }
 0x628   : > { %v4453_v50 = vsel %vm4450_vm7, %v4452_v45, %v4448_v0  ;;  %5319 = vmatpush.bf16.msra.mxu2 %v7596_v7  ;;  %v7668_v45 = vor.u32 %v8295_v53, %v7667_v32  ;;  %v8315_v0 = vld [vmem:[#allocation13 + $0x934] sm:$0xf0] }
 0x629   : > { %v4462_v29 = vmul.f32 %v8667_v9, %v4453_v50  ;;  %5291 = vmatmul.bf16.vlgmr.msrb.gmra.mxu1 %v10385_v6  ;;  %5372 = vmatpush.bf16.msra.mxu0 %v7764_v41  ;;  %v7748_v9 = vor.u32 %v8315_v0, %v7747_v56  ;;  %v10388_v50 = vperm.slane %v4485_v38, 1  ;;  %v7576_v41 = vor.u32 %v8270_v26, %v7573_v61  ;;  %v8335_v38 = vld [vmem:[#allocation13 + $0x9d4] sm:$0xf0]  ;;  %v8268_v56 = vld [vmem:[#allocation13 + $0x7c4] sm:$0xf] }
 0x62a   : > { %5347 = vmatpush.bf16.msra.mxu3 %v7668_v45  ;;  %5399 = vmatpush.bf16.msra.mxu1 %v7844_v24  ;;  %v7565_v45 = vld [vmem:[#allocation13 + $0x7c8] sm:$0xf0] }
 0x62b   : > { %v4466_v33 = vpack.c.bf16 %v4462_v29, %v4461_v5  ;;  %v7756_v5 = vor.u32 %v8317_v47, %v7755_v63  ;;  %v7659_v29 = vld [vmem:[#allocation13 + $0x880] sm:$0xf]  ;;  %v8754_v24 = vld [vmem:[#allocation2 + $0x28] sm:$0xff] }
 0x62c   : > { %5428 = vmatpush.bf16.msrb.mxu2 %v7592_v28 }
 0x62d   : > { %4594 = vmatmul.bf16.gmra.mxu3 %v4466_v33  ;;  %4623 = vmatmul.bf16.gmra.mxu0 %v4466_v33  ;;  %v8293_v33 = vld [vmem:[#allocation13 + $0x884] sm:$0xf0] }
 0x62e   : > { %5373 = vmatpush.bf16.msra.mxu0 %v7756_v5  ;;  %v7660_v57 = vor.u32 %v8293_v33, %v7659_v29  ;;  %5400 = vmatpush.bf16.msra.mxu1 %v7836_v15  ;;  %v7827_v5 = vld [vmem:[#allocation13 + $0x9d0] sm:$0xf]  ;;  %v7568_v29 = vor.u32 %v8268_v56, %v7565_v45  ;;  %v7803_v15 = vld [vmem:[#allocation13 + $0x9a0] sm:$0xf]  ;;  %v8327_v56 = vld [vmem:[#allocation13 + $0x994] sm:$0xf0] }
 0x62f   : > { %v7828_v53 = vor.u32 %v8335_v38, %v7827_v5  ;;  %v8306_v45 = vld [vmem:[#allocation13 + $0x8f4] sm:$0xf] }
 0x630   : > { %5348 = vmatpush.bf16.msra.mxu3 %v7660_v57  ;;  %5429 = vmatpush.bf16.msrb.mxu2 %v7584_v21 }
 0x632   : > { %5374 = vmatpush.bf16.msra.mxu0 %v7748_v9  ;;  %5401 = vmatpush.bf16.msra.mxu1 %v7828_v53  ;;  %v7795_v53 = vld [vmem:[#allocation13 + $0x990] sm:$0xf] }
 0x634   : > { %5430 = vmatpush.bf16.msrb.mxu2 %v7576_v41 }
 0x636   : > { %5375 = vmatpush.bf16.msra.mxu0 %v7740_v42  ;;  %v7820_v42 = vor.u32 %v8333_v34, %v7819_v44  ;;  %v7717_v44 = vld [vmem:[#allocation13 + $0x8f8] sm:$0xf0] }
 0x637   : > { %v7720_v34 = vor.u32 %v8306_v45, %v7717_v44 }
 0x638   : > { %5431 = vmatpush.bf16.msrb.mxu2 %v7568_v29  ;;  %5402 = vmatpush.bf16.msra.mxu1 %v7820_v42 }
 0x63a   : > { %5376 = vmatpush.bf16.msra.mxu0 %v7732_v30  ;;  %v8290_v30 = vld [vmem:[#allocation13 + $0x874] sm:$0xf] }
 0x63b   : > { %v7656_v52 = vor.u32 %v8290_v30, %v7653_v36  ;;  %v7787_v30 = vld [vmem:[#allocation13 + $0x980] sm:$0xf]  ;;  %v8325_v36 = vld [vmem:[#allocation13 + $0x984] sm:$0xf0] }
 0x63d   : > { %5457 = vmatpush.bf16.msrb.mxu3 %v7656_v52  ;;  %v7621_v52 = vld [vmem:[#allocation13 + $0x838] sm:$0xf0] }
 0x63e   : > { %5377 = vmatpush.bf16.msra.mxu0 %v7724_v2  ;;  %v7811_v2 = vld [vmem:[#allocation13 + $0x9b0] sm:$0xf] }
 0x642   : > { %5486 = vmatpush.bf16.msrb.mxu0 %v7720_v34 }
 0x67a   : > { %v4609_v18 = vpop.f32.mrf.mxu0 }
 0x67b   : > { %v4610_v59 = vadd.f32 %v4609_v18, %v10388_v50  ;;  %v8266_v18 = vld [vmem:[#allocation13 + $0x7b4] sm:$0xf] }
 0x67d   : > { %v10392_v1 = vadd.f32 %v4610_v59, %v10096_v43  ;;  %v8751_v43 = vld [vmem:[#allocation2 + $0x10] sm:$0xff]  ;;  %v7560_v59 = vor.u32 %v8266_v18, %v7557_v48  ;;  %v7541_v48 = vld [vmem:[#allocation13 + $0x798] sm:$0xf0] }
 0x67e   : > { %v8262_v18 = vld [vmem:[#allocation13 + $0x794] sm:$0xf] }
 0x67f   : > { %5432 = vmatpush.bf16.msrb.mxu2 %v7560_v59  ;;  %v7544_v59 = vor.u32 %v8262_v18, %v7541_v48  ;;  %v8298_v18 = vld [vmem:[#allocation13 + $0x8b4] sm:$0xf]  ;;  %v7685_v48 = vld [vmem:[#allocation13 + $0x8b8] sm:$0xf0] }
 0x680   : > { %v4580_v25 = vpop.f32.mrf.mxu3 }
 0x681   : > { %v4581_v8 = vadd.f32 %v4580_v25, %v10394_v39  ;;  %v8331_v25 = vld [vmem:[#allocation13 + $0x9b4] sm:$0xf0] }
 0x682   : > { %v10397_v23 = vpop.f32.mrf.mxu0 }
 0x683   : > { %v4629_v37 = vadd.f32 %v8751_v43, %v4581_v8  ;;  %v7812_v43 = vor.u32 %v8331_v25, %v7811_v2  ;;  %v8304_v25 = vld [vmem:[#allocation13 + $0x8e4] sm:$0xf] }
 0x685   : > { %v4637_v55 = vmul.f32 %v9484_v35, %v4629_v37  ;;  %v10799_v37 = vld [vmem:[#allocation36_spill] sm:$0xff]  ;;  %5403 = vmatpush.bf16.msra.mxu1 %v7812_v43 }
 0x687   : > { %v4653_v3 = vpack.c.bf16 %v4637_v55, %v4637_v55  ;;  %4661 = vst [vmem:[#allocation2 + $0x10] sm:$0xff] %v4637_v55 }
 0x688   : > { %v4582_v51 = vpop.f32.mrf.mxu3 }
 0x689   : > { %v4749_v62 = vunpack.c.l.b16 %v4653_v3  ;;  %v4583_v60 = vadd.f32 %v4582_v51, %v10394_v39  ;;  %v10800_v3 = vld [vmem:[#allocation47_spill] sm:$0xff]  ;;  %v7645_v51 = vld [vmem:[#allocation13 + $0x868] sm:$0xf0] }
 0x68a   : > { %v4614_v27 = vpop.f32.mrf.mxu0  ;;  %v7648_v61 = vor.u32 %v8288_v14, %v7645_v51 }
 0x68b   : > { %v4630_v49 = vadd.f32 %v8752_v22, %v4583_v60  ;;  %v4615_v11 = vadd.f32 %v4614_v27, %v10388_v50  ;;  %v10403_v19 = vpack.c.b16 %v4749_v62, %v10381_v4  ;;  %v7549_v60 = vld [vmem:[#allocation13 + $0x7a8] sm:$0xf0]  ;;  %v8286_v22 = vld [vmem:[#allocation13 + $0x854] sm:$0xf] }
 0x68c   : > { %5458 = vmatpush.bf16.msrb.mxu3 %v7648_v61  ;;  %v7701_v61 = vld [vmem:[#allocation13 + $0x8d8] sm:$0xf0] }
 0x68d   : > { %v4638_v63 = vmul.f32 %v9500_v54, %v4630_v49  ;;  %v10407_v47 = vadd.f32 %v4615_v11, %v10114_v16  ;;  %5320 = vmatmul.bf16.vlgmr.msra.gmra.mxu2 %v10403_v19  ;;  %v8753_v16 = vld [vmem:[#allocation2 + $0x20] sm:$0xff]  ;;  %v8329_v11 = vld [vmem:[#allocation13 + $0x9a4] sm:$0xf0] }
 0x68e   : > { %v7637_v49 = vld [vmem:[#allocation13 + $0x858] sm:$0xf0]  ;;  %v7804_v5 = vor.u32 %v8329_v11, %v7803_v15 }
 0x68f   : > { %v4654_v7 = vpack.c.bf16 %v4638_v63, %v4638_v63  ;;  %4662 = vst [vmem:[#allocation2 + $0x18] sm:$0xff] %v4638_v63 }
 0x690   : > { %v4585_v32 = vpop.f32.mrf.mxu3  ;;  %5404 = vmatpush.bf16.msra.mxu1 %v7804_v5  ;;  %v7693_v5 = vld [vmem:[#allocation13 + $0x8c8] sm:$0xf0] }
 0x691   : > { %v4750_v0 = vunpack.c.l.b16 %v4654_v7  ;;  %v4586_v9 = vadd.f32 %v4585_v32, %v10394_v39  ;;  %v7640_v32 = vor.u32 %v8286_v22, %v7637_v49  ;;  %v8280_v22 = vld [vmem:[#allocation13 + $0x824] sm:$0xf]  ;;  %v7613_v49 = vld [vmem:[#allocation13 + $0x828] sm:$0xf0] }
 0x692   : > { %v10411_v33 = vpop.f32.mrf.mxu0 }
 0x693   : > { %v10413_v40 = vpack.c.b16 %v4750_v0, %v4749_v62  ;;  %v4631_v57 = vadd.f32 %v8753_v16, %v4586_v9  ;;  %v8264_v62 = vld [vmem:[#allocation13 + $0x7a4] sm:$0xf]  ;;  %5459 = vmatpush.bf16.msrb.mxu3 %v7640_v32  ;;  %v10802_v32 = vld [vmem:[#allocation34_spill] sm:$0xff] }
 0x694   : > { %v7552_v27 = vor.u32 %v8264_v62, %v7549_v60  ;;  %v8284_v16 = vld [vmem:[#allocation13 + $0x844] sm:$0xf]  ;;  %v8756_v62 = vld [vmem:[#allocation2 + $0x38] sm:$0xff] }
 0x695   : > { %v4639_v31 = vmul.f32 %v9520_v17, %v4631_v57  ;;  %5349 = vmatmul.bf16.vlgmr.msra.gmra.mxu3 %v10413_v40  ;;  %5296 = vmatmul.bf16.gmra.mxu1 %v10413_v40  ;;  %v7629_v57 = vld [vmem:[#allocation13 + $0x848] sm:$0xf0] }
 0x696   : > { %5433 = vmatpush.bf16.msrb.mxu2 %v7552_v27 }
 0x697   : > { %4663 = vst [vmem:[#allocation2 + $0x20] sm:$0xff] %v4639_v31  ;;  %v4681_v28 = vpack.c.bf16 %v4639_v31, %v4639_v31  ;;  %v7796_v31 = vor.u32 %v8327_v56, %v7795_v53  ;;  %v10803_v56 = vld [vmem:[#allocation41_spill] sm:$0xff] }
 0x698   : > { %v4587_v58 = vpop.f32.mrf.mxu3 }
 0x699   : > { %v4588_v13 = vadd.f32 %v4587_v58, %v10394_v39  ;;  %v4719_v20 = vunpack.c.l.b16 %v4681_v28  ;;  %v10801_v28 = vld [vmem:[#allocation33_spill] sm:$0xff]  ;;  %v7632_v58 = vor.u32 %v8284_v16, %v7629_v57  ;;  %5405 = vmatpush.bf16.msra.mxu1 %v7796_v31  ;;  %v7605_v16 = vld [vmem:[#allocation13 + $0x818] sm:$0xf0] }
 0x69a   : > { %v4619_v12 = vpop.f32.mrf.mxu0  ;;  %5434 = vmatpush.bf16.msrb.mxu2 %v7544_v59 }
 0x69b   : > { %v4632_v10 = vadd.f32 %v8754_v24, %v4588_v13  ;;  %v4620_v8 = vadd.f32 %v4619_v12, %v10388_v50  ;;  %v10420_v21 = vpack.c.b16 %v4719_v20, %v4750_v0  ;;  %v8755_v0 = vld [vmem:[#allocation2 + $0x30] sm:$0xff]  ;;  %v7788_v12 = vor.u32 %v8325_v36, %v7787_v30  ;;  %5460 = vmatpush.bf16.msrb.mxu3 %v7632_v58  ;;  %v8757_v58 = vld [vmem:[#allocation2 + $0x40] sm:$0xff] }
 0x69c   : > { %v7709_v24 = vld [vmem:[#allocation13 + $0x8e8] sm:$0xf0]  ;;  %v8276_v36 = vld [vmem:[#allocation13 + $0x804] sm:$0xf] }
 0x69d   : > { %v4640_v55 = vmul.f32 %v10799_v37, %v4632_v10  ;;  %v10424_v46 = vadd.f32 %v4620_v8, %v10800_v3  ;;  %5325 = vmatmul.bf16.gmra.mxu2 %v10420_v21  ;;  %5378 = vmatmul.bf16.vlgmr.msra.gmra.mxu0 %v10420_v21  ;;  %v8260_v10 = vld [vmem:[#allocation13 + $0x784] sm:$0xf]  ;;  %v7533_v3 = vld [vmem:[#allocation13 + $0x788] sm:$0xf0] }
 0x69e   : > { %v7536_v15 = vor.u32 %v8260_v10, %v7533_v3  ;;  %5406 = vmatpush.bf16.msra.mxu1 %v7788_v12  ;;  %v8296_v3 = vld [vmem:[#allocation13 + $0x8a4] sm:$0xf] }
 0x69f   : > { %4664 = vst [vmem:[#allocation2 + $0x28] sm:$0xff] %v4640_v55  ;;  %v4656_v26 = vpack.c.bf16 %v4640_v55, %v4640_v55  ;;  %v7712_v55 = vor.u32 %v8304_v25, %v7709_v24  ;;  %v7845_v25 = vld [vmem:[#allocation13 + $0x9f8] sm:$0xf0]  ;;  %v8322_v24 = vld [vmem:[#allocation13 + $0x974] sm:$0xf] }
 0x6a0   : > { %v4590_v41 = vpop.f32.mrf.mxu3  ;;  %5435 = vmatpush.bf16.msrb.mxu2 %v7536_v15 }
 0x6a1   : > { %v4591_v63 = vadd.f32 %v4590_v41, %v10394_v39  ;;  %v4752_v7 = vunpack.c.l.b16 %v4656_v26  ;;  %v8302_v26 = vld [vmem:[#allocation13 + $0x8d4] sm:$0xf]  ;;  %5487 = vmatpush.bf16.msrb.mxu0 %v7712_v55  ;;  %v7781_v55 = vld [vmem:[#allocation13 + $0x978] sm:$0xf0] }
 0x6a2   : > { %v10429_v38 = vpop.f32.mrf.mxu0  ;;  %v7704_v11 = vor.u32 %v8302_v26, %v7701_v61  ;;  %v8336_v26 = vld [vmem:[#allocation13 + $0x9e4] sm:$0xf]  ;;  %v7837_v61 = vld [vmem:[#allocation13 + $0x9e8] sm:$0xf0] }
 0x6a3   : > { %v4633_v9 = vadd.f32 %v8755_v0, %v4591_v63  ;;  %v10431_v29 = vpack.c.b16 %v4752_v7, %v4719_v20  ;;  %v8282_v20 = vld [vmem:[#allocation13 + $0x834] sm:$0xf]  ;;  %v8300_v63 = vld [vmem:[#allocation13 + $0x8c4] sm:$0xf] }
 0x6a4   : > { %v7624_v51 = vor.u32 %v8282_v20, %v7621_v52  ;;  %v7696_v57 = vor.u32 %v8300_v63, %v7693_v5  ;;  %v7688_v20 = vor.u32 %v8298_v18, %v7685_v48  ;;  %v10804_v52 = vld [vmem:[#allocation35_spill] sm:$0xff]  ;;  %v7773_v5 = vld [vmem:[#allocation13 + $0x968] sm:$0xf0] }
 0x6a5   : > { %v4641_v42 = vmul.f32 %v10801_v28, %v4633_v9  ;;  %5354 = vmatmul.bf16.gmra.mxu3 %v10431_v29  ;;  %5301 = vmatmul.bf16.gmra.mxu1 %v10431_v29  ;;  %v8278_v9 = vld [vmem:[#allocation13 + $0x814] sm:$0xf] }
 0x6a6   : > { %5461 = vmatpush.bf16.msrb.mxu3 %v7624_v51  ;;  %5488 = vmatpush.bf16.msrb.mxu0 %v7704_v11  ;;  %v7784_v51 = vor.u32 %v8322_v24, %v7781_v55  ;;  %v7757_v24 = vld [vmem:[#allocation13 + $0x948] sm:$0xf0] }
 0x6a7   : > { %4665 = vst [vmem:[#allocation2 + $0x30] sm:$0xff] %v4641_v42  ;;  %v4683_v13 = vpack.c.bf16 %v4641_v42, %v4641_v42  ;;  %v7608_v42 = vor.u32 %v8278_v9, %v7605_v16  ;;  %v8292_v16 = vld [vmem:[#allocation13 + $0x884] sm:$0xf] }
 0x6a8   : > { %v4592_v2 = vpop.f32.mrf.mxu3  ;;  %5515 = vmatpush.bf16.msrb.mxu1 %v7784_v51 }
 0x6a9   : > { %v4593_v8 = vadd.f32 %v4592_v2, %v10394_v39  ;;  %v4721_v43 = vunpack.c.l.b16 %v4683_v13  ;;  %v7597_v13 = vld [vmem:[#allocation13 + $0x808] sm:$0xf0]  ;;  %v8338_v2 = vld [vmem:[#allocation13 + $0x9f4] sm:$0xf] }
 0x6aa   : > { %v4624_v14 = vpop.f32.mrf.mxu0  ;;  %5489 = vmatpush.bf16.msrb.mxu0 %v7696_v57  ;;  %v7600_v10 = vor.u32 %v8276_v36, %v7597_v13  ;;  %v7661_v57 = vld [vmem:[#allocation13 + $0x888] sm:$0xf0]  ;;  %v7765_v13 = vld [vmem:[#allocation13 + $0x958] sm:$0xf0] }
 0x6ab   : > { %v4634_v60 = vadd.f32 %v8756_v62, %v4593_v8  ;;  %v4625_v41 = vadd.f32 %v4624_v14, %v10388_v50  ;;  %v10438_v27 = vpack.c.b16 %v4721_v43, %v4752_v7  ;;  %v7616_v7 = vor.u32 %v8280_v22, %v7613_v49  ;;  %v7669_v22 = vld [vmem:[#allocation13 + $0x898] sm:$0xf0]  ;;  %v8320_v49 = vld [vmem:[#allocation13 + $0x964] sm:$0xf] }
 0x6ac   : > { %v7848_v8 = vor.u32 %v8338_v2, %v7845_v25  ;;  %v8316_v25 = vld [vmem:[#allocation13 + $0x944] sm:$0xf] }
 0x6ad   : > { %v4642_v53 = vmul.f32 %v10802_v32, %v4634_v60  ;;  %v10442_v45 = vadd.f32 %v4625_v41, %v10803_v56  ;;  %5330 = vmatmul.bf16.gmra.mxu2 %v10438_v27  ;;  %5383 = vmatmul.bf16.gmra.mxu0 %v10438_v27  ;;  %v7840_v60 = vor.u32 %v8336_v26, %v7837_v61  ;;  %v8294_v41 = vld [vmem:[#allocation13 + $0x894] sm:$0xf]  ;;  %v8758_v56 = vld [vmem:[#allocation2 + $0x48] sm:$0xff] }
 0x6ae   : > { %5462 = vmatpush.bf16.msrb.mxu3 %v7616_v7  ;;  %5490 = vmatpush.bf16.msrb.mxu0 %v7688_v20  ;;  %v7672_v9 = vor.u32 %v8294_v41, %v7669_v22  ;;  %v8332_v20 = vld [vmem:[#allocation13 + $0x9c4] sm:$0xf]  ;;  %v7805_v61 = vld [vmem:[#allocation13 + $0x9a8] sm:$0xf0] }
 0x6af   : > { %4666 = vst [vmem:[#allocation2 + $0x38] sm:$0xff] %v4642_v53  ;;  %v4658_v0 = vpack.c.bf16 %v4642_v53, %v4642_v53  ;;  %5544 = vmatpush.bf16.msra.mxu2 %v7848_v8  ;;  %v7776_v53 = vor.u32 %v8320_v49, %v7773_v5  ;;  %v7760_v8 = vor.u32 %v8316_v25, %v7757_v24  ;;  %v8328_v26 = vld [vmem:[#allocation13 + $0x9a4] sm:$0xf]  ;;  %v7733_v49 = vld [vmem:[#allocation13 + $0x918] sm:$0xf0] }
 0x6b0   : > { %v4595_v31 = vpop.f32.mrf.mxu3  ;;  %v7808_v41 = vor.u32 %v8328_v26, %v7805_v61  ;;  %v7797_v5 = vld [vmem:[#allocation13 + $0x998] sm:$0xf0] }
 0x6b1   : > { %v4596_v44 = vadd.f32 %v4595_v31, %v10394_v39  ;;  %v4754_v34 = vunpack.c.l.b16 %v4658_v0  ;;  %v10805_v31 = vld [vmem:[#allocation37_spill] sm:$0xff]  ;;  %5516 = vmatpush.bf16.msrb.mxu1 %v7776_v53 }
 0x6b2   : > { %5463 = vmatpush.bf16.msrb.mxu3 %v7608_v42  ;;  %v7664_v42 = vor.u32 %v8292_v16, %v7661_v57  ;;  %v8324_v16 = vld [vmem:[#allocation13 + $0x984] sm:$0xf]  ;;  %v7789_v57 = vld [vmem:[#allocation13 + $0x988] sm:$0xf0] }
 0x6b3   : > { %v4635_v59 = vadd.f32 %v8757_v58, %v4596_v44  ;;  %v10447_v30 = vpack.c.b16 %v4754_v34, %v4721_v43  ;;  %v7677_v43 = vld [vmem:[#allocation13 + $0x8a8] sm:$0xf0]  ;;  %5545 = vmatpush.bf16.msra.mxu2 %v7840_v60  ;;  %v7829_v58 = vld [vmem:[#allocation13 + $0x9d8] sm:$0xf0] }
 0x6b4   : > { %v7680_v15 = vor.u32 %v8296_v3, %v7677_v43  ;;  %v8330_v3 = vld [vmem:[#allocation13 + $0x9b4] sm:$0xf]  ;;  %v7813_v43 = vld [vmem:[#allocation13 + $0x9b8] sm:$0xf0]  ;;  %v7741_v60 = vld [vmem:[#allocation13 + $0x928] sm:$0xf0] }
 0x6b5   : > { %v4643_v12 = vmul.f32 %v10804_v52, %v4635_v59  ;;  %5359 = vmatmul.bf16.gmra.mxu3 %v10447_v30  ;;  %5306 = vmatmul.bf16.gmra.mxu1 %v10447_v30  ;;  %v8318_v59 = vld [vmem:[#allocation13 + $0x954] sm:$0xf]  ;;  %v7816_v51 = vor.u32 %v8330_v3, %v7813_v43 }
 0x6b6   : > { %5464 = vmatpush.bf16.msrb.mxu3 %v7600_v10  ;;  %5491 = vmatpush.bf16.msrb.mxu0 %v7680_v15  ;;  %v7768_v2 = vor.u32 %v8318_v59, %v7765_v13  ;;  %v7749_v15 = vld [vmem:[#allocation13 + $0x938] sm:$0xf0] }
 0x6b7   : > { %4667 = vst [vmem:[#allocation2 + $0x40] sm:$0xff] %v4643_v12  ;;  %v4686_v14 = vpack.c.bf16 %v4643_v12, %v4643_v12  ;;  %v7821_v12 = vld [vmem:[#allocation13 + $0x9c8] sm:$0xf0] }
 0x6b8   : > { %v4597_v62 = vpop.f32.mrf.mxu3  ;;  %v7824_v10 = vor.u32 %v8332_v20, %v7821_v12  ;;  %5517 = vmatpush.bf16.msrb.mxu1 %v7768_v2 }
 0x6b9   : > { %v4598_v11 = vadd.f32 %v4597_v62, %v10394_v39  ;;  %v4732_v63 = vunpack.c.l.b16 %v4686_v14  ;;  %v8314_v14 = vld [vmem:[#allocation13 + $0x934] sm:$0xf] }
 0x6ba   : > { %5492 = vmatpush.bf16.msrb.mxu0 %v7672_v9  ;;  %v7752_v62 = vor.u32 %v8314_v14, %v7749_v15 }
 0x6bb   : > { %v4636_v7 = vadd.f32 %v8758_v56, %v4598_v11  ;;  %v10453_v0 = vpack.c.b16 %v4732_v63, %v4754_v34  ;;  %v8334_v34 = vld [vmem:[#allocation13 + $0x9d4] sm:$0xf]  ;;  %v8308_v56 = vld [vmem:[#allocation13 + $0x904] sm:$0xf] }
 0x6bc   : > { %v7832_v36 = vor.u32 %v8334_v34, %v7829_v58  ;;  %5518 = vmatpush.bf16.msrb.mxu1 %v7760_v8 }
 0x6bd   : > { %v4644_v44 = vmul.f32 %v10805_v31, %v4636_v7  ;;  %5335 = vmatmul.bf16.gmra.mxu2 %v10453_v0  ;;  %5388 = vmatmul.bf16.gmra.mxu0 %v10453_v0  ;;  %v7725_v7 = vld [vmem:[#allocation13 + $0x908] sm:$0xf0] }
 0x6be   : > { %5493 = vmatpush.bf16.msrb.mxu0 %v7664_v42  ;;  %5546 = vmatpush.bf16.msra.mxu2 %v7832_v36  ;;  %v7728_v9 = vor.u32 %v8308_v56, %v7725_v7  ;;  %v10489_v36 = vpop.f32.mrf.mxu0 }
 0x6bf   : > { %4668 = vst [vmem:[#allocation2 + $0x48] sm:$0xff] %v4644_v44  ;;  %v4660_v39 = vpack.c.bf16 %v4644_v44, %v4644_v44  ;;  %v7792_v44 = vor.u32 %v8324_v16, %v7789_v57 }
 0x6c0   : > { %5519 = vmatpush.bf16.msrb.mxu1 %v7752_v62 }
 0x6c1   : > { %v4756_v18 = vunpack.c.l.b16 %v4660_v39  ;;  %v10481_v39 = vld [vmem:[#allocation14 + $0x6] sm:$0x3] }
 0x6c2   : > { %5547 = vmatpush.bf16.msra.mxu2 %v7824_v10 }
 0x6c3   : > { %v10458_v48 = vpack.c.b16 %v4756_v18, %v4732_v63  ;;  %v10463_v55 = vpack.c.b16 %v10381_v4, %v4756_v18  ;;  %v8312_v4 = vld [vmem:[#allocation13 + $0x924] sm:$0xf]  ;;  %v8326_v63 = vld [vmem:[#allocation13 + $0x994] sm:$0xf]  ;;  %v10484_v18 = vperm.slane %v10481_v39, 0 }
 0x6c4   : > { %v7744_v22 = vor.u32 %v8312_v4, %v7741_v60  ;;  %v7800_v53 = vor.u32 %v8326_v63, %v7797_v5 }
 0x6c5   : > { %5364 = vmatmul.bf16.gmra.mxu3 %v10458_v48  ;;  %5407 = vmatmul.bf16.vlgmr.msra.gmra.mxu1 %v10431_v29 }
 0x6c6   : > { %5548 = vmatpush.bf16.msra.mxu2 %v7816_v51  ;;  %5520 = vmatpush.bf16.msrb.mxu1 %v7744_v22 }
 0x6ca   : > { %5549 = vmatpush.bf16.msra.mxu2 %v7808_v41 }
 0x6cd   : > { %5393 = vmatmul.bf16.gmra.mxu0 %v10463_v55  ;;  %5436 = vmatmul.bf16.vlgmr.msrb.gmra.mxu2 %v10385_v6 }
 0x6ce   : > { %5550 = vmatpush.bf16.msra.mxu2 %v7800_v53 }
 0x6d2   : > { %5551 = vmatpush.bf16.msra.mxu2 %v7792_v44 }
 0x6d5   : > { %5465 = vmatmul.bf16.vlgmr.msrb.gmra.mxu3 %v10403_v19  ;;  %5412 = vmatmul.bf16.gmra.mxu1 %v10447_v30  ;;  %v8310_v19 = vld [vmem:[#allocation13 + $0x914] sm:$0xf] }
 0x6d6   : > { %v7736_v11 = vor.u32 %v8310_v19, %v7733_v49 }
 0x6d8   : > { %5521 = vmatpush.bf16.msrb.mxu1 %v7736_v11 }
 0x6dc   : > { %5522 = vmatpush.bf16.msrb.mxu1 %v7728_v9 }
 0x6dd   : > { %5441 = vmatmul.bf16.gmra.mxu2 %v10413_v40  ;;  %5494 = vmatmul.bf16.vlgmr.msrb.gmra.mxu0 %v10413_v40  ;;  %v5292_v40 = vpop.f32.mrf.mxu1 }
 0x6de   : > { %v5293_v34 = vadd.f32 %v5292_v40, %v10484_v18 }
 0x6e5   : > { %5470 = vmatmul.bf16.gmra.mxu3 %v10420_v21  ;;  %5417 = vmatmul.bf16.gmra.mxu1 %v10458_v48  ;;  %v5294_v42 = vpop.f32.mrf.mxu1 }
 0x6e6   : > { %v5295_v10 = vadd.f32 %v5294_v42, %v10484_v18 }
 0x6ed   : > { %5446 = vmatmul.bf16.gmra.mxu2 %v10431_v29  ;;  %5499 = vmatmul.bf16.gmra.mxu0 %v10431_v29 }
 0x6f5   : > { %5475 = vmatmul.bf16.gmra.mxu3 %v10438_v27  ;;  %5422 = vmatmul.bf16.gmra.mxu1 %v10385_v6 }
 0x6fd   : > { %5451 = vmatmul.bf16.gmra.mxu2 %v10447_v30  ;;  %5504 = vmatmul.bf16.gmra.mxu0 %v10447_v30 }
 0x705   : > { %5480 = vmatmul.bf16.gmra.mxu3 %v10453_v0  ;;  %5523 = vmatmul.bf16.vlgmr.msrb.gmra.mxu1 %v10420_v21 }
 0x70d   : > { %5509 = vmatmul.bf16.gmra.mxu0 %v10458_v48  ;;  %5552 = vmatmul.bf16.vlgmr.msra.gmra.mxu2 %v10431_v29 }
 0x710   : > { %v5321_v58 = vpop.f32.mrf.mxu2 }
 0x711   : > { %v5322_v59 = vadd.f32 %v5321_v58, %v5293_v34 }
 0x712   : > { %v5297_v13 = vpop.f32.mrf.mxu1 }
 0x713   : > { %v5298_v8 = vadd.f32 %v5297_v13, %v10484_v18 }
 0x715   : > { %5528 = vmatmul.bf16.gmra.mxu1 %v10438_v27 }
 0x718   : > { %v5350_v21 = vpop.f32.mrf.mxu3  ;;  %v5323_v20 = vpop.f32.mrf.mxu2 }
 0x719   : > { %v5351_v12 = vadd.f32 %v5350_v21, %v5322_v59  ;;  %v5324_v29 = vadd.f32 %v5323_v20, %v5295_v10 }
 0x71a   : > { %v5299_v2 = vpop.f32.mrf.mxu1  ;;  %v5379_v25 = vpop.f32.mrf.mxu0 }
 0x71b   : > { %v5380_v24 = vadd.f32 %v5379_v25, %v5351_v12 }
 0x71d   : > { %5557 = vmatmul.bf16.gmra.mxu2 %v10447_v30  ;;  %v5300_v30 = vadd.f32 %v5299_v2, %v10484_v18 }
 0x720   : > { %v5352_v3 = vpop.f32.mrf.mxu3  ;;  %v5326_v43 = vpop.f32.mrf.mxu2 }
 0x721   : > { %v5353_v14 = vadd.f32 %v5352_v3, %v5324_v29  ;;  %v5327_v51 = vadd.f32 %v5326_v43, %v5298_v8 }
 0x722   : > { %v5302_v15 = vpop.f32.mrf.mxu1  ;;  %v5381_v26 = vpop.f32.mrf.mxu0 }
 0x723   : > { %v5382_v27 = vadd.f32 %v5381_v26, %v5353_v14  ;;  %v5303_v19 = vadd.f32 %v5302_v15, %v10484_v18 }
 0x725   : > { %5533 = vmatmul.bf16.gmra.mxu1 %v10453_v0 }
 0x728   : > { %v5355_v61 = vpop.f32.mrf.mxu3  ;;  %v5328_v62 = vpop.f32.mrf.mxu2 }
 0x729   : > { %v5356_v4 = vadd.f32 %v5355_v61, %v5327_v51  ;;  %v5329_v49 = vadd.f32 %v5328_v62, %v5300_v30 }
 0x72a   : > { %v5304_v60 = vpop.f32.mrf.mxu1  ;;  %v5384_v41 = vpop.f32.mrf.mxu0 }
 0x72b   : > { %v5385_v22 = vadd.f32 %v5384_v41, %v5356_v4 }
 0x72d   : > { %5562 = vmatmul.bf16.gmra.mxu2 %v10458_v48  ;;  %v5305_v48 = vadd.f32 %v5304_v60, %v10484_v18 }
 0x730   : > { %v5357_v11 = vpop.f32.mrf.mxu3  ;;  %v5331_v63 = vpop.f32.mrf.mxu2 }
 0x731   : > { %v5358_v5 = vadd.f32 %v5357_v11, %v5329_v49  ;;  %v5332_v53 = vadd.f32 %v5331_v63, %v5303_v19  ;;  %v8347_v63 = vld [vmem:[#allocation16 + $0x1f4] sm:$0xf] }
 0x732   : > { %v5307_v56 = vpop.f32.mrf.mxu1  ;;  %v5386_v7 = vpop.f32.mrf.mxu0 }
 0x733   : > { %v5387_v0 = vadd.f32 %v5386_v7, %v5358_v5  ;;  %v5308_v34 = vadd.f32 %v5307_v56, %v10484_v18  ;;  %v7885_v5 = vld [vmem:[#allocation16 + $0x1f8] sm:$0xf0]  ;;  %v8346_v7 = vld [vmem:[#allocation16 + $0x1e4] sm:$0xf] }
 0x735   : > { %5538 = vmatmul.bf16.gmra.mxu1 %v10463_v55 }
 0x738   : > { %v5360_v9 = vpop.f32.mrf.mxu3  ;;  %v5333_v16 = vpop.f32.mrf.mxu2 }
 0x739   : > { %v5361_v57 = vadd.f32 %v5360_v9, %v5332_v53  ;;  %v5334_v58 = vadd.f32 %v5333_v16, %v5305_v48  ;;  %v7888_v53 = vor.u32 %v8347_v63, %v7885_v5  ;;  %v7881_v9 = vld [vmem:[#allocation16 + $0x1e8] sm:$0xf0]  ;;  %v7869_v5 = vld [vmem:[#allocation16 + $0x1b8] sm:$0xf0] }
 0x73a   : > { %v5309_v44 = vpop.f32.mrf.mxu1  ;;  %v5389_v40 = vpop.f32.mrf.mxu0 }
 0x73b   : > { %v5390_v42 = vadd.f32 %v5389_v40, %v5361_v57  ;;  %5815 = vmatpush.bf16.msra.mxu3 %v7888_v53  ;;  %v7884_v57 = vor.u32 %v8346_v7, %v7881_v9  ;;  %v7877_v40 = vld [vmem:[#allocation16 + $0x1d8] sm:$0xf0] }
 0x73d   : > { %5567 = vmatmul.bf16.gmra.mxu2 %v10385_v6  ;;  %v5310_v6 = vadd.f32 %v5309_v44, %v10484_v18 }
 0x73f   : > { %5816 = vmatpush.bf16.msra.mxu3 %v7884_v57  ;;  %v7865_v57 = vld [vmem:[#allocation16 + $0x1a8] sm:$0xf0] }
 0x740   : > { %v5362_v59 = vpop.f32.mrf.mxu3  ;;  %v5336_v13 = vpop.f32.mrf.mxu2 }
 0x741   : > { %v5363_v21 = vadd.f32 %v5362_v59, %v5334_v58  ;;  %v5337_v20 = vadd.f32 %v5336_v13, %v5308_v34 }
 0x742   : > { %v5391_v12 = vpop.f32.mrf.mxu0  ;;  %v5408_v2 = vpop.f32.mrf.mxu1 }
 0x743   : > { %v5392_v55 = vadd.f32 %v5391_v12, %v5363_v21  ;;  %v10503_v25 = vadd.f32 %v5408_v2, %v5380_v24 }
 0x748   : > { %v5365_v10 = vpop.f32.mrf.mxu3  ;;  %v5338_v8 = vpop.f32.mrf.mxu2 }
 0x749   : > { %v5366_v29 = vadd.f32 %v5365_v10, %v5337_v20  ;;  %v5339_v15 = vadd.f32 %v5338_v8, %v5310_v6  ;;  %v10529_v10 = vperm.slane %v10481_v39, 1  ;;  %v8343_v39 = vld [vmem:[#allocation16 + $0x1b4] sm:$0xf] }
 0x74a   : > { %v5394_v3 = vpop.f32.mrf.mxu0  ;;  %v5410_v43 = vpop.f32.mrf.mxu1 }
 0x74b   : > { %v5395_v14 = vadd.f32 %v5394_v3, %v5366_v29  ;;  %v10505_v51 = vadd.f32 %v5410_v43, %v5382_v27 }
 0x750   : > { %v5367_v26 = vpop.f32.mrf.mxu3  ;;  %v5437_v61 = vpop.f32.mrf.mxu2 }
 0x751   : > { %v5368_v62 = vadd.f32 %v5367_v26, %v5339_v15  ;;  %v5438_v29 = vadd.f32 %v5437_v61, %v10529_v10  ;;  %v8344_v15 = vld [vmem:[#allocation16 + $0x1c4] sm:$0xf]  ;;  %v7873_v26 = vld [vmem:[#allocation16 + $0x1c8] sm:$0xf0]  ;;  %v7872_v61 = vor.u32 %v8343_v39, %v7869_v5 }
 0x752   : > { %v5396_v4 = vpop.f32.mrf.mxu0  ;;  %v5413_v60 = vpop.f32.mrf.mxu1 }
 0x753   : > { %v5397_v41 = vadd.f32 %v5396_v4, %v5368_v62  ;;  %v10508_v30 = vadd.f32 %v5413_v60, %v5385_v22  ;;  %v7876_v62 = vor.u32 %v8344_v15, %v7873_v26 }
 0x758   : > { %v5439_v24 = vpop.f32.mrf.mxu2 }
 0x759   : > { %v5440_v60 = vadd.f32 %v5439_v24, %v10529_v10 }
 0x75a   : > { %v5415_v19 = vpop.f32.mrf.mxu1  ;;  %v5495_v21 = vpop.f32.mrf.mxu0 }
 0x75b   : > { %v10510_v49 = vadd.f32 %v5415_v19, %v5387_v0  ;;  %v8345_v0 = vld [vmem:[#allocation16 + $0x1d4] sm:$0xf] }
 0x75c   : > { %v7880_v34 = vor.u32 %v8345_v0, %v7877_v40 }
 0x75e   : > { %5817 = vmatpush.bf16.msra.mxu3 %v7880_v34 }
 0x760   : > { %v5442_v11 = vpop.f32.mrf.mxu2 }
 0x761   : > { %v5443_v34 = vadd.f32 %v5442_v11, %v10529_v10 }
 0x762   : > { %v5418_v27 = vpop.f32.mrf.mxu1  ;;  %v5497_v8 = vpop.f32.mrf.mxu0  ;;  %5818 = vmatpush.bf16.msra.mxu3 %v7876_v62 }
 0x763   : > { %v10512_v56 = vadd.f32 %v5418_v27, %v5390_v42  ;;  %v5466_v42 = vpop.f32.mrf.mxu3 }
 0x764   : > { %v5467_v43 = vadd.f32 %v5466_v42, %v5438_v29 }
 0x766   : > { %v5496_v4 = vadd.f32 %v5495_v21, %v5467_v43  ;;  %5819 = vmatpush.bf16.msra.mxu3 %v7872_v61  ;;  %v7861_v21 = vld [vmem:[#allocation16 + $0x198] sm:$0xf0] }
 0x768   : > { %v10514_v18 = vpop.f32.mrf.mxu2 }
 0x769   : > { %v5445_v11 = vadd.f32 %v10514_v18, %v10529_v10 }
 0x76a   : > { %v5420_v16 = vpop.f32.mrf.mxu1 }
 0x76b   : > { %v10516_v22 = vadd.f32 %v5420_v16, %v5392_v55  ;;  %v5468_v2 = vpop.f32.mrf.mxu3  ;;  %v8342_v16 = vld [vmem:[#allocation16 + $0x1a4] sm:$0xf] }
 0x76c   : > { %v5469_v27 = vadd.f32 %v5468_v2, %v5440_v60  ;;  %v7857_v60 = vld [vmem:[#allocation16 + $0x188] sm:$0xf0] }
 0x76e   : > { %v5498_v0 = vadd.f32 %v5497_v8, %v5469_v27  ;;  %v8340_v8 = vld [vmem:[#allocation16 + $0x184] sm:$0xf] }
 0x770   : > { %v10518_v44 = vpop.f32.mrf.mxu2 }
 0x772   : > { %v5423_v48 = vpop.f32.mrf.mxu1 }
 0x773   : > { %v10520_v58 = vadd.f32 %v5423_v48, %v5395_v14  ;;  %v5471_v6 = vpop.f32.mrf.mxu3  ;;  %v7868_v48 = vor.u32 %v8342_v16, %v7865_v57 }
 0x775   : > { %5820 = vmatpush.bf16.msra.mxu3 %v7868_v48 }
 0x778   : > { %v10522_v59 = vpop.f32.mrf.mxu2 }
 0x77a   : > { %v5425_v13 = vpop.f32.mrf.mxu1 }
 0x77b   : > { %v10524_v20 = vadd.f32 %v5425_v13, %v5397_v41  ;;  %v5500_v41 = vpop.f32.mrf.mxu0  ;;  %v5473_v40 = vpop.f32.mrf.mxu3  ;;  %v8341_v13 = vld [vmem:[#allocation16 + $0x194] sm:$0xf] }
 0x77c   : > { %v7864_v43 = vor.u32 %v8341_v13, %v7861_v21  ;;  %v5474_v5 = vadd.f32 %v5473_v40, %v5445_v11  ;;  %v5450_v11 = vadd.f32 %v10522_v59, %v10529_v10 }
 0x77e   : > { %5821 = vmatpush.bf16.msra.mxu3 %v7864_v43 }
 0x780   : > { %v10526_v12 = vpop.f32.mrf.mxu2 }
 0x782   : > { %v5524_v55 = vpop.f32.mrf.mxu1 }
 0x783   : > { %v5525_v19 = vadd.f32 %v5524_v55, %v5496_v4  ;;  %v5472_v55 = vadd.f32 %v5471_v6, %v5443_v34  ;;  %v5502_v2 = vpop.f32.mrf.mxu0 }
 0x788   : > { %v10532_v3 = vpop.f32.mrf.mxu2 }
 0x78a   : > { %v5526_v14 = vpop.f32.mrf.mxu1 }
 0x78b   : > { %v5527_v24 = vadd.f32 %v5526_v14, %v5498_v0  ;;  %v5476_v14 = vpop.f32.mrf.mxu3  ;;  %v5505_v61 = vpop.f32.mrf.mxu0  ;;  %v5503_v0 = vadd.f32 %v5502_v2, %v5474_v5 }
 0x790   : > { %v5553_v63 = vpop.f32.mrf.mxu2 }
 0x791   : > { %v5554_v53 = vadd.f32 %v5553_v63, %v5525_v19  ;;  %v5501_v19 = vadd.f32 %v5500_v41, %v5472_v55  ;;  %v7860_v63 = vor.u32 %v8340_v8, %v7857_v60  ;;  %v5448_v41 = vadd.f32 %v10518_v44, %v10529_v10 }
 0x792   : > { %v5529_v7 = vpop.f32.mrf.mxu1 }
 0x793   : > { %v7849_v9 = vmul.f32 -1.442695, %v5554_v53  ;;  %v5530_v39 = vadd.f32 %v5529_v7, %v5501_v19  ;;  %5822 = vmatpush.bf16.msra.mxu3 %v7860_v63  ;;  %v5477_v7 = vadd.f32 %v5476_v14, %v5448_v41  ;;  %v5478_v13 = vpop.f32.mrf.mxu3 }
 0x794   : > { %v5479_v5 = vadd.f32 %v5478_v13, %v5450_v11 }
 0x795   : > { %8668 = vpow2.f32 %v7849_v9  ;;  %v5506_v44 = vadd.f32 %v5505_v61, %v5477_v7 }
 0x798   : > { %v5555_v42 = vpop.f32.mrf.mxu2 }
 0x799   : > { %v5556_v29 = vadd.f32 %v5555_v42, %v5527_v24 }
 0x79a   : > { %v5531_v4 = vpop.f32.mrf.mxu1 }
 0x79b   : > { %v8669_v15 = vpop.eup %8668  ;;  %v7850_v26 = vmul.f32 -1.442695, %v5556_v29  ;;  %v5532_v24 = vadd.f32 %v5531_v4, %v5503_v0  ;;  %v5507_v4 = vpop.f32.mrf.mxu0 }
 0x79c   : > { %v5605_v62 = vadd.f32 1.0, %v8669_v15  ;;  %v5481_v41 = vpop.f32.mrf.mxu3  ;;  %v5508_v7 = vadd.f32 %v5507_v4, %v5479_v5 }
 0x79d   : > { %8670 = vpow2.f32 %v7850_v26 }
 0x79e   : > { %8672 = vrcp.f32 %v5605_v62  ;;  %v5624_v40 = vand.u32 2147483648, %v5605_v62  ;;  %v5622_v55 = vand.u32 2147483647, %v5605_v62  ;;  %vm5618_vm9 = vweird.f32 %v5605_v62 }
 0x7a0   : > { %v5558_v6 = vpop.f32.mrf.mxu2  ;;  %v5625_v8 = vor.u32 1.1754944e-38, %v5624_v40  ;;  %vm5623_vm11 = vcmp.eq.f32.partialorder %v5622_v55, 8.507059e+37 }
 0x7a1   : > { %v5559_v27 = vadd.f32 %v5558_v6, %v5530_v39 }
 0x7a2   : > { %v5534_v34 = vpop.f32.mrf.mxu1 }
 0x7a3   : > { %v8671_v53 = vpop.eup %8670  ;;  %v7851_v9 = vmul.f32 -1.442695, %v5559_v27  ;;  %v5535_v39 = vadd.f32 %v5534_v34, %v5506_v44 }
 0x7a4   : > { %v8673_v16 = vpop.eup %8672  ;;  %v5606_v57 = vadd.f32 1.0, %v8671_v53 }
 0x7a5   : > { %v5614_v48 = vmul.f32 %v8673_v16, %v5605_v62  ;;  %8674 = vpow2.f32 %v7851_v9  ;;  %vm5619_vm8 = vweird.f32 %v8673_v16 }
 0x7a6   : > { %8676 = vrcp.f32 %v5606_v57  ;;  %vm5620_vm10 = vmor %vm5618_vm9, %vm5619_vm8  ;;  %v5639_v27 = vand.u32 2147483648, %v5606_v57  ;;  %v5637_v0 = vand.u32 2147483647, %v5606_v57  ;;  %vm5633_vm13 = vweird.f32 %v5606_v57 }
 0x7a7   : > { %v5615_v18 = vsub.f32 1.0, %v5614_v48  ;;  %8678 = vtanh.f32 %v10503_v25 }
 0x7a8   : > { %v5560_v42 = vpop.f32.mrf.mxu2  ;;  %v5640_v34 = vor.u32 1.1754944e-38, %v5639_v27  ;;  %vm5638_vm15 = vcmp.eq.f32.partialorder %v5637_v0, 8.507059e+37  ;;  %v5483_v27 = vpop.f32.mrf.mxu3 }
 0x7a9   : > { %v5616_v21 = vmul.f32 %v8673_v16, %v5615_v18  ;;  %v5561_v29 = vadd.f32 %v5560_v42, %v5532_v24 }
 0x7aa   : > { %v5536_v53 = vpop.f32.mrf.mxu1 }
 0x7ab   : > { %v8675_v2 = vpop.eup %8674  ;;  %v5617_v43 = vadd.f32 %v8673_v16, %v5616_v21  ;;  %v7852_v15 = vmul.f32 -1.442695, %v5561_v29  ;;  %v5453_v21 = vadd.f32 %v10526_v12, %v10529_v10 }
 0x7ac   : > { %v8677_v26 = vpop.eup %8676  ;;  %v10541_v60 = vadd.f32 1.0, %v8675_v2  ;;  %v5537_v2 = vadd.f32 %v5536_v53, %v5508_v7 }
 0x7ad   : > { %v5629_v25 = vmul.f32 %v8677_v26, %v5606_v57  ;;  %8680 = vpow2.f32 %v7852_v15  ;;  %v5621_v19 = vsel %vm5620_vm10, %v8673_v16, %v5617_v43  ;;  %v8679_v63 = vpop.eup %8678  ;;  %vm5634_vm12 = vweird.f32 %v8677_v26  ;;  %v5510_v57 = vpop.f32.mrf.mxu0 }
 0x7ae   : > { %8682 = vrcp.f32 %v10541_v60  ;;  %v5626_v14 = vsel %vm5623_vm11, %v5625_v8, %v5621_v19  ;;  %vm5635_vm14 = vmor %vm5633_vm13, %vm5634_vm12  ;;  %v5482_v15 = vadd.f32 %v5481_v41, %v5453_v21  ;;  %v5652_v8 = vand.u32 2147483647, %v10541_v60 }
 0x7af   : > { %v5630_v62 = vsub.f32 1.0, %v5629_v25  ;;  %v5733_v6 = vmul.f32 %v8679_v63, %v5626_v14  ;;  %8684 = vtanh.f32 %v10505_v51  ;;  %v5654_v4 = vand.u32 2147483648, %v10541_v60 }
 0x7b0   : > { %v5563_v61 = vpop.f32.mrf.mxu2  ;;  %vm5648_vm1 = vweird.f32 %v10541_v60  ;;  %vm5653_vm3 = vcmp.eq.f32.partialorder %v5652_v8, 8.507059e+37 }
 0x7b1   : > { %v5631_v9 = vmul.f32 %v8677_v26, %v5630_v62  ;;  %v5564_v16 = vadd.f32 %v5563_v61, %v5535_v39  ;;  %v5511_v39 = vadd.f32 %v5510_v57, %v5482_v15  ;;  %v5655_v5 = vor.u32 1.1754944e-38, %v5654_v4 }
 0x7b2   : > { %v5539_v12 = vpop.f32.mrf.mxu1 }
 0x7b3   : > { %v8681_v48 = vpop.eup %8680  ;;  %v5632_v18 = vadd.f32 %v8677_v26, %v5631_v9  ;;  %v7853_v59 = vmul.f32 -1.442695, %v5564_v16  ;;  %v5455_v9 = vadd.f32 %v10532_v3, %v10529_v10  ;;  %v5540_v16 = vadd.f32 %v5539_v12, %v5511_v39  ;;  %v8362_v39 = vld [vmem:[#allocation19 + $0x74] sm:$0xf] }
 0x7b4   : > { %v8683_v24 = vpop.eup %8682  ;;  %v10547_v40 = vadd.f32 1.0, %v8681_v48 }
 0x7b5   : > { %v5644_v51 = vmul.f32 %v8683_v24, %v10541_v60  ;;  %8686 = vpow2.f32 %v7853_v59  ;;  %v5636_v42 = vsel %vm5635_vm14, %v8677_v26, %v5632_v18  ;;  %v8685_v13 = vpop.eup %8684  ;;  %vm5649_vm0 = vweird.f32 %v8683_v24  ;;  %v5512_v7 = vpop.f32.mrf.mxu0 }
 0x7b6   : > { %8688 = vrcp.f32 %v10547_v40  ;;  %v5641_v55 = vsel %vm5638_vm15, %v5640_v34, %v5636_v42  ;;  %vm5650_vm2 = vmor %vm5648_vm1, %vm5649_vm0  ;;  %v5484_v41 = vadd.f32 %v5483_v27, %v5455_v9  ;;  %v5669_v59 = vand.u32 2147483648, %v10547_v40  ;;  %v7941_v9 = vld [vmem:[#allocation19 + $0x68] sm:$0xf0] }
 0x7b7   : > { %v5645_v29 = vsub.f32 1.0, %v5644_v51  ;;  %v5734_v43 = vmul.f32 %v8685_v13, %v5641_v55  ;;  %8690 = vtanh.f32 %v10508_v30  ;;  %v5667_v51 = vand.u32 2147483647, %v10547_v40 }
 0x7b8   : > { %v5565_v44 = vpop.f32.mrf.mxu2  ;;  %vm5663_vm5 = vweird.f32 %v10547_v40  ;;  %v5513_v21 = vadd.f32 %v5512_v7, %v5484_v41  ;;  %v5670_v57 = vor.u32 1.1754944e-38, %v5669_v59  ;;  %v7933_v59 = vld [vmem:[#allocation19 + $0x58] sm:$0xf0] }
 0x7b9   : > { %v5566_v26 = vadd.f32 %v5565_v44, %v5537_v2  ;;  %v5741_v25 = vpack.c.bf16 %v5734_v43, %v5733_v6  ;;  %v5646_v19 = vmul.f32 %v8683_v24, %v5645_v29  ;;  %vm5668_vm7 = vcmp.eq.f32.partialorder %v5667_v51, 8.507059e+37  ;;  %v7939_v51 = vld [vmem:[#allocation19 + $0x60] sm:$0xf] }
 0x7bb   : > { %v8687_v63 = vpop.eup %8686  ;;  %v7854_v11 = vmul.f32 -1.442695, %v5566_v26  ;;  %5823 = vmatmul.bf16.vlgmr.msra.gmra.mxu3 %v5741_v25  ;;  %v5647_v14 = vadd.f32 %v8683_v24, %v5646_v19 }
 0x7bc   : > { %v8689_v62 = vpop.eup %8688  ;;  %v10557_v30 = vadd.f32 1.0, %v8687_v63 }
 0x7bd   : > { %v5659_v53 = vmul.f32 %v8689_v62, %v10547_v40  ;;  %8692 = vpow2.f32 %v7854_v11  ;;  %v5651_v6 = vsel %vm5650_vm2, %v8683_v24, %v5647_v14  ;;  %v8691_v61 = vpop.eup %8690  ;;  %vm5664_vm4 = vweird.f32 %v8689_v62 }
 0x7be   : > { %8694 = vrcp.f32 %v10557_v30  ;;  %v5656_v0 = vsel %vm5653_vm3, %v5655_v5, %v5651_v6  ;;  %vm5665_vm6 = vmor %vm5663_vm5, %vm5664_vm4  ;;  %v5682_v26 = vand.u32 2147483647, %v10557_v30  ;;  %v5684_v25 = vand.u32 2147483648, %v10557_v30  ;;  %v7949_v5 = vld [vmem:[#allocation19 + $0x78] sm:$0xf0] }
 0x7bf   : > { %v5660_v60 = vsub.f32 1.0, %v5659_v53  ;;  %v5735_v48 = vmul.f32 %v8691_v61, %v5656_v0  ;;  %8696 = vtanh.f32 %v10510_v49  ;;  %v5541_v49 = vpop.f32.mrf.mxu1  ;;  %vm5678_vm9 = vweird.f32 %v10557_v30  ;;  %v8360_v61 = vld [vmem:[#allocation19 + $0x64] sm:$0xf] }
 0x7c0   : > { %v5568_v18 = vpop.f32.mrf.mxu2  ;;  %v5542_v8 = vadd.f32 %v5541_v49, %v5513_v21  ;;  %v7952_v6 = vor.u32 %v8362_v39, %v7949_v5  ;;  %vm5683_vm11 = vcmp.eq.f32.partialorder %v5682_v26, 8.507059e+37  ;;  %v7923_v5 = vld [vmem:[#allocation19 + $0x40] sm:$0xf] }
 0x7c1   : > { %v5569_v34 = vadd.f32 %v5568_v18, %v5540_v16  ;;  %v5661_v24 = vmul.f32 %v8689_v62, %v5660_v60  ;;  %v7947_v16 = vld [vmem:[#allocation19 + $0x70] sm:$0xf]  ;;  %v8358_v18 = vld [vmem:[#allocation19 + $0x54] sm:$0xf] }
 0x7c2   : > { %5995 = vmatpush.bf16.msra.mxu1 %v7952_v6  ;;  %v7936_v49 = vor.u32 %v8358_v18, %v7933_v59  ;;  %v8355_v18 = vld [vmem:[#allocation19 + $0x34] sm:$0xf0] }
 0x7c3   : > { %v8693_v42 = vpop.eup %8692  ;;  %v7855_v10 = vmul.f32 -1.442695, %v5569_v34  ;;  %v5662_v3 = vadd.f32 %v8689_v62, %v5661_v24  ;;  %v7944_v24 = vor.u32 %v8360_v61, %v7941_v9 }
 0x7c4   : > { %v8695_v13 = vpop.eup %8694  ;;  %v10567_v55 = vadd.f32 1.0, %v8693_v42  ;;  %v8361_v42 = vld [vmem:[#allocation19 + $0x64] sm:$0xf0] }
 0x7c5   : > { %v5674_v29 = vmul.f32 %v8695_v13, %v10557_v30  ;;  %8698 = vpow2.f32 %v7855_v10  ;;  %v5666_v2 = vsel %vm5665_vm6, %v8689_v62, %v5662_v3  ;;  %v8697_v43 = vpop.eup %8696  ;;  %vm5679_vm8 = vweird.f32 %v8695_v13 }
 0x7c6   : > { %8700 = vrcp.f32 %v10567_v55  ;;  %v5671_v15 = vsel %vm5668_vm7, %v5670_v57, %v5666_v2  ;;  %vm5680_vm10 = vmor %vm5678_vm9, %vm5679_vm8  ;;  %v5699_v10 = vand.u32 2147483648, %v10567_v55  ;;  %v5697_v21 = vand.u32 2147483647, %v10567_v55  ;;  %5996 = vmatpush.bf16.msra.mxu1 %v7944_v24 }
 0x7c7   : > { %v5675_v44 = vsub.f32 1.0, %v5674_v29  ;;  %v5736_v4 = vmul.f32 %v8697_v43, %v5671_v15  ;;  %8702 = vtanh.f32 %v10512_v56  ;;  %v5685_v56 = vor.u32 1.1754944e-38, %v5684_v25  ;;  %v8356_v29 = vld [vmem:[#allocation19 + $0x44] sm:$0xf]  ;;  %v7925_v15 = vld [vmem:[#allocation19 + $0x48] sm:$0xf0] }
 0x7c8   : > { %v5570_v40 = vpop.f32.mrf.mxu2  ;;  %v7940_v57 = vor.u32 %v8361_v42, %v7939_v51  ;;  %vm5693_vm13 = vweird.f32 %v10567_v55  ;;  %vm5698_vm15 = vcmp.eq.f32.partialorder %v5697_v21, 8.507059e+37 }
 0x7c9   : > { %v5571_v19 = vadd.f32 %v5570_v40, %v5542_v8  ;;  %v5742_v12 = vpack.c.bf16 %v5736_v4, %v5735_v48  ;;  %v5676_v63 = vmul.f32 %v8695_v13, %v5675_v44  ;;  %v8363_v48 = vld [vmem:[#allocation19 + $0x74] sm:$0xf0]  ;;  %v7931_v44 = vld [vmem:[#allocation19 + $0x50] sm:$0xf]  ;;  %v5700_v40 = vor.u32 1.1754944e-38, %v5699_v10 }
 0x7ca   : > { %v7948_v3 = vor.u32 %v8363_v48, %v7947_v16  ;;  %v8359_v8 = vld [vmem:[#allocation19 + $0x54] sm:$0xf0]  ;;  %5997 = vmatpush.bf16.msra.mxu1 %v7936_v49  ;;  %v8352_v16 = vld [vmem:[#allocation19 + $0x24] sm:$0xf] }
 0x7cb   : > { %v8699_v11 = vpop.eup %8698  ;;  %v7856_v14 = vmul.f32 -1.442695, %v5571_v19  ;;  %5828 = vmatmul.bf16.gmra.mxu3 %v5742_v12  ;;  %v5677_v62 = vadd.f32 %v8695_v13, %v5676_v63  ;;  %v7932_v63 = vor.u32 %v8359_v8, %v7931_v44 }
 0x7cc   : > { %v8701_v27 = vpop.eup %8700  ;;  %v10575_v53 = vadd.f32 1.0, %v8699_v11  ;;  %5966 = vmatpush.bf16.msra.mxu0 %v7948_v3  ;;  %v8354_v11 = vld [vmem:[#allocation19 + $0x34] sm:$0xf] }
 0x7cd   : > { %v5689_v0 = vmul.f32 %v8701_v27, %v10567_v55  ;;  %8704 = vpow2.f32 %v7856_v14  ;;  %v5681_v60 = vsel %vm5680_vm10, %v8695_v13, %v5677_v62  ;;  %v8703_v41 = vpop.eup %8702  ;;  %vm5694_vm12 = vweird.f32 %v8701_v27  ;;  %v7917_v14 = vld [vmem:[#allocation19 + $0x38] sm:$0xf0] }
 0x7ce   : > { %8706 = vrcp.f32 %v10575_v53  ;;  %v5686_v30 = vsel %vm5683_vm11, %v5685_v56, %v5681_v60  ;;  %vm5695_vm14 = vmor %vm5693_vm13, %vm5694_vm12  ;;  %v7928_v55 = vor.u32 %v8356_v29, %v7925_v15  ;;  %v8357_v56 = vld [vmem:[#allocation19 + $0x44] sm:$0xf0]  ;;  %v5714_v6 = vand.u32 2147483648, %v10575_v53 }
 0x7cf   : > { %v5690_v7 = vsub.f32 1.0, %v5689_v0  ;;  %v5737_v34 = vmul.f32 %v8703_v41, %v5686_v30  ;;  %8708 = vtanh.f32 %v10516_v22  ;;  %v5712_v9 = vand.u32 2147483647, %v10575_v53  ;;  %v7909_v41 = vld [vmem:[#allocation19 + $0x28] sm:$0xf0] }
 0x7d0   : > { %5967 = vmatpush.bf16.msra.mxu0 %v7940_v57  ;;  %5998 = vmatpush.bf16.msra.mxu1 %v7928_v55  ;;  %v7920_v0 = vor.u32 %v8354_v11, %v7917_v14  ;;  %v7924_v60 = vor.u32 %v8357_v56, %v7923_v5  ;;  %vm5708_vm1 = vweird.f32 %v10575_v53  ;;  %v7915_v30 = vld [vmem:[#allocation19 + $0x30] sm:$0xf]  ;;  %v5715_v59 = vor.u32 1.1754944e-38, %v5714_v6  ;;  %v8351_v55 = vld [vmem:[#allocation19 + $0x14] sm:$0xf0] }
 0x7d1   : > { %v5691_v13 = vmul.f32 %v8701_v27, %v5690_v7  ;;  %vm5713_vm3 = vcmp.eq.f32.partialorder %v5712_v9, 8.507059e+37  ;;  %v7912_v42 = vor.u32 %v8352_v16, %v7909_v41  ;;  %v7916_v10 = vor.u32 %v8355_v18, %v7915_v30  ;;  %v7891_v14 = vld [vmem:[#allocation19] sm:$0xf]  ;;  %v5763_v56 = vld [vmem:[#allocation17 + $0x6] sm:$0x3]  ;;  %v10809_v16 = vld [vmem:[#allocation38_spill] sm:$0xff] }
 0x7d2   : > { %v10807_v9 = vld [vmem:[#allocation45_spill] sm:$0xff]  ;;  %v4612_v41 = vadd.f32 %v10397_v23, %v10388_v50  ;;  %v10811_v23 = vld [vmem:[#allocation39_spill] sm:$0xff] }
 0x7d3   : > { %v8705_v2 = vpop.eup %8704  ;;  %v5692_v43 = vadd.f32 %v8701_v27, %v5691_v13 }
 0x7d4   : > { %v8707_v22 = vpop.eup %8706  ;;  %v10583_v4 = vadd.f32 1.0, %v8705_v2  ;;  %5968 = vmatpush.bf16.msra.mxu0 %v7932_v63  ;;  %5999 = vmatpush.bf16.msra.mxu1 %v7920_v0  ;;  %v7893_v63 = vld [vmem:[#allocation19 + $0x8] sm:$0xf0] }
 0x7d5   : > { %v5704_v26 = vmul.f32 %v8707_v22, %v10575_v53  ;;  %v5696_v25 = vsel %vm5695_vm14, %v8701_v27, %v5692_v43  ;;  %v8709_v19 = vpop.eup %8708  ;;  %vm5709_vm0 = vweird.f32 %v8707_v22 }
 0x7d6   : > { %8710 = vrcp.f32 %v10583_v4  ;;  %v5701_v12 = vsel %vm5698_vm15, %v5700_v40, %v5696_v25  ;;  %vm5710_vm2 = vmor %vm5708_vm1, %vm5709_vm0  ;;  %v5729_v53 = vand.u32 2147483648, %v10583_v4  ;;  %v5727_v49 = vand.u32 2147483647, %v10583_v4  ;;  %v7907_v40 = vld [vmem:[#allocation19 + $0x20] sm:$0xf] }
 0x7d7   : > { %v5705_v62 = vsub.f32 1.0, %v5704_v26  ;;  %v5738_v39 = vmul.f32 %v8709_v19, %v5701_v12  ;;  %8712 = vtanh.f32 %v10520_v58  ;;  %vm5723_vm5 = vweird.f32 %v10583_v4  ;;  %v8353_v25 = vld [vmem:[#allocation19 + $0x24] sm:$0xf0]  ;;  %v7899_v12 = vld [vmem:[#allocation19 + $0x10] sm:$0xf] }
 0x7d8   : > { %5969 = vmatpush.bf16.msra.mxu0 %v7924_v60  ;;  %8714 = vtanh.f32 %v10524_v20  ;;  %6000 = vmatpush.bf16.msra.mxu1 %v7912_v42  ;;  %v5730_v29 = vor.u32 1.1754944e-38, %v5729_v53  ;;  %vm5728_vm7 = vcmp.eq.f32.partialorder %v5727_v49, 8.507059e+37  ;;  %v8350_v20 = vld [vmem:[#allocation19 + $0x14] sm:$0xf]  ;;  %v7908_v19 = vor.u32 %v8353_v25, %v7907_v40 }
 0x7d9   : > { %v5743_v27 = vpack.c.bf16 %v5738_v39, %v5737_v34  ;;  %v5706_v61 = vmul.f32 %v8707_v22, %v5705_v62  ;;  %v7900_v11 = vor.u32 %v8351_v55, %v7899_v12  ;;  %v8349_v39 = vld [vmem:[#allocation19 + $0x4] sm:$0xf0]  ;;  %v10808_v60 = vld [vmem:[#allocation43_spill] sm:$0xff]  ;;  %v4617_v49 = vadd.f32 %v10411_v33, %v10388_v50  ;;  %v10813_v33 = vld [vmem:[#allocation40_spill] sm:$0xff] }
 0x7da   : > { %v7892_v5 = vor.u32 %v8349_v39, %v7891_v14  ;;  %v4622_v12 = vadd.f32 %v10429_v38, %v10388_v50  ;;  %v10815_v38 = vld [vmem:[#allocation42_spill] sm:$0xff] }
 0x7db   : > { %5833 = vmatmul.bf16.gmra.mxu3 %v5743_v27  ;;  %v5707_v48 = vadd.f32 %v8707_v22, %v5706_v61  ;;  %v5765_v27 = vperm.slane %v5763_v56, 1  ;;  %v10806_v61 = vld [vmem:[#allocation44_spill] sm:$0xff] }
 0x7dc   : > { %v8711_v58 = vpop.eup %8710  ;;  %5970 = vmatpush.bf16.msra.mxu0 %v7916_v10  ;;  %v3334_v0 = vadd.f32 %v10807_v9, %v10806_v61  ;;  %v10814_v9 = vld [vmem:[#allocation49_spill] sm:$0xff] }
 0x7dd   : > { %v5719_v7 = vmul.f32 %v8711_v58, %v10583_v4  ;;  %v5711_v34 = vsel %vm5710_vm2, %v8707_v22, %v5707_v48  ;;  %v8713_v24 = vpop.eup %8712  ;;  %vm5724_vm4 = vweird.f32 %v8711_v58  ;;  %v7901_v22 = vld [vmem:[#allocation19 + $0x18] sm:$0xf0]  ;;  %v8348_v4 = vld [vmem:[#allocation19 + $0x4] sm:$0xf]  ;;  %v2026_v48 = vadd.f32 %v10809_v16, %v10808_v60 }
 0x7de   : > { %v5716_v51 = vsel %vm5713_vm3, %v5715_v59, %v5711_v34  ;;  %vm5725_vm6 = vmor %vm5723_vm5, %vm5724_vm4  ;;  %v8715_v43 = vpop.eup %8714  ;;  %v7904_v26 = vor.u32 %v8350_v20, %v7901_v22  ;;  %v7896_v62 = vor.u32 %v8348_v4, %v7893_v63  ;;  %v2041_v16 = vadd.f32 %v10815_v38, %v10808_v60 }
 0x7df   : > { %v5720_v3 = vsub.f32 1.0, %v5719_v7  ;;  %v5739_v13 = vmul.f32 %v8713_v24, %v5716_v51  ;;  %v3368_v18 = vadd.f32 %v3334_v0, %v2026_v48  ;;  %v3349_v0 = vadd.f32 %v10814_v9, %v10806_v61 }
 0x7e0   : > { %6001 = vmatpush.bf16.msra.mxu1 %v7904_v26  ;;  %5971 = vmatpush.bf16.msra.mxu0 %v7908_v19  ;;  %v10812_v26 = vld [vmem:[#allocation48_spill] sm:$0xff]  ;;  %v2036_v19 = vadd.f32 %v10813_v33, %v10808_v60  ;;  %v4627_v48 = vadd.f32 %v10489_v36, %v10388_v50 }
 0x7e1   : > { %v5721_v21 = vmul.f32 %v8711_v58, %v5720_v3  ;;  %v4646_v59 = vadd.f32 %v4612_v41, %v3368_v18  ;;  %v3344_v25 = vadd.f32 %v10812_v26, %v10806_v61  ;;  %v3374_v41 = vadd.f32 %v3349_v0, %v2041_v16  ;;  %v6026_v33 = vld [vmem:[%s9440_s29 + $0x10] sm:$0xff] }
 0x7e3   : > { %v5722_v57 = vadd.f32 %v8711_v58, %v5721_v21  ;;  %v2031_v21 = vadd.f32 %v10811_v23, %v10808_v60  ;;  %v3372_v55 = vadd.f32 %v3344_v25, %v2036_v19  ;;  %v4652_v18 = vadd.f32 %v4627_v48, %v3374_v41  ;;  %v5880_v60 = vld [vmem:[#allocation20] sm:$0x3] }
 0x7e4   : > { %5972 = vmatpush.bf16.msra.mxu0 %v7900_v11  ;;  %6002 = vmatpush.bf16.msra.mxu1 %v7896_v62 }
 0x7e5   : > { %v5726_v2 = vsel %vm5725_vm6, %v8711_v58, %v5722_v57  ;;  %v4650_v63 = vadd.f32 %v4622_v12, %v3372_v55 }
 0x7e6   : > { %v5731_v15 = vsel %vm5728_vm7, %v5730_v29, %v5726_v2 }
 0x7e7   : > { %v5740_v44 = vmul.f32 %v8715_v43, %v5731_v15 }
 0x7e8   : > { %5973 = vmatpush.bf16.msra.mxu0 %v7892_v5 }
 0x7e9   : > { %v5744_v8 = vpack.c.bf16 %v5740_v44, %v5739_v13  ;;  %v10810_v13 = vld [vmem:[#allocation46_spill] sm:$0xff] }
 0x7ea   : > { %v3339_v53 = vadd.f32 %v10810_v13, %v10806_v61  ;;  %v6024_v13 = vld [vmem:[%s9440_s29] sm:$0xff] }
 0x7eb   : > { %5838 = vmatmul.bf16.gmra.mxu3 %v5744_v8 }
 0x7ec   : > { %v3370_v57 = vadd.f32 %v3339_v53, %v2031_v21 }
 0x7ee   : > { %v4648_v2 = vadd.f32 %v4617_v49, %v3370_v57 }
 0x83e   : > { %v5824_v6 = vpop.f32.mrf.mxu3 }
 0x83f   : > { %v5825_v30 = vadd.f32 %v5824_v6, %v5765_v27 }
 0x841   : > { %v5844_v7 = vadd.f32 %v5825_v30, %v10392_v1 }
 0x843   : > { %v5852_v51 = vmul.f32 %v9484_v35, %v5844_v7 }
 0x846   : > { %v5826_v58 = vpop.f32.mrf.mxu3 }
 0x847   : > { %v5827_v34 = vadd.f32 %v5826_v58, %v5765_v27 }
 0x849   : > { %v5845_v24 = vadd.f32 %v5827_v34, %v4646_v59 }
 0x84b   : > { %v5853_v42 = vmul.f32 %v9500_v54, %v5845_v24 }
 0x84d   : > { %v5860_v10 = vpack.c.bf16 %v5853_v42, %v5852_v51  ;;  %v10633_v51 = vperm.slane %v5880_v60, 1 }
 0x84e   : > { %v5829_v3 = vpop.f32.mrf.mxu3 }
 0x84f   : > { %5974 = vmatmul.bf16.vlgmr.msra.gmra.mxu0 %v5860_v10  ;;  %6003 = vmatmul.bf16.vlgmr.msra.gmra.mxu1 %v5860_v10  ;;  %v5830_v1 = vadd.f32 %v5829_v3, %v5765_v27 }
 0x851   : > { %v5846_v43 = vadd.f32 %v5830_v1, %v10407_v47 }
 0x853   : > { %v5854_v8 = vmul.f32 %v9520_v17, %v5846_v43 }
 0x856   : > { %v5831_v29 = vpop.f32.mrf.mxu3 }
 0x857   : > { %v5832_v15 = vadd.f32 %v5831_v29, %v5765_v27 }
 0x859   : > { %v5847_v44 = vadd.f32 %v5832_v15, %v4648_v2  ;;  %v6025_v15 = vld [vmem:[%s9440_s29 + $0x8] sm:$0xff] }
 0x85b   : > { %v5855_v20 = vmul.f32 %v10799_v37, %v5847_v44 }
 0x85d   : > { %v5861_v22 = vpack.c.bf16 %v5855_v20, %v5854_v8 }
 0x85e   : > { %v5834_v40 = vpop.f32.mrf.mxu3 }
 0x85f   : > { %5979 = vmatmul.bf16.gmra.mxu0 %v5861_v22  ;;  %6008 = vmatmul.bf16.gmra.mxu1 %v5861_v22  ;;  %v5835_v47 = vadd.f32 %v5834_v40, %v5765_v27 }
 0x861   : > { %v5848_v11 = vadd.f32 %v5835_v47, %v10424_v46 }
 0x863   : > { %v5856_v39 = vmul.f32 %v10801_v28, %v5848_v11 }
 0x866   : > { %v5836_v4 = vpop.f32.mrf.mxu3 }
 0x867   : > { %v5837_v14 = vadd.f32 %v5836_v4, %v5765_v27 }
 0x869   : > { %v5849_v62 = vadd.f32 %v5837_v14, %v4650_v63 }
 0x86b   : > { %v5857_v5 = vmul.f32 %v10802_v32, %v5849_v62 }
 0x86d   : > { %v5862_v56 = vpack.c.bf16 %v5857_v5, %v5856_v39 }
 0x86e   : > { %v5839_v6 = vpop.f32.mrf.mxu3 }
 0x86f   : > { %5984 = vmatmul.bf16.gmra.mxu0 %v5862_v56  ;;  %6013 = vmatmul.bf16.gmra.mxu1 %v5862_v56  ;;  %v5840_v46 = vadd.f32 %v5839_v6, %v5765_v27 }
 0x871   : > { %v5850_v58 = vadd.f32 %v5840_v46, %v10442_v45  ;;  %v10636_v45 = vperm.slane %v5880_v60, 0 }
 0x873   : > { %v5858_v34 = vmul.f32 %v10804_v52, %v5850_v58 }
 0x876   : > { %v5841_v30 = vpop.f32.mrf.mxu3 }
 0x877   : > { %v5842_v59 = vadd.f32 %v5841_v30, %v5765_v27 }
 0x879   : > { %v5851_v7 = vadd.f32 %v5842_v59, %v4652_v18 }
 0x87b   : > { %v5859_v24 = vmul.f32 %v10805_v31, %v5851_v7 }
 0x87d   : > { %v5863_v61 = vpack.c.bf16 %v5859_v24, %v5858_v34 }
 0x87f   : > { %5989 = vmatmul.bf16.gmra.mxu0 %v5863_v61  ;;  %6018 = vmatmul.bf16.gmra.mxu1 %v5863_v61 }
 0x8cc   : > { %v5975_v50 = vpop.f32.mrf.mxu0  ;;  %v6004_v36 = vpop.f32.mrf.mxu1 }
 0x8cd   : > { %v6005_v42 = vadd.f32 %v6004_v36, %v10633_v51  ;;  %v5976_v49 = vadd.f32 %v5975_v50, %v10636_v45 }
 0x8cf   : > { %v6032_v10 = vmul.f32 1.442695, %v6005_v42 }
 0x8d1   : > { %8716 = vpow2.f32 %v6032_v10 }
 0x8d4   : > { %v5977_v27 = vpop.f32.mrf.mxu0  ;;  %v6006_v3 = vpop.f32.mrf.mxu1 }
 0x8d5   : > { %v6007_v53 = vadd.f32 %v6006_v3, %v10633_v51  ;;  %v5978_v22 = vadd.f32 %v5977_v27, %v10636_v45 }
 0x8d7   : > { %v8717_v23 = vpop.eup %8716  ;;  %v6034_v21 = vmul.f32 1.442695, %v6007_v53 }
 0x8d8   : > { %v6048_v1 = vmul.f32 %v8717_v23, %v6024_v13  ;;  %v6030_v13 = vld [vmem:[%s9440_s29 + $0x30] sm:$0xff] }
 0x8d9   : > { %8718 = vpow2.f32 %v6034_v21 }
 0x8da   : > { %v6056_v57 = vadd.f32 %v6048_v1, %v5976_v49 }
 0x8dc   : > { %v6064_v29 = vmul.f32 %v9484_v35, %v6056_v57  ;;  %v5980_v2 = vpop.f32.mrf.mxu0  ;;  %v6009_v43 = vpop.f32.mrf.mxu1 }
 0x8dd   : > { %v6010_v44 = vadd.f32 %v6009_v43, %v10633_v51  ;;  %v5981_v4 = vadd.f32 %v5980_v2, %v10636_v45  ;;  %v6031_v2 = vld [vmem:[%s9440_s29 + $0x38] sm:$0xff] }
 0x8de   : > { %6072 = vst [vmem:[%s10646_s8] sm:$0xff] %v6064_v29 }
 0x8df   : > { %v8719_v8 = vpop.eup %8718  ;;  %v6036_v20 = vmul.f32 1.442695, %v6010_v44 }
 0x8e0   : > { %v6049_v40 = vmul.f32 %v8719_v8, %v6025_v15 }
 0x8e1   : > { %8720 = vpow2.f32 %v6036_v20 }
 0x8e2   : > { %v6057_v26 = vadd.f32 %v6049_v40, %v5978_v22 }
 0x8e4   : > { %v6065_v35 = vmul.f32 %v9500_v54, %v6057_v26  ;;  %v6011_v25 = vpop.f32.mrf.mxu1  ;;  %v5982_v19 = vpop.f32.mrf.mxu0  ;;  %v6027_v54 = vld [vmem:[%s9440_s29 + $0x18] sm:$0xff] }
 0x8e5   : > { %v6012_v12 = vadd.f32 %v6011_v25, %v10633_v51  ;;  %v5983_v9 = vadd.f32 %v5982_v19, %v10636_v45 }
 0x8e6   : > { %6073 = vst [vmem:[%s10646_s8 + $0x8] sm:$0xff] %v6065_v35 }
 0x8e7   : > { %v8721_v47 = vpop.eup %8720  ;;  %v6038_v55 = vmul.f32 1.442695, %v6012_v12 }
 0x8e8   : > { %v6050_v63 = vmul.f32 %v8721_v47, %v6026_v33 }
 0x8e9   : > { %8722 = vpow2.f32 %v6038_v55 }
 0x8ea   : > { %v6058_v11 = vadd.f32 %v6050_v63, %v5981_v4 }
 0x8ec   : > { %v6066_v14 = vmul.f32 %v9520_v17, %v6058_v11  ;;  %v6014_v62 = vpop.f32.mrf.mxu1  ;;  %v5985_v56 = vpop.f32.mrf.mxu0  ;;  %v6028_v17 = vld [vmem:[%s9440_s29 + $0x20] sm:$0xff] }
 0x8ed   : > { %v6015_v39 = vadd.f32 %v6014_v62, %v10633_v51  ;;  %v5986_v18 = vadd.f32 %v5985_v56, %v10636_v45 }
 0x8ee   : > { %6074 = vst [vmem:[%s10646_s8 + $0x10] sm:$0xff] %v6066_v14 }
 0x8ef   : > { %v8723_v5 = vpop.eup %8722  ;;  %v6040_v6 = vmul.f32 1.442695, %v6015_v39 }
 0x8f0   : > { %v6051_v0 = vmul.f32 %v8723_v5, %v6027_v54 }
 0x8f1   : > { %8724 = vpow2.f32 %v6040_v6 }
 0x8f2   : > { %v6059_v38 = vadd.f32 %v6051_v0, %v5983_v9 }
 0x8f4   : > { %v6067_v16 = vmul.f32 %v10799_v37, %v6059_v38  ;;  %v6016_v48 = vpop.f32.mrf.mxu1  ;;  %v5987_v59 = vpop.f32.mrf.mxu0  ;;  %v6029_v37 = vld [vmem:[%s9440_s29 + $0x28] sm:$0xff] }
 0x8f5   : > { %v6017_v46 = vadd.f32 %v6016_v48, %v10633_v51  ;;  %v5988_v36 = vadd.f32 %v5987_v59, %v10636_v45 }
 0x8f6   : > { %6075 = vst [vmem:[%s10646_s8 + $0x18] sm:$0xff] %v6067_v16 }
 0x8f7   : > { %v8725_v41 = vpop.eup %8724  ;;  %v6042_v30 = vmul.f32 1.442695, %v6017_v46 }
 0x8f8   : > { %v6052_v58 = vmul.f32 %v8725_v41, %v6028_v17 }
 0x8f9   : > { %8726 = vpow2.f32 %v6042_v30 }
 0x8fa   : > { %v6060_v7 = vadd.f32 %v6052_v58, %v5986_v18 }
 0x8fc   : > { %v6068_v34 = vmul.f32 %v10801_v28, %v6060_v7  ;;  %v6019_v24 = vpop.f32.mrf.mxu1  ;;  %v5990_v27 = vpop.f32.mrf.mxu0 }
 0x8fd   : > { %v6020_v61 = vadd.f32 %v6019_v24, %v10633_v51  ;;  %v5991_v49 = vadd.f32 %v5990_v27, %v10636_v45 }
 0x8fe   : > { %6076 = vst [vmem:[%s10646_s8 + $0x20] sm:$0xff] %v6068_v34 }
 0x8ff   : > { %v8727_v60 = vpop.eup %8726  ;;  %v6044_v50 = vmul.f32 1.442695, %v6020_v61 }
 0x900   : > { %v6053_v42 = vmul.f32 %v8727_v60, %v6029_v37 }
 0x901   : > { %8728 = vpow2.f32 %v6044_v50 }
 0x902   : > { %v6061_v10 = vadd.f32 %v6053_v42, %v5988_v36 }
 0x904   : > { %v6069_v3 = vmul.f32 %v10802_v32, %v6061_v10  ;;  %v6021_v28 = vpop.f32.mrf.mxu1  ;;  %v5992_v32 = vpop.f32.mrf.mxu0 }
 0x905   : > { %v6022_v53 = vadd.f32 %v6021_v28, %v10633_v51  ;;  %v5993_v43 = vadd.f32 %v5992_v32, %v10636_v45 }
 0x906   : > { %6077 = vst [vmem:[%s10646_s8 + $0x28] sm:$0xff] %v6069_v3 }
 0x907   : > { %v8729_v23 = vpop.eup %8728  ;;  %v6046_v21 = vmul.f32 1.442695, %v6022_v53 }
 0x908   : > { %v6054_v1 = vmul.f32 %v8729_v23, %v6030_v13 }
 0x909   : > { %8730 = vpow2.f32 %v6046_v21 }
 0x90a   : > { %v6062_v57 = vadd.f32 %v6054_v1, %v5991_v49 }
 0x90c   : > { %v6070_v29 = vmul.f32 %v10804_v52, %v6062_v57 }
 0x90e   : > { %6078 = vst [vmem:[%s10646_s8 + $0x30] sm:$0xff] %v6070_v29 }
 0x90f   : > { %v8731_v51 = vpop.eup %8730 }
 0x910   : > { %v6055_v15 = vmul.f32 %v8731_v51, %v6031_v2 }
 0x912   : > { %v6063_v44 = vadd.f32 %v6055_v15, %v5993_v43 }
 0x914   : > { %v6071_v8 = vmul.f32 %v10805_v31, %v6063_v44 }
 0x916   : > { %6079 = vst [vmem:[%s10646_s8 + $0x38] sm:$0xff] %v6071_v8 }
 0x917   : > { %9098 = shalt.err (!%p9095_p8)
}
 0x918   : > { %s9181_s17 = smov 128   ;;  %s9182_s28 = smov 8  }
 0x919   : > { %8417 = dma.vmem_to_hbm [thread:$0]  (%p9367_p4), %s6094_s18, 1024, %s6096_s24, %s6081_s27, %s9181_s17, %s9181_s17, %s9182_s28  }
 0x91a PF: > { %s6110_s12 = sand.u32 1, %s9151_s21   ;;  %p10816_p10 = scmp.ge.s32.totalorder %s9163_s23, 2 }
 0x91b   : > { %s6111_s14 = scalar_lea.sflag [#allocation7], %s6110_s12 }
 0x91c   : > { %p8452_p13 = pnand %p10816_p10, %p9371_p6 }
 0x91e   : > { %p8453_p11 = pneg %p8452_p13 }
 0x920   : > { %9146 = dma.done.wait (%p8453_p11), %s6111_s14, 1024  }
 0x921   : > { %9148 = vsyncadd (%p8453_p11), %s6111_s14, 4294966272  ;;  %s10817_s29 = sld [smem:[#allocation32_spill]]  ;;  %p39_p0 = scmp.ge.s32.totalorder %s9339_s4, 4  }
 0x922   : > { %s10818_s21 = smov %s9155_s22  ;;  %s10819_s22 = smov %s9159_s0 }
 0x923   : > { %s10821_s23 = smov %s9339_s4  ;;  %41 = sbr.rel (!%p39_p0) target bundleno = 24 (0x18), region = 162 }
 0x927   : > { %s10820_s0 = smov %s10817_s29 }
 0x928   :  { %6117 = vsyncpa [#allocation6], 1 }
 0x929   :  { %6119 = vsyncpa [#allocation6 + $0x1], 1 }
 0x92a   :  { %6120 = vsyncpa [#allocation9], 1 }
 0x92b   :  { %6122 = vsyncpa [#allocation9 + $0x1], 1 }
 0x92c   :  { %6123 = vsyncpa [#allocation12], 1 }
 0x92d   :  { %6124 = vsyncpa [#allocation15], 1 }
 0x92e   :  { %6125 = vsyncpa [#allocation18], 1 }
 0x92f   :  { %6126 = vsyncpa [#allocation21], 1 }
 0x930   :  { %6127 = vsyncpa [#allocation7], 1 }
 0x931   :  { %6129 = vsyncpa [#allocation7 + $0x1], 1 }

</bundles_post_ra>
